<compile_context>
chip_gen: v5e
topology: v5e:2x2
jax: 0.10.0
libtpu: 0.0.40
codegen_flags: <defaults>
</compile_context>

<pallas_src>
import functools

import jax
import jax.numpy as jnp
import numpy as np
from jax import lax
from jax.experimental import pallas as pl
from jax.experimental.pallas import tpu as pltpu


# ---------------------------------------------------------------------------
# Kernel 1: fused two-layer GCN  relu(A @ (relu(A @ (X @ W1) + b1) @ W2) + b2)
# ---------------------------------------------------------------------------

def gcn2_kernel(a_ref, x_ref, w1_ref, b1_ref, w2_ref, b2_ref, o_ref):
    xw = jnp.dot(x_ref[...], w1_ref[...], preferred_element_type=jnp.float32)
    h1 = jnp.maximum(
        jnp.dot(a_ref[...], xw, preferred_element_type=jnp.float32) + b1_ref[...],
        0.0)
    hw = jnp.dot(h1, w2_ref[...], preferred_element_type=jnp.float32)
    o_ref[...] = jnp.maximum(
        jnp.dot(a_ref[...], hw, preferred_element_type=jnp.float32) + b2_ref[...],
        0.0)


def gcn2_pallas(a_hat, x_flat, w1, b1, w2, b2):
    m = a_hat.shape[0]
    fout = w2.shape[1]
    # Single block: X@W computed once, both layers fused, one dispatch, one HBM
    # round-trip.
    return pl.pallas_call(
        gcn2_kernel,
        out_shape=jax.ShapeDtypeStruct((m, fout), jnp.float32),
    )(a_hat, x_flat, w1, b1, w2, b2)


# ---------------------------------------------------------------------------
# Kernel 2: one bidirectional LSTM layer, grid=(2,) over direction
# ---------------------------------------------------------------------------

def bilstm_kernel(x_ref, wih_ref, whh_ref, b_ref, o_ref, gi_sc, *, seq_len, bsz):
    """One direction (grid axis 0) of a bidirectional LSTM layer.

    x_ref  : (C, S*B, Ic) flattened input chunks (C=1 for the first layer, C=2
                          afterwards: previous layer's fwd / bwd hidden states)
    wih_ref: (C, Ic, 4H)  this direction's input->gate weights, chunked like x
    whh_ref: (H, 4H)
    b_ref  : (1, 4H)      b_ih + b_hh folded together
    o_ref  : (S*B, H)     this direction's slot of the (2, S*B, H) output
    gi_sc  : (S*B, 4H)    hoisted input-projection scratch
    Gate order matches PyTorch: i, f, g, o.
    """
    d = pl.program_id(0)                       # 0 = forward, 1 = backward
    n_chunks = x_ref.shape[0]
    hdim = whh_ref.shape[0]

    # Hoisted sequence-parallel input projection: one big (S*B, Ic) x (Ic, 4H) MXU
    # matmul per chunk instead of S tiny per-step matmuls; bias broadcast done once.
    total = None
    for c in range(n_chunks):                  # static python loop (C in {1, 2})
        p = jnp.dot(x_ref[c], wih_ref[c], preferred_element_type=jnp.float32)
        total = p if total is None else total + p
    gi_sc[...] = total + b_ref[...]

    base = d * (seq_len - 1)                   # 0 (fwd) or S-1 (bwd)
    sign = 1 - 2 * d                           # +1 (fwd) or -1 (bwd)

    def step(t, carry):
        h_prev, c_prev = carry
        # reversed indexing for the bwd direction: no [::-1] HBM copies
        row = pl.multiple_of((base + sign * t) * bsz, bsz)   # sublane-aligned slice
        gates = gi_sc[pl.ds(row, bsz), :] + jnp.dot(
            h_prev, whh_ref[...], preferred_element_type=jnp.float32)     # (B, 4H)
        i_g = jax.nn.sigmoid(gates[:, 0 * hdim:1 * hdim])
        f_g = jax.nn.sigmoid(gates[:, 1 * hdim:2 * hdim])
        g_g = jnp.tanh(gates[:, 2 * hdim:3 * hdim])
        o_g = jax.nn.sigmoid(gates[:, 3 * hdim:4 * hdim])
        c_new = f_g * c_prev + i_g * g_g
        h_new = o_g * jnp.tanh(c_new)
        o_ref[pl.ds(row, bsz), :] = h_new
        return (h_new, c_new)

    # Full unroll keeps h/c in vregs and lets the next step's Whh MXU push overlap
    # this step's EUP sigmoid/tanh instead of serializing the recurrence.
    zeros = jnp.zeros((bsz, hdim), jnp.float32)
    lax.fori_loop(0, seq_len, step, (zeros, zeros), unroll=True)


def bilstm_layer_pallas(x_csbi, wih, whh, b, *, seq_len, bsz):
    """x_csbi: (C, S*B, Ic);  wih: (2, C, Ic, 4H);  whh: (2, H, 4H);  b: (2, 1, 4H).

    Returns (2, S*B, H): direction-major output that feeds the next layer directly.
    """
    n_chunks, sb, icz = x_csbi.shape
    hdim = whh.shape[1]
    g4 = 4 * hdim
    kernel = functools.partial(bilstm_kernel, seq_len=seq_len, bsz=bsz)
    return pl.pallas_call(
        kernel,
        out_shape=jax.ShapeDtypeStruct((2, sb, hdim), jnp.float32),
        grid=(2,),                              # both directions in one dispatch
        in_specs=[
            pl.BlockSpec((n_chunks, sb, icz), lambda d: (0, 0, 0)),
            pl.BlockSpec((None, n_chunks, icz, g4), lambda d: (d, 0, 0, 0)),
            pl.BlockSpec((None, hdim, g4), lambda d: (d, 0, 0)),
            pl.BlockSpec((None, 1, g4), lambda d: (d, 0, 0)),
        ],
        out_specs=pl.BlockSpec((None, sb, hdim), lambda d: (d, 0, 0)),
        scratch_shapes=[pltpu.VMEM((sb, g4), jnp.float32)],
        compiler_params=pltpu.CompilerParams(
            dimension_semantics=("parallel",)),  # 2 TCs on v7x, sequential elsewhere
    )(x_csbi, wih, whh, b)


# ---------------------------------------------------------------------------
# Kernel 3: fused decoder linear + masked-MSE loss + imputation (lane-dense layout)
# ---------------------------------------------------------------------------

def decoder_loss_kernel(y_ref, w_ref, b_ref, xm_ref, mask_ref, xf_ref, loss_ref):
    """y_ref: (2, S*B, H) lstm output; w_ref: (2, H, F); b_ref: (F, 1);
    xm_ref/mask_ref/xf_ref: (F, S*B) feature-major so the S*B axis is lane-dense."""
    n_dir = y_ref.shape[0]
    total = None
    for di in range(n_dir):
        # (F, SB) = W[di]^T @ y[di]^T via dot_general (no explicit transposes)
        p = lax.dot_general(w_ref[di], y_ref[di], (((0,), (1,)), ((), ())),
                            preferred_element_type=jnp.float32)
        total = p if total is None else total + p
    imputed_t = total + b_ref[...]                              # (F, SB)
    xm = xm_ref[...]
    msk = mask_ref[...]
    diff = imputed_t - xm
    loss_ref[...] = jnp.reshape(
        jnp.sum(msk * diff * diff) / (jnp.sum(msk) + 1e-8), (1, 1))
    xf_ref[...] = jnp.where(msk != 0, xm, imputed_t)


def decoder_loss_pallas(y, w_dec, b_dec, xm_t, mk_t):
    feat, m = xm_t.shape
    return pl.pallas_call(
        decoder_loss_kernel,
        out_shape=(jax.ShapeDtypeStruct((feat, m), jnp.float32),
                   jax.ShapeDtypeStruct((1, 1), jnp.float32)),
    )(y, w_dec, b_dec.reshape(feat, 1), xm_t, mk_t)


# ---------------------------------------------------------------------------
# Glue: adjacency normalization, parameter init, full forward
# ---------------------------------------------------------------------------

def build_a_hat(edge_index, num_nodes):
    """A_hat = D^{-1/2} (A + I) D^{-1/2}  (PyG GCNConv normalization).
    deg >= 1 always because of the +I self loop, so the rsqrt is safe."""
    src, dst = edge_index
    a = jnp.zeros((num_nodes, num_nodes), jnp.float32).at[src, dst].set(1.0)
    a = a + jnp.eye(num_nodes, dtype=jnp.float32)
    deg = jnp.sum(a, axis=1)
    d_inv_sqrt = 1.0 / jnp.sqrt(deg)
    return a * d_inv_sqrt[:, None] * d_inv_sqrt[None, :]


def init_params(key, in_dim, hidden_dim, gcn_out_dim, lstm_hidden_dim, num_layers):
    keys = iter(jax.random.split(key, 64))

    def w(shape):
        return jax.random.normal(next(keys), shape, jnp.float32) * 0.1

    params = {
        "gcn1_w": w((in_dim, hidden_dim)), "gcn1_b": w((1, hidden_dim)),
        "gcn2_w": w((hidden_dim, gcn_out_dim)), "gcn2_b": w((1, gcn_out_dim)),
        "dec_w": w((2, lstm_hidden_dim, in_dim)),     # direction-major decoder weight
        "dec_b": w((in_dim,)),
        "lstm": [],
    }
    h = lstm_hidden_dim
    for layer in range(num_layers):
        n_chunks = 1 if layer == 0 else 2
        icz = gcn_out_dim if layer == 0 else lstm_hidden_dim
        params["lstm"].append({
            "wih": w((2, n_chunks, icz, 4 * h)),      # [direction, input-chunk, Ic, 4H]
            "whh": w((2, h, 4 * h)),
            "b": w((2, 1, 4 * h)),                    # b_ih + b_hh folded together
        })
    return params


def stgi_forward(params, x_missing, a_hat, mask):
    t_steps, n_nodes, feat = x_missing.shape
    m = t_steps * n_nodes

    x_flat = x_missing.reshape(m, feat)
    h = gcn2_pallas(a_hat, x_flat, params["gcn1_w"], params["gcn1_b"],
                    params["gcn2_w"], params["gcn2_b"])          # (M, GCN_OUT)

    # One small relayout into the LSTM's flattened (chunk=1, seq*batch, feat) layout;
    # row index = n * T + t  (seq = nodes, batch = time).
    x_sb = h.reshape(t_steps, n_nodes, -1).transpose(1, 0, 2).reshape(1, m, -1)

    y = x_sb
    for layer in params["lstm"]:
        y = bilstm_layer_pallas(y, layer["wih"], layer["whh"], layer["b"],
                                seq_len=n_nodes, bsz=t_steps)    # (2, N*T, H)

    # Feature-major (F, N*T) views so the decoder output is lane-dense;
    # element [f, n*T + t] == x_missing[t, n, f].
    xm_t = x_missing.transpose(2, 1, 0).reshape(feat, m)
    mk_t = mask.transpose(2, 1, 0).reshape(feat, m)

    xf_t, loss = decoder_loss_pallas(y, params["dec_w"], params["dec_b"], xm_t, mk_t)
    x_final = xf_t.reshape(feat, n_nodes, t_steps).transpose(2, 1, 0)   # (T, N, F)
    return x_final, loss[0, 0]


# ---------------------------------------------------------------------------
# Pure-JAX reference (for correctness check)
# ---------------------------------------------------------------------------

def lstm_dir_ref(x_bsi, wih, whh, b):
    bsz = x_bsi.shape[0]
    hdim = whh.shape[0]

    def step(carry, x_t):
        h, c = carry
        gates = x_t @ wih + h @ whh + b
        i_g = jax.nn.sigmoid(gates[:, :hdim])
        f_g = jax.nn.sigmoid(gates[:, hdim:2 * hdim])
        g_g = jnp.tanh(gates[:, 2 * hdim:3 * hdim])
        o_g = jax.nn.sigmoid(gates[:, 3 * hdim:])
        c = f_g * c + i_g * g_g
        h = o_g * jnp.tanh(c)
        return (h, c), h

    init = (jnp.zeros((bsz, hdim), jnp.float32), jnp.zeros((bsz, hdim), jnp.float32))
    _, ys = lax.scan(step, init, jnp.swapaxes(x_bsi, 0, 1))
    return jnp.swapaxes(ys, 0, 1)


def stgi_ref(params, x_missing, a_hat, mask):
    t_steps, n_nodes, feat = x_missing.shape
    x = x_missing.reshape(-1, feat)
    h = jnp.maximum(a_hat @ (x @ params["gcn1_w"]) + params["gcn1_b"], 0.0)
    h = jnp.maximum(a_hat @ (h @ params["gcn2_w"]) + params["gcn2_b"], 0.0)
    out = h.reshape(t_steps, n_nodes, -1)                       # batch_first: (T, N, C)
    for layer in params["lstm"]:
        wih, whh, b = layer["wih"], layer["whh"], layer["b"]
        wih_f = wih[0].reshape(-1, wih.shape[-1])
        wih_b = wih[1].reshape(-1, wih.shape[-1])
        y_f = lstm_dir_ref(out, wih_f, whh[0], b[0])
        y_b = lstm_dir_ref(out[:, ::-1, :], wih_b, whh[1], b[1])[:, ::-1, :]
        out = jnp.concatenate([y_f, y_b], axis=-1)
    dec_w = params["dec_w"].reshape(-1, feat)
    imputed = out @ dec_w + params["dec_b"]
    diff = imputed - x_missing
    loss = jnp.sum(mask * diff * diff) / (jnp.sum(mask) + 1e-8)
    x_final = jnp.where(mask != 0, x_missing, imputed)
    return x_final, loss


# ---------------------------------------------------------------------------
# Main
# ---------------------------------------------------------------------------

if __name__ == "__main__":
    T, N, IN_DIM = 8, 16, 4
    HIDDEN, GCN_OUT, LSTM_H, NUM_LAYERS = 32, 32, 32, 2
    M = T * N

    key = jax.random.PRNGKey(0)
    k_param, k_x, k_mask = jax.random.split(key, 3)

    params = init_params(k_param, IN_DIM, HIDDEN, GCN_OUT, LSTM_H, NUM_LAYERS)

    x_missing = jax.random.normal(k_x, (T, N, IN_DIM), jnp.float32)
    mask = jax.random.bernoulli(k_mask, 0.7, (T, N, IN_DIM)).astype(jnp.float32)

    # deterministic ring graph over the T*N flattened nodes (both directions)
    idx = jnp.arange(M, dtype=jnp.int32)
    edge_index = jnp.stack([jnp.concatenate([idx, (idx + 1) % M]),
                            jnp.concatenate([(idx + 1) % M, idx])], axis=0)
    a_hat = build_a_hat(edge_index, M)

    fwd = jax.jit(stgi_forward)
    x_final, loss = fwd(params, x_missing, a_hat, mask)
    jax.block_until_ready((x_final, loss))

    ref_final, ref_loss = jax.jit(stgi_ref)(params, x_missing, a_hat, mask)
    np.testing.assert_allclose(np.asarray(x_final), np.asarray(ref_final),
                               rtol=5e-3, atol=5e-3)
    np.testing.assert_allclose(np.asarray(loss), np.asarray(ref_loss),
                               rtol=5e-3, atol=5e-3)

    print("KERNEL_OK")
</pallas_src>

<mosaic_0001>
module attributes {stable_mosaic.version = 11 : i64} {
  func.func @gcn2_kernel(%arg0: memref<128x128xf32, #tpu.memory_space<vmem>>, %arg1: memref<128x4xf32, #tpu.memory_space<vmem>>, %arg2: memref<4x32xf32, #tpu.memory_space<vmem>>, %arg3: memref<1x32xf32, #tpu.memory_space<vmem>>, %arg4: memref<32x32xf32, #tpu.memory_space<vmem>>, %arg5: memref<1x32xf32, #tpu.memory_space<vmem>>, %arg6: memref<128x32xf32, #tpu.memory_space<vmem>>) attributes {dimension_semantics = [], scalar_prefetch = 0 : i64, scratch_operands = 0 : i64, tpu.core_type = #tpu.core_type<tc>} {
    %c0 = arith.constant 0 : index
    %c0_0 = arith.constant 0 : index
    %0 = vector.load %arg1[%c0, %c0_0] : memref<128x4xf32, #tpu.memory_space<vmem>>, vector<128x4xf32>
    %c0_1 = arith.constant 0 : index
    %c0_2 = arith.constant 0 : index
    %1 = vector.load %arg2[%c0_1, %c0_2] : memref<4x32xf32, #tpu.memory_space<vmem>>, vector<4x32xf32>
    %cst = arith.constant dense<0.000000e+00> : vector<128x32xf32>
    %2 = tpu.matmul %0, %1, %cst {dimension_numbers = #tpu.dot_dimension_numbers<[1], [0], [0], [1], [0, 0, 1, 1], [], []>} : vector<128x4xf32>, vector<4x32xf32>, vector<128x32xf32> -> vector<128x32xf32>
    %c0_3 = arith.constant 0 : index
    %c0_4 = arith.constant 0 : index
    %3 = vector.load %arg0[%c0_3, %c0_4] : memref<128x128xf32, #tpu.memory_space<vmem>>, vector<128x128xf32>
    %cst_5 = arith.constant dense<0.000000e+00> : vector<128x32xf32>
    %4 = tpu.matmul %3, %2, %cst_5 {dimension_numbers = #tpu.dot_dimension_numbers<[1], [0], [0], [1], [0, 0, 1, 1], [], []>} : vector<128x128xf32>, vector<128x32xf32>, vector<128x32xf32> -> vector<128x32xf32>
    %c0_6 = arith.constant 0 : index
    %c0_7 = arith.constant 0 : index
    %5 = vector.load %arg3[%c0_6, %c0_7] : memref<1x32xf32, #tpu.memory_space<vmem>>, vector<1x32xf32>
    %6 = vector.broadcast %5 : vector<1x32xf32> to vector<128x32xf32>
    %7 = arith.addf %4, %6 : vector<128x32xf32>
    %cst_8 = arith.constant 0.000000e+00 : f32
    %8 = vector.broadcast %cst_8 : f32 to vector<128x32xf32>
    %9 = arith.maximumf %7, %8 : vector<128x32xf32>
    %c0_9 = arith.constant 0 : index
    %c0_10 = arith.constant 0 : index
    %10 = vector.load %arg4[%c0_9, %c0_10] : memref<32x32xf32, #tpu.memory_space<vmem>>, vector<32x32xf32>
    %cst_11 = arith.constant dense<0.000000e+00> : vector<128x32xf32>
    %11 = tpu.matmul %9, %10, %cst_11 {dimension_numbers = #tpu.dot_dimension_numbers<[1], [0], [0], [1], [0, 0, 1, 1], [], []>} : vector<128x32xf32>, vector<32x32xf32>, vector<128x32xf32> -> vector<128x32xf32>
    %c0_12 = arith.constant 0 : index
    %c0_13 = arith.constant 0 : index
    %12 = vector.load %arg0[%c0_12, %c0_13] : memref<128x128xf32, #tpu.memory_space<vmem>>, vector<128x128xf32>
    %cst_14 = arith.constant dense<0.000000e+00> : vector<128x32xf32>
    %13 = tpu.matmul %12, %11, %cst_14 {dimension_numbers = #tpu.dot_dimension_numbers<[1], [0], [0], [1], [0, 0, 1, 1], [], []>} : vector<128x128xf32>, vector<128x32xf32>, vector<128x32xf32> -> vector<128x32xf32>
    %c0_15 = arith.constant 0 : index
    %c0_16 = arith.constant 0 : index
    %14 = vector.load %arg5[%c0_15, %c0_16] : memref<1x32xf32, #tpu.memory_space<vmem>>, vector<1x32xf32>
    %15 = vector.broadcast %14 : vector<1x32xf32> to vector<128x32xf32>
    %16 = arith.addf %13, %15 : vector<128x32xf32>
    %cst_17 = arith.constant 0.000000e+00 : f32
    %17 = vector.broadcast %cst_17 : f32 to vector<128x32xf32>
    %18 = arith.maximumf %16, %17 : vector<128x32xf32>
    %c0_18 = arith.constant 0 : index
    %c0_19 = arith.constant 0 : index
    %19 = vector.load %arg6[%c0_18, %c0_19] : memref<128x32xf32, #tpu.memory_space<vmem>>, vector<128x32xf32>
    tpu.vector_store %arg6[%c0_18, %c0_19], %18 {strides = array<i32>} : memref<128x32xf32, #tpu.memory_space<vmem>>, vector<128x32xf32>,
    return
  }
}

module attributes {stable_mosaic.version = 11 : i64} {
  func.func @bilstm_kernel(%arg0: i32, %arg1: memref<1x128x32xf32, #tpu.memory_space<vmem>>, %arg2: memref<1x1x32x128xf32, #tpu.memory_space<vmem>>, %arg3: memref<1x32x128xf32, #tpu.memory_space<vmem>>, %arg4: memref<1x1x128xf32, #tpu.memory_space<vmem>>, %arg5: memref<1x128x32xf32, #tpu.memory_space<vmem>>, %arg6: memref<128x128xf32, #tpu.memory_space<vmem>>) attributes {dimension_semantics = [#tpu.dimension_semantics<parallel>], iteration_bounds = array<i64: 2>, scalar_prefetch = 0 : i64, scratch_operands = 1 : i64, tpu.core_type = #tpu.core_type<tc>, window_params = [{pipeline_mode = #tpu.pipeline_mode<synchronous>, transform_indices = @transform_0, window_bounds = array<i64: 1, 128, 32>}, {transform_indices = @transform_1, window_bounds = array<i64: 1, 1, 32, 128>}, {transform_indices = @transform_2, window_bounds = array<i64: 1, 32, 128>}, {transform_indices = @transform_3, window_bounds = array<i64: 1, 1, 128>}, {transform_indices = @transform_4, window_bounds = array<i64: 1, 128, 32>}]} {
    %c0 = arith.constant 0 : index
    %c0_0 = arith.constant 0 : index
    %c0_1 = arith.constant 0 : index
    %0 = vector.load %arg1[%c0, %c0_0, %c0_1] : memref<1x128x32xf32, #tpu.memory_space<vmem>>, vector<1x128x32xf32>
    %1 = vector.shape_cast %0 : vector<1x128x32xf32> to vector<128x32xf32>
    %c0_2 = arith.constant 0 : index
    %c0_3 = arith.constant 0 : index
    %c0_4 = arith.constant 0 : index
    %c0_5 = arith.constant 0 : index
    %2 = vector.load %arg2[%c0_2, %c0_3, %c0_4, %c0_5] : memref<1x1x32x128xf32, #tpu.memory_space<vmem>>, vector<1x1x32x128xf32>
    %3 = vector.shape_cast %2 : vector<1x1x32x128xf32> to vector<32x128xf32>
    %cst = arith.constant dense<0.000000e+00> : vector<128x128xf32>
    %4 = tpu.matmul %1, %3, %cst {dimension_numbers = #tpu.dot_dimension_numbers<[1], [0], [0], [1], [0, 0, 1, 1], [], []>} : vector<128x32xf32>, vector<32x128xf32>, vector<128x128xf32> -> vector<128x128xf32>
    %c0_6 = arith.constant 0 : index
    %c0_7 = arith.constant 0 : index
    %c0_8 = arith.constant 0 : index
    %5 = vector.load %arg4[%c0_6, %c0_7, %c0_8] : memref<1x1x128xf32, #tpu.memory_space<vmem>>, vector<1x1x128xf32>
    %6 = vector.shape_cast %5 : vector<1x1x128xf32> to vector<1x128xf32>
    %7 = vector.broadcast %6 : vector<1x128xf32> to vector<128x128xf32>
    %8 = arith.addf %4, %7 : vector<128x128xf32>
    %c0_9 = arith.constant 0 : index
    %c0_10 = arith.constant 0 : index
    %9 = vector.load %arg6[%c0_9, %c0_10] : memref<128x128xf32, #tpu.memory_space<vmem>>, vector<128x128xf32>
    tpu.vector_store %arg6[%c0_9, %c0_10], %8 {strides = array<i32>} : memref<128x128xf32, #tpu.memory_space<vmem>>, vector<128x128xf32>,
    %c15_i32 = arith.constant 15 : i32
    %10 = arith.muli %arg0, %c15_i32 : i32
    %c2_i32 = arith.constant 2 : i32
    %11 = arith.muli %c2_i32, %arg0 : i32
    %c1_i32 = arith.constant 1 : i32
    %12 = arith.subi %c1_i32, %11 : i32
    %cst_11 = arith.constant 0.000000e+00 : f32
    %13 = vector.broadcast %cst_11 : f32 to vector<8x32xf32>
    %c0_i32 = arith.constant 0 : i32
    %14 = arith.muli %12, %c0_i32 : i32
    %15 = arith.addi %10, %14 : i32
    %c8_i32 = arith.constant 8 : i32
    %16 = arith.muli %15, %c8_i32 : i32
    %17 = tpu.assume_multiple %16, 8 : i32
    %18 = arith.index_cast %17 : i32 to index
    %c0_12 = arith.constant 0 : index
    %19 = vector.load %arg6[%18, %c0_12] : memref<128x128xf32, #tpu.memory_space<vmem>>, vector<8x128xf32>
    %c0_13 = arith.constant 0 : index
    %c0_14 = arith.constant 0 : index
    %c0_15 = arith.constant 0 : index
    %20 = vector.load %arg3[%c0_13, %c0_14, %c0_15] : memref<1x32x128xf32, #tpu.memory_space<vmem>>, vector<1x32x128xf32>
    %21 = vector.shape_cast %20 : vector<1x32x128xf32> to vector<32x128xf32>
    %cst_16 = arith.constant dense<0.000000e+00> : vector<8x128xf32>
    %22 = tpu.matmul %13, %21, %cst_16 {dimension_numbers = #tpu.dot_dimension_numbers<[1], [0], [0], [1], [0, 0, 1, 1], [], []>} : vector<8x32xf32>, vector<32x128xf32>, vector<8x128xf32> -> vector<8x128xf32>
    %23 = arith.addf %19, %22 : vector<8x128xf32>
    %24 = vector.extract_strided_slice %23 {offsets = [0, 0], sizes = [8, 32], strides = [1, 1]} : vector<8x128xf32> to vector<8x32xf32>
    %25 = arith.negf %24 : vector<8x32xf32>
    %26 = math.exp %25 : vector<8x32xf32>
    %cst_17 = arith.constant 1.000000e+00 : f32
    %27 = vector.broadcast %cst_17 : f32 to vector<8x32xf32>
    %28 = arith.addf %27, %26 : vector<8x32xf32>
    %29 = arith.divf %27, %28 : vector<8x32xf32>
    %30 = vector.extract_strided_slice %23 {offsets = [0, 32], sizes = [8, 32], strides = [1, 1]} : vector<8x128xf32> to vector<8x32xf32>
    %31 = arith.negf %30 : vector<8x32xf32>
    %32 = math.exp %31 : vector<8x32xf32>
    %cst_18 = arith.constant 1.000000e+00 : f32
    %33 = vector.broadcast %cst_18 : f32 to vector<8x32xf32>
    %34 = arith.addf %33, %32 : vector<8x32xf32>
    %35 = arith.divf %33, %34 : vector<8x32xf32>
    %36 = vector.extract_strided_slice %23 {offsets = [0, 64], sizes = [8, 32], strides = [1, 1]} : vector<8x128xf32> to vector<8x32xf32>
    %37 = math.tanh %36 : vector<8x32xf32>
    %38 = vector.extract_strided_slice %23 {offsets = [0, 96], sizes = [8, 32], strides = [1, 1]} : vector<8x128xf32> to vector<8x32xf32>
    %39 = arith.negf %38 : vector<8x32xf32>
    %40 = math.exp %39 : vector<8x32xf32>
    %cst_19 = arith.constant 1.000000e+00 : f32
    %41 = vector.broadcast %cst_19 : f32 to vector<8x32xf32>
    %42 = arith.addf %41, %40 : vector<8x32xf32>
    %43 = arith.divf %41, %42 : vector<8x32xf32>
    %44 = arith.mulf %35, %13 : vector<8x32xf32>
    %45 = arith.mulf %29, %37 : vector<8x32xf32>
    %46 = arith.addf %44, %45 : vector<8x32xf32>
    %47 = math.tanh %46 : vector<8x32xf32>
    %48 = arith.mulf %43, %47 : vector<8x32xf32>
    %c0_20 = arith.constant 0 : index
    %49 = arith.index_cast %17 : i32 to index
    %c0_21 = arith.constant 0 : index
    %50 = vector.load %arg5[%c0_20, %49, %c0_21] : memref<1x128x32xf32, #tpu.memory_space<vmem>>, vector<1x8x32xf32>
    %51 = vector.shape_cast %50 : vector<1x8x32xf32> to vector<8x32xf32>
    %52 = vector.shape_cast %48 : vector<8x32xf32> to vector<1x8x32xf32>
    tpu.vector_store %arg5[%c0_20, %49, %c0_21], %52 {strides = array<i32>} : memref<1x128x32xf32, #tpu.memory_space<vmem>>, vector<1x8x32xf32>,
    %c1_i32_22 = arith.constant 1 : i32
    %53 = arith.muli %12, %c1_i32_22 : i32
    %54 = arith.addi %10, %53 : i32
    %c8_i32_23 = arith.constant 8 : i32
    %55 = arith.muli %54, %c8_i32_23 : i32
    %56 = tpu.assume_multiple %55, 8 : i32
    %57 = arith.index_cast %56 : i32 to index
    %c0_24 = arith.constant 0 : index
    %58 = vector.load %arg6[%57, %c0_24] : memref<128x128xf32, #tpu.memory_space<vmem>>, vector<8x128xf32>
    %c0_25 = arith.constant 0 : index
    %c0_26 = arith.constant 0 : index
    %c0_27 = arith.constant 0 : index
    %59 = vector.load %arg3[%c0_25, %c0_26, %c0_27] : memref<1x32x128xf32, #tpu.memory_space<vmem>>, vector<1x32x128xf32>
    %60 = vector.shape_cast %59 : vector<1x32x128xf32> to vector<32x128xf32>
    %cst_28 = arith.constant dense<0.000000e+00> : vector<8x128xf32>
    %61 = tpu.matmul %48, %60, %cst_28 {dimension_numbers = #tpu.dot_dimension_numbers<[1], [0], [0], [1], [0, 0, 1, 1], [], []>} : vector<8x32xf32>, vector<32x128xf32>, vector<8x128xf32> -> vector<8x128xf32>
    %62 = arith.addf %58, %61 : vector<8x128xf32>
    %63 = vector.extract_strided_slice %62 {offsets = [0, 0], sizes = [8, 32], strides = [1, 1]} : vector<8x128xf32> to vector<8x32xf32>
    %64 = arith.negf %63 : vector<8x32xf32>
    %65 = math.exp %64 : vector<8x32xf32>
    %cst_29 = arith.constant 1.000000e+00 : f32
    %66 = vector.broadcast %cst_29 : f32 to vector<8x32xf32>
    %67 = arith.addf %66, %65 : vector<8x32xf32>
    %68 = arith.divf %66, %67 : vector<8x32xf32>
    %69 = vector.extract_strided_slice %62 {offsets = [0, 32], sizes = [8, 32], strides = [1, 1]} : vector<8x128xf32> to vector<8x32xf32>
    %70 = arith.negf %69 : vector<8x32xf32>
    %71 = math.exp %70 : vector<8x32xf32>
    %cst_30 = arith.constant 1.000000e+00 : f32
    %72 = vector.broadcast %cst_30 : f32 to vector<8x32xf32>
    %73 = arith.addf %72, %71 : vector<8x32xf32>
    %74 = arith.divf %72, %73 : vector<8x32xf32>
    %75 = vector.extract_strided_slice %62 {offsets = [0, 64], sizes = [8, 32], strides = [1, 1]} : vector<8x128xf32> to vector<8x32xf32>
    %76 = math.tanh %75 : vector<8x32xf32>
    %77 = vector.extract_strided_slice %62 {offsets = [0, 96], sizes = [8, 32], strides = [1, 1]} : vector<8x128xf32> to vector<8x32xf32>
    %78 = arith.negf %77 : vector<8x32xf32>
    %79 = math.exp %78 : vector<8x32xf32>
    %cst_31 = arith.constant 1.000000e+00 : f32
    %80 = vector.broadcast %cst_31 : f32 to vector<8x32xf32>
    %81 = arith.addf %80, %79 : vector<8x32xf32>
    %82 = arith.divf %80, %81 : vector<8x32xf32>
    %83 = arith.mulf %74, %46 : vector<8x32xf32>
    %84 = arith.mulf %68, %76 : vector<8x32xf32>
    %85 = arith.addf %83, %84 : vector<8x32xf32>
    %86 = math.tanh %85 : vector<8x32xf32>
    %87 = arith.mulf %82, %86 : vector<8x32xf32>
    %c0_32 = arith.constant 0 : index
    %88 = arith.index_cast %56 : i32 to index
    %c0_33 = arith.constant 0 : index
    %89 = vector.load %arg5[%c0_32, %88, %c0_33] : memref<1x128x32xf32, #tpu.memory_space<vmem>>, vector<1x8x32xf32>
    %90 = vector.shape_cast %89 : vector<1x8x32xf32> to vector<8x32xf32>
    %91 = vector.shape_cast %87 : vector<8x32xf32> to vector<1x8x32xf32>
    tpu.vector_store %arg5[%c0_32, %88, %c0_33], %91 {strides = array<i32>} : memref<1x128x32xf32, #tpu.memory_space<vmem>>, vector<1x8x32xf32>,
    %c2_i32_34 = arith.constant 2 : i32
    %92 = arith.muli %12, %c2_i32_34 : i32
    %93 = arith.addi %10, %92 : i32
    %c8_i32_35 = arith.constant 8 : i32
    %94 = arith.muli %93, %c8_i32_35 : i32
    %95 = tpu.assume_multiple %94, 8 : i32
    %96 = arith.index_cast %95 : i32 to index
    %c0_36 = arith.constant 0 : index
    %97 = vector.load %arg6[%96, %c0_36] : memref<128x128xf32, #tpu.memory_space<vmem>>, vector<8x128xf32>
    %c0_37 = arith.constant 0 : index
    %c0_38 = arith.constant 0 : index
    %c0_39 = arith.constant 0 : index
    %98 = vector.load %arg3[%c0_37, %c0_38, %c0_39] : memref<1x32x128xf32, #tpu.memory_space<vmem>>, vector<1x32x128xf32>
    %99 = vector.shape_cast %98 : vector<1x32x128xf32> to vector<32x128xf32>
    %cst_40 = arith.constant dense<0.000000e+00> : vector<8x128xf32>
    %100 = tpu.matmul %87, %99, %cst_40 {dimension_numbers = #tpu.dot_dimension_numbers<[1], [0], [0], [1], [0, 0, 1, 1], [], []>} : vector<8x32xf32>, vector<32x128xf32>, vector<8x128xf32> -> vector<8x128xf32>
    %101 = arith.addf %97, %100 : vector<8x128xf32>
    %102 = vector.extract_strided_slice %101 {offsets = [0, 0], sizes = [8, 32], strides = [1, 1]} : vector<8x128xf32> to vector<8x32xf32>
    %103 = arith.negf %102 : vector<8x32xf32>
    %104 = math.exp %103 : vector<8x32xf32>
    %cst_41 = arith.constant 1.000000e+00 : f32
    %105 = vector.broadcast %cst_41 : f32 to vector<8x32xf32>
    %106 = arith.addf %105, %104 : vector<8x32xf32>
    %107 = arith.divf %105, %106 : vector<8x32xf32>
    %108 = vector.extract_strided_slice %101 {offsets = [0, 32], sizes = [8, 32], strides = [1, 1]} : vector<8x128xf32> to vector<8x32xf32>
    %109 = arith.negf %108 : vector<8x32xf32>
    %110 = math.exp %109 : vector<8x32xf32>
    %cst_42 = arith.constant 1.000000e+00 : f32
    %111 = vector.broadcast %cst_42 : f32 to vector<8x32xf32>
    %112 = arith.addf %111, %110 : vector<8x32xf32>
    %113 = arith.divf %111, %112 : vector<8x32xf32>
    %114 = vector.extract_strided_slice %101 {offsets = [0, 64], sizes = [8, 32], strides = [1, 1]} : vector<8x128xf32> to vector<8x32xf32>
    %115 = math.tanh %114 : vector<8x32xf32>
    %116 = vector.extract_strided_slice %101 {offsets = [0, 96], sizes = [8, 32], strides = [1, 1]} : vector<8x128xf32> to vector<8x32xf32>
    %117 = arith.negf %116 : vector<8x32xf32>
    %118 = math.exp %117 : vector<8x32xf32>
    %cst_43 = arith.constant 1.000000e+00 : f32
    %119 = vector.broadcast %cst_43 : f32 to vector<8x32xf32>
    %120 = arith.addf %119, %118 : vector<8x32xf32>
    %121 = arith.divf %119, %120 : vector<8x32xf32>
    %122 = arith.mulf %113, %85 : vector<8x32xf32>
    %123 = arith.mulf %107, %115 : vector<8x32xf32>
    %124 = arith.addf %122, %123 : vector<8x32xf32>
    %125 = math.tanh %124 : vector<8x32xf32>
    %126 = arith.mulf %121, %125 : vector<8x32xf32>
    %c0_44 = arith.constant 0 : index
    %127 = arith.index_cast %95 : i32 to index
    %c0_45 = arith.constant 0 : index
    %128 = vector.load %arg5[%c0_44, %127, %c0_45] : memref<1x128x32xf32, #tpu.memory_space<vmem>>, vector<1x8x32xf32>
    %129 = vector.shape_cast %128 : vector<1x8x32xf32> to vector<8x32xf32>
    %130 = vector.shape_cast %126 : vector<8x32xf32> to vector<1x8x32xf32>
    tpu.vector_store %arg5[%c0_44, %127, %c0_45], %130 {strides = array<i32>} : memref<1x128x32xf32, #tpu.memory_space<vmem>>, vector<1x8x32xf32>,
    %c3_i32 = arith.constant 3 : i32
    %131 = arith.muli %12, %c3_i32 : i32
    %132 = arith.addi %10, %131 : i32
    %c8_i32_46 = arith.constant 8 : i32
    %133 = arith.muli %132, %c8_i32_46 : i32
    %134 = tpu.assume_multiple %133, 8 : i32
    %135 = arith.index_cast %134 : i32 to index
    %c0_47 = arith.constant 0 : index
    %136 = vector.load %arg6[%135, %c0_47] : memref<128x128xf32, #tpu.memory_space<vmem>>, vector<8x128xf32>
    %c0_48 = arith.constant 0 : index
    %c0_49 = arith.constant 0 : index
    %c0_50 = arith.constant 0 : index
    %137 = vector.load %arg3[%c0_48, %c0_49, %c0_50] : memref<1x32x128xf32, #tpu.memory_space<vmem>>, vector<1x32x128xf32>
    %138 = vector.shape_cast %137 : vector<1x32x128xf32> to vector<32x128xf32>
    %cst_51 = arith.constant dense<0.000000e+00> : vector<8x128xf32>
    %139 = tpu.matmul %126, %138, %cst_51 {dimension_numbers = #tpu.dot_dimension_numbers<[1], [0], [0], [1], [0, 0, 1, 1], [], []>} : vector<8x32xf32>, vector<32x128xf32>, vector<8x128xf32> -> vector<8x128xf32>
    %140 = arith.addf %136, %139 : vector<8x128xf32>
    %141 = vector.extract_strided_slice %140 {offsets = [0, 0], sizes = [8, 32], strides = [1, 1]} : vector<8x128xf32> to vector<8x32xf32>
    %142 = arith.negf %141 : vector<8x32xf32>
    %143 = math.exp %142 : vector<8x32xf32>
    %cst_52 = arith.constant 1.000000e+00 : f32
    %144 = vector.broadcast %cst_52 : f32 to vector<8x32xf32>
    %145 = arith.addf %144, %143 : vector<8x32xf32>
    %146 = arith.divf %144, %145 : vector<8x32xf32>
    %147 = vector.extract_strided_slice %140 {offsets = [0, 32], sizes = [8, 32], strides = [1, 1]} : vector<8x128xf32> to vector<8x32xf32>
    %148 = arith.negf %147 : vector<8x32xf32>
    %149 = math.exp %148 : vector<8x32xf32>
    %cst_53 = arith.constant 1.000000e+00 : f32
    %150 = vector.broadcast %cst_53 : f32 to vector<8x32xf32>
    %151 = arith.addf %150, %149 : vector<8x32xf32>
    %152 = arith.divf %150, %151 : vector<8x32xf32>
    %153 = vector.extract_strided_slice %140 {offsets = [0, 64], sizes = [8, 32], strides = [1, 1]} : vector<8x128xf32> to vector<8x32xf32>
    %154 = math.tanh %153 : vector<8x32xf32>
    %155 = vector.extract_strided_slice %140 {offsets = [0, 96], sizes = [8, 32], strides = [1, 1]} : vector<8x128xf32> to vector<8x32xf32>
    %156 = arith.negf %155 : vector<8x32xf32>
    %157 = math.exp %156 : vector<8x32xf32>
    %cst_54 = arith.constant 1.000000e+00 : f32
    %158 = vector.broadcast %cst_54 : f32 to vector<8x32xf32>
    %159 = arith.addf %158, %157 : vector<8x32xf32>
    %160 = arith.divf %158, %159 : vector<8x32xf32>
    %161 = arith.mulf %152, %124 : vector<8x32xf32>
    %162 = arith.mulf %146, %154 : vector<8x32xf32>
    %163 = arith.addf %161, %162 : vector<8x32xf32>
    %164 = math.tanh %163 : vector<8x32xf32>
    %165 = arith.mulf %160, %164 : vector<8x32xf32>
    %c0_55 = arith.constant 0 : index
    %166 = arith.index_cast %134 : i32 to index
    %c0_56 = arith.constant 0 : index
    %167 = vector.load %arg5[%c0_55, %166, %c0_56] : memref<1x128x32xf32, #tpu.memory_space<vmem>>, vector<1x8x32xf32>
    %168 = vector.shape_cast %167 : vector<1x8x32xf32> to vector<8x32xf32>
    %169 = vector.shape_cast %165 : vector<8x32xf32> to vector<1x8x32xf32>
    tpu.vector_store %arg5[%c0_55, %166, %c0_56], %169 {strides = array<i32>} : memref<1x128x32xf32, #tpu.memory_space<vmem>>, vector<1x8x32xf32>,
    %c4_i32 = arith.constant 4 : i32
    %170 = arith.muli %12, %c4_i32 : i32
    %171 = arith.addi %10, %170 : i32
    %c8_i32_57 = arith.constant 8 : i32
    %172 = arith.muli %171, %c8_i32_57 : i32
    %173 = tpu.assume_multiple %172, 8 : i32
    %174 = arith.index_cast %173 : i32 to index
    %c0_58 = arith.constant 0 : index
    %175 = vector.load %arg6[%174, %c0_58] : memref<128x128xf32, #tpu.memory_space<vmem>>, vector<8x128xf32>
    %c0_59 = arith.constant 0 : index
    %c0_60 = arith.constant 0 : index
    %c0_61 = arith.constant 0 : index
    %176 = vector.load %arg3[%c0_59, %c0_60, %c0_61] : memref<1x32x128xf32, #tpu.memory_space<vmem>>, vector<1x32x128xf32>
    %177 = vector.shape_cast %176 : vector<1x32x128xf32> to vector<32x128xf32>
    %cst_62 = arith.constant dense<0.000000e+00> : vector<8x128xf32>
    %178 = tpu.matmul %165, %177, %cst_62 {dimension_numbers = #tpu.dot_dimension_numbers<[1], [0], [0], [1], [0, 0, 1, 1], [], []>} : vector<8x32xf32>, vector<32x128xf32>, vector<8x128xf32> -> vector<8x128xf32>
    %179 = arith.addf %175, %178 : vector<8x128xf32>
    %180 = vector.extract_strided_slice %179 {offsets = [0, 0], sizes = [8, 32], strides = [1, 1]} : vector<8x128xf32> to vector<8x32xf32>
    %181 = arith.negf %180 : vector<8x32xf32>
    %182 = math.exp %181 : vector<8x32xf32>
    %cst_63 = arith.constant 1.000000e+00 : f32
    %183 = vector.broadcast %cst_63 : f32 to vector<8x32xf32>
    %184 = arith.addf %183, %182 : vector<8x32xf32>
    %185 = arith.divf %183, %184 : vector<8x32xf32>
    %186 = vector.extract_strided_slice %179 {offsets = [0, 32], sizes = [8, 32], strides = [1, 1]} : vector<8x128xf32> to vector<8x32xf32>
    %187 = arith.negf %186 : vector<8x32xf32>
    %188 = math.exp %187 : vector<8x32xf32>
    %cst_64 = arith.constant 1.000000e+00 : f32
    %189 = vector.broadcast %cst_64 : f32 to vector<8x32xf32>
    %190 = arith.addf %189, %188 : vector<8x32xf32>
    %191 = arith.divf %189, %190 : vector<8x32xf32>
    %192 = vector.extract_strided_slice %179 {offsets = [0, 64], sizes = [8, 32], strides = [1, 1]} : vector<8x128xf32> to vector<8x32xf32>
    %193 = math.tanh %192 : vector<8x32xf32>
    %194 = vector.extract_strided_slice %179 {offsets = [0, 96], sizes = [8, 32], strides = [1, 1]} : vector<8x128xf32> to vector<8x32xf32>
    %195 = arith.negf %194 : vector<8x32xf32>
    %196 = math.exp %195 : vector<8x32xf32>
    %cst_65 = arith.constant 1.000000e+00 : f32
    %197 = vector.broadcast %cst_65 : f32 to vector<8x32xf32>
    %198 = arith.addf %197, %196 : vector<8x32xf32>
    %199 = arith.divf %197, %198 : vector<8x32xf32>
    %200 = arith.mulf %191, %163 : vector<8x32xf32>
    %201 = arith.mulf %185, %193 : vector<8x32xf32>
    %202 = arith.addf %200, %201 : vector<8x32xf32>
    %203 = math.tanh %202 : vector<8x32xf32>
    %204 = arith.mulf %199, %203 : vector<8x32xf32>
    %c0_66 = arith.constant 0 : index
    %205 = arith.index_cast %173 : i32 to index
    %c0_67 = arith.constant 0 : index
    %206 = vector.load %arg5[%c0_66, %205, %c0_67] : memref<1x128x32xf32, #tpu.memory_space<vmem>>, vector<1x8x32xf32>
    %207 = vector.shape_cast %206 : vector<1x8x32xf32> to vector<8x32xf32>
    %208 = vector.shape_cast %204 : vector<8x32xf32> to vector<1x8x32xf32>
    tpu.vector_store %arg5[%c0_66, %205, %c0_67], %208 {strides = array<i32>} : memref<1x128x32xf32, #tpu.memory_space<vmem>>, vector<1x8x32xf32>,
    %c5_i32 = arith.constant 5 : i32
    %209 = arith.muli %12, %c5_i32 : i32
    %210 = arith.addi %10, %209 : i32
    %c8_i32_68 = arith.constant 8 : i32
    %211 = arith.muli %210, %c8_i32_68 : i32
    %212 = tpu.assume_multiple %211, 8 : i32
    %213 = arith.index_cast %212 : i32 to index
    %c0_69 = arith.constant 0 : index
    %214 = vector.load %arg6[%213, %c0_69] : memref<128x128xf32, #tpu.memory_space<vmem>>, vector<8x128xf32>
    %c0_70 = arith.constant 0 : index
    %c0_71 = arith.constant 0 : index
    %c0_72 = arith.constant 0 : index
    %215 = vector.load %arg3[%c0_70, %c0_71, %c0_72] : memref<1x32x128xf32, #tpu.memory_space<vmem>>, vector<1x32x128xf32>
    %216 = vector.shape_cast %215 : vector<1x32x128xf32> to vector<32x128xf32>
    %cst_73 = arith.constant dense<0.000000e+00> : vector<8x128xf32>
    %217 = tpu.matmul %204, %216, %cst_73 {dimension_numbers = #tpu.dot_dimension_numbers<[1], [0], [0], [1], [0, 0, 1, 1], [], []>} : vector<8x32xf32>, vector<32x128xf32>, vector<8x128xf32> -> vector<8x128xf32>
    %218 = arith.addf %214, %217 : vector<8x128xf32>
    %219 = vector.extract_strided_slice %218 {offsets = [0, 0], sizes = [8, 32], strides = [1, 1]} : vector<8x128xf32> to vector<8x32xf32>
    %220 = arith.negf %219 : vector<8x32xf32>
    %221 = math.exp %220 : vector<8x32xf32>
    %cst_74 = arith.constant 1.000000e+00 : f32
    %222 = vector.broadcast %cst_74 : f32 to vector<8x32xf32>
    %223 = arith.addf %222, %221 : vector<8x32xf32>
    %224 = arith.divf %222, %223 : vector<8x32xf32>
    %225 = vector.extract_strided_slice %218 {offsets = [0, 32], sizes = [8, 32], strides = [1, 1]} : vector<8x128xf32> to vector<8x32xf32>
    %226 = arith.negf %225 : vector<8x32xf32>
    %227 = math.exp %226 : vector<8x32xf32>
    %cst_75 = arith.constant 1.000000e+00 : f32
    %228 = vector.broadcast %cst_75 : f32 to vector<8x32xf32>
    %229 = arith.addf %228, %227 : vector<8x32xf32>
    %230 = arith.divf %228, %229 : vector<8x32xf32>
    %231 = vector.extract_strided_slice %218 {offsets = [0, 64], sizes = [8, 32], strides = [1, 1]} : vector<8x128xf32> to vector<8x32xf32>
    %232 = math.tanh %231 : vector<8x32xf32>
    %233 = vector.extract_strided_slice %218 {offsets = [0, 96], sizes = [8, 32], strides = [1, 1]} : vector<8x128xf32> to vector<8x32xf32>
    %234 = arith.negf %233 : vector<8x32xf32>
    %235 = math.exp %234 : vector<8x32xf32>
    %cst_76 = arith.constant 1.000000e+00 : f32
    %236 = vector.broadcast %cst_76 : f32 to vector<8x32xf32>
    %237 = arith.addf %236, %235 : vector<8x32xf32>
    %238 = arith.divf %236, %237 : vector<8x32xf32>
    %239 = arith.mulf %230, %202 : vector<8x32xf32>
    %240 = arith.mulf %224, %232 : vector<8x32xf32>
    %241 = arith.addf %239, %240 : vector<8x32xf32>
    %242 = math.tanh %241 : vector<8x32xf32>
    %243 = arith.mulf %238, %242 : vector<8x32xf32>
    %c0_77 = arith.constant 0 : index
    %244 = arith.index_cast %212 : i32 to index
    %c0_78 = arith.constant 0 : index
    %245 = vector.load %arg5[%c0_77, %244, %c0_78] : memref<1x128x32xf32, #tpu.memory_space<vmem>>, vector<1x8x32xf32>
    %246 = vector.shape_cast %245 : vector<1x8x32xf32> to vector<8x32xf32>
    %247 = vector.shape_cast %243 : vector<8x32xf32> to vector<1x8x32xf32>
    tpu.vector_store %arg5[%c0_77, %244, %c0_78], %247 {strides = array<i32>} : memref<1x128x32xf32, #tpu.memory_space<vmem>>, vector<1x8x32xf32>,
    %c6_i32 = arith.constant 6 : i32
    %248 = arith.muli %12, %c6_i32 : i32
    %249 = arith.addi %10, %248 : i32
    %c8_i32_79 = arith.constant 8 : i32
    %250 = arith.muli %249, %c8_i32_79 : i32
    %251 = tpu.assume_multiple %250, 8 : i32
    %252 = arith.index_cast %251 : i32 to index
    %c0_80 = arith.constant 0 : index
    %253 = vector.load %arg6[%252, %c0_80] : memref<128x128xf32, #tpu.memory_space<vmem>>, vector<8x128xf32>
    %c0_81 = arith.constant 0 : index
    %c0_82 = arith.constant 0 : index
    %c0_83 = arith.constant 0 : index
    %254 = vector.load %arg3[%c0_81, %c0_82, %c0_83] : memref<1x32x128xf32, #tpu.memory_space<vmem>>, vector<1x32x128xf32>
    %255 = vector.shape_cast %254 : vector<1x32x128xf32> to vector<32x128xf32>
    %cst_84 = arith.constant dense<0.000000e+00> : vector<8x128xf32>
    %256 = tpu.matmul %243, %255, %cst_84 {dimension_numbers = #tpu.dot_dimension_numbers<[1], [0], [0], [1], [0, 0, 1, 1], [], []>} : vector<8x32xf32>, vector<32x128xf32>, vector<8x128xf32> -> vector<8x128xf32>
    %257 = arith.addf %253, %256 : vector<8x128xf32>
    %258 = vector.extract_strided_slice %257 {offsets = [0, 0], sizes = [8, 32], strides = [1, 1]} : vector<8x128xf32> to vector<8x32xf32>
    %259 = arith.negf %258 : vector<8x32xf32>
    %260 = math.exp %259 : vector<8x32xf32>
    %cst_85 = arith.constant 1.000000e+00 : f32
    %261 = vector.broadcast %cst_85 : f32 to vector<8x32xf32>
    %262 = arith.addf %261, %260 : vector<8x32xf32>
    %263 = arith.divf %261, %262 : vector<8x32xf32>
    %264 = vector.extract_strided_slice %257 {offsets = [0, 32], sizes = [8, 32], strides = [1, 1]} : vector<8x128xf32> to vector<8x32xf32>
    %265 = arith.negf %264 : vector<8x32xf32>
    %266 = math.exp %265 : vector<8x32xf32>
    %cst_86 = arith.constant 1.000000e+00 : f32
    %267 = vector.broadcast %cst_86 : f32 to vector<8x32xf32>
    %268 = arith.addf %267, %266 : vector<8x32xf32>
    %269 = arith.divf %267, %268 : vector<8x32xf32>
    %270 = vector.extract_strided_slice %257 {offsets = [0, 64], sizes = [8, 32], strides = [1, 1]} : vector<8x128xf32> to vector<8x32xf32>
    %271 = math.tanh %270 : vector<8x32xf32>
    %272 = vector.extract_strided_slice %257 {offsets = [0, 96], sizes = [8, 32], strides = [1, 1]} : vector<8x128xf32> to vector<8x32xf32>
    %273 = arith.negf %272 : vector<8x32xf32>
    %274 = math.exp %273 : vector<8x32xf32>
    %cst_87 = arith.constant 1.000000e+00 : f32
    %275 = vector.broadcast %cst_87 : f32 to vector<8x32xf32>
    %276 = arith.addf %275, %274 : vector<8x32xf32>
    %277 = arith.divf %275, %276 : vector<8x32xf32>
    %278 = arith.mulf %269, %241 : vector<8x32xf32>
    %279 = arith.mulf %263, %271 : vector<8x32xf32>
    %280 = arith.addf %278, %279 : vector<8x32xf32>
    %281 = math.tanh %280 : vector<8x32xf32>
    %282 = arith.mulf %277, %281 : vector<8x32xf32>
    %c0_88 = arith.constant 0 : index
    %283 = arith.index_cast %251 : i32 to index
    %c0_89 = arith.constant 0 : index
    %284 = vector.load %arg5[%c0_88, %283, %c0_89] : memref<1x128x32xf32, #tpu.memory_space<vmem>>, vector<1x8x32xf32>
    %285 = vector.shape_cast %284 : vector<1x8x32xf32> to vector<8x32xf32>
    %286 = vector.shape_cast %282 : vector<8x32xf32> to vector<1x8x32xf32>
    tpu.vector_store %arg5[%c0_88, %283, %c0_89], %286 {strides = array<i32>} : memref<1x128x32xf32, #tpu.memory_space<vmem>>, vector<1x8x32xf32>,
    %c7_i32 = arith.constant 7 : i32
    %287 = arith.muli %12, %c7_i32 : i32
    %288 = arith.addi %10, %287 : i32
    %c8_i32_90 = arith.constant 8 : i32
    %289 = arith.muli %288, %c8_i32_90 : i32
    %290 = tpu.assume_multiple %289, 8 : i32
    %291 = arith.index_cast %290 : i32 to index
    %c0_91 = arith.constant 0 : index
    %292 = vector.load %arg6[%291, %c0_91] : memref<128x128xf32, #tpu.memory_space<vmem>>, vector<8x128xf32>
    %c0_92 = arith.constant 0 : index
    %c0_93 = arith.constant 0 : index
    %c0_94 = arith.constant 0 : index
    %293 = vector.load %arg3[%c0_92, %c0_93, %c0_94] : memref<1x32x128xf32, #tpu.memory_space<vmem>>, vector<1x32x128xf32>
    %294 = vector.shape_cast %293 : vector<1x32x128xf32> to vector<32x128xf32>
    %cst_95 = arith.constant dense<0.000000e+00> : vector<8x128xf32>
    %295 = tpu.matmul %282, %294, %cst_95 {dimension_numbers = #tpu.dot_dimension_numbers<[1], [0], [0], [1], [0, 0, 1, 1], [], []>} : vector<8x32xf32>, vector<32x128xf32>, vector<8x128xf32> -> vector<8x128xf32>
    %296 = arith.addf %292, %295 : vector<8x128xf32>
    %297 = vector.extract_strided_slice %296 {offsets = [0, 0], sizes = [8, 32], strides = [1, 1]} : vector<8x128xf32> to vector<8x32xf32>
    %298 = arith.negf %297 : vector<8x32xf32>
    %299 = math.exp %298 : vector<8x32xf32>
    %cst_96 = arith.constant 1.000000e+00 : f32
    %300 = vector.broadcast %cst_96 : f32 to vector<8x32xf32>
    %301 = arith.addf %300, %299 : vector<8x32xf32>
    %302 = arith.divf %300, %301 : vector<8x32xf32>
    %303 = vector.extract_strided_slice %296 {offsets = [0, 32], sizes = [8, 32], strides = [1, 1]} : vector<8x128xf32> to vector<8x32xf32>
    %304 = arith.negf %303 : vector<8x32xf32>
    %305 = math.exp %304 : vector<8x32xf32>
    %cst_97 = arith.constant 1.000000e+00 : f32
    %306 = vector.broadcast %cst_97 : f32 to vector<8x32xf32>
    %307 = arith.addf %306, %305 : vector<8x32xf32>
    %308 = arith.divf %306, %307 : vector<8x32xf32>
    %309 = vector.extract_strided_slice %296 {offsets = [0, 64], sizes = [8, 32], strides = [1, 1]} : vector<8x128xf32> to vector<8x32xf32>
    %310 = math.tanh %309 : vector<8x32xf32>
    %311 = vector.extract_strided_slice %296 {offsets = [0, 96], sizes = [8, 32], strides = [1, 1]} : vector<8x128xf32> to vector<8x32xf32>
    %312 = arith.negf %311 : vector<8x32xf32>
    %313 = math.exp %312 : vector<8x32xf32>
    %cst_98 = arith.constant 1.000000e+00 : f32
    %314 = vector.broadcast %cst_98 : f32 to vector<8x32xf32>
    %315 = arith.addf %314, %313 : vector<8x32xf32>
    %316 = arith.divf %314, %315 : vector<8x32xf32>
    %317 = arith.mulf %308, %280 : vector<8x32xf32>
    %318 = arith.mulf %302, %310 : vector<8x32xf32>
    %319 = arith.addf %317, %318 : vector<8x32xf32>
    %320 = math.tanh %319 : vector<8x32xf32>
    %321 = arith.mulf %316, %320 : vector<8x32xf32>
    %c0_99 = arith.constant 0 : index
    %322 = arith.index_cast %290 : i32 to index
    %c0_100 = arith.constant 0 : index
    %323 = vector.load %arg5[%c0_99, %322, %c0_100] : memref<1x128x32xf32, #tpu.memory_space<vmem>>, vector<1x8x32xf32>
    %324 = vector.shape_cast %323 : vector<1x8x32xf32> to vector<8x32xf32>
    %325 = vector.shape_cast %321 : vector<8x32xf32> to vector<1x8x32xf32>
    tpu.vector_store %arg5[%c0_99, %322, %c0_100], %325 {strides = array<i32>} : memref<1x128x32xf32, #tpu.memory_space<vmem>>, vector<1x8x32xf32>,
    %c8_i32_101 = arith.constant 8 : i32
    %326 = arith.muli %12, %c8_i32_101 : i32
    %327 = arith.addi %10, %326 : i32
    %c8_i32_102 = arith.constant 8 : i32
    %328 = arith.muli %327, %c8_i32_102 : i32
    %329 = tpu.assume_multiple %328, 8 : i32
    %330 = arith.index_cast %329 : i32 to index
    %c0_103 = arith.constant 0 : index
    %331 = vector.load %arg6[%330, %c0_103] : memref<128x128xf32, #tpu.memory_space<vmem>>, vector<8x128xf32>
    %c0_104 = arith.constant 0 : index
    %c0_105 = arith.constant 0 : index
    %c0_106 = arith.constant 0 : index
    %332 = vector.load %arg3[%c0_104, %c0_105, %c0_106] : memref<1x32x128xf32, #tpu.memory_space<vmem>>, vector<1x32x128xf32>
    %333 = vector.shape_cast %332 : vector<1x32x128xf32> to vector<32x128xf32>
    %cst_107 = arith.constant dense<0.000000e+00> : vector<8x128xf32>
    %334 = tpu.matmul %321, %333, %cst_107 {dimension_numbers = #tpu.dot_dimension_numbers<[1], [0], [0], [1], [0, 0, 1, 1], [], []>} : vector<8x32xf32>, vector<32x128xf32>, vector<8x128xf32> -> vector<8x128xf32>
    %335 = arith.addf %331, %334 : vector<8x128xf32>
    %336 = vector.extract_strided_slice %335 {offsets = [0, 0], sizes = [8, 32], strides = [1, 1]} : vector<8x128xf32> to vector<8x32xf32>
    %337 = arith.negf %336 : vector<8x32xf32>
    %338 = math.exp %337 : vector<8x32xf32>
    %cst_108 = arith.constant 1.000000e+00 : f32
    %339 = vector.broadcast %cst_108 : f32 to vector<8x32xf32>
    %340 = arith.addf %339, %338 : vector<8x32xf32>
    %341 = arith.divf %339, %340 : vector<8x32xf32>
    %342 = vector.extract_strided_slice %335 {offsets = [0, 32], sizes = [8, 32], strides = [1, 1]} : vector<8x128xf32> to vector<8x32xf32>
    %343 = arith.negf %342 : vector<8x32xf32>
    %344 = math.exp %343 : vector<8x32xf32>
    %cst_109 = arith.constant 1.000000e+00 : f32
    %345 = vector.broadcast %cst_109 : f32 to vector<8x32xf32>
    %346 = arith.addf %345, %344 : vector<8x32xf32>
    %347 = arith.divf %345, %346 : vector<8x32xf32>
    %348 = vector.extract_strided_slice %335 {offsets = [0, 64], sizes = [8, 32], strides = [1, 1]} : vector<8x128xf32> to vector<8x32xf32>
    %349 = math.tanh %348 : vector<8x32xf32>
    %350 = vector.extract_strided_slice %335 {offsets = [0, 96], sizes = [8, 32], strides = [1, 1]} : vector<8x128xf32> to vector<8x32xf32>
    %351 = arith.negf %350 : vector<8x32xf32>
    %352 = math.exp %351 : vector<8x32xf32>
    %cst_110 = arith.constant 1.000000e+00 : f32
    %353 = vector.broadcast %cst_110 : f32 to vector<8x32xf32>
    %354 = arith.addf %353, %352 : vector<8x32xf32>
    %355 = arith.divf %353, %354 : vector<8x32xf32>
    %356 = arith.mulf %347, %319 : vector<8x32xf32>
    %357 = arith.mulf %341, %349 : vector<8x32xf32>
    %358 = arith.addf %356, %357 : vector<8x32xf32>
    %359 = math.tanh %358 : vector<8x32xf32>
    %360 = arith.mulf %355, %359 : vector<8x32xf32>
    %c0_111 = arith.constant 0 : index
    %361 = arith.index_cast %329 : i32 to index
    %c0_112 = arith.constant 0 : index
    %362 = vector.load %arg5[%c0_111, %361, %c0_112] : memref<1x128x32xf32, #tpu.memory_space<vmem>>, vector<1x8x32xf32>
    %363 = vector.shape_cast %362 : vector<1x8x32xf32> to vector<8x32xf32>
    %364 = vector.shape_cast %360 : vector<8x32xf32> to vector<1x8x32xf32>
    tpu.vector_store %arg5[%c0_111, %361, %c0_112], %364 {strides = array<i32>} : memref<1x128x32xf32, #tpu.memory_space<vmem>>, vector<1x8x32xf32>,
    %c9_i32 = arith.constant 9 : i32
    %365 = arith.muli %12, %c9_i32 : i32
    %366 = arith.addi %10, %365 : i32
    %c8_i32_113 = arith.constant 8 : i32
    %367 = arith.muli %366, %c8_i32_113 : i32
    %368 = tpu.assume_multiple %367, 8 : i32
    %369 = arith.index_cast %368 : i32 to index
    %c0_114 = arith.constant 0 : index
    %370 = vector.load %arg6[%369, %c0_114] : memref<128x128xf32, #tpu.memory_space<vmem>>, vector<8x128xf32>
    %c0_115 = arith.constant 0 : index
    %c0_116 = arith.constant 0 : index
    %c0_117 = arith.constant 0 : index
    %371 = vector.load %arg3[%c0_115, %c0_116, %c0_117] : memref<1x32x128xf32, #tpu.memory_space<vmem>>, vector<1x32x128xf32>
    %372 = vector.shape_cast %371 : vector<1x32x128xf32> to vector<32x128xf32>
    %cst_118 = arith.constant dense<0.000000e+00> : vector<8x128xf32>
    %373 = tpu.matmul %360, %372, %cst_118 {dimension_numbers = #tpu.dot_dimension_numbers<[1], [0], [0], [1], [0, 0, 1, 1], [], []>} : vector<8x32xf32>, vector<32x128xf32>, vector<8x128xf32> -> vector<8x128xf32>
    %374 = arith.addf %370, %373 : vector<8x128xf32>
    %375 = vector.extract_strided_slice %374 {offsets = [0, 0], sizes = [8, 32], strides = [1, 1]} : vector<8x128xf32> to vector<8x32xf32>
    %376 = arith.negf %375 : vector<8x32xf32>
    %377 = math.exp %376 : vector<8x32xf32>
    %cst_119 = arith.constant 1.000000e+00 : f32
    %378 = vector.broadcast %cst_119 : f32 to vector<8x32xf32>
    %379 = arith.addf %378, %377 : vector<8x32xf32>
    %380 = arith.divf %378, %379 : vector<8x32xf32>
    %381 = vector.extract_strided_slice %374 {offsets = [0, 32], sizes = [8, 32], strides = [1, 1]} : vector<8x128xf32> to vector<8x32xf32>
    %382 = arith.negf %381 : vector<8x32xf32>
    %383 = math.exp %382 : vector<8x32xf32>
    %cst_120 = arith.constant 1.000000e+00 : f32
    %384 = vector.broadcast %cst_120 : f32 to vector<8x32xf32>
    %385 = arith.addf %384, %383 : vector<8x32xf32>
    %386 = arith.divf %384, %385 : vector<8x32xf32>
    %387 = vector.extract_strided_slice %374 {offsets = [0, 64], sizes = [8, 32], strides = [1, 1]} : vector<8x128xf32> to vector<8x32xf32>
    %388 = math.tanh %387 : vector<8x32xf32>
    %389 = vector.extract_strided_slice %374 {offsets = [0, 96], sizes = [8, 32], strides = [1, 1]} : vector<8x128xf32> to vector<8x32xf32>
    %390 = arith.negf %389 : vector<8x32xf32>
    %391 = math.exp %390 : vector<8x32xf32>
    %cst_121 = arith.constant 1.000000e+00 : f32
    %392 = vector.broadcast %cst_121 : f32 to vector<8x32xf32>
    %393 = arith.addf %392, %391 : vector<8x32xf32>
    %394 = arith.divf %392, %393 : vector<8x32xf32>
    %395 = arith.mulf %386, %358 : vector<8x32xf32>
    %396 = arith.mulf %380, %388 : vector<8x32xf32>
    %397 = arith.addf %395, %396 : vector<8x32xf32>
    %398 = math.tanh %397 : vector<8x32xf32>
    %399 = arith.mulf %394, %398 : vector<8x32xf32>
    %c0_122 = arith.constant 0 : index
    %400 = arith.index_cast %368 : i32 to index
    %c0_123 = arith.constant 0 : index
    %401 = vector.load %arg5[%c0_122, %400, %c0_123] : memref<1x128x32xf32, #tpu.memory_space<vmem>>, vector<1x8x32xf32>
    %402 = vector.shape_cast %401 : vector<1x8x32xf32> to vector<8x32xf32>
    %403 = vector.shape_cast %399 : vector<8x32xf32> to vector<1x8x32xf32>
    tpu.vector_store %arg5[%c0_122, %400, %c0_123], %403 {strides = array<i32>} : memref<1x128x32xf32, #tpu.memory_space<vmem>>, vector<1x8x32xf32>,
    %c10_i32 = arith.constant 10 : i32
    %404 = arith.muli %12, %c10_i32 : i32
    %405 = arith.addi %10, %404 : i32
    %c8_i32_124 = arith.constant 8 : i32
    %406 = arith.muli %405, %c8_i32_124 : i32
    %407 = tpu.assume_multiple %406, 8 : i32
    %408 = arith.index_cast %407 : i32 to index
    %c0_125 = arith.constant 0 : index
    %409 = vector.load %arg6[%408, %c0_125] : memref<128x128xf32, #tpu.memory_space<vmem>>, vector<8x128xf32>
    %c0_126 = arith.constant 0 : index
    %c0_127 = arith.constant 0 : index
    %c0_128 = arith.constant 0 : index
    %410 = vector.load %arg3[%c0_126, %c0_127, %c0_128] : memref<1x32x128xf32, #tpu.memory_space<vmem>>, vector<1x32x128xf32>
    %411 = vector.shape_cast %410 : vector<1x32x128xf32> to vector<32x128xf32>
    %cst_129 = arith.constant dense<0.000000e+00> : vector<8x128xf32>
    %412 = tpu.matmul %399, %411, %cst_129 {dimension_numbers = #tpu.dot_dimension_numbers<[1], [0], [0], [1], [0, 0, 1, 1], [], []>} : vector<8x32xf32>, vector<32x128xf32>, vector<8x128xf32> -> vector<8x128xf32>
    %413 = arith.addf %409, %412 : vector<8x128xf32>
    %414 = vector.extract_strided_slice %413 {offsets = [0, 0], sizes = [8, 32], strides = [1, 1]} : vector<8x128xf32> to vector<8x32xf32>
    %415 = arith.negf %414 : vector<8x32xf32>
    %416 = math.exp %415 : vector<8x32xf32>
    %cst_130 = arith.constant 1.000000e+00 : f32
    %417 = vector.broadcast %cst_130 : f32 to vector<8x32xf32>
    %418 = arith.addf %417, %416 : vector<8x32xf32>
    %419 = arith.divf %417, %418 : vector<8x32xf32>
    %420 = vector.extract_strided_slice %413 {offsets = [0, 32], sizes = [8, 32], strides = [1, 1]} : vector<8x128xf32> to vector<8x32xf32>
    %421 = arith.negf %420 : vector<8x32xf32>
    %422 = math.exp %421 : vector<8x32xf32>
    %cst_131 = arith.constant 1.000000e+00 : f32
    %423 = vector.broadcast %cst_131 : f32 to vector<8x32xf32>
    %424 = arith.addf %423, %422 : vector<8x32xf32>
    %425 = arith.divf %423, %424 : vector<8x32xf32>
    %426 = vector.extract_strided_slice %413 {offsets = [0, 64], sizes = [8, 32], strides = [1, 1]} : vector<8x128xf32> to vector<8x32xf32>
    %427 = math.tanh %426 : vector<8x32xf32>
    %428 = vector.extract_strided_slice %413 {offsets = [0, 96], sizes = [8, 32], strides = [1, 1]} : vector<8x128xf32> to vector<8x32xf32>
    %429 = arith.negf %428 : vector<8x32xf32>
    %430 = math.exp %429 : vector<8x32xf32>
    %cst_132 = arith.constant 1.000000e+00 : f32
    %431 = vector.broadcast %cst_132 : f32 to vector<8x32xf32>
    %432 = arith.addf %431, %430 : vector<8x32xf32>
    %433 = arith.divf %431, %432 : vector<8x32xf32>
    %434 = arith.mulf %425, %397 : vector<8x32xf32>
    %435 = arith.mulf %419, %427 : vector<8x32xf32>
    %436 = arith.addf %434, %435 : vector<8x32xf32>
    %437 = math.tanh %436 : vector<8x32xf32>
    %438 = arith.mulf %433, %437 : vector<8x32xf32>
    %c0_133 = arith.constant 0 : index
    %439 = arith.index_cast %407 : i32 to index
    %c0_134 = arith.constant 0 : index
    %440 = vector.load %arg5[%c0_133, %439, %c0_134] : memref<1x128x32xf32, #tpu.memory_space<vmem>>, vector<1x8x32xf32>
    %441 = vector.shape_cast %440 : vector<1x8x32xf32> to vector<8x32xf32>
    %442 = vector.shape_cast %438 : vector<8x32xf32> to vector<1x8x32xf32>
    tpu.vector_store %arg5[%c0_133, %439, %c0_134], %442 {strides = array<i32>} : memref<1x128x32xf32, #tpu.memory_space<vmem>>, vector<1x8x32xf32>,
    %c11_i32 = arith.constant 11 : i32
    %443 = arith.muli %12, %c11_i32 : i32
    %444 = arith.addi %10, %443 : i32
    %c8_i32_135 = arith.constant 8 : i32
    %445 = arith.muli %444, %c8_i32_135 : i32
    %446 = tpu.assume_multiple %445, 8 : i32
    %447 = arith.index_cast %446 : i32 to index
    %c0_136 = arith.constant 0 : index
    %448 = vector.load %arg6[%447, %c0_136] : memref<128x128xf32, #tpu.memory_space<vmem>>, vector<8x128xf32>
    %c0_137 = arith.constant 0 : index
    %c0_138 = arith.constant 0 : index
    %c0_139 = arith.constant 0 : index
    %449 = vector.load %arg3[%c0_137, %c0_138, %c0_139] : memref<1x32x128xf32, #tpu.memory_space<vmem>>, vector<1x32x128xf32>
    %450 = vector.shape_cast %449 : vector<1x32x128xf32> to vector<32x128xf32>
    %cst_140 = arith.constant dense<0.000000e+00> : vector<8x128xf32>
    %451 = tpu.matmul %438, %450, %cst_140 {dimension_numbers = #tpu.dot_dimension_numbers<[1], [0], [0], [1], [0, 0, 1, 1], [], []>} : vector<8x32xf32>, vector<32x128xf32>, vector<8x128xf32> -> vector<8x128xf32>
    %452 = arith.addf %448, %451 : vector<8x128xf32>
    %453 = vector.extract_strided_slice %452 {offsets = [0, 0], sizes = [8, 32], strides = [1, 1]} : vector<8x128xf32> to vector<8x32xf32>
    %454 = arith.negf %453 : vector<8x32xf32>
    %455 = math.exp %454 : vector<8x32xf32>
    %cst_141 = arith.constant 1.000000e+00 : f32
    %456 = vector.broadcast %cst_141 : f32 to vector<8x32xf32>
    %457 = arith.addf %456, %455 : vector<8x32xf32>
    %458 = arith.divf %456, %457 : vector<8x32xf32>
    %459 = vector.extract_strided_slice %452 {offsets = [0, 32], sizes = [8, 32], strides = [1, 1]} : vector<8x128xf32> to vector<8x32xf32>
    %460 = arith.negf %459 : vector<8x32xf32>
    %461 = math.exp %460 : vector<8x32xf32>
    %cst_142 = arith.constant 1.000000e+00 : f32
    %462 = vector.broadcast %cst_142 : f32 to vector<8x32xf32>
    %463 = arith.addf %462, %461 : vector<8x32xf32>
    %464 = arith.divf %462, %463 : vector<8x32xf32>
    %465 = vector.extract_strided_slice %452 {offsets = [0, 64], sizes = [8, 32], strides = [1, 1]} : vector<8x128xf32> to vector<8x32xf32>
    %466 = math.tanh %465 : vector<8x32xf32>
    %467 = vector.extract_strided_slice %452 {offsets = [0, 96], sizes = [8, 32], strides = [1, 1]} : vector<8x128xf32> to vector<8x32xf32>
    %468 = arith.negf %467 : vector<8x32xf32>
    %469 = math.exp %468 : vector<8x32xf32>
    %cst_143 = arith.constant 1.000000e+00 : f32
    %470 = vector.broadcast %cst_143 : f32 to vector<8x32xf32>
    %471 = arith.addf %470, %469 : vector<8x32xf32>
    %472 = arith.divf %470, %471 : vector<8x32xf32>
    %473 = arith.mulf %464, %436 : vector<8x32xf32>
    %474 = arith.mulf %458, %466 : vector<8x32xf32>
    %475 = arith.addf %473, %474 : vector<8x32xf32>
    %476 = math.tanh %475 : vector<8x32xf32>
    %477 = arith.mulf %472, %476 : vector<8x32xf32>
    %c0_144 = arith.constant 0 : index
    %478 = arith.index_cast %446 : i32 to index
    %c0_145 = arith.constant 0 : index
    %479 = vector.load %arg5[%c0_144, %478, %c0_145] : memref<1x128x32xf32, #tpu.memory_space<vmem>>, vector<1x8x32xf32>
    %480 = vector.shape_cast %479 : vector<1x8x32xf32> to vector<8x32xf32>
    %481 = vector.shape_cast %477 : vector<8x32xf32> to vector<1x8x32xf32>
    tpu.vector_store %arg5[%c0_144, %478, %c0_145], %481 {strides = array<i32>} : memref<1x128x32xf32, #tpu.memory_space<vmem>>, vector<1x8x32xf32>,
    %c12_i32 = arith.constant 12 : i32
    %482 = arith.muli %12, %c12_i32 : i32
    %483 = arith.addi %10, %482 : i32
    %c8_i32_146 = arith.constant 8 : i32
    %484 = arith.muli %483, %c8_i32_146 : i32
    %485 = tpu.assume_multiple %484, 8 : i32
    %486 = arith.index_cast %485 : i32 to index
    %c0_147 = arith.constant 0 : index
    %487 = vector.load %arg6[%486, %c0_147] : memref<128x128xf32, #tpu.memory_space<vmem>>, vector<8x128xf32>
    %c0_148 = arith.constant 0 : index
    %c0_149 = arith.constant 0 : index
    %c0_150 = arith.constant 0 : index
    %488 = vector.load %arg3[%c0_148, %c0_149, %c0_150] : memref<1x32x128xf32, #tpu.memory_space<vmem>>, vector<1x32x128xf32>
    %489 = vector.shape_cast %488 : vector<1x32x128xf32> to vector<32x128xf32>
    %cst_151 = arith.constant dense<0.000000e+00> : vector<8x128xf32>
    %490 = tpu.matmul %477, %489, %cst_151 {dimension_numbers = #tpu.dot_dimension_numbers<[1], [0], [0], [1], [0, 0, 1, 1], [], []>} : vector<8x32xf32>, vector<32x128xf32>, vector<8x128xf32> -> vector<8x128xf32>
    %491 = arith.addf %487, %490 : vector<8x128xf32>
    %492 = vector.extract_strided_slice %491 {offsets = [0, 0], sizes = [8, 32], strides = [1, 1]} : vector<8x128xf32> to vector<8x32xf32>
    %493 = arith.negf %492 : vector<8x32xf32>
    %494 = math.exp %493 : vector<8x32xf32>
    %cst_152 = arith.constant 1.000000e+00 : f32
    %495 = vector.broadcast %cst_152 : f32 to vector<8x32xf32>
    %496 = arith.addf %495, %494 : vector<8x32xf32>
    %497 = arith.divf %495, %496 : vector<8x32xf32>
    %498 = vector.extract_strided_slice %491 {offsets = [0, 32], sizes = [8, 32], strides = [1, 1]} : vector<8x128xf32> to vector<8x32xf32>
    %499 = arith.negf %498 : vector<8x32xf32>
    %500 = math.exp %499 : vector<8x32xf32>
    %cst_153 = arith.constant 1.000000e+00 : f32
    %501 = vector.broadcast %cst_153 : f32 to vector<8x32xf32>
    %502 = arith.addf %501, %500 : vector<8x32xf32>
    %503 = arith.divf %501, %502 : vector<8x32xf32>
    %504 = vector.extract_strided_slice %491 {offsets = [0, 64], sizes = [8, 32], strides = [1, 1]} : vector<8x128xf32> to vector<8x32xf32>
    %505 = math.tanh %504 : vector<8x32xf32>
    %506 = vector.extract_strided_slice %491 {offsets = [0, 96], sizes = [8, 32], strides = [1, 1]} : vector<8x128xf32> to vector<8x32xf32>
    %507 = arith.negf %506 : vector<8x32xf32>
    %508 = math.exp %507 : vector<8x32xf32>
    %cst_154 = arith.constant 1.000000e+00 : f32
    %509 = vector.broadcast %cst_154 : f32 to vector<8x32xf32>
    %510 = arith.addf %509, %508 : vector<8x32xf32>
    %511 = arith.divf %509, %510 : vector<8x32xf32>
    %512 = arith.mulf %503, %475 : vector<8x32xf32>
    %513 = arith.mulf %497, %505 : vector<8x32xf32>
    %514 = arith.addf %512, %513 : vector<8x32xf32>
    %515 = math.tanh %514 : vector<8x32xf32>
    %516 = arith.mulf %511, %515 : vector<8x32xf32>
    %c0_155 = arith.constant 0 : index
    %517 = arith.index_cast %485 : i32 to index
    %c0_156 = arith.constant 0 : index
    %518 = vector.load %arg5[%c0_155, %517, %c0_156] : memref<1x128x32xf32, #tpu.memory_space<vmem>>, vector<1x8x32xf32>
    %519 = vector.shape_cast %518 : vector<1x8x32xf32> to vector<8x32xf32>
    %520 = vector.shape_cast %516 : vector<8x32xf32> to vector<1x8x32xf32>
    tpu.vector_store %arg5[%c0_155, %517, %c0_156], %520 {strides = array<i32>} : memref<1x128x32xf32, #tpu.memory_space<vmem>>, vector<1x8x32xf32>,
    %c13_i32 = arith.constant 13 : i32
    %521 = arith.muli %12, %c13_i32 : i32
    %522 = arith.addi %10, %521 : i32
    %c8_i32_157 = arith.constant 8 : i32
    %523 = arith.muli %522, %c8_i32_157 : i32
    %524 = tpu.assume_multiple %523, 8 : i32
    %525 = arith.index_cast %524 : i32 to index
    %c0_158 = arith.constant 0 : index
    %526 = vector.load %arg6[%525, %c0_158] : memref<128x128xf32, #tpu.memory_space<vmem>>, vector<8x128xf32>
    %c0_159 = arith.constant 0 : index
    %c0_160 = arith.constant 0 : index
    %c0_161 = arith.constant 0 : index
    %527 = vector.load %arg3[%c0_159, %c0_160, %c0_161] : memref<1x32x128xf32, #tpu.memory_space<vmem>>, vector<1x32x128xf32>
    %528 = vector.shape_cast %527 : vector<1x32x128xf32> to vector<32x128xf32>
    %cst_162 = arith.constant dense<0.000000e+00> : vector<8x128xf32>
    %529 = tpu.matmul %516, %528, %cst_162 {dimension_numbers = #tpu.dot_dimension_numbers<[1], [0], [0], [1], [0, 0, 1, 1], [], []>} : vector<8x32xf32>, vector<32x128xf32>, vector<8x128xf32> -> vector<8x128xf32>
    %530 = arith.addf %526, %529 : vector<8x128xf32>
    %531 = vector.extract_strided_slice %530 {offsets = [0, 0], sizes = [8, 32], strides = [1, 1]} : vector<8x128xf32> to vector<8x32xf32>
    %532 = arith.negf %531 : vector<8x32xf32>
    %533 = math.exp %532 : vector<8x32xf32>
    %cst_163 = arith.constant 1.000000e+00 : f32
    %534 = vector.broadcast %cst_163 : f32 to vector<8x32xf32>
    %535 = arith.addf %534, %533 : vector<8x32xf32>
    %536 = arith.divf %534, %535 : vector<8x32xf32>
    %537 = vector.extract_strided_slice %530 {offsets = [0, 32], sizes = [8, 32], strides = [1, 1]} : vector<8x128xf32> to vector<8x32xf32>
    %538 = arith.negf %537 : vector<8x32xf32>
    %539 = math.exp %538 : vector<8x32xf32>
    %cst_164 = arith.constant 1.000000e+00 : f32
    %540 = vector.broadcast %cst_164 : f32 to vector<8x32xf32>
    %541 = arith.addf %540, %539 : vector<8x32xf32>
    %542 = arith.divf %540, %541 : vector<8x32xf32>
    %543 = vector.extract_strided_slice %530 {offsets = [0, 64], sizes = [8, 32], strides = [1, 1]} : vector<8x128xf32> to vector<8x32xf32>
    %544 = math.tanh %543 : vector<8x32xf32>
    %545 = vector.extract_strided_slice %530 {offsets = [0, 96], sizes = [8, 32], strides = [1, 1]} : vector<8x128xf32> to vector<8x32xf32>
    %546 = arith.negf %545 : vector<8x32xf32>
    %547 = math.exp %546 : vector<8x32xf32>
    %cst_165 = arith.constant 1.000000e+00 : f32
    %548 = vector.broadcast %cst_165 : f32 to vector<8x32xf32>
    %549 = arith.addf %548, %547 : vector<8x32xf32>
    %550 = arith.divf %548, %549 : vector<8x32xf32>
    %551 = arith.mulf %542, %514 : vector<8x32xf32>
    %552 = arith.mulf %536, %544 : vector<8x32xf32>
    %553 = arith.addf %551, %552 : vector<8x32xf32>
    %554 = math.tanh %553 : vector<8x32xf32>
    %555 = arith.mulf %550, %554 : vector<8x32xf32>
    %c0_166 = arith.constant 0 : index
    %556 = arith.index_cast %524 : i32 to index
    %c0_167 = arith.constant 0 : index
    %557 = vector.load %arg5[%c0_166, %556, %c0_167] : memref<1x128x32xf32, #tpu.memory_space<vmem>>, vector<1x8x32xf32>
    %558 = vector.shape_cast %557 : vector<1x8x32xf32> to vector<8x32xf32>
    %559 = vector.shape_cast %555 : vector<8x32xf32> to vector<1x8x32xf32>
    tpu.vector_store %arg5[%c0_166, %556, %c0_167], %559 {strides = array<i32>} : memref<1x128x32xf32, #tpu.memory_space<vmem>>, vector<1x8x32xf32>,
    %c14_i32 = arith.constant 14 : i32
    %560 = arith.muli %12, %c14_i32 : i32
    %561 = arith.addi %10, %560 : i32
    %c8_i32_168 = arith.constant 8 : i32
    %562 = arith.muli %561, %c8_i32_168 : i32
    %563 = tpu.assume_multiple %562, 8 : i32
    %564 = arith.index_cast %563 : i32 to index
    %c0_169 = arith.constant 0 : index
    %565 = vector.load %arg6[%564, %c0_169] : memref<128x128xf32, #tpu.memory_space<vmem>>, vector<8x128xf32>
    %c0_170 = arith.constant 0 : index
    %c0_171 = arith.constant 0 : index
    %c0_172 = arith.constant 0 : index
    %566 = vector.load %arg3[%c0_170, %c0_171, %c0_172] : memref<1x32x128xf32, #tpu.memory_space<vmem>>, vector<1x32x128xf32>
    %567 = vector.shape_cast %566 : vector<1x32x128xf32> to vector<32x128xf32>
    %cst_173 = arith.constant dense<0.000000e+00> : vector<8x128xf32>
    %568 = tpu.matmul %555, %567, %cst_173 {dimension_numbers = #tpu.dot_dimension_numbers<[1], [0], [0], [1], [0, 0, 1, 1], [], []>} : vector<8x32xf32>, vector<32x128xf32>, vector<8x128xf32> -> vector<8x128xf32>
    %569 = arith.addf %565, %568 : vector<8x128xf32>
    %570 = vector.extract_strided_slice %569 {offsets = [0, 0], sizes = [8, 32], strides = [1, 1]} : vector<8x128xf32> to vector<8x32xf32>
    %571 = arith.negf %570 : vector<8x32xf32>
    %572 = math.exp %571 : vector<8x32xf32>
    %cst_174 = arith.constant 1.000000e+00 : f32
    %573 = vector.broadcast %cst_174 : f32 to vector<8x32xf32>
    %574 = arith.addf %573, %572 : vector<8x32xf32>
    %575 = arith.divf %573, %574 : vector<8x32xf32>
    %576 = vector.extract_strided_slice %569 {offsets = [0, 32], sizes = [8, 32], strides = [1, 1]} : vector<8x128xf32> to vector<8x32xf32>
    %577 = arith.negf %576 : vector<8x32xf32>
    %578 = math.exp %577 : vector<8x32xf32>
    %cst_175 = arith.constant 1.000000e+00 : f32
    %579 = vector.broadcast %cst_175 : f32 to vector<8x32xf32>
    %580 = arith.addf %579, %578 : vector<8x32xf32>
    %581 = arith.divf %579, %580 : vector<8x32xf32>
    %582 = vector.extract_strided_slice %569 {offsets = [0, 64], sizes = [8, 32], strides = [1, 1]} : vector<8x128xf32> to vector<8x32xf32>
    %583 = math.tanh %582 : vector<8x32xf32>
    %584 = vector.extract_strided_slice %569 {offsets = [0, 96], sizes = [8, 32], strides = [1, 1]} : vector<8x128xf32> to vector<8x32xf32>
    %585 = arith.negf %584 : vector<8x32xf32>
    %586 = math.exp %585 : vector<8x32xf32>
    %cst_176 = arith.constant 1.000000e+00 : f32
    %587 = vector.broadcast %cst_176 : f32 to vector<8x32xf32>
    %588 = arith.addf %587, %586 : vector<8x32xf32>
    %589 = arith.divf %587, %588 : vector<8x32xf32>
    %590 = arith.mulf %581, %553 : vector<8x32xf32>
    %591 = arith.mulf %575, %583 : vector<8x32xf32>
    %592 = arith.addf %590, %591 : vector<8x32xf32>
    %593 = math.tanh %592 : vector<8x32xf32>
    %594 = arith.mulf %589, %593 : vector<8x32xf32>
    %c0_177 = arith.constant 0 : index
    %595 = arith.index_cast %563 : i32 to index
    %c0_178 = arith.constant 0 : index
    %596 = vector.load %arg5[%c0_177, %595, %c0_178] : memref<1x128x32xf32, #tpu.memory_space<vmem>>, vector<1x8x32xf32>
    %597 = vector.shape_cast %596 : vector<1x8x32xf32> to vector<8x32xf32>
    %598 = vector.shape_cast %594 : vector<8x32xf32> to vector<1x8x32xf32>
    tpu.vector_store %arg5[%c0_177, %595, %c0_178], %598 {strides = array<i32>} : memref<1x128x32xf32, #tpu.memory_space<vmem>>, vector<1x8x32xf32>,
    %c15_i32_179 = arith.constant 15 : i32
    %599 = arith.muli %12, %c15_i32_179 : i32
    %600 = arith.addi %10, %599 : i32
    %c8_i32_180 = arith.constant 8 : i32
    %601 = arith.muli %600, %c8_i32_180 : i32
    %602 = tpu.assume_multiple %601, 8 : i32
    %603 = arith.index_cast %602 : i32 to index
    %c0_181 = arith.constant 0 : index
    %604 = vector.load %arg6[%603, %c0_181] : memref<128x128xf32, #tpu.memory_space<vmem>>, vector<8x128xf32>
    %c0_182 = arith.constant 0 : index
    %c0_183 = arith.constant 0 : index
    %c0_184 = arith.constant 0 : index
    %605 = vector.load %arg3[%c0_182, %c0_183, %c0_184] : memref<1x32x128xf32, #tpu.memory_space<vmem>>, vector<1x32x128xf32>
    %606 = vector.shape_cast %605 : vector<1x32x128xf32> to vector<32x128xf32>
    %cst_185 = arith.constant dense<0.000000e+00> : vector<8x128xf32>
    %607 = tpu.matmul %594, %606, %cst_185 {dimension_numbers = #tpu.dot_dimension_numbers<[1], [0], [0], [1], [0, 0, 1, 1], [], []>} : vector<8x32xf32>, vector<32x128xf32>, vector<8x128xf32> -> vector<8x128xf32>
    %608 = arith.addf %604, %607 : vector<8x128xf32>
    %609 = vector.extract_strided_slice %608 {offsets = [0, 0], sizes = [8, 32], strides = [1, 1]} : vector<8x128xf32> to vector<8x32xf32>
    %610 = arith.negf %609 : vector<8x32xf32>
    %611 = math.exp %610 : vector<8x32xf32>
    %cst_186 = arith.constant 1.000000e+00 : f32
    %612 = vector.broadcast %cst_186 : f32 to vector<8x32xf32>
    %613 = arith.addf %612, %611 : vector<8x32xf32>
    %614 = arith.divf %612, %613 : vector<8x32xf32>
    %615 = vector.extract_strided_slice %608 {offsets = [0, 32], sizes = [8, 32], strides = [1, 1]} : vector<8x128xf32> to vector<8x32xf32>
    %616 = arith.negf %615 : vector<8x32xf32>
    %617 = math.exp %616 : vector<8x32xf32>
    %cst_187 = arith.constant 1.000000e+00 : f32
    %618 = vector.broadcast %cst_187 : f32 to vector<8x32xf32>
    %619 = arith.addf %618, %617 : vector<8x32xf32>
    %620 = arith.divf %618, %619 : vector<8x32xf32>
    %621 = vector.extract_strided_slice %608 {offsets = [0, 64], sizes = [8, 32], strides = [1, 1]} : vector<8x128xf32> to vector<8x32xf32>
    %622 = math.tanh %621 : vector<8x32xf32>
    %623 = vector.extract_strided_slice %608 {offsets = [0, 96], sizes = [8, 32], strides = [1, 1]} : vector<8x128xf32> to vector<8x32xf32>
    %624 = arith.negf %623 : vector<8x32xf32>
    %625 = math.exp %624 : vector<8x32xf32>
    %cst_188 = arith.constant 1.000000e+00 : f32
    %626 = vector.broadcast %cst_188 : f32 to vector<8x32xf32>
    %627 = arith.addf %626, %625 : vector<8x32xf32>
    %628 = arith.divf %626, %627 : vector<8x32xf32>
    %629 = arith.mulf %620, %592 : vector<8x32xf32>
    %630 = arith.mulf %614, %622 : vector<8x32xf32>
    %631 = arith.addf %629, %630 : vector<8x32xf32>
    %632 = math.tanh %631 : vector<8x32xf32>
    %633 = arith.mulf %628, %632 : vector<8x32xf32>
    %c0_189 = arith.constant 0 : index
    %634 = arith.index_cast %602 : i32 to index
    %c0_190 = arith.constant 0 : index
    %635 = vector.load %arg5[%c0_189, %634, %c0_190] : memref<1x128x32xf32, #tpu.memory_space<vmem>>, vector<1x8x32xf32>
    %636 = vector.shape_cast %635 : vector<1x8x32xf32> to vector<8x32xf32>
    %637 = vector.shape_cast %633 : vector<8x32xf32> to vector<1x8x32xf32>
    tpu.vector_store %arg5[%c0_189, %634, %c0_190], %637 {strides = array<i32>} : memref<1x128x32xf32, #tpu.memory_space<vmem>>, vector<1x8x32xf32>,
    %c16_i32 = arith.constant 16 : i32
    return
  }
  func.func @transform_0(%arg0: i32) -> (i32, i32, i32) {
    %c0_i32 = arith.constant 0 : i32
    %c0_i32_0 = arith.constant 0 : i32
    %c0_i32_1 = arith.constant 0 : i32
    %c0_i32_2 = arith.constant 0 : i32
    return %c0_i32, %c0_i32_0, %c0_i32_1 : i32, i32, i32
  }
  func.func @transform_1(%arg0: i32) -> (i32, i32, i32, i32) {
    %c0_i32 = arith.constant 0 : i32
    %c0_i32_0 = arith.constant 0 : i32
    %c0_i32_1 = arith.constant 0 : i32
    %c0_i32_2 = arith.constant 0 : i32
    return %arg0, %c0_i32, %c0_i32_0, %c0_i32_1 : i32, i32, i32, i32
  }
  func.func @transform_2(%arg0: i32) -> (i32, i32, i32) {
    %c0_i32 = arith.constant 0 : i32
    %c0_i32_0 = arith.constant 0 : i32
    %c0_i32_1 = arith.constant 0 : i32
    return %arg0, %c0_i32, %c0_i32_0 : i32, i32, i32
  }
  func.func @transform_3(%arg0: i32) -> (i32, i32, i32) {
    %c0_i32 = arith.constant 0 : i32
    %c0_i32_0 = arith.constant 0 : i32
    %c0_i32_1 = arith.constant 0 : i32
    return %arg0, %c0_i32, %c0_i32_0 : i32, i32, i32
  }
  func.func @transform_4(%arg0: i32) -> (i32, i32, i32) {
    %c0_i32 = arith.constant 0 : i32
    %c0_i32_0 = arith.constant 0 : i32
    %c0_i32_1 = arith.constant 0 : i32
    return %arg0, %c0_i32, %c0_i32_0 : i32, i32, i32
  }
}

module attributes {stable_mosaic.version = 11 : i64} {
  func.func @bilstm_kernel(%arg0: i32, %arg1: memref<2x128x32xf32, #tpu.memory_space<vmem>>, %arg2: memref<1x2x32x128xf32, #tpu.memory_space<vmem>>, %arg3: memref<1x32x128xf32, #tpu.memory_space<vmem>>, %arg4: memref<1x1x128xf32, #tpu.memory_space<vmem>>, %arg5: memref<1x128x32xf32, #tpu.memory_space<vmem>>, %arg6: memref<128x128xf32, #tpu.memory_space<vmem>>) attributes {dimension_semantics = [#tpu.dimension_semantics<parallel>], iteration_bounds = array<i64: 2>, scalar_prefetch = 0 : i64, scratch_operands = 1 : i64, tpu.core_type = #tpu.core_type<tc>, window_params = [{pipeline_mode = #tpu.pipeline_mode<synchronous>, transform_indices = @transform_0, window_bounds = array<i64: 2, 128, 32>}, {transform_indices = @transform_1, window_bounds = array<i64: 1, 2, 32, 128>}, {transform_indices = @transform_2, window_bounds = array<i64: 1, 32, 128>}, {transform_indices = @transform_3, window_bounds = array<i64: 1, 1, 128>}, {transform_indices = @transform_4, window_bounds = array<i64: 1, 128, 32>}]} {
    %c0 = arith.constant 0 : index
    %c0_0 = arith.constant 0 : index
    %c0_1 = arith.constant 0 : index
    %0 = vector.load %arg1[%c0, %c0_0, %c0_1] : memref<2x128x32xf32, #tpu.memory_space<vmem>>, vector<1x128x32xf32>
    %1 = vector.shape_cast %0 : vector<1x128x32xf32> to vector<128x32xf32>
    %c0_2 = arith.constant 0 : index
    %c0_3 = arith.constant 0 : index
    %c0_4 = arith.constant 0 : index
    %c0_5 = arith.constant 0 : index
    %2 = vector.load %arg2[%c0_2, %c0_3, %c0_4, %c0_5] : memref<1x2x32x128xf32, #tpu.memory_space<vmem>>, vector<1x1x32x128xf32>
    %3 = vector.shape_cast %2 : vector<1x1x32x128xf32> to vector<32x128xf32>
    %cst = arith.constant dense<0.000000e+00> : vector<128x128xf32>
    %4 = tpu.matmul %1, %3, %cst {dimension_numbers = #tpu.dot_dimension_numbers<[1], [0], [0], [1], [0, 0, 1, 1], [], []>} : vector<128x32xf32>, vector<32x128xf32>, vector<128x128xf32> -> vector<128x128xf32>
    %c1 = arith.constant 1 : index
    %c0_6 = arith.constant 0 : index
    %c0_7 = arith.constant 0 : index
    %5 = vector.load %arg1[%c1, %c0_6, %c0_7] : memref<2x128x32xf32, #tpu.memory_space<vmem>>, vector<1x128x32xf32>
    %6 = vector.shape_cast %5 : vector<1x128x32xf32> to vector<128x32xf32>
    %c0_8 = arith.constant 0 : index
    %c1_9 = arith.constant 1 : index
    %c0_10 = arith.constant 0 : index
    %c0_11 = arith.constant 0 : index
    %7 = vector.load %arg2[%c0_8, %c1_9, %c0_10, %c0_11] : memref<1x2x32x128xf32, #tpu.memory_space<vmem>>, vector<1x1x32x128xf32>
    %8 = vector.shape_cast %7 : vector<1x1x32x128xf32> to vector<32x128xf32>
    %cst_12 = arith.constant dense<0.000000e+00> : vector<128x128xf32>
    %9 = tpu.matmul %6, %8, %cst_12 {dimension_numbers = #tpu.dot_dimension_numbers<[1], [0], [0], [1], [0, 0, 1, 1], [], []>} : vector<128x32xf32>, vector<32x128xf32>, vector<128x128xf32> -> vector<128x128xf32>
    %10 = arith.addf %4, %9 : vector<128x128xf32>
    %c0_13 = arith.constant 0 : index
    %c0_14 = arith.constant 0 : index
    %c0_15 = arith.constant 0 : index
    %11 = vector.load %arg4[%c0_13, %c0_14, %c0_15] : memref<1x1x128xf32, #tpu.memory_space<vmem>>, vector<1x1x128xf32>
    %12 = vector.shape_cast %11 : vector<1x1x128xf32> to vector<1x128xf32>
    %13 = vector.broadcast %12 : vector<1x128xf32> to vector<128x128xf32>
    %14 = arith.addf %10, %13 : vector<128x128xf32>
    %c0_16 = arith.constant 0 : index
    %c0_17 = arith.constant 0 : index
    %15 = vector.load %arg6[%c0_16, %c0_17] : memref<128x128xf32, #tpu.memory_space<vmem>>, vector<128x128xf32>
    tpu.vector_store %arg6[%c0_16, %c0_17], %14 {strides = array<i32>} : memref<128x128xf32, #tpu.memory_space<vmem>>, vector<128x128xf32>,
    %c15_i32 = arith.constant 15 : i32
    %16 = arith.muli %arg0, %c15_i32 : i32
    %c2_i32 = arith.constant 2 : i32
    %17 = arith.muli %c2_i32, %arg0 : i32
    %c1_i32 = arith.constant 1 : i32
    %18 = arith.subi %c1_i32, %17 : i32
    %cst_18 = arith.constant 0.000000e+00 : f32
    %19 = vector.broadcast %cst_18 : f32 to vector<8x32xf32>
    %c0_i32 = arith.constant 0 : i32
    %20 = arith.muli %18, %c0_i32 : i32
    %21 = arith.addi %16, %20 : i32
    %c8_i32 = arith.constant 8 : i32
    %22 = arith.muli %21, %c8_i32 : i32
    %23 = tpu.assume_multiple %22, 8 : i32
    %24 = arith.index_cast %23 : i32 to index
    %c0_19 = arith.constant 0 : index
    %25 = vector.load %arg6[%24, %c0_19] : memref<128x128xf32, #tpu.memory_space<vmem>>, vector<8x128xf32>
    %c0_20 = arith.constant 0 : index
    %c0_21 = arith.constant 0 : index
    %c0_22 = arith.constant 0 : index
    %26 = vector.load %arg3[%c0_20, %c0_21, %c0_22] : memref<1x32x128xf32, #tpu.memory_space<vmem>>, vector<1x32x128xf32>
    %27 = vector.shape_cast %26 : vector<1x32x128xf32> to vector<32x128xf32>
    %cst_23 = arith.constant dense<0.000000e+00> : vector<8x128xf32>
    %28 = tpu.matmul %19, %27, %cst_23 {dimension_numbers = #tpu.dot_dimension_numbers<[1], [0], [0], [1], [0, 0, 1, 1], [], []>} : vector<8x32xf32>, vector<32x128xf32>, vector<8x128xf32> -> vector<8x128xf32>
    %29 = arith.addf %25, %28 : vector<8x128xf32>
    %30 = vector.extract_strided_slice %29 {offsets = [0, 0], sizes = [8, 32], strides = [1, 1]} : vector<8x128xf32> to vector<8x32xf32>
    %31 = arith.negf %30 : vector<8x32xf32>
    %32 = math.exp %31 : vector<8x32xf32>
    %cst_24 = arith.constant 1.000000e+00 : f32
    %33 = vector.broadcast %cst_24 : f32 to vector<8x32xf32>
    %34 = arith.addf %33, %32 : vector<8x32xf32>
    %35 = arith.divf %33, %34 : vector<8x32xf32>
    %36 = vector.extract_strided_slice %29 {offsets = [0, 32], sizes = [8, 32], strides = [1, 1]} : vector<8x128xf32> to vector<8x32xf32>
    %37 = arith.negf %36 : vector<8x32xf32>
    %38 = math.exp %37 : vector<8x32xf32>
    %cst_25 = arith.constant 1.000000e+00 : f32
    %39 = vector.broadcast %cst_25 : f32 to vector<8x32xf32>
    %40 = arith.addf %39, %38 : vector<8x32xf32>
    %41 = arith.divf %39, %40 : vector<8x32xf32>
    %42 = vector.extract_strided_slice %29 {offsets = [0, 64], sizes = [8, 32], strides = [1, 1]} : vector<8x128xf32> to vector<8x32xf32>
    %43 = math.tanh %42 : vector<8x32xf32>
    %44 = vector.extract_strided_slice %29 {offsets = [0, 96], sizes = [8, 32], strides = [1, 1]} : vector<8x128xf32> to vector<8x32xf32>
    %45 = arith.negf %44 : vector<8x32xf32>
    %46 = math.exp %45 : vector<8x32xf32>
    %cst_26 = arith.constant 1.000000e+00 : f32
    %47 = vector.broadcast %cst_26 : f32 to vector<8x32xf32>
    %48 = arith.addf %47, %46 : vector<8x32xf32>
    %49 = arith.divf %47, %48 : vector<8x32xf32>
    %50 = arith.mulf %41, %19 : vector<8x32xf32>
    %51 = arith.mulf %35, %43 : vector<8x32xf32>
    %52 = arith.addf %50, %51 : vector<8x32xf32>
    %53 = math.tanh %52 : vector<8x32xf32>
    %54 = arith.mulf %49, %53 : vector<8x32xf32>
    %c0_27 = arith.constant 0 : index
    %55 = arith.index_cast %23 : i32 to index
    %c0_28 = arith.constant 0 : index
    %56 = vector.load %arg5[%c0_27, %55, %c0_28] : memref<1x128x32xf32, #tpu.memory_space<vmem>>, vector<1x8x32xf32>
    %57 = vector.shape_cast %56 : vector<1x8x32xf32> to vector<8x32xf32>
    %58 = vector.shape_cast %54 : vector<8x32xf32> to vector<1x8x32xf32>
    tpu.vector_store %arg5[%c0_27, %55, %c0_28], %58 {strides = array<i32>} : memref<1x128x32xf32, #tpu.memory_space<vmem>>, vector<1x8x32xf32>,
    %c1_i32_29 = arith.constant 1 : i32
    %59 = arith.muli %18, %c1_i32_29 : i32
    %60 = arith.addi %16, %59 : i32
    %c8_i32_30 = arith.constant 8 : i32
    %61 = arith.muli %60, %c8_i32_30 : i32
    %62 = tpu.assume_multiple %61, 8 : i32
    %63 = arith.index_cast %62 : i32 to index
    %c0_31 = arith.constant 0 : index
    %64 = vector.load %arg6[%63, %c0_31] : memref<128x128xf32, #tpu.memory_space<vmem>>, vector<8x128xf32>
    %c0_32 = arith.constant 0 : index
    %c0_33 = arith.constant 0 : index
    %c0_34 = arith.constant 0 : index
    %65 = vector.load %arg3[%c0_32, %c0_33, %c0_34] : memref<1x32x128xf32, #tpu.memory_space<vmem>>, vector<1x32x128xf32>
    %66 = vector.shape_cast %65 : vector<1x32x128xf32> to vector<32x128xf32>
    %cst_35 = arith.constant dense<0.000000e+00> : vector<8x128xf32>
    %67 = tpu.matmul %54, %66, %cst_35 {dimension_numbers = #tpu.dot_dimension_numbers<[1], [0], [0], [1], [0, 0, 1, 1], [], []>} : vector<8x32xf32>, vector<32x128xf32>, vector<8x128xf32> -> vector<8x128xf32>
    %68 = arith.addf %64, %67 : vector<8x128xf32>
    %69 = vector.extract_strided_slice %68 {offsets = [0, 0], sizes = [8, 32], strides = [1, 1]} : vector<8x128xf32> to vector<8x32xf32>
    %70 = arith.negf %69 : vector<8x32xf32>
    %71 = math.exp %70 : vector<8x32xf32>
    %cst_36 = arith.constant 1.000000e+00 : f32
    %72 = vector.broadcast %cst_36 : f32 to vector<8x32xf32>
    %73 = arith.addf %72, %71 : vector<8x32xf32>
    %74 = arith.divf %72, %73 : vector<8x32xf32>
    %75 = vector.extract_strided_slice %68 {offsets = [0, 32], sizes = [8, 32], strides = [1, 1]} : vector<8x128xf32> to vector<8x32xf32>
    %76 = arith.negf %75 : vector<8x32xf32>
    %77 = math.exp %76 : vector<8x32xf32>
    %cst_37 = arith.constant 1.000000e+00 : f32
    %78 = vector.broadcast %cst_37 : f32 to vector<8x32xf32>
    %79 = arith.addf %78, %77 : vector<8x32xf32>
    %80 = arith.divf %78, %79 : vector<8x32xf32>
    %81 = vector.extract_strided_slice %68 {offsets = [0, 64], sizes = [8, 32], strides = [1, 1]} : vector<8x128xf32> to vector<8x32xf32>
    %82 = math.tanh %81 : vector<8x32xf32>
    %83 = vector.extract_strided_slice %68 {offsets = [0, 96], sizes = [8, 32], strides = [1, 1]} : vector<8x128xf32> to vector<8x32xf32>
    %84 = arith.negf %83 : vector<8x32xf32>
    %85 = math.exp %84 : vector<8x32xf32>
    %cst_38 = arith.constant 1.000000e+00 : f32
    %86 = vector.broadcast %cst_38 : f32 to vector<8x32xf32>
    %87 = arith.addf %86, %85 : vector<8x32xf32>
    %88 = arith.divf %86, %87 : vector<8x32xf32>
    %89 = arith.mulf %80, %52 : vector<8x32xf32>
    %90 = arith.mulf %74, %82 : vector<8x32xf32>
    %91 = arith.addf %89, %90 : vector<8x32xf32>
    %92 = math.tanh %91 : vector<8x32xf32>
    %93 = arith.mulf %88, %92 : vector<8x32xf32>
    %c0_39 = arith.constant 0 : index
    %94 = arith.index_cast %62 : i32 to index
    %c0_40 = arith.constant 0 : index
    %95 = vector.load %arg5[%c0_39, %94, %c0_40] : memref<1x128x32xf32, #tpu.memory_space<vmem>>, vector<1x8x32xf32>
    %96 = vector.shape_cast %95 : vector<1x8x32xf32> to vector<8x32xf32>
    %97 = vector.shape_cast %93 : vector<8x32xf32> to vector<1x8x32xf32>
    tpu.vector_store %arg5[%c0_39, %94, %c0_40], %97 {strides = array<i32>} : memref<1x128x32xf32, #tpu.memory_space<vmem>>, vector<1x8x32xf32>,
    %c2_i32_41 = arith.constant 2 : i32
    %98 = arith.muli %18, %c2_i32_41 : i32
    %99 = arith.addi %16, %98 : i32
    %c8_i32_42 = arith.constant 8 : i32
    %100 = arith.muli %99, %c8_i32_42 : i32
    %101 = tpu.assume_multiple %100, 8 : i32
    %102 = arith.index_cast %101 : i32 to index
    %c0_43 = arith.constant 0 : index
    %103 = vector.load %arg6[%102, %c0_43] : memref<128x128xf32, #tpu.memory_space<vmem>>, vector<8x128xf32>
    %c0_44 = arith.constant 0 : index
    %c0_45 = arith.constant 0 : index
    %c0_46 = arith.constant 0 : index
    %104 = vector.load %arg3[%c0_44, %c0_45, %c0_46] : memref<1x32x128xf32, #tpu.memory_space<vmem>>, vector<1x32x128xf32>
    %105 = vector.shape_cast %104 : vector<1x32x128xf32> to vector<32x128xf32>
    %cst_47 = arith.constant dense<0.000000e+00> : vector<8x128xf32>
    %106 = tpu.matmul %93, %105, %cst_47 {dimension_numbers = #tpu.dot_dimension_numbers<[1], [0], [0], [1], [0, 0, 1, 1], [], []>} : vector<8x32xf32>, vector<32x128xf32>, vector<8x128xf32> -> vector<8x128xf32>
    %107 = arith.addf %103, %106 : vector<8x128xf32>
    %108 = vector.extract_strided_slice %107 {offsets = [0, 0], sizes = [8, 32], strides = [1, 1]} : vector<8x128xf32> to vector<8x32xf32>
    %109 = arith.negf %108 : vector<8x32xf32>
    %110 = math.exp %109 : vector<8x32xf32>
    %cst_48 = arith.constant 1.000000e+00 : f32
    %111 = vector.broadcast %cst_48 : f32 to vector<8x32xf32>
    %112 = arith.addf %111, %110 : vector<8x32xf32>
    %113 = arith.divf %111, %112 : vector<8x32xf32>
    %114 = vector.extract_strided_slice %107 {offsets = [0, 32], sizes = [8, 32], strides = [1, 1]} : vector<8x128xf32> to vector<8x32xf32>
    %115 = arith.negf %114 : vector<8x32xf32>
    %116 = math.exp %115 : vector<8x32xf32>
    %cst_49 = arith.constant 1.000000e+00 : f32
    %117 = vector.broadcast %cst_49 : f32 to vector<8x32xf32>
    %118 = arith.addf %117, %116 : vector<8x32xf32>
    %119 = arith.divf %117, %118 : vector<8x32xf32>
    %120 = vector.extract_strided_slice %107 {offsets = [0, 64], sizes = [8, 32], strides = [1, 1]} : vector<8x128xf32> to vector<8x32xf32>
    %121 = math.tanh %120 : vector<8x32xf32>
    %122 = vector.extract_strided_slice %107 {offsets = [0, 96], sizes = [8, 32], strides = [1, 1]} : vector<8x128xf32> to vector<8x32xf32>
    %123 = arith.negf %122 : vector<8x32xf32>
    %124 = math.exp %123 : vector<8x32xf32>
    %cst_50 = arith.constant 1.000000e+00 : f32
    %125 = vector.broadcast %cst_50 : f32 to vector<8x32xf32>
    %126 = arith.addf %125, %124 : vector<8x32xf32>
    %127 = arith.divf %125, %126 : vector<8x32xf32>
    %128 = arith.mulf %119, %91 : vector<8x32xf32>
    %129 = arith.mulf %113, %121 : vector<8x32xf32>
    %130 = arith.addf %128, %129 : vector<8x32xf32>
    %131 = math.tanh %130 : vector<8x32xf32>
    %132 = arith.mulf %127, %131 : vector<8x32xf32>
    %c0_51 = arith.constant 0 : index
    %133 = arith.index_cast %101 : i32 to index
    %c0_52 = arith.constant 0 : index
    %134 = vector.load %arg5[%c0_51, %133, %c0_52] : memref<1x128x32xf32, #tpu.memory_space<vmem>>, vector<1x8x32xf32>
    %135 = vector.shape_cast %134 : vector<1x8x32xf32> to vector<8x32xf32>
    %136 = vector.shape_cast %132 : vector<8x32xf32> to vector<1x8x32xf32>
    tpu.vector_store %arg5[%c0_51, %133, %c0_52], %136 {strides = array<i32>} : memref<1x128x32xf32, #tpu.memory_space<vmem>>, vector<1x8x32xf32>,
    %c3_i32 = arith.constant 3 : i32
    %137 = arith.muli %18, %c3_i32 : i32
    %138 = arith.addi %16, %137 : i32
    %c8_i32_53 = arith.constant 8 : i32
    %139 = arith.muli %138, %c8_i32_53 : i32
    %140 = tpu.assume_multiple %139, 8 : i32
    %141 = arith.index_cast %140 : i32 to index
    %c0_54 = arith.constant 0 : index
    %142 = vector.load %arg6[%141, %c0_54] : memref<128x128xf32, #tpu.memory_space<vmem>>, vector<8x128xf32>
    %c0_55 = arith.constant 0 : index
    %c0_56 = arith.constant 0 : index
    %c0_57 = arith.constant 0 : index
    %143 = vector.load %arg3[%c0_55, %c0_56, %c0_57] : memref<1x32x128xf32, #tpu.memory_space<vmem>>, vector<1x32x128xf32>
    %144 = vector.shape_cast %143 : vector<1x32x128xf32> to vector<32x128xf32>
    %cst_58 = arith.constant dense<0.000000e+00> : vector<8x128xf32>
    %145 = tpu.matmul %132, %144, %cst_58 {dimension_numbers = #tpu.dot_dimension_numbers<[1], [0], [0], [1], [0, 0, 1, 1], [], []>} : vector<8x32xf32>, vector<32x128xf32>, vector<8x128xf32> -> vector<8x128xf32>
    %146 = arith.addf %142, %145 : vector<8x128xf32>
    %147 = vector.extract_strided_slice %146 {offsets = [0, 0], sizes = [8, 32], strides = [1, 1]} : vector<8x128xf32> to vector<8x32xf32>
    %148 = arith.negf %147 : vector<8x32xf32>
    %149 = math.exp %148 : vector<8x32xf32>
    %cst_59 = arith.constant 1.000000e+00 : f32
    %150 = vector.broadcast %cst_59 : f32 to vector<8x32xf32>
    %151 = arith.addf %150, %149 : vector<8x32xf32>
    %152 = arith.divf %150, %151 : vector<8x32xf32>
    %153 = vector.extract_strided_slice %146 {offsets = [0, 32], sizes = [8, 32], strides = [1, 1]} : vector<8x128xf32> to vector<8x32xf32>
    %154 = arith.negf %153 : vector<8x32xf32>
    %155 = math.exp %154 : vector<8x32xf32>
    %cst_60 = arith.constant 1.000000e+00 : f32
    %156 = vector.broadcast %cst_60 : f32 to vector<8x32xf32>
    %157 = arith.addf %156, %155 : vector<8x32xf32>
    %158 = arith.divf %156, %157 : vector<8x32xf32>
    %159 = vector.extract_strided_slice %146 {offsets = [0, 64], sizes = [8, 32], strides = [1, 1]} : vector<8x128xf32> to vector<8x32xf32>
    %160 = math.tanh %159 : vector<8x32xf32>
    %161 = vector.extract_strided_slice %146 {offsets = [0, 96], sizes = [8, 32], strides = [1, 1]} : vector<8x128xf32> to vector<8x32xf32>
    %162 = arith.negf %161 : vector<8x32xf32>
    %163 = math.exp %162 : vector<8x32xf32>
    %cst_61 = arith.constant 1.000000e+00 : f32
    %164 = vector.broadcast %cst_61 : f32 to vector<8x32xf32>
    %165 = arith.addf %164, %163 : vector<8x32xf32>
    %166 = arith.divf %164, %165 : vector<8x32xf32>
    %167 = arith.mulf %158, %130 : vector<8x32xf32>
    %168 = arith.mulf %152, %160 : vector<8x32xf32>
    %169 = arith.addf %167, %168 : vector<8x32xf32>
    %170 = math.tanh %169 : vector<8x32xf32>
    %171 = arith.mulf %166, %170 : vector<8x32xf32>
    %c0_62 = arith.constant 0 : index
    %172 = arith.index_cast %140 : i32 to index
    %c0_63 = arith.constant 0 : index
    %173 = vector.load %arg5[%c0_62, %172, %c0_63] : memref<1x128x32xf32, #tpu.memory_space<vmem>>, vector<1x8x32xf32>
    %174 = vector.shape_cast %173 : vector<1x8x32xf32> to vector<8x32xf32>
    %175 = vector.shape_cast %171 : vector<8x32xf32> to vector<1x8x32xf32>
    tpu.vector_store %arg5[%c0_62, %172, %c0_63], %175 {strides = array<i32>} : memref<1x128x32xf32, #tpu.memory_space<vmem>>, vector<1x8x32xf32>,
    %c4_i32 = arith.constant 4 : i32
    %176 = arith.muli %18, %c4_i32 : i32
    %177 = arith.addi %16, %176 : i32
    %c8_i32_64 = arith.constant 8 : i32
    %178 = arith.muli %177, %c8_i32_64 : i32
    %179 = tpu.assume_multiple %178, 8 : i32
    %180 = arith.index_cast %179 : i32 to index
    %c0_65 = arith.constant 0 : index
    %181 = vector.load %arg6[%180, %c0_65] : memref<128x128xf32, #tpu.memory_space<vmem>>, vector<8x128xf32>
    %c0_66 = arith.constant 0 : index
    %c0_67 = arith.constant 0 : index
    %c0_68 = arith.constant 0 : index
    %182 = vector.load %arg3[%c0_66, %c0_67, %c0_68] : memref<1x32x128xf32, #tpu.memory_space<vmem>>, vector<1x32x128xf32>
    %183 = vector.shape_cast %182 : vector<1x32x128xf32> to vector<32x128xf32>
    %cst_69 = arith.constant dense<0.000000e+00> : vector<8x128xf32>
    %184 = tpu.matmul %171, %183, %cst_69 {dimension_numbers = #tpu.dot_dimension_numbers<[1], [0], [0], [1], [0, 0, 1, 1], [], []>} : vector<8x32xf32>, vector<32x128xf32>, vector<8x128xf32> -> vector<8x128xf32>
    %185 = arith.addf %181, %184 : vector<8x128xf32>
    %186 = vector.extract_strided_slice %185 {offsets = [0, 0], sizes = [8, 32], strides = [1, 1]} : vector<8x128xf32> to vector<8x32xf32>
    %187 = arith.negf %186 : vector<8x32xf32>
    %188 = math.exp %187 : vector<8x32xf32>
    %cst_70 = arith.constant 1.000000e+00 : f32
    %189 = vector.broadcast %cst_70 : f32 to vector<8x32xf32>
    %190 = arith.addf %189, %188 : vector<8x32xf32>
    %191 = arith.divf %189, %190 : vector<8x32xf32>
    %192 = vector.extract_strided_slice %185 {offsets = [0, 32], sizes = [8, 32], strides = [1, 1]} : vector<8x128xf32> to vector<8x32xf32>
    %193 = arith.negf %192 : vector<8x32xf32>
    %194 = math.exp %193 : vector<8x32xf32>
    %cst_71 = arith.constant 1.000000e+00 : f32
    %195 = vector.broadcast %cst_71 : f32 to vector<8x32xf32>
    %196 = arith.addf %195, %194 : vector<8x32xf32>
    %197 = arith.divf %195, %196 : vector<8x32xf32>
    %198 = vector.extract_strided_slice %185 {offsets = [0, 64], sizes = [8, 32], strides = [1, 1]} : vector<8x128xf32> to vector<8x32xf32>
    %199 = math.tanh %198 : vector<8x32xf32>
    %200 = vector.extract_strided_slice %185 {offsets = [0, 96], sizes = [8, 32], strides = [1, 1]} : vector<8x128xf32> to vector<8x32xf32>
    %201 = arith.negf %200 : vector<8x32xf32>
    %202 = math.exp %201 : vector<8x32xf32>
    %cst_72 = arith.constant 1.000000e+00 : f32
    %203 = vector.broadcast %cst_72 : f32 to vector<8x32xf32>
    %204 = arith.addf %203, %202 : vector<8x32xf32>
    %205 = arith.divf %203, %204 : vector<8x32xf32>
    %206 = arith.mulf %197, %169 : vector<8x32xf32>
    %207 = arith.mulf %191, %199 : vector<8x32xf32>
    %208 = arith.addf %206, %207 : vector<8x32xf32>
    %209 = math.tanh %208 : vector<8x32xf32>
    %210 = arith.mulf %205, %209 : vector<8x32xf32>
    %c0_73 = arith.constant 0 : index
    %211 = arith.index_cast %179 : i32 to index
    %c0_74 = arith.constant 0 : index
    %212 = vector.load %arg5[%c0_73, %211, %c0_74] : memref<1x128x32xf32, #tpu.memory_space<vmem>>, vector<1x8x32xf32>
    %213 = vector.shape_cast %212 : vector<1x8x32xf32> to vector<8x32xf32>
    %214 = vector.shape_cast %210 : vector<8x32xf32> to vector<1x8x32xf32>
    tpu.vector_store %arg5[%c0_73, %211, %c0_74], %214 {strides = array<i32>} : memref<1x128x32xf32, #tpu.memory_space<vmem>>, vector<1x8x32xf32>,
    %c5_i32 = arith.constant 5 : i32
    %215 = arith.muli %18, %c5_i32 : i32
    %216 = arith.addi %16, %215 : i32
    %c8_i32_75 = arith.constant 8 : i32
    %217 = arith.muli %216, %c8_i32_75 : i32
    %218 = tpu.assume_multiple %217, 8 : i32
    %219 = arith.index_cast %218 : i32 to index
    %c0_76 = arith.constant 0 : index
    %220 = vector.load %arg6[%219, %c0_76] : memref<128x128xf32, #tpu.memory_space<vmem>>, vector<8x128xf32>
    %c0_77 = arith.constant 0 : index
    %c0_78 = arith.constant 0 : index
    %c0_79 = arith.constant 0 : index
    %221 = vector.load %arg3[%c0_77, %c0_78, %c0_79] : memref<1x32x128xf32, #tpu.memory_space<vmem>>, vector<1x32x128xf32>
    %222 = vector.shape_cast %221 : vector<1x32x128xf32> to vector<32x128xf32>
    %cst_80 = arith.constant dense<0.000000e+00> : vector<8x128xf32>
    %223 = tpu.matmul %210, %222, %cst_80 {dimension_numbers = #tpu.dot_dimension_numbers<[1], [0], [0], [1], [0, 0, 1, 1], [], []>} : vector<8x32xf32>, vector<32x128xf32>, vector<8x128xf32> -> vector<8x128xf32>
    %224 = arith.addf %220, %223 : vector<8x128xf32>
    %225 = vector.extract_strided_slice %224 {offsets = [0, 0], sizes = [8, 32], strides = [1, 1]} : vector<8x128xf32> to vector<8x32xf32>
    %226 = arith.negf %225 : vector<8x32xf32>
    %227 = math.exp %226 : vector<8x32xf32>
    %cst_81 = arith.constant 1.000000e+00 : f32
    %228 = vector.broadcast %cst_81 : f32 to vector<8x32xf32>
    %229 = arith.addf %228, %227 : vector<8x32xf32>
    %230 = arith.divf %228, %229 : vector<8x32xf32>
    %231 = vector.extract_strided_slice %224 {offsets = [0, 32], sizes = [8, 32], strides = [1, 1]} : vector<8x128xf32> to vector<8x32xf32>
    %232 = arith.negf %231 : vector<8x32xf32>
    %233 = math.exp %232 : vector<8x32xf32>
    %cst_82 = arith.constant 1.000000e+00 : f32
    %234 = vector.broadcast %cst_82 : f32 to vector<8x32xf32>
    %235 = arith.addf %234, %233 : vector<8x32xf32>
    %236 = arith.divf %234, %235 : vector<8x32xf32>
    %237 = vector.extract_strided_slice %224 {offsets = [0, 64], sizes = [8, 32], strides = [1, 1]} : vector<8x128xf32> to vector<8x32xf32>
    %238 = math.tanh %237 : vector<8x32xf32>
    %239 = vector.extract_strided_slice %224 {offsets = [0, 96], sizes = [8, 32], strides = [1, 1]} : vector<8x128xf32> to vector<8x32xf32>
    %240 = arith.negf %239 : vector<8x32xf32>
    %241 = math.exp %240 : vector<8x32xf32>
    %cst_83 = arith.constant 1.000000e+00 : f32
    %242 = vector.broadcast %cst_83 : f32 to vector<8x32xf32>
    %243 = arith.addf %242, %241 : vector<8x32xf32>
    %244 = arith.divf %242, %243 : vector<8x32xf32>
    %245 = arith.mulf %236, %208 : vector<8x32xf32>
    %246 = arith.mulf %230, %238 : vector<8x32xf32>
    %247 = arith.addf %245, %246 : vector<8x32xf32>
    %248 = math.tanh %247 : vector<8x32xf32>
    %249 = arith.mulf %244, %248 : vector<8x32xf32>
    %c0_84 = arith.constant 0 : index
    %250 = arith.index_cast %218 : i32 to index
    %c0_85 = arith.constant 0 : index
    %251 = vector.load %arg5[%c0_84, %250, %c0_85] : memref<1x128x32xf32, #tpu.memory_space<vmem>>, vector<1x8x32xf32>
    %252 = vector.shape_cast %251 : vector<1x8x32xf32> to vector<8x32xf32>
    %253 = vector.shape_cast %249 : vector<8x32xf32> to vector<1x8x32xf32>
    tpu.vector_store %arg5[%c0_84, %250, %c0_85], %253 {strides = array<i32>} : memref<1x128x32xf32, #tpu.memory_space<vmem>>, vector<1x8x32xf32>,
    %c6_i32 = arith.constant 6 : i32
    %254 = arith.muli %18, %c6_i32 : i32
    %255 = arith.addi %16, %254 : i32
    %c8_i32_86 = arith.constant 8 : i32
    %256 = arith.muli %255, %c8_i32_86 : i32
    %257 = tpu.assume_multiple %256, 8 : i32
    %258 = arith.index_cast %257 : i32 to index
    %c0_87 = arith.constant 0 : index
    %259 = vector.load %arg6[%258, %c0_87] : memref<128x128xf32, #tpu.memory_space<vmem>>, vector<8x128xf32>
    %c0_88 = arith.constant 0 : index
    %c0_89 = arith.constant 0 : index
    %c0_90 = arith.constant 0 : index
    %260 = vector.load %arg3[%c0_88, %c0_89, %c0_90] : memref<1x32x128xf32, #tpu.memory_space<vmem>>, vector<1x32x128xf32>
    %261 = vector.shape_cast %260 : vector<1x32x128xf32> to vector<32x128xf32>
    %cst_91 = arith.constant dense<0.000000e+00> : vector<8x128xf32>
    %262 = tpu.matmul %249, %261, %cst_91 {dimension_numbers = #tpu.dot_dimension_numbers<[1], [0], [0], [1], [0, 0, 1, 1], [], []>} : vector<8x32xf32>, vector<32x128xf32>, vector<8x128xf32> -> vector<8x128xf32>
    %263 = arith.addf %259, %262 : vector<8x128xf32>
    %264 = vector.extract_strided_slice %263 {offsets = [0, 0], sizes = [8, 32], strides = [1, 1]} : vector<8x128xf32> to vector<8x32xf32>
    %265 = arith.negf %264 : vector<8x32xf32>
    %266 = math.exp %265 : vector<8x32xf32>
    %cst_92 = arith.constant 1.000000e+00 : f32
    %267 = vector.broadcast %cst_92 : f32 to vector<8x32xf32>
    %268 = arith.addf %267, %266 : vector<8x32xf32>
    %269 = arith.divf %267, %268 : vector<8x32xf32>
    %270 = vector.extract_strided_slice %263 {offsets = [0, 32], sizes = [8, 32], strides = [1, 1]} : vector<8x128xf32> to vector<8x32xf32>
    %271 = arith.negf %270 : vector<8x32xf32>
    %272 = math.exp %271 : vector<8x32xf32>
    %cst_93 = arith.constant 1.000000e+00 : f32
    %273 = vector.broadcast %cst_93 : f32 to vector<8x32xf32>
    %274 = arith.addf %273, %272 : vector<8x32xf32>
    %275 = arith.divf %273, %274 : vector<8x32xf32>
    %276 = vector.extract_strided_slice %263 {offsets = [0, 64], sizes = [8, 32], strides = [1, 1]} : vector<8x128xf32> to vector<8x32xf32>
    %277 = math.tanh %276 : vector<8x32xf32>
    %278 = vector.extract_strided_slice %263 {offsets = [0, 96], sizes = [8, 32], strides = [1, 1]} : vector<8x128xf32> to vector<8x32xf32>
    %279 = arith.negf %278 : vector<8x32xf32>
    %280 = math.exp %279 : vector<8x32xf32>
    %cst_94 = arith.constant 1.000000e+00 : f32
    %281 = vector.broadcast %cst_94 : f32 to vector<8x32xf32>
    %282 = arith.addf %281, %280 : vector<8x32xf32>
    %283 = arith.divf %281, %282 : vector<8x32xf32>
    %284 = arith.mulf %275, %247 : vector<8x32xf32>
    %285 = arith.mulf %269, %277 : vector<8x32xf32>
    %286 = arith.addf %284, %285 : vector<8x32xf32>
    %287 = math.tanh %286 : vector<8x32xf32>
    %288 = arith.mulf %283, %287 : vector<8x32xf32>
    %c0_95 = arith.constant 0 : index
    %289 = arith.index_cast %257 : i32 to index
    %c0_96 = arith.constant 0 : index
    %290 = vector.load %arg5[%c0_95, %289, %c0_96] : memref<1x128x32xf32, #tpu.memory_space<vmem>>, vector<1x8x32xf32>
    %291 = vector.shape_cast %290 : vector<1x8x32xf32> to vector<8x32xf32>
    %292 = vector.shape_cast %288 : vector<8x32xf32> to vector<1x8x32xf32>
    tpu.vector_store %arg5[%c0_95, %289, %c0_96], %292 {strides = array<i32>} : memref<1x128x32xf32, #tpu.memory_space<vmem>>, vector<1x8x32xf32>,
    %c7_i32 = arith.constant 7 : i32
    %293 = arith.muli %18, %c7_i32 : i32
    %294 = arith.addi %16, %293 : i32
    %c8_i32_97 = arith.constant 8 : i32
    %295 = arith.muli %294, %c8_i32_97 : i32
    %296 = tpu.assume_multiple %295, 8 : i32
    %297 = arith.index_cast %296 : i32 to index
    %c0_98 = arith.constant 0 : index
    %298 = vector.load %arg6[%297, %c0_98] : memref<128x128xf32, #tpu.memory_space<vmem>>, vector<8x128xf32>
    %c0_99 = arith.constant 0 : index
    %c0_100 = arith.constant 0 : index
    %c0_101 = arith.constant 0 : index
    %299 = vector.load %arg3[%c0_99, %c0_100, %c0_101] : memref<1x32x128xf32, #tpu.memory_space<vmem>>, vector<1x32x128xf32>
    %300 = vector.shape_cast %299 : vector<1x32x128xf32> to vector<32x128xf32>
    %cst_102 = arith.constant dense<0.000000e+00> : vector<8x128xf32>
    %301 = tpu.matmul %288, %300, %cst_102 {dimension_numbers = #tpu.dot_dimension_numbers<[1], [0], [0], [1], [0, 0, 1, 1], [], []>} : vector<8x32xf32>, vector<32x128xf32>, vector<8x128xf32> -> vector<8x128xf32>
    %302 = arith.addf %298, %301 : vector<8x128xf32>
    %303 = vector.extract_strided_slice %302 {offsets = [0, 0], sizes = [8, 32], strides = [1, 1]} : vector<8x128xf32> to vector<8x32xf32>
    %304 = arith.negf %303 : vector<8x32xf32>
    %305 = math.exp %304 : vector<8x32xf32>
    %cst_103 = arith.constant 1.000000e+00 : f32
    %306 = vector.broadcast %cst_103 : f32 to vector<8x32xf32>
    %307 = arith.addf %306, %305 : vector<8x32xf32>
    %308 = arith.divf %306, %307 : vector<8x32xf32>
    %309 = vector.extract_strided_slice %302 {offsets = [0, 32], sizes = [8, 32], strides = [1, 1]} : vector<8x128xf32> to vector<8x32xf32>
    %310 = arith.negf %309 : vector<8x32xf32>
    %311 = math.exp %310 : vector<8x32xf32>
    %cst_104 = arith.constant 1.000000e+00 : f32
    %312 = vector.broadcast %cst_104 : f32 to vector<8x32xf32>
    %313 = arith.addf %312, %311 : vector<8x32xf32>
    %314 = arith.divf %312, %313 : vector<8x32xf32>
    %315 = vector.extract_strided_slice %302 {offsets = [0, 64], sizes = [8, 32], strides = [1, 1]} : vector<8x128xf32> to vector<8x32xf32>
    %316 = math.tanh %315 : vector<8x32xf32>
    %317 = vector.extract_strided_slice %302 {offsets = [0, 96], sizes = [8, 32], strides = [1, 1]} : vector<8x128xf32> to vector<8x32xf32>
    %318 = arith.negf %317 : vector<8x32xf32>
    %319 = math.exp %318 : vector<8x32xf32>
    %cst_105 = arith.constant 1.000000e+00 : f32
    %320 = vector.broadcast %cst_105 : f32 to vector<8x32xf32>
    %321 = arith.addf %320, %319 : vector<8x32xf32>
    %322 = arith.divf %320, %321 : vector<8x32xf32>
    %323 = arith.mulf %314, %286 : vector<8x32xf32>
    %324 = arith.mulf %308, %316 : vector<8x32xf32>
    %325 = arith.addf %323, %324 : vector<8x32xf32>
    %326 = math.tanh %325 : vector<8x32xf32>
    %327 = arith.mulf %322, %326 : vector<8x32xf32>
    %c0_106 = arith.constant 0 : index
    %328 = arith.index_cast %296 : i32 to index
    %c0_107 = arith.constant 0 : index
    %329 = vector.load %arg5[%c0_106, %328, %c0_107] : memref<1x128x32xf32, #tpu.memory_space<vmem>>, vector<1x8x32xf32>
    %330 = vector.shape_cast %329 : vector<1x8x32xf32> to vector<8x32xf32>
    %331 = vector.shape_cast %327 : vector<8x32xf32> to vector<1x8x32xf32>
    tpu.vector_store %arg5[%c0_106, %328, %c0_107], %331 {strides = array<i32>} : memref<1x128x32xf32, #tpu.memory_space<vmem>>, vector<1x8x32xf32>,
    %c8_i32_108 = arith.constant 8 : i32
    %332 = arith.muli %18, %c8_i32_108 : i32
    %333 = arith.addi %16, %332 : i32
    %c8_i32_109 = arith.constant 8 : i32
    %334 = arith.muli %333, %c8_i32_109 : i32
    %335 = tpu.assume_multiple %334, 8 : i32
    %336 = arith.index_cast %335 : i32 to index
    %c0_110 = arith.constant 0 : index
    %337 = vector.load %arg6[%336, %c0_110] : memref<128x128xf32, #tpu.memory_space<vmem>>, vector<8x128xf32>
    %c0_111 = arith.constant 0 : index
    %c0_112 = arith.constant 0 : index
    %c0_113 = arith.constant 0 : index
    %338 = vector.load %arg3[%c0_111, %c0_112, %c0_113] : memref<1x32x128xf32, #tpu.memory_space<vmem>>, vector<1x32x128xf32>
    %339 = vector.shape_cast %338 : vector<1x32x128xf32> to vector<32x128xf32>
    %cst_114 = arith.constant dense<0.000000e+00> : vector<8x128xf32>
    %340 = tpu.matmul %327, %339, %cst_114 {dimension_numbers = #tpu.dot_dimension_numbers<[1], [0], [0], [1], [0, 0, 1, 1], [], []>} : vector<8x32xf32>, vector<32x128xf32>, vector<8x128xf32> -> vector<8x128xf32>
    %341 = arith.addf %337, %340 : vector<8x128xf32>
    %342 = vector.extract_strided_slice %341 {offsets = [0, 0], sizes = [8, 32], strides = [1, 1]} : vector<8x128xf32> to vector<8x32xf32>
    %343 = arith.negf %342 : vector<8x32xf32>
    %344 = math.exp %343 : vector<8x32xf32>
    %cst_115 = arith.constant 1.000000e+00 : f32
    %345 = vector.broadcast %cst_115 : f32 to vector<8x32xf32>
    %346 = arith.addf %345, %344 : vector<8x32xf32>
    %347 = arith.divf %345, %346 : vector<8x32xf32>
    %348 = vector.extract_strided_slice %341 {offsets = [0, 32], sizes = [8, 32], strides = [1, 1]} : vector<8x128xf32> to vector<8x32xf32>
    %349 = arith.negf %348 : vector<8x32xf32>
    %350 = math.exp %349 : vector<8x32xf32>
    %cst_116 = arith.constant 1.000000e+00 : f32
    %351 = vector.broadcast %cst_116 : f32 to vector<8x32xf32>
    %352 = arith.addf %351, %350 : vector<8x32xf32>
    %353 = arith.divf %351, %352 : vector<8x32xf32>
    %354 = vector.extract_strided_slice %341 {offsets = [0, 64], sizes = [8, 32], strides = [1, 1]} : vector<8x128xf32> to vector<8x32xf32>
    %355 = math.tanh %354 : vector<8x32xf32>
    %356 = vector.extract_strided_slice %341 {offsets = [0, 96], sizes = [8, 32], strides = [1, 1]} : vector<8x128xf32> to vector<8x32xf32>
    %357 = arith.negf %356 : vector<8x32xf32>
    %358 = math.exp %357 : vector<8x32xf32>
    %cst_117 = arith.constant 1.000000e+00 : f32
    %359 = vector.broadcast %cst_117 : f32 to vector<8x32xf32>
    %360 = arith.addf %359, %358 : vector<8x32xf32>
    %361 = arith.divf %359, %360 : vector<8x32xf32>
    %362 = arith.mulf %353, %325 : vector<8x32xf32>
    %363 = arith.mulf %347, %355 : vector<8x32xf32>
    %364 = arith.addf %362, %363 : vector<8x32xf32>
    %365 = math.tanh %364 : vector<8x32xf32>
    %366 = arith.mulf %361, %365 : vector<8x32xf32>
    %c0_118 = arith.constant 0 : index
    %367 = arith.index_cast %335 : i32 to index
    %c0_119 = arith.constant 0 : index
    %368 = vector.load %arg5[%c0_118, %367, %c0_119] : memref<1x128x32xf32, #tpu.memory_space<vmem>>, vector<1x8x32xf32>
    %369 = vector.shape_cast %368 : vector<1x8x32xf32> to vector<8x32xf32>
    %370 = vector.shape_cast %366 : vector<8x32xf32> to vector<1x8x32xf32>
    tpu.vector_store %arg5[%c0_118, %367, %c0_119], %370 {strides = array<i32>} : memref<1x128x32xf32, #tpu.memory_space<vmem>>, vector<1x8x32xf32>,
    %c9_i32 = arith.constant 9 : i32
    %371 = arith.muli %18, %c9_i32 : i32
    %372 = arith.addi %16, %371 : i32
    %c8_i32_120 = arith.constant 8 : i32
    %373 = arith.muli %372, %c8_i32_120 : i32
    %374 = tpu.assume_multiple %373, 8 : i32
    %375 = arith.index_cast %374 : i32 to index
    %c0_121 = arith.constant 0 : index
    %376 = vector.load %arg6[%375, %c0_121] : memref<128x128xf32, #tpu.memory_space<vmem>>, vector<8x128xf32>
    %c0_122 = arith.constant 0 : index
    %c0_123 = arith.constant 0 : index
    %c0_124 = arith.constant 0 : index
    %377 = vector.load %arg3[%c0_122, %c0_123, %c0_124] : memref<1x32x128xf32, #tpu.memory_space<vmem>>, vector<1x32x128xf32>
    %378 = vector.shape_cast %377 : vector<1x32x128xf32> to vector<32x128xf32>
    %cst_125 = arith.constant dense<0.000000e+00> : vector<8x128xf32>
    %379 = tpu.matmul %366, %378, %cst_125 {dimension_numbers = #tpu.dot_dimension_numbers<[1], [0], [0], [1], [0, 0, 1, 1], [], []>} : vector<8x32xf32>, vector<32x128xf32>, vector<8x128xf32> -> vector<8x128xf32>
    %380 = arith.addf %376, %379 : vector<8x128xf32>
    %381 = vector.extract_strided_slice %380 {offsets = [0, 0], sizes = [8, 32], strides = [1, 1]} : vector<8x128xf32> to vector<8x32xf32>
    %382 = arith.negf %381 : vector<8x32xf32>
    %383 = math.exp %382 : vector<8x32xf32>
    %cst_126 = arith.constant 1.000000e+00 : f32
    %384 = vector.broadcast %cst_126 : f32 to vector<8x32xf32>
    %385 = arith.addf %384, %383 : vector<8x32xf32>
    %386 = arith.divf %384, %385 : vector<8x32xf32>
    %387 = vector.extract_strided_slice %380 {offsets = [0, 32], sizes = [8, 32], strides = [1, 1]} : vector<8x128xf32> to vector<8x32xf32>
    %388 = arith.negf %387 : vector<8x32xf32>
    %389 = math.exp %388 : vector<8x32xf32>
    %cst_127 = arith.constant 1.000000e+00 : f32
    %390 = vector.broadcast %cst_127 : f32 to vector<8x32xf32>
    %391 = arith.addf %390, %389 : vector<8x32xf32>
    %392 = arith.divf %390, %391 : vector<8x32xf32>
    %393 = vector.extract_strided_slice %380 {offsets = [0, 64], sizes = [8, 32], strides = [1, 1]} : vector<8x128xf32> to vector<8x32xf32>
    %394 = math.tanh %393 : vector<8x32xf32>
    %395 = vector.extract_strided_slice %380 {offsets = [0, 96], sizes = [8, 32], strides = [1, 1]} : vector<8x128xf32> to vector<8x32xf32>
    %396 = arith.negf %395 : vector<8x32xf32>
    %397 = math.exp %396 : vector<8x32xf32>
    %cst_128 = arith.constant 1.000000e+00 : f32
    %398 = vector.broadcast %cst_128 : f32 to vector<8x32xf32>
    %399 = arith.addf %398, %397 : vector<8x32xf32>
    %400 = arith.divf %398, %399 : vector<8x32xf32>
    %401 = arith.mulf %392, %364 : vector<8x32xf32>
    %402 = arith.mulf %386, %394 : vector<8x32xf32>
    %403 = arith.addf %401, %402 : vector<8x32xf32>
    %404 = math.tanh %403 : vector<8x32xf32>
    %405 = arith.mulf %400, %404 : vector<8x32xf32>
    %c0_129 = arith.constant 0 : index
    %406 = arith.index_cast %374 : i32 to index
    %c0_130 = arith.constant 0 : index
    %407 = vector.load %arg5[%c0_129, %406, %c0_130] : memref<1x128x32xf32, #tpu.memory_space<vmem>>, vector<1x8x32xf32>
    %408 = vector.shape_cast %407 : vector<1x8x32xf32> to vector<8x32xf32>
    %409 = vector.shape_cast %405 : vector<8x32xf32> to vector<1x8x32xf32>
    tpu.vector_store %arg5[%c0_129, %406, %c0_130], %409 {strides = array<i32>} : memref<1x128x32xf32, #tpu.memory_space<vmem>>, vector<1x8x32xf32>,
    %c10_i32 = arith.constant 10 : i32
    %410 = arith.muli %18, %c10_i32 : i32
    %411 = arith.addi %16, %410 : i32
    %c8_i32_131 = arith.constant 8 : i32
    %412 = arith.muli %411, %c8_i32_131 : i32
    %413 = tpu.assume_multiple %412, 8 : i32
    %414 = arith.index_cast %413 : i32 to index
    %c0_132 = arith.constant 0 : index
    %415 = vector.load %arg6[%414, %c0_132] : memref<128x128xf32, #tpu.memory_space<vmem>>, vector<8x128xf32>
    %c0_133 = arith.constant 0 : index
    %c0_134 = arith.constant 0 : index
    %c0_135 = arith.constant 0 : index
    %416 = vector.load %arg3[%c0_133, %c0_134, %c0_135] : memref<1x32x128xf32, #tpu.memory_space<vmem>>, vector<1x32x128xf32>
    %417 = vector.shape_cast %416 : vector<1x32x128xf32> to vector<32x128xf32>
    %cst_136 = arith.constant dense<0.000000e+00> : vector<8x128xf32>
    %418 = tpu.matmul %405, %417, %cst_136 {dimension_numbers = #tpu.dot_dimension_numbers<[1], [0], [0], [1], [0, 0, 1, 1], [], []>} : vector<8x32xf32>, vector<32x128xf32>, vector<8x128xf32> -> vector<8x128xf32>
    %419 = arith.addf %415, %418 : vector<8x128xf32>
    %420 = vector.extract_strided_slice %419 {offsets = [0, 0], sizes = [8, 32], strides = [1, 1]} : vector<8x128xf32> to vector<8x32xf32>
    %421 = arith.negf %420 : vector<8x32xf32>
    %422 = math.exp %421 : vector<8x32xf32>
    %cst_137 = arith.constant 1.000000e+00 : f32
    %423 = vector.broadcast %cst_137 : f32 to vector<8x32xf32>
    %424 = arith.addf %423, %422 : vector<8x32xf32>
    %425 = arith.divf %423, %424 : vector<8x32xf32>
    %426 = vector.extract_strided_slice %419 {offsets = [0, 32], sizes = [8, 32], strides = [1, 1]} : vector<8x128xf32> to vector<8x32xf32>
    %427 = arith.negf %426 : vector<8x32xf32>
    %428 = math.exp %427 : vector<8x32xf32>
    %cst_138 = arith.constant 1.000000e+00 : f32
    %429 = vector.broadcast %cst_138 : f32 to vector<8x32xf32>
    %430 = arith.addf %429, %428 : vector<8x32xf32>
    %431 = arith.divf %429, %430 : vector<8x32xf32>
    %432 = vector.extract_strided_slice %419 {offsets = [0, 64], sizes = [8, 32], strides = [1, 1]} : vector<8x128xf32> to vector<8x32xf32>
    %433 = math.tanh %432 : vector<8x32xf32>
    %434 = vector.extract_strided_slice %419 {offsets = [0, 96], sizes = [8, 32], strides = [1, 1]} : vector<8x128xf32> to vector<8x32xf32>
    %435 = arith.negf %434 : vector<8x32xf32>
    %436 = math.exp %435 : vector<8x32xf32>
    %cst_139 = arith.constant 1.000000e+00 : f32
    %437 = vector.broadcast %cst_139 : f32 to vector<8x32xf32>
    %438 = arith.addf %437, %436 : vector<8x32xf32>
    %439 = arith.divf %437, %438 : vector<8x32xf32>
    %440 = arith.mulf %431, %403 : vector<8x32xf32>
    %441 = arith.mulf %425, %433 : vector<8x32xf32>
    %442 = arith.addf %440, %441 : vector<8x32xf32>
    %443 = math.tanh %442 : vector<8x32xf32>
    %444 = arith.mulf %439, %443 : vector<8x32xf32>
    %c0_140 = arith.constant 0 : index
    %445 = arith.index_cast %413 : i32 to index
    %c0_141 = arith.constant 0 : index
    %446 = vector.load %arg5[%c0_140, %445, %c0_141] : memref<1x128x32xf32, #tpu.memory_space<vmem>>, vector<1x8x32xf32>
    %447 = vector.shape_cast %446 : vector<1x8x32xf32> to vector<8x32xf32>
    %448 = vector.shape_cast %444 : vector<8x32xf32> to vector<1x8x32xf32>
    tpu.vector_store %arg5[%c0_140, %445, %c0_141], %448 {strides = array<i32>} : memref<1x128x32xf32, #tpu.memory_space<vmem>>, vector<1x8x32xf32>,
    %c11_i32 = arith.constant 11 : i32
    %449 = arith.muli %18, %c11_i32 : i32
    %450 = arith.addi %16, %449 : i32
    %c8_i32_142 = arith.constant 8 : i32
    %451 = arith.muli %450, %c8_i32_142 : i32
    %452 = tpu.assume_multiple %451, 8 : i32
    %453 = arith.index_cast %452 : i32 to index
    %c0_143 = arith.constant 0 : index
    %454 = vector.load %arg6[%453, %c0_143] : memref<128x128xf32, #tpu.memory_space<vmem>>, vector<8x128xf32>
    %c0_144 = arith.constant 0 : index
    %c0_145 = arith.constant 0 : index
    %c0_146 = arith.constant 0 : index
    %455 = vector.load %arg3[%c0_144, %c0_145, %c0_146] : memref<1x32x128xf32, #tpu.memory_space<vmem>>, vector<1x32x128xf32>
    %456 = vector.shape_cast %455 : vector<1x32x128xf32> to vector<32x128xf32>
    %cst_147 = arith.constant dense<0.000000e+00> : vector<8x128xf32>
    %457 = tpu.matmul %444, %456, %cst_147 {dimension_numbers = #tpu.dot_dimension_numbers<[1], [0], [0], [1], [0, 0, 1, 1], [], []>} : vector<8x32xf32>, vector<32x128xf32>, vector<8x128xf32> -> vector<8x128xf32>
    %458 = arith.addf %454, %457 : vector<8x128xf32>
    %459 = vector.extract_strided_slice %458 {offsets = [0, 0], sizes = [8, 32], strides = [1, 1]} : vector<8x128xf32> to vector<8x32xf32>
    %460 = arith.negf %459 : vector<8x32xf32>
    %461 = math.exp %460 : vector<8x32xf32>
    %cst_148 = arith.constant 1.000000e+00 : f32
    %462 = vector.broadcast %cst_148 : f32 to vector<8x32xf32>
    %463 = arith.addf %462, %461 : vector<8x32xf32>
    %464 = arith.divf %462, %463 : vector<8x32xf32>
    %465 = vector.extract_strided_slice %458 {offsets = [0, 32], sizes = [8, 32], strides = [1, 1]} : vector<8x128xf32> to vector<8x32xf32>
    %466 = arith.negf %465 : vector<8x32xf32>
    %467 = math.exp %466 : vector<8x32xf32>
    %cst_149 = arith.constant 1.000000e+00 : f32
    %468 = vector.broadcast %cst_149 : f32 to vector<8x32xf32>
    %469 = arith.addf %468, %467 : vector<8x32xf32>
    %470 = arith.divf %468, %469 : vector<8x32xf32>
    %471 = vector.extract_strided_slice %458 {offsets = [0, 64], sizes = [8, 32], strides = [1, 1]} : vector<8x128xf32> to vector<8x32xf32>
    %472 = math.tanh %471 : vector<8x32xf32>
    %473 = vector.extract_strided_slice %458 {offsets = [0, 96], sizes = [8, 32], strides = [1, 1]} : vector<8x128xf32> to vector<8x32xf32>
    %474 = arith.negf %473 : vector<8x32xf32>
    %475 = math.exp %474 : vector<8x32xf32>
    %cst_150 = arith.constant 1.000000e+00 : f32
    %476 = vector.broadcast %cst_150 : f32 to vector<8x32xf32>
    %477 = arith.addf %476, %475 : vector<8x32xf32>
    %478 = arith.divf %476, %477 : vector<8x32xf32>
    %479 = arith.mulf %470, %442 : vector<8x32xf32>
    %480 = arith.mulf %464, %472 : vector<8x32xf32>
    %481 = arith.addf %479, %480 : vector<8x32xf32>
    %482 = math.tanh %481 : vector<8x32xf32>
    %483 = arith.mulf %478, %482 : vector<8x32xf32>
    %c0_151 = arith.constant 0 : index
    %484 = arith.index_cast %452 : i32 to index
    %c0_152 = arith.constant 0 : index
    %485 = vector.load %arg5[%c0_151, %484, %c0_152] : memref<1x128x32xf32, #tpu.memory_space<vmem>>, vector<1x8x32xf32>
    %486 = vector.shape_cast %485 : vector<1x8x32xf32> to vector<8x32xf32>
    %487 = vector.shape_cast %483 : vector<8x32xf32> to vector<1x8x32xf32>
    tpu.vector_store %arg5[%c0_151, %484, %c0_152], %487 {strides = array<i32>} : memref<1x128x32xf32, #tpu.memory_space<vmem>>, vector<1x8x32xf32>,
    %c12_i32 = arith.constant 12 : i32
    %488 = arith.muli %18, %c12_i32 : i32
    %489 = arith.addi %16, %488 : i32
    %c8_i32_153 = arith.constant 8 : i32
    %490 = arith.muli %489, %c8_i32_153 : i32
    %491 = tpu.assume_multiple %490, 8 : i32
    %492 = arith.index_cast %491 : i32 to index
    %c0_154 = arith.constant 0 : index
    %493 = vector.load %arg6[%492, %c0_154] : memref<128x128xf32, #tpu.memory_space<vmem>>, vector<8x128xf32>
    %c0_155 = arith.constant 0 : index
    %c0_156 = arith.constant 0 : index
    %c0_157 = arith.constant 0 : index
    %494 = vector.load %arg3[%c0_155, %c0_156, %c0_157] : memref<1x32x128xf32, #tpu.memory_space<vmem>>, vector<1x32x128xf32>
    %495 = vector.shape_cast %494 : vector<1x32x128xf32> to vector<32x128xf32>
    %cst_158 = arith.constant dense<0.000000e+00> : vector<8x128xf32>
    %496 = tpu.matmul %483, %495, %cst_158 {dimension_numbers = #tpu.dot_dimension_numbers<[1], [0], [0], [1], [0, 0, 1, 1], [], []>} : vector<8x32xf32>, vector<32x128xf32>, vector<8x128xf32> -> vector<8x128xf32>
    %497 = arith.addf %493, %496 : vector<8x128xf32>
    %498 = vector.extract_strided_slice %497 {offsets = [0, 0], sizes = [8, 32], strides = [1, 1]} : vector<8x128xf32> to vector<8x32xf32>
    %499 = arith.negf %498 : vector<8x32xf32>
    %500 = math.exp %499 : vector<8x32xf32>
    %cst_159 = arith.constant 1.000000e+00 : f32
    %501 = vector.broadcast %cst_159 : f32 to vector<8x32xf32>
    %502 = arith.addf %501, %500 : vector<8x32xf32>
    %503 = arith.divf %501, %502 : vector<8x32xf32>
    %504 = vector.extract_strided_slice %497 {offsets = [0, 32], sizes = [8, 32], strides = [1, 1]} : vector<8x128xf32> to vector<8x32xf32>
    %505 = arith.negf %504 : vector<8x32xf32>
    %506 = math.exp %505 : vector<8x32xf32>
    %cst_160 = arith.constant 1.000000e+00 : f32
    %507 = vector.broadcast %cst_160 : f32 to vector<8x32xf32>
    %508 = arith.addf %507, %506 : vector<8x32xf32>
    %509 = arith.divf %507, %508 : vector<8x32xf32>
    %510 = vector.extract_strided_slice %497 {offsets = [0, 64], sizes = [8, 32], strides = [1, 1]} : vector<8x128xf32> to vector<8x32xf32>
    %511 = math.tanh %510 : vector<8x32xf32>
    %512 = vector.extract_strided_slice %497 {offsets = [0, 96], sizes = [8, 32], strides = [1, 1]} : vector<8x128xf32> to vector<8x32xf32>
    %513 = arith.negf %512 : vector<8x32xf32>
    %514 = math.exp %513 : vector<8x32xf32>
    %cst_161 = arith.constant 1.000000e+00 : f32
    %515 = vector.broadcast %cst_161 : f32 to vector<8x32xf32>
    %516 = arith.addf %515, %514 : vector<8x32xf32>
    %517 = arith.divf %515, %516 : vector<8x32xf32>
    %518 = arith.mulf %509, %481 : vector<8x32xf32>
    %519 = arith.mulf %503, %511 : vector<8x32xf32>
    %520 = arith.addf %518, %519 : vector<8x32xf32>
    %521 = math.tanh %520 : vector<8x32xf32>
    %522 = arith.mulf %517, %521 : vector<8x32xf32>
    %c0_162 = arith.constant 0 : index
    %523 = arith.index_cast %491 : i32 to index
    %c0_163 = arith.constant 0 : index
    %524 = vector.load %arg5[%c0_162, %523, %c0_163] : memref<1x128x32xf32, #tpu.memory_space<vmem>>, vector<1x8x32xf32>
    %525 = vector.shape_cast %524 : vector<1x8x32xf32> to vector<8x32xf32>
    %526 = vector.shape_cast %522 : vector<8x32xf32> to vector<1x8x32xf32>
    tpu.vector_store %arg5[%c0_162, %523, %c0_163], %526 {strides = array<i32>} : memref<1x128x32xf32, #tpu.memory_space<vmem>>, vector<1x8x32xf32>,
    %c13_i32 = arith.constant 13 : i32
    %527 = arith.muli %18, %c13_i32 : i32
    %528 = arith.addi %16, %527 : i32
    %c8_i32_164 = arith.constant 8 : i32
    %529 = arith.muli %528, %c8_i32_164 : i32
    %530 = tpu.assume_multiple %529, 8 : i32
    %531 = arith.index_cast %530 : i32 to index
    %c0_165 = arith.constant 0 : index
    %532 = vector.load %arg6[%531, %c0_165] : memref<128x128xf32, #tpu.memory_space<vmem>>, vector<8x128xf32>
    %c0_166 = arith.constant 0 : index
    %c0_167 = arith.constant 0 : index
    %c0_168 = arith.constant 0 : index
    %533 = vector.load %arg3[%c0_166, %c0_167, %c0_168] : memref<1x32x128xf32, #tpu.memory_space<vmem>>, vector<1x32x128xf32>
    %534 = vector.shape_cast %533 : vector<1x32x128xf32> to vector<32x128xf32>
    %cst_169 = arith.constant dense<0.000000e+00> : vector<8x128xf32>
    %535 = tpu.matmul %522, %534, %cst_169 {dimension_numbers = #tpu.dot_dimension_numbers<[1], [0], [0], [1], [0, 0, 1, 1], [], []>} : vector<8x32xf32>, vector<32x128xf32>, vector<8x128xf32> -> vector<8x128xf32>
    %536 = arith.addf %532, %535 : vector<8x128xf32>
    %537 = vector.extract_strided_slice %536 {offsets = [0, 0], sizes = [8, 32], strides = [1, 1]} : vector<8x128xf32> to vector<8x32xf32>
    %538 = arith.negf %537 : vector<8x32xf32>
    %539 = math.exp %538 : vector<8x32xf32>
    %cst_170 = arith.constant 1.000000e+00 : f32
    %540 = vector.broadcast %cst_170 : f32 to vector<8x32xf32>
    %541 = arith.addf %540, %539 : vector<8x32xf32>
    %542 = arith.divf %540, %541 : vector<8x32xf32>
    %543 = vector.extract_strided_slice %536 {offsets = [0, 32], sizes = [8, 32], strides = [1, 1]} : vector<8x128xf32> to vector<8x32xf32>
    %544 = arith.negf %543 : vector<8x32xf32>
    %545 = math.exp %544 : vector<8x32xf32>
    %cst_171 = arith.constant 1.000000e+00 : f32
    %546 = vector.broadcast %cst_171 : f32 to vector<8x32xf32>
    %547 = arith.addf %546, %545 : vector<8x32xf32>
    %548 = arith.divf %546, %547 : vector<8x32xf32>
    %549 = vector.extract_strided_slice %536 {offsets = [0, 64], sizes = [8, 32], strides = [1, 1]} : vector<8x128xf32> to vector<8x32xf32>
    %550 = math.tanh %549 : vector<8x32xf32>
    %551 = vector.extract_strided_slice %536 {offsets = [0, 96], sizes = [8, 32], strides = [1, 1]} : vector<8x128xf32> to vector<8x32xf32>
    %552 = arith.negf %551 : vector<8x32xf32>
    %553 = math.exp %552 : vector<8x32xf32>
    %cst_172 = arith.constant 1.000000e+00 : f32
    %554 = vector.broadcast %cst_172 : f32 to vector<8x32xf32>
    %555 = arith.addf %554, %553 : vector<8x32xf32>
    %556 = arith.divf %554, %555 : vector<8x32xf32>
    %557 = arith.mulf %548, %520 : vector<8x32xf32>
    %558 = arith.mulf %542, %550 : vector<8x32xf32>
    %559 = arith.addf %557, %558 : vector<8x32xf32>
    %560 = math.tanh %559 : vector<8x32xf32>
    %561 = arith.mulf %556, %560 : vector<8x32xf32>
    %c0_173 = arith.constant 0 : index
    %562 = arith.index_cast %530 : i32 to index
    %c0_174 = arith.constant 0 : index
    %563 = vector.load %arg5[%c0_173, %562, %c0_174] : memref<1x128x32xf32, #tpu.memory_space<vmem>>, vector<1x8x32xf32>
    %564 = vector.shape_cast %563 : vector<1x8x32xf32> to vector<8x32xf32>
    %565 = vector.shape_cast %561 : vector<8x32xf32> to vector<1x8x32xf32>
    tpu.vector_store %arg5[%c0_173, %562, %c0_174], %565 {strides = array<i32>} : memref<1x128x32xf32, #tpu.memory_space<vmem>>, vector<1x8x32xf32>,
    %c14_i32 = arith.constant 14 : i32
    %566 = arith.muli %18, %c14_i32 : i32
    %567 = arith.addi %16, %566 : i32
    %c8_i32_175 = arith.constant 8 : i32
    %568 = arith.muli %567, %c8_i32_175 : i32
    %569 = tpu.assume_multiple %568, 8 : i32
    %570 = arith.index_cast %569 : i32 to index
    %c0_176 = arith.constant 0 : index
    %571 = vector.load %arg6[%570, %c0_176] : memref<128x128xf32, #tpu.memory_space<vmem>>, vector<8x128xf32>
    %c0_177 = arith.constant 0 : index
    %c0_178 = arith.constant 0 : index
    %c0_179 = arith.constant 0 : index
    %572 = vector.load %arg3[%c0_177, %c0_178, %c0_179] : memref<1x32x128xf32, #tpu.memory_space<vmem>>, vector<1x32x128xf32>
    %573 = vector.shape_cast %572 : vector<1x32x128xf32> to vector<32x128xf32>
    %cst_180 = arith.constant dense<0.000000e+00> : vector<8x128xf32>
    %574 = tpu.matmul %561, %573, %cst_180 {dimension_numbers = #tpu.dot_dimension_numbers<[1], [0], [0], [1], [0, 0, 1, 1], [], []>} : vector<8x32xf32>, vector<32x128xf32>, vector<8x128xf32> -> vector<8x128xf32>
    %575 = arith.addf %571, %574 : vector<8x128xf32>
    %576 = vector.extract_strided_slice %575 {offsets = [0, 0], sizes = [8, 32], strides = [1, 1]} : vector<8x128xf32> to vector<8x32xf32>
    %577 = arith.negf %576 : vector<8x32xf32>
    %578 = math.exp %577 : vector<8x32xf32>
    %cst_181 = arith.constant 1.000000e+00 : f32
    %579 = vector.broadcast %cst_181 : f32 to vector<8x32xf32>
    %580 = arith.addf %579, %578 : vector<8x32xf32>
    %581 = arith.divf %579, %580 : vector<8x32xf32>
    %582 = vector.extract_strided_slice %575 {offsets = [0, 32], sizes = [8, 32], strides = [1, 1]} : vector<8x128xf32> to vector<8x32xf32>
    %583 = arith.negf %582 : vector<8x32xf32>
    %584 = math.exp %583 : vector<8x32xf32>
    %cst_182 = arith.constant 1.000000e+00 : f32
    %585 = vector.broadcast %cst_182 : f32 to vector<8x32xf32>
    %586 = arith.addf %585, %584 : vector<8x32xf32>
    %587 = arith.divf %585, %586 : vector<8x32xf32>
    %588 = vector.extract_strided_slice %575 {offsets = [0, 64], sizes = [8, 32], strides = [1, 1]} : vector<8x128xf32> to vector<8x32xf32>
    %589 = math.tanh %588 : vector<8x32xf32>
    %590 = vector.extract_strided_slice %575 {offsets = [0, 96], sizes = [8, 32], strides = [1, 1]} : vector<8x128xf32> to vector<8x32xf32>
    %591 = arith.negf %590 : vector<8x32xf32>
    %592 = math.exp %591 : vector<8x32xf32>
    %cst_183 = arith.constant 1.000000e+00 : f32
    %593 = vector.broadcast %cst_183 : f32 to vector<8x32xf32>
    %594 = arith.addf %593, %592 : vector<8x32xf32>
    %595 = arith.divf %593, %594 : vector<8x32xf32>
    %596 = arith.mulf %587, %559 : vector<8x32xf32>
    %597 = arith.mulf %581, %589 : vector<8x32xf32>
    %598 = arith.addf %596, %597 : vector<8x32xf32>
    %599 = math.tanh %598 : vector<8x32xf32>
    %600 = arith.mulf %595, %599 : vector<8x32xf32>
    %c0_184 = arith.constant 0 : index
    %601 = arith.index_cast %569 : i32 to index
    %c0_185 = arith.constant 0 : index
    %602 = vector.load %arg5[%c0_184, %601, %c0_185] : memref<1x128x32xf32, #tpu.memory_space<vmem>>, vector<1x8x32xf32>
    %603 = vector.shape_cast %602 : vector<1x8x32xf32> to vector<8x32xf32>
    %604 = vector.shape_cast %600 : vector<8x32xf32> to vector<1x8x32xf32>
    tpu.vector_store %arg5[%c0_184, %601, %c0_185], %604 {strides = array<i32>} : memref<1x128x32xf32, #tpu.memory_space<vmem>>, vector<1x8x32xf32>,
    %c15_i32_186 = arith.constant 15 : i32
    %605 = arith.muli %18, %c15_i32_186 : i32
    %606 = arith.addi %16, %605 : i32
    %c8_i32_187 = arith.constant 8 : i32
    %607 = arith.muli %606, %c8_i32_187 : i32
    %608 = tpu.assume_multiple %607, 8 : i32
    %609 = arith.index_cast %608 : i32 to index
    %c0_188 = arith.constant 0 : index
    %610 = vector.load %arg6[%609, %c0_188] : memref<128x128xf32, #tpu.memory_space<vmem>>, vector<8x128xf32>
    %c0_189 = arith.constant 0 : index
    %c0_190 = arith.constant 0 : index
    %c0_191 = arith.constant 0 : index
    %611 = vector.load %arg3[%c0_189, %c0_190, %c0_191] : memref<1x32x128xf32, #tpu.memory_space<vmem>>, vector<1x32x128xf32>
    %612 = vector.shape_cast %611 : vector<1x32x128xf32> to vector<32x128xf32>
    %cst_192 = arith.constant dense<0.000000e+00> : vector<8x128xf32>
    %613 = tpu.matmul %600, %612, %cst_192 {dimension_numbers = #tpu.dot_dimension_numbers<[1], [0], [0], [1], [0, 0, 1, 1], [], []>} : vector<8x32xf32>, vector<32x128xf32>, vector<8x128xf32> -> vector<8x128xf32>
    %614 = arith.addf %610, %613 : vector<8x128xf32>
    %615 = vector.extract_strided_slice %614 {offsets = [0, 0], sizes = [8, 32], strides = [1, 1]} : vector<8x128xf32> to vector<8x32xf32>
    %616 = arith.negf %615 : vector<8x32xf32>
    %617 = math.exp %616 : vector<8x32xf32>
    %cst_193 = arith.constant 1.000000e+00 : f32
    %618 = vector.broadcast %cst_193 : f32 to vector<8x32xf32>
    %619 = arith.addf %618, %617 : vector<8x32xf32>
    %620 = arith.divf %618, %619 : vector<8x32xf32>
    %621 = vector.extract_strided_slice %614 {offsets = [0, 32], sizes = [8, 32], strides = [1, 1]} : vector<8x128xf32> to vector<8x32xf32>
    %622 = arith.negf %621 : vector<8x32xf32>
    %623 = math.exp %622 : vector<8x32xf32>
    %cst_194 = arith.constant 1.000000e+00 : f32
    %624 = vector.broadcast %cst_194 : f32 to vector<8x32xf32>
    %625 = arith.addf %624, %623 : vector<8x32xf32>
    %626 = arith.divf %624, %625 : vector<8x32xf32>
    %627 = vector.extract_strided_slice %614 {offsets = [0, 64], sizes = [8, 32], strides = [1, 1]} : vector<8x128xf32> to vector<8x32xf32>
    %628 = math.tanh %627 : vector<8x32xf32>
    %629 = vector.extract_strided_slice %614 {offsets = [0, 96], sizes = [8, 32], strides = [1, 1]} : vector<8x128xf32> to vector<8x32xf32>
    %630 = arith.negf %629 : vector<8x32xf32>
    %631 = math.exp %630 : vector<8x32xf32>
    %cst_195 = arith.constant 1.000000e+00 : f32
    %632 = vector.broadcast %cst_195 : f32 to vector<8x32xf32>
    %633 = arith.addf %632, %631 : vector<8x32xf32>
    %634 = arith.divf %632, %633 : vector<8x32xf32>
    %635 = arith.mulf %626, %598 : vector<8x32xf32>
    %636 = arith.mulf %620, %628 : vector<8x32xf32>
    %637 = arith.addf %635, %636 : vector<8x32xf32>
    %638 = math.tanh %637 : vector<8x32xf32>
    %639 = arith.mulf %634, %638 : vector<8x32xf32>
    %c0_196 = arith.constant 0 : index
    %640 = arith.index_cast %608 : i32 to index
    %c0_197 = arith.constant 0 : index
    %641 = vector.load %arg5[%c0_196, %640, %c0_197] : memref<1x128x32xf32, #tpu.memory_space<vmem>>, vector<1x8x32xf32>
    %642 = vector.shape_cast %641 : vector<1x8x32xf32> to vector<8x32xf32>
    %643 = vector.shape_cast %639 : vector<8x32xf32> to vector<1x8x32xf32>
    tpu.vector_store %arg5[%c0_196, %640, %c0_197], %643 {strides = array<i32>} : memref<1x128x32xf32, #tpu.memory_space<vmem>>, vector<1x8x32xf32>,
    %c16_i32 = arith.constant 16 : i32
    return
  }
  func.func @transform_0(%arg0: i32) -> (i32, i32, i32) {
    %c0_i32 = arith.constant 0 : i32
    %c0_i32_0 = arith.constant 0 : i32
    %c0_i32_1 = arith.constant 0 : i32
    %c0_i32_2 = arith.constant 0 : i32
    return %c0_i32, %c0_i32_0, %c0_i32_1 : i32, i32, i32
  }
  func.func @transform_1(%arg0: i32) -> (i32, i32, i32, i32) {
    %c0_i32 = arith.constant 0 : i32
    %c0_i32_0 = arith.constant 0 : i32
    %c0_i32_1 = arith.constant 0 : i32
    %c0_i32_2 = arith.constant 0 : i32
    return %arg0, %c0_i32, %c0_i32_0, %c0_i32_1 : i32, i32, i32, i32
  }
  func.func @transform_2(%arg0: i32) -> (i32, i32, i32) {
    %c0_i32 = arith.constant 0 : i32
    %c0_i32_0 = arith.constant 0 : i32
    %c0_i32_1 = arith.constant 0 : i32
    return %arg0, %c0_i32, %c0_i32_0 : i32, i32, i32
  }
  func.func @transform_3(%arg0: i32) -> (i32, i32, i32) {
    %c0_i32 = arith.constant 0 : i32
    %c0_i32_0 = arith.constant 0 : i32
    %c0_i32_1 = arith.constant 0 : i32
    return %arg0, %c0_i32, %c0_i32_0 : i32, i32, i32
  }
  func.func @transform_4(%arg0: i32) -> (i32, i32, i32) {
    %c0_i32 = arith.constant 0 : i32
    %c0_i32_0 = arith.constant 0 : i32
    %c0_i32_1 = arith.constant 0 : i32
    return %arg0, %c0_i32, %c0_i32_0 : i32, i32, i32
  }
}

module attributes {stable_mosaic.version = 11 : i64} {
  func.func @decoder_loss_kernel(%arg0: memref<2x128x32xf32, #tpu.memory_space<vmem>>, %arg1: memref<2x32x4xf32, #tpu.memory_space<vmem>>, %arg2: memref<4x1xf32, #tpu.memory_space<vmem>>, %arg3: memref<4x128xf32, #tpu.memory_space<vmem>>, %arg4: memref<4x128xf32, #tpu.memory_space<vmem>>, %arg5: memref<4x128xf32, #tpu.memory_space<vmem>>, %arg6: memref<1x1xf32, #tpu.memory_space<vmem>>) attributes {dimension_semantics = [], scalar_prefetch = 0 : i64, scratch_operands = 0 : i64, tpu.core_type = #tpu.core_type<tc>} {
    %c0 = arith.constant 0 : index
    %c0_0 = arith.constant 0 : index
    %c0_1 = arith.constant 0 : index
    %0 = vector.load %arg1[%c0, %c0_0, %c0_1] : memref<2x32x4xf32, #tpu.memory_space<vmem>>, vector<1x32x4xf32>
    %1 = vector.shape_cast %0 : vector<1x32x4xf32> to vector<32x4xf32>
    %c0_2 = arith.constant 0 : index
    %c0_3 = arith.constant 0 : index
    %c0_4 = arith.constant 0 : index
    %2 = vector.load %arg0[%c0_2, %c0_3, %c0_4] : memref<2x128x32xf32, #tpu.memory_space<vmem>>, vector<1x128x32xf32>
    %3 = vector.shape_cast %2 : vector<1x128x32xf32> to vector<128x32xf32>
    %cst = arith.constant dense<0.000000e+00> : vector<4x128xf32>
    %4 = tpu.matmul %1, %3, %cst {dimension_numbers = #tpu.dot_dimension_numbers<[0], [1], [1], [0], [0, 1, 1, 0], [], []>} : vector<32x4xf32>, vector<128x32xf32>, vector<4x128xf32> -> vector<4x128xf32>
    %c1 = arith.constant 1 : index
    %c0_5 = arith.constant 0 : index
    %c0_6 = arith.constant 0 : index
    %5 = vector.load %arg1[%c1, %c0_5, %c0_6] : memref<2x32x4xf32, #tpu.memory_space<vmem>>, vector<1x32x4xf32>
    %6 = vector.shape_cast %5 : vector<1x32x4xf32> to vector<32x4xf32>
    %c1_7 = arith.constant 1 : index
    %c0_8 = arith.constant 0 : index
    %c0_9 = arith.constant 0 : index
    %7 = vector.load %arg0[%c1_7, %c0_8, %c0_9] : memref<2x128x32xf32, #tpu.memory_space<vmem>>, vector<1x128x32xf32>
    %8 = vector.shape_cast %7 : vector<1x128x32xf32> to vector<128x32xf32>
    %cst_10 = arith.constant dense<0.000000e+00> : vector<4x128xf32>
    %9 = tpu.matmul %6, %8, %cst_10 {dimension_numbers = #tpu.dot_dimension_numbers<[0], [1], [1], [0], [0, 1, 1, 0], [], []>} : vector<32x4xf32>, vector<128x32xf32>, vector<4x128xf32> -> vector<4x128xf32>
    %10 = arith.addf %4, %9 : vector<4x128xf32>
    %c0_11 = arith.constant 0 : index
    %c0_12 = arith.constant 0 : index
    %11 = vector.load %arg2[%c0_11, %c0_12] : memref<4x1xf32, #tpu.memory_space<vmem>>, vector<4x1xf32>
    %12 = vector.broadcast %11 : vector<4x1xf32> to vector<4x128xf32>
    %13 = arith.addf %10, %12 : vector<4x128xf32>
    %c0_13 = arith.constant 0 : index
    %c0_14 = arith.constant 0 : index
    %14 = vector.load %arg3[%c0_13, %c0_14] : memref<4x128xf32, #tpu.memory_space<vmem>>, vector<4x128xf32>
    %c0_15 = arith.constant 0 : index
    %c0_16 = arith.constant 0 : index
    %15 = vector.load %arg4[%c0_15, %c0_16] : memref<4x128xf32, #tpu.memory_space<vmem>>, vector<4x128xf32>
    %16 = arith.subf %13, %14 : vector<4x128xf32>
    %17 = arith.mulf %15, %16 : vector<4x128xf32>
    %18 = arith.mulf %17, %16 : vector<4x128xf32>
    %19 = vector.shape_cast %18 : vector<4x128xf32> to vector<1x4x128xf32>
    %cst_17 = arith.constant dense<0.000000e+00> : vector<1xf32>
    %20 = vector.multi_reduction <add>, %19, %cst_17 [1, 2] : vector<1x4x128xf32> to vector<1xf32>
    %21 = vector.shape_cast %20 : vector<1xf32> to vector<1x1x1xf32>
    %22 = vector.extract %21[0, 0, 0] : f32 from vector<1x1x1xf32>
    %23 = vector.shape_cast %15 : vector<4x128xf32> to vector<1x4x128xf32>
    %cst_18 = arith.constant dense<0.000000e+00> : vector<1xf32>
    %24 = vector.multi_reduction <add>, %23, %cst_18 [1, 2] : vector<1x4x128xf32> to vector<1xf32>
    %25 = vector.shape_cast %24 : vector<1xf32> to vector<1x1x1xf32>
    %26 = vector.extract %25[0, 0, 0] : f32 from vector<1x1x1xf32>
    %cst_19 = arith.constant 9.99999993E-9 : f32
    %27 = arith.addf %26, %cst_19 : f32
    %28 = arith.divf %22, %27 : f32
    %29 = vector.broadcast %28 : f32 to vector<1x1xf32>
    %c0_20 = arith.constant 0 : index
    %c0_21 = arith.constant 0 : index
    %30 = vector.load %arg6[%c0_20, %c0_21] : memref<1x1xf32, #tpu.memory_space<vmem>>, vector<1x1xf32>
    tpu.vector_store %arg6[%c0_20, %c0_21], %29 {strides = array<i32>} : memref<1x1xf32, #tpu.memory_space<vmem>>, vector<1x1xf32>,
    %cst_22 = arith.constant 0.000000e+00 : f32
    %31 = vector.broadcast %cst_22 : f32 to vector<4x128xf32>
    %32 = arith.cmpf one, %15, %31 : vector<4x128xf32>
    %33 = arith.select %32, %14, %13 : vector<4x128xi1>, vector<4x128xf32>
    %c0_23 = arith.constant 0 : index
    %c0_24 = arith.constant 0 : index
    %34 = vector.load %arg5[%c0_23, %c0_24] : memref<4x128xf32, #tpu.memory_space<vmem>>, vector<4x128xf32>
    tpu.vector_store %arg5[%c0_23, %c0_24], %33 {strides = array<i32>} : memref<4x128xf32, #tpu.memory_space<vmem>>, vector<4x128xf32>,
    return
  }
}

</mosaic_0001>

<bundles_post_ra>
// kernel: stgi_forward.4
= control target key start
LH: loop header
LB: loop body
LE: loop exit
PB: predicated region body
PF: predicated region fallthrough
CT: control target
= control target key end

     0   :  { %11 = vsyncpa [#allocation3], 0  ;;  %s595_s24 = smov [#allocation2]   ;;  %s596_s26 = smov 128   ;;  %s919_s0 = inlined_call_operand.vmem [shape: f32[128,128], index: 0, kind: input, shape index: {}]   ;;  %s920_s1 = inlined_call_operand.vmem [shape: f32[128,4], index: 1, kind: input, shape index: {}]   ;;  %s921_s2 = inlined_call_operand.vmem [shape: f32[4,32], index: 2, kind: input, shape index: {}]   ;;  %s922_s3 = inlined_call_operand.vmem [shape: f32[1,32], index: 3, kind: input, shape index: {}]   ;;  %s923_s4 = inlined_call_operand.hbm [shape: f32[32,32], index: 4, kind: input, shape index: {}]   ;;  %s924_s5 = inlined_call_operand.vmem [shape: f32[1,32], index: 5, kind: input, shape index: {}]   ;;  %s925_s6 = inlined_call_operand.vmem [shape: f32[128,32], index: 6, kind: output, shape index: {}]  }
   0x1   :  { %s24_s23 = sshll.u32 %s923_s4, 4  ;;  %s26_s25 = sshll.u32 %s595_s24, 4  ;;  %s25_s23 = int_to_ptr.hbm [resolvable:$true] %s24_s23  ;;  %s27_s25 = int_to_ptr.vmem [resolvable:$true] %s26_s25 }
   0x2   :  { %s597_s27 = smov 8  }
   0x3   :  { %32 = dma.hbm_to_vmem [thread:$0]  %s25_s23, 512, %s27_s25, [#allocation3], %s596_s26, %s596_s26, %s597_s27  }
   0x4   :  { %593 = dma.done.wait [#allocation3], 512  }
   0x5   :  { %594 = vsyncadd [#allocation3], 4294966784  ;;  %vm105_vm0 = vcmask 1043456   ;;  %vm56_vm1 = vcmask 31744   ;;  %v55_v0 = vld [vmem:[%s921_s2] sm:$0xf] }
   0x6   :  { %v39_v1 = vld [vmem:[%s920_s1] sm:$0xff]  ;;  %499 = vmatpush.msk.msra.mxu0 %vm105_vm0, %v55_v0  ;;  %v40_v2 = vld [vmem:[%s920_s1 + $0x8] sm:$0xff]  ;;  %v41_v3 = vld [vmem:[%s920_s1 + $0x10] sm:$0xff]  ;;  %vm279_vm2 = vcmask 261120  }
   0x7   :  { %500 = vmatmul.msk.f32.vlgmr.msra.gmra.mxu0 %vm56_vm1, %v39_v1  ;;  %v42_v4 = vld [vmem:[%s920_s1 + $0x18] sm:$0xff]  ;;  %v43_v5 = vld [vmem:[%s920_s1 + $0x20] sm:$0xff]  ;;  %v44_v6 = vld [vmem:[%s920_s1 + $0x28] sm:$0xff] }
   0x8   :  { %v45_v7 = vld [vmem:[%s920_s1 + $0x30] sm:$0xff]  ;;  %v46_v8 = vld [vmem:[%s920_s1 + $0x38] sm:$0xff]  ;;  %v47_v9 = vld [vmem:[%s920_s1 + $0x40] sm:$0xff] }
   0x9   :  { %v48_v10 = vld [vmem:[%s920_s1 + $0x48] sm:$0xff]  ;;  %v49_v11 = vld [vmem:[%s920_s1 + $0x50] sm:$0xff]  ;;  %v50_v12 = vld [vmem:[%s920_s1 + $0x58] sm:$0xff] }
   0xa   :  { %v51_v13 = vld [vmem:[%s920_s1 + $0x60] sm:$0xff]  ;;  %v52_v14 = vld [vmem:[%s920_s1 + $0x68] sm:$0xff]  ;;  %v53_v15 = vld [vmem:[%s920_s1 + $0x70] sm:$0xff] }
   0xb   :  { %v54_v16 = vld [vmem:[%s920_s1 + $0x78] sm:$0xff]  ;;  %v706_v33 = vld [vmem:[%s919_s0] sm:$0xff]  ;;  %v711_v34 = vld [vmem:[%s919_s0 + $0x8] sm:$0xff] }
   0xc   :  { %v718_v35 = vld [vmem:[%s919_s0 + $0x10] sm:$0xff]  ;;  %v724_v36 = vld [vmem:[%s919_s0 + $0x18] sm:$0xff]  ;;  %v730_v37 = vld [vmem:[%s919_s0 + $0x20] sm:$0xff] }
   0xd   :  { %v736_v38 = vld [vmem:[%s919_s0 + $0x28] sm:$0xff]  ;;  %v742_v39 = vld [vmem:[%s919_s0 + $0x30] sm:$0xff]  ;;  %v748_v40 = vld [vmem:[%s919_s0 + $0x38] sm:$0xff] }
   0xe   :  { %v754_v41 = vld [vmem:[%s919_s0 + $0x40] sm:$0xff]  ;;  %v760_v42 = vld [vmem:[%s919_s0 + $0x48] sm:$0xff]  ;;  %v766_v43 = vld [vmem:[%s919_s0 + $0x50] sm:$0xff] }
   0xf   :  { %501 = vmatmul.msk.f32.gmra.mxu0 %vm56_vm1, %v40_v2  ;;  %v772_v44 = vld [vmem:[%s919_s0 + $0x58] sm:$0xff]  ;;  %v778_v46 = vld [vmem:[%s919_s0 + $0x60] sm:$0xff]  ;;  %v277_v47 = vld [vmem:[#allocation2 + $0x10] sm:$0xff] }
  0x10   :  { %v278_v45 = vld [vmem:[#allocation2 + $0x18] sm:$0xff]  ;;  %v784_v48 = vld [vmem:[%s919_s0 + $0x68] sm:$0xff]  ;;  %v275_v50 = vld [vmem:[#allocation2] sm:$0xff] }
  0x11   :  { %340 = vmatpush.msra.mxu2 %v278_v45  ;;  %v276_v49 = vld [vmem:[#allocation2 + $0x8] sm:$0xff]  ;;  %v790_v51 = vld [vmem:[%s919_s0 + $0x70] sm:$0xff]  ;;  %v796_v52 = vld [vmem:[%s919_s0 + $0x78] sm:$0xff] }
  0x12   :  { %v802_v53 = vld [vmem:[%s922_s3] ss:$0 sm:$0xff] }
  0x13   :  { %341 = vmatpush.msra.mxu2 %v277_v47 }
  0x15   :  { %342 = vmatpush.msra.mxu2 %v276_v49 }
  0x17   :  { %502 = vmatmul.msk.f32.gmra.mxu0 %vm56_vm1, %v41_v3  ;;  %343 = vmatpush.msra.mxu2 %v275_v50 }
  0x1f   :  { %503 = vmatmul.msk.f32.gmra.mxu0 %vm56_vm1, %v42_v4 }
  0x27   :  { %504 = vmatmul.msk.f32.gmra.mxu0 %vm56_vm1, %v43_v5 }
  0x2f   :  { %505 = vmatmul.msk.f32.gmra.mxu0 %vm56_vm1, %v44_v6 }
  0x37   :  { %506 = vmatmul.msk.f32.gmra.mxu0 %vm56_vm1, %v45_v7 }
  0x3f   :  { %507 = vmatmul.msk.f32.gmra.mxu0 %vm56_vm1, %v46_v8 }
  0x47   :  { %508 = vmatmul.msk.f32.gmra.mxu0 %vm56_vm1, %v47_v9 }
  0x4f   :  { %509 = vmatmul.msk.f32.gmra.mxu0 %vm56_vm1, %v48_v10 }
  0x57   :  { %510 = vmatmul.msk.f32.gmra.mxu0 %vm56_vm1, %v49_v11 }
  0x5f   :  { %511 = vmatmul.msk.f32.gmra.mxu0 %vm56_vm1, %v50_v12 }
  0x67   :  { %512 = vmatmul.msk.f32.gmra.mxu0 %vm56_vm1, %v51_v13 }
  0x6f   :  { %513 = vmatmul.msk.f32.gmra.mxu0 %vm56_vm1, %v52_v14 }
  0x77   :  { %514 = vmatmul.msk.f32.gmra.mxu0 %vm56_vm1, %v53_v15 }
  0x7f   :  { %515 = vmatmul.msk.f32.gmra.mxu0 %vm56_vm1, %v54_v16 }
  0x84   :  { %v126_v17 = vpop.f32.mrf.mxu0 }
  0x8c   :  { %v129_v18 = vpop.f32.mrf.mxu0 }
  0x94   :  { %v132_v19 = vpop.f32.mrf.mxu0 }
  0x9c   :  { %v135_v20 = vpop.f32.mrf.mxu0 }
  0xa4   :  { %v138_v21 = vpop.f32.mrf.mxu0 }
  0xac   :  { %v141_v22 = vpop.f32.mrf.mxu0 }
  0xb4   :  { %v144_v23 = vpop.f32.mrf.mxu0 }
  0xbc   :  { %v147_v24 = vpop.f32.mrf.mxu0 }
  0xc4   :  { %v150_v25 = vpop.f32.mrf.mxu0 }
  0xcc   :  { %v153_v26 = vpop.f32.mrf.mxu0 }
  0xd4   :  { %v156_v27 = vpop.f32.mrf.mxu0 }
  0xdc   :  { %v159_v28 = vpop.f32.mrf.mxu0 }
  0xe4   :  { %v162_v29 = vpop.f32.mrf.mxu0 }
  0xec   :  { %v165_v30 = vpop.f32.mrf.mxu0 }
  0xf4   :  { %v168_v31 = vpop.f32.mrf.mxu0 }
  0xfc   :  { %v171_v32 = vpop.f32.mrf.mxu0 }
  0xfd   :  { %194 = vmatpush.msrb.mxu0 %v171_v32  ;;  %532 = vmatpush.msra.mxu1 %v171_v32 }
  0xff   :  { %195 = vmatpush.msrb.mxu0 %v168_v31  ;;  %533 = vmatpush.msra.mxu1 %v168_v31 }
 0x101   :  { %196 = vmatpush.msrb.mxu0 %v165_v30  ;;  %534 = vmatpush.msra.mxu1 %v165_v30 }
 0x103   :  { %197 = vmatpush.msrb.mxu0 %v162_v29  ;;  %535 = vmatpush.msra.mxu1 %v162_v29 }
 0x105   :  { %198 = vmatpush.msrb.mxu0 %v159_v28  ;;  %536 = vmatpush.msra.mxu1 %v159_v28 }
 0x107   :  { %199 = vmatpush.msrb.mxu0 %v156_v27  ;;  %537 = vmatpush.msra.mxu1 %v156_v27 }
 0x109   :  { %200 = vmatpush.msrb.mxu0 %v153_v26  ;;  %538 = vmatpush.msra.mxu1 %v153_v26 }
 0x10b   :  { %201 = vmatpush.msrb.mxu0 %v150_v25  ;;  %539 = vmatpush.msra.mxu1 %v150_v25 }
 0x10d   :  { %202 = vmatpush.msrb.mxu0 %v147_v24  ;;  %540 = vmatpush.msra.mxu1 %v147_v24 }
 0x10f   :  { %203 = vmatpush.msrb.mxu0 %v144_v23  ;;  %541 = vmatpush.msra.mxu1 %v144_v23 }
 0x111   :  { %204 = vmatpush.msrb.mxu0 %v141_v22  ;;  %542 = vmatpush.msra.mxu1 %v141_v22 }
 0x113   :  { %205 = vmatpush.msrb.mxu0 %v138_v21  ;;  %543 = vmatpush.msra.mxu1 %v138_v21 }
 0x115   :  { %206 = vmatpush.msrb.mxu0 %v135_v20  ;;  %544 = vmatpush.msra.mxu1 %v135_v20 }
 0x117   :  { %207 = vmatpush.msrb.mxu0 %v132_v19  ;;  %545 = vmatpush.msra.mxu1 %v132_v19 }
 0x119   :  { %208 = vmatpush.msrb.mxu0 %v129_v18  ;;  %546 = vmatpush.msra.mxu1 %v129_v18 }
 0x11b   :  { %209 = vmatpush.msrb.mxu0 %v126_v17  ;;  %547 = vmatpush.msra.mxu1 %v126_v17 }
 0x11c   :  { %210 = vmatmul.f32.vlgmr.msrb.gmra.mxu0 %v706_v33  ;;  %213 = vmatmul.f32.vlgmr.msra.gmra.mxu1 %v711_v34 }
 0x124   :  { %216 = vmatmul.f32.gmra.mxu1 %v718_v35 }
 0x12c   :  { %219 = vmatmul.f32.gmra.mxu1 %v724_v36 }
 0x134   :  { %222 = vmatmul.f32.gmra.mxu1 %v730_v37 }
 0x13c   :  { %225 = vmatmul.f32.gmra.mxu1 %v736_v38 }
 0x144   :  { %228 = vmatmul.f32.gmra.mxu1 %v742_v39 }
 0x14c   :  { %231 = vmatmul.f32.gmra.mxu1 %v748_v40 }
 0x154   :  { %234 = vmatmul.f32.gmra.mxu1 %v754_v41 }
 0x15c   :  { %237 = vmatmul.f32.gmra.mxu1 %v760_v42 }
 0x164   :  { %240 = vmatmul.f32.gmra.mxu1 %v766_v43 }
 0x16c   :  { %243 = vmatmul.f32.gmra.mxu1 %v772_v44 }
 0x174   :  { %246 = vmatmul.f32.gmra.mxu1 %v778_v46 }
 0x17c   :  { %249 = vmatmul.f32.gmra.mxu1 %v784_v48 }
 0x184   :  { %252 = vmatmul.f32.gmra.mxu1 %v790_v51 }
 0x18c   :  { %255 = vmatmul.f32.gmra.mxu1 %v796_v52 }
 0x199   :  { %v211_v54 = vpop.f32.mrf.mxu0  ;;  %v214_v55 = vpop.f32.mrf.mxu1 }
 0x19a   :  { %v212_v56 = vadd.f32 %v802_v53, %v211_v54  ;;  %v215_v58 = vadd.f32 %v802_v53, %v214_v55 }
 0x19c   :  { %v259_v57 = vmax.f32 %v212_v56, 0.0  ;;  %v260_v60 = vmax.f32 %v215_v58, 0.0 }
 0x19e   :  { %516 = vmatmul.msk.f32.vlgmr.msra.gmra.mxu2 %vm279_vm2, %v259_v57 }
 0x1a1   :  { %v217_v59 = vpop.f32.mrf.mxu1 }
 0x1a2   :  { %v218_v61 = vadd.f32 %v802_v53, %v217_v59 }
 0x1a4   :  { %v261_v63 = vmax.f32 %v218_v61, 0.0 }
 0x1a6   :  { %517 = vmatmul.msk.f32.gmra.mxu2 %vm279_vm2, %v260_v60 }
 0x1a9   :  { %v220_v62 = vpop.f32.mrf.mxu1 }
 0x1aa   :  { %v221_v0 = vadd.f32 %v802_v53, %v220_v62 }
 0x1ac   :  { %v262_v2 = vmax.f32 %v221_v0, 0.0 }
 0x1ae   :  { %518 = vmatmul.msk.f32.gmra.mxu2 %vm279_vm2, %v261_v63 }
 0x1b1   :  { %v223_v1 = vpop.f32.mrf.mxu1 }
 0x1b2   :  { %v224_v3 = vadd.f32 %v802_v53, %v223_v1 }
 0x1b4   :  { %v263_v5 = vmax.f32 %v224_v3, 0.0 }
 0x1b6   :  { %519 = vmatmul.msk.f32.gmra.mxu2 %vm279_vm2, %v262_v2 }
 0x1b9   :  { %v226_v4 = vpop.f32.mrf.mxu1 }
 0x1ba   :  { %v227_v6 = vadd.f32 %v802_v53, %v226_v4 }
 0x1bc   :  { %v264_v8 = vmax.f32 %v227_v6, 0.0 }
 0x1be   :  { %520 = vmatmul.msk.f32.gmra.mxu2 %vm279_vm2, %v263_v5 }
 0x1c1   :  { %v229_v7 = vpop.f32.mrf.mxu1 }
 0x1c2   :  { %v230_v9 = vadd.f32 %v802_v53, %v229_v7 }
 0x1c4   :  { %v265_v11 = vmax.f32 %v230_v9, 0.0 }
 0x1c6   :  { %521 = vmatmul.msk.f32.gmra.mxu2 %vm279_vm2, %v264_v8 }
 0x1c9   :  { %v232_v10 = vpop.f32.mrf.mxu1 }
 0x1ca   :  { %v233_v12 = vadd.f32 %v802_v53, %v232_v10 }
 0x1cc   :  { %v266_v14 = vmax.f32 %v233_v12, 0.0 }
 0x1ce   :  { %522 = vmatmul.msk.f32.gmra.mxu2 %vm279_vm2, %v265_v11 }
 0x1d1   :  { %v235_v13 = vpop.f32.mrf.mxu1 }
 0x1d2   :  { %v236_v15 = vadd.f32 %v802_v53, %v235_v13 }
 0x1d4   :  { %v267_v17 = vmax.f32 %v236_v15, 0.0 }
 0x1d6   :  { %523 = vmatmul.msk.f32.gmra.mxu2 %vm279_vm2, %v266_v14 }
 0x1d9   :  { %v238_v16 = vpop.f32.mrf.mxu1 }
 0x1da   :  { %v239_v18 = vadd.f32 %v802_v53, %v238_v16 }
 0x1dc   :  { %v268_v20 = vmax.f32 %v239_v18, 0.0 }
 0x1de   :  { %524 = vmatmul.msk.f32.gmra.mxu2 %vm279_vm2, %v267_v17 }
 0x1e1   :  { %v241_v19 = vpop.f32.mrf.mxu1 }
 0x1e2   :  { %v242_v21 = vadd.f32 %v802_v53, %v241_v19 }
 0x1e4   :  { %v269_v23 = vmax.f32 %v242_v21, 0.0 }
 0x1e6   :  { %525 = vmatmul.msk.f32.gmra.mxu2 %vm279_vm2, %v268_v20 }
 0x1e9   :  { %v244_v22 = vpop.f32.mrf.mxu1 }
 0x1ea   :  { %v245_v24 = vadd.f32 %v802_v53, %v244_v22 }
 0x1ec   :  { %v270_v26 = vmax.f32 %v245_v24, 0.0 }
 0x1ee   :  { %526 = vmatmul.msk.f32.gmra.mxu2 %vm279_vm2, %v269_v23 }
 0x1f1   :  { %v247_v25 = vpop.f32.mrf.mxu1 }
 0x1f2   :  { %v248_v27 = vadd.f32 %v802_v53, %v247_v25 }
 0x1f4   :  { %v271_v29 = vmax.f32 %v248_v27, 0.0 }
 0x1f6   :  { %527 = vmatmul.msk.f32.gmra.mxu2 %vm279_vm2, %v270_v26 }
 0x1f9   :  { %v250_v28 = vpop.f32.mrf.mxu1 }
 0x1fa   :  { %v251_v30 = vadd.f32 %v802_v53, %v250_v28 }
 0x1fc   :  { %v272_v32 = vmax.f32 %v251_v30, 0.0 }
 0x1fe   :  { %528 = vmatmul.msk.f32.gmra.mxu2 %vm279_vm2, %v271_v29 }
 0x201   :  { %v253_v31 = vpop.f32.mrf.mxu1 }
 0x202   :  { %v254_v45 = vadd.f32 %v802_v53, %v253_v31 }
 0x204   :  { %v273_v47 = vmax.f32 %v254_v45, 0.0 }
 0x206   :  { %529 = vmatmul.msk.f32.gmra.mxu2 %vm279_vm2, %v272_v32 }
 0x209   :  { %v256_v49 = vpop.f32.mrf.mxu1 }
 0x20a   :  { %v257_v50 = vadd.f32 %v802_v53, %v256_v49 }
 0x20c   :  { %v274_v54 = vmax.f32 %v257_v50, 0.0 }
 0x20e   :  { %530 = vmatmul.msk.f32.gmra.mxu2 %vm279_vm2, %v273_v47 }
 0x216   :  { %531 = vmatmul.msk.f32.gmra.mxu2 %vm279_vm2, %v274_v54 }
 0x221   :  { %v345_v55 = vpop.f32.mrf.mxu2 }
 0x229   :  { %v348_v56 = vpop.f32.mrf.mxu2 }
 0x231   :  { %v351_v57 = vpop.f32.mrf.mxu2 }
 0x239   :  { %v354_v58 = vpop.f32.mrf.mxu2 }
 0x241   :  { %v357_v59 = vpop.f32.mrf.mxu2 }
 0x249   :  { %v360_v60 = vpop.f32.mrf.mxu2 }
 0x251   :  { %v363_v61 = vpop.f32.mrf.mxu2 }
 0x259   :  { %v366_v62 = vpop.f32.mrf.mxu2 }
 0x261   :  { %v369_v63 = vpop.f32.mrf.mxu2 }
 0x269   :  { %v372_v0 = vpop.f32.mrf.mxu2 }
 0x271   :  { %v375_v1 = vpop.f32.mrf.mxu2 }
 0x279   :  { %v378_v2 = vpop.f32.mrf.mxu2 }
 0x281   :  { %v381_v3 = vpop.f32.mrf.mxu2 }
 0x289   :  { %v384_v4 = vpop.f32.mrf.mxu2 }
 0x291   :  { %v387_v5 = vpop.f32.mrf.mxu2 }
 0x299   :  { %v390_v6 = vpop.f32.mrf.mxu2 }
 0x29a   :  { %397 = vmatpush.msrb.mxu2 %v390_v6  ;;  %548 = vmatpush.msra.mxu3 %v390_v6 }
 0x29c   :  { %398 = vmatpush.msrb.mxu2 %v387_v5  ;;  %549 = vmatpush.msra.mxu3 %v387_v5 }
 0x29e   :  { %399 = vmatpush.msrb.mxu2 %v384_v4  ;;  %550 = vmatpush.msra.mxu3 %v384_v4 }
 0x2a0   :  { %400 = vmatpush.msrb.mxu2 %v381_v3  ;;  %551 = vmatpush.msra.mxu3 %v381_v3 }
 0x2a2   :  { %401 = vmatpush.msrb.mxu2 %v378_v2  ;;  %552 = vmatpush.msra.mxu3 %v378_v2 }
 0x2a4   :  { %402 = vmatpush.msrb.mxu2 %v375_v1  ;;  %553 = vmatpush.msra.mxu3 %v375_v1 }
 0x2a6   :  { %403 = vmatpush.msrb.mxu2 %v372_v0  ;;  %554 = vmatpush.msra.mxu3 %v372_v0 }
 0x2a8   :  { %404 = vmatpush.msrb.mxu2 %v369_v63  ;;  %555 = vmatpush.msra.mxu3 %v369_v63 }
 0x2aa   :  { %405 = vmatpush.msrb.mxu2 %v366_v62  ;;  %556 = vmatpush.msra.mxu3 %v366_v62 }
 0x2ac   :  { %406 = vmatpush.msrb.mxu2 %v363_v61  ;;  %557 = vmatpush.msra.mxu3 %v363_v61 }
 0x2ae   :  { %407 = vmatpush.msrb.mxu2 %v360_v60  ;;  %558 = vmatpush.msra.mxu3 %v360_v60 }
 0x2b0   :  { %408 = vmatpush.msrb.mxu2 %v357_v59  ;;  %559 = vmatpush.msra.mxu3 %v357_v59 }
 0x2b2   :  { %409 = vmatpush.msrb.mxu2 %v354_v58  ;;  %560 = vmatpush.msra.mxu3 %v354_v58 }
 0x2b4   :  { %410 = vmatpush.msrb.mxu2 %v351_v57  ;;  %561 = vmatpush.msra.mxu3 %v351_v57 }
 0x2b6   :  { %411 = vmatpush.msrb.mxu2 %v348_v56  ;;  %562 = vmatpush.msra.mxu3 %v348_v56 }
 0x2b8   :  { %412 = vmatpush.msrb.mxu2 %v345_v55  ;;  %563 = vmatpush.msra.mxu3 %v345_v55 }
 0x2b9   :  { %416 = vmatmul.f32.vlgmr.msra.gmra.mxu3 %v711_v34  ;;  %413 = vmatmul.f32.vlgmr.msrb.gmra.mxu2 %v706_v33  ;;  %v568_v33 = vld [vmem:[%s924_s5] ss:$0 sm:$0xff] }
 0x2c1   :  { %419 = vmatmul.f32.gmra.mxu3 %v718_v35 }
 0x2c9   :  { %422 = vmatmul.f32.gmra.mxu3 %v724_v36 }
 0x2d1   :  { %425 = vmatmul.f32.gmra.mxu3 %v730_v37 }
 0x2d9   :  { %428 = vmatmul.f32.gmra.mxu3 %v736_v38 }
 0x2e1   :  { %431 = vmatmul.f32.gmra.mxu3 %v742_v39 }
 0x2e9   :  { %434 = vmatmul.f32.gmra.mxu3 %v748_v40 }
 0x2f1   :  { %437 = vmatmul.f32.gmra.mxu3 %v754_v41 }
 0x2f9   :  { %440 = vmatmul.f32.gmra.mxu3 %v760_v42 }
 0x301   :  { %443 = vmatmul.f32.gmra.mxu3 %v766_v43 }
 0x309   :  { %446 = vmatmul.f32.gmra.mxu3 %v772_v44 }
 0x311   :  { %449 = vmatmul.f32.gmra.mxu3 %v778_v46 }
 0x319   :  { %452 = vmatmul.f32.gmra.mxu3 %v784_v48 }
 0x321   :  { %455 = vmatmul.f32.gmra.mxu3 %v790_v51 }
 0x329   :  { %458 = vmatmul.f32.gmra.mxu3 %v796_v52 }
 0x33c   :  { %v417_v34 = vpop.f32.mrf.mxu3  ;;  %v414_v21 = vpop.f32.mrf.mxu2 }
 0x33d   :  { %v418_v35 = vadd.f32 %v568_v33, %v417_v34  ;;  %v415_v22 = vadd.f32 %v568_v33, %v414_v21 }
 0x33f   :  { %v463_v36 = vmax.f32 %v418_v35, 0.0  ;;  %v462_v24 = vmax.f32 %v415_v22, 0.0 }
 0x341   :  { %479 = vst.msk [vmem:[%s925_s6 + $0x8] sm:$0xff] %vm279_vm2, %v463_v36 }
 0x342   :  { %478 = vst.msk [vmem:[%s925_s6] sm:$0xff] %vm279_vm2, %v462_v24 }
 0x344   :  { %v420_v37 = vpop.f32.mrf.mxu3 }
 0x345   :  { %v421_v38 = vadd.f32 %v568_v33, %v420_v37 }
 0x347   :  { %v464_v39 = vmax.f32 %v421_v38, 0.0 }
 0x349   :  { %480 = vst.msk [vmem:[%s925_s6 + $0x10] sm:$0xff] %vm279_vm2, %v464_v39 }
 0x34c   :  { %v423_v40 = vpop.f32.mrf.mxu3 }
 0x34d   :  { %v424_v41 = vadd.f32 %v568_v33, %v423_v40 }
 0x34f   :  { %v465_v42 = vmax.f32 %v424_v41, 0.0 }
 0x351   :  { %481 = vst.msk [vmem:[%s925_s6 + $0x18] sm:$0xff] %vm279_vm2, %v465_v42 }
 0x354   :  { %v426_v43 = vpop.f32.mrf.mxu3 }
 0x355   :  { %v427_v44 = vadd.f32 %v568_v33, %v426_v43 }
 0x357   :  { %v466_v46 = vmax.f32 %v427_v44, 0.0 }
 0x359   :  { %482 = vst.msk [vmem:[%s925_s6 + $0x20] sm:$0xff] %vm279_vm2, %v466_v46 }
 0x35c   :  { %v429_v48 = vpop.f32.mrf.mxu3 }
 0x35d   :  { %v430_v51 = vadd.f32 %v568_v33, %v429_v48 }
 0x35f   :  { %v467_v52 = vmax.f32 %v430_v51, 0.0 }
 0x361   :  { %483 = vst.msk [vmem:[%s925_s6 + $0x28] sm:$0xff] %vm279_vm2, %v467_v52 }
 0x364   :  { %v432_v53 = vpop.f32.mrf.mxu3 }
 0x365   :  { %v433_v7 = vadd.f32 %v568_v33, %v432_v53 }
 0x367   :  { %v468_v8 = vmax.f32 %v433_v7, 0.0 }
 0x369   :  { %484 = vst.msk [vmem:[%s925_s6 + $0x30] sm:$0xff] %vm279_vm2, %v468_v8 }
 0x36c   :  { %v435_v9 = vpop.f32.mrf.mxu3 }
 0x36d   :  { %v436_v10 = vadd.f32 %v568_v33, %v435_v9 }
 0x36f   :  { %v469_v11 = vmax.f32 %v436_v10, 0.0 }
 0x371   :  { %485 = vst.msk [vmem:[%s925_s6 + $0x38] sm:$0xff] %vm279_vm2, %v469_v11 }
 0x374   :  { %v438_v12 = vpop.f32.mrf.mxu3 }
 0x375   :  { %v439_v13 = vadd.f32 %v568_v33, %v438_v12 }
 0x377   :  { %v470_v14 = vmax.f32 %v439_v13, 0.0 }
 0x379   :  { %486 = vst.msk [vmem:[%s925_s6 + $0x40] sm:$0xff] %vm279_vm2, %v470_v14 }
 0x37c   :  { %v441_v15 = vpop.f32.mrf.mxu3 }
 0x37d   :  { %v442_v16 = vadd.f32 %v568_v33, %v441_v15 }
 0x37f   :  { %v471_v17 = vmax.f32 %v442_v16, 0.0 }
 0x381   :  { %487 = vst.msk [vmem:[%s925_s6 + $0x48] sm:$0xff] %vm279_vm2, %v471_v17 }
 0x384   :  { %v444_v18 = vpop.f32.mrf.mxu3 }
 0x385   :  { %v445_v19 = vadd.f32 %v568_v33, %v444_v18 }
 0x387   :  { %v472_v20 = vmax.f32 %v445_v19, 0.0 }
 0x389   :  { %488 = vst.msk [vmem:[%s925_s6 + $0x50] sm:$0xff] %vm279_vm2, %v472_v20 }
 0x38c   :  { %v447_v23 = vpop.f32.mrf.mxu3 }
 0x38d   :  { %v448_v25 = vadd.f32 %v568_v33, %v447_v23 }
 0x38f   :  { %v473_v26 = vmax.f32 %v448_v25, 0.0 }
 0x391   :  { %489 = vst.msk [vmem:[%s925_s6 + $0x58] sm:$0xff] %vm279_vm2, %v473_v26 }
 0x394   :  { %v450_v27 = vpop.f32.mrf.mxu3 }
 0x395   :  { %v451_v28 = vadd.f32 %v568_v33, %v450_v27 }
 0x397   :  { %v474_v29 = vmax.f32 %v451_v28, 0.0 }
 0x399   :  { %490 = vst.msk [vmem:[%s925_s6 + $0x60] sm:$0xff] %vm279_vm2, %v474_v29 }
 0x39c   :  { %v453_v30 = vpop.f32.mrf.mxu3 }
 0x39d   :  { %v454_v31 = vadd.f32 %v568_v33, %v453_v30 }
 0x39f   :  { %v475_v32 = vmax.f32 %v454_v31, 0.0 }
 0x3a1   :  { %491 = vst.msk [vmem:[%s925_s6 + $0x68] sm:$0xff] %vm279_vm2, %v475_v32 }
 0x3a4   :  { %v456_v45 = vpop.f32.mrf.mxu3 }
 0x3a5   :  { %v457_v47 = vadd.f32 %v568_v33, %v456_v45 }
 0x3a7   :  { %v476_v49 = vmax.f32 %v457_v47, 0.0 }
 0x3a9   :  { %492 = vst.msk [vmem:[%s925_s6 + $0x70] sm:$0xff] %vm279_vm2, %v476_v49 }
 0x3ac   :  { %v459_v50 = vpop.f32.mrf.mxu3 }
 0x3ad   :  { %v460_v54 = vadd.f32 %v568_v33, %v459_v50 }
 0x3af   :  { %v477_v55 = vmax.f32 %v460_v54, 0.0 }
 0x3b1   :  { %493 = vst.msk [vmem:[%s925_s6 + $0x78] sm:$0xff] %vm279_vm2, %v477_v55 }
 0x3b2   :  { %498 = vsyncpa [#allocation3], 1 }

// kernel: stgi_forward.7
= control target key start
LH: loop header
LB: loop body
LE: loop exit
PB: predicated region body
PF: predicated region fallthrough
CT: control target
= control target key end

     0   :  { %vm97_vm0 = vcmask 261120   ;;  %s648_s0 = inlined_call_operand.vmem [shape: f32[2,128,32], index: 0, kind: input, shape index: {}]   ;;  %s649_s1 = inlined_call_operand.vmem [shape: f32[2,32,4], index: 1, kind: input, shape index: {}]   ;;  %s650_s2 = inlined_call_operand.vmem [shape: f32[4,1], index: 2, kind: input, shape index: {}]   ;;  %s651_s3 = inlined_call_operand.vmem [shape: f32[4,128], index: 3, kind: input, shape index: {}]   ;;  %s652_s4 = inlined_call_operand.vmem [shape: f32[4,128], index: 4, kind: input, shape index: {}]   ;;  %s653_s5 = inlined_call_operand.vmem [shape: f32[4,128], index: 5, kind: output, shape index: {0}]   ;;  %s654_s6 = inlined_call_operand.hbm [shape: f32[1,1], index: 6, kind: output, shape index: {1}]  }
   0x1   :  { %v349_v0 = vld [vmem:[%s649_s1 + $0x20] sm:$0xff]  ;;  %v368_v2 = vld [vmem:[%s648_s0 + $0xf8] sm:$0xff]  ;;  %v367_v4 = vld [vmem:[%s648_s0 + $0xf0] sm:$0xff] }
   0x2   :  { %v23_v1 = vld [vmem:[%s649_s1] sm:$0xff]  ;;  %65 = vxpose.xlu0.b32.start [1/4] (short) (narrow) %v349_v0, 8  ;;  %369 = vmatpush.xpose.msk.msra.mxu0 %vm97_vm0, %v368_v2  ;;  %v42_v3 = vld [vmem:[%s648_s0 + $0x78] sm:$0xff]  ;;  %v41_v5 = vld [vmem:[%s648_s0 + $0x70] sm:$0xff] }
   0x3   :  { %169 = vxpose.xlu1.b32.start [1/4] (short) (narrow) %v23_v1, 8  ;;  %386 = vmatpush.xpose.msk.msra.mxu1 %vm97_vm0, %v42_v3  ;;  %v350_v6 = vld [vmem:[%s649_s1 + $0x28] sm:$0xff] }
   0x4   :  { %v24_v7 = vld [vmem:[%s649_s1 + $0x8] sm:$0xff] }
   0x5   :  { %v366_v8 = vld [vmem:[%s648_s0 + $0xe8] sm:$0xff] }
   0x6   :  { %370 = vmatpush.xpose.msk.msra.mxu0 %vm97_vm0, %v367_v4  ;;  %v40_v9 = vld [vmem:[%s648_s0 + $0x68] sm:$0xff] }
   0x7   :  { %387 = vmatpush.xpose.msk.msra.mxu1 %vm97_vm0, %v41_v5 }
   0xa   :  { %66 = vxpose.xlu0.b32.cont [2/4] (short) (narrow) %v350_v6, 8 }
   0xb   :  { %170 = vxpose.xlu1.b32.cont [2/4] (short) (narrow) %v24_v7, 8 }
   0xc   :  { %12 = vsyncpa [#allocation3], 0  ;;  %371 = vmatpush.xpose.msk.msra.mxu0 %vm97_vm0, %v366_v8  ;;  %388 = vmatpush.xpose.msk.msra.mxu1 %vm97_vm0, %v40_v9  ;;  %v365_v10 = vld [vmem:[%s648_s0 + $0xe0] sm:$0xff]  ;;  %v351_v12 = vld [vmem:[%s649_s1 + $0x30] sm:$0xff]  ;;  %v442_v41 = vmov 0   ;;  %vm284_vm1 = vcmask 1043456  }
   0xd   :  { %v39_v11 = vld [vmem:[%s648_s0 + $0x60] sm:$0xff]  ;;  %v25_v13 = vld [vmem:[%s649_s1 + $0x10] sm:$0xff]  ;;  %v364_v14 = vld [vmem:[%s648_s0 + $0xd8] sm:$0xff]  ;;  %412 = vset.pattern.permute.xlu2 %v442_v41  ;;  %s443_s9 = smov [#allocation2]   ;;  %s338_s13 = sshll.u32 %s654_s6, 4  ;;  %vm324_vm7 = vcmask 0   ;;  %s339_s13 = int_to_ptr.hbm [resolvable:$true] %s338_s13 }
   0xe   :  { %v38_v15 = vld [vmem:[%s648_s0 + $0x58] sm:$0xff]  ;;  %v363_v16 = vld [vmem:[%s648_s0 + $0xd0] sm:$0xff]  ;;  %v362_v20 = vld [vmem:[%s648_s0 + $0xc8] sm:$0xff]  ;;  %s336_s10 = sshll.u32 %s443_s9, 4  ;;  %s337_s10 = int_to_ptr.vmem [resolvable:$true] %s336_s10 }
   0xf   :  { %v37_v17 = vld [vmem:[%s648_s0 + $0x50] sm:$0xff]  ;;  %v352_v18 = vld [vmem:[%s649_s1 + $0x38] sm:$0xff]  ;;  %v36_v21 = vld [vmem:[%s648_s0 + $0x48] sm:$0xff] }
  0x10   :  { %372 = vmatpush.xpose.msk.msra.mxu0 %vm97_vm0, %v365_v10  ;;  %389 = vmatpush.xpose.msk.msra.mxu1 %vm97_vm0, %v39_v11  ;;  %v26_v19 = vld [vmem:[%s649_s1 + $0x18] sm:$0xff]  ;;  %v361_v22 = vld [vmem:[%s648_s0 + $0xc0] sm:$0xff]  ;;  %v359_v26 = vld [vmem:[%s648_s0 + $0xb0] sm:$0xff] }
  0x11   :  { %v35_v23 = vld [vmem:[%s648_s0 + $0x40] sm:$0xff]  ;;  %v360_v24 = vld [vmem:[%s648_s0 + $0xb8] sm:$0xff]  ;;  %v33_v27 = vld [vmem:[%s648_s0 + $0x30] sm:$0xff] }
  0x12   :  { %67 = vxpose.xlu0.b32.cont [3/4] (short) (narrow) %v351_v12, 8  ;;  %v34_v25 = vld [vmem:[%s648_s0 + $0x38] sm:$0xff]  ;;  %v358_v28 = vld [vmem:[%s648_s0 + $0xa8] sm:$0xff]  ;;  %v357_v30 = vld [vmem:[%s648_s0 + $0xa0] sm:$0xff] }
  0x13   :  { %171 = vxpose.xlu1.b32.cont [3/4] (short) (narrow) %v25_v13, 8  ;;  %v32_v29 = vld [vmem:[%s648_s0 + $0x28] sm:$0xff]  ;;  %v31_v31 = vld [vmem:[%s648_s0 + $0x20] sm:$0xff]  ;;  %v356_v32 = vld [vmem:[%s648_s0 + $0x98] sm:$0xff] }
  0x14   :  { %373 = vmatpush.xpose.msk.msra.mxu0 %vm97_vm0, %v364_v14  ;;  %390 = vmatpush.xpose.msk.msra.mxu1 %vm97_vm0, %v38_v15  ;;  %v30_v33 = vld [vmem:[%s648_s0 + $0x18] sm:$0xff]  ;;  %v355_v34 = vld [vmem:[%s648_s0 + $0x90] sm:$0xff]  ;;  %v354_v36 = vld [vmem:[%s648_s0 + $0x88] sm:$0xff] }
  0x15   :  { %v29_v35 = vld [vmem:[%s648_s0 + $0x10] sm:$0xff]  ;;  %v28_v37 = vld [vmem:[%s648_s0 + $0x8] sm:$0xff]  ;;  %v353_v38 = vld [vmem:[%s648_s0 + $0x80] sm:$0xff] }
  0x16   :  { %v27_v39 = vld [vmem:[%s648_s0] sm:$0xff] }
  0x17   :  { %v272_v40 = vld [vmem:[%s650_s2] sm:$0xf] }
  0x18   :  { %374 = vmatpush.xpose.msk.msra.mxu0 %vm97_vm0, %v363_v16  ;;  %391 = vmatpush.xpose.msk.msra.mxu1 %vm97_vm0, %v37_v17  ;;  %v280_v44 = vld [vmem:[%s652_s4] sm:$0xf] }
  0x19   :  { %275 = vperm.xlu2 %412, %v272_v40   ;;  %v295_v45 = vsel %vm284_vm1, %v280_v44, 0.0  ;;  %v279_v50 = vld [vmem:[%s651_s3] sm:$0xf]  ;;  %vm326_vm2 = vcmp.ne.f32.partialorder %v280_v44, 0.0 }
  0x1a   :  { %68 = vxpose.xlu0.b32.end [4/4] (short) (narrow) %v352_v18, 8 }
  0x1b   :  { %172 = vxpose.xlu1.b32.end [4/4] (short) (narrow) %v26_v19, 8 }
  0x1c   :  { %375 = vmatpush.xpose.msk.msra.mxu0 %vm97_vm0, %v362_v20  ;;  %392 = vmatpush.xpose.msk.msra.mxu1 %vm97_vm0, %v36_v21 }
  0x20   :  { %376 = vmatpush.xpose.msk.msra.mxu0 %vm97_vm0, %v361_v22  ;;  %393 = vmatpush.xpose.msk.msra.mxu1 %vm97_vm0, %v35_v23 }
  0x24   :  { %377 = vmatpush.xpose.msk.msra.mxu0 %vm97_vm0, %v360_v24  ;;  %394 = vmatpush.xpose.msk.msra.mxu1 %vm97_vm0, %v34_v25 }
  0x28   :  { %378 = vmatpush.xpose.msk.msra.mxu0 %vm97_vm0, %v359_v26  ;;  %395 = vmatpush.xpose.msk.msra.mxu1 %vm97_vm0, %v33_v27 }
  0x2c   :  { %379 = vmatpush.xpose.msk.msra.mxu0 %vm97_vm0, %v358_v28  ;;  %396 = vmatpush.xpose.msk.msra.mxu1 %vm97_vm0, %v32_v29 }
  0x30   :  { %380 = vmatpush.xpose.msk.msra.mxu0 %vm97_vm0, %v357_v30  ;;  %397 = vmatpush.xpose.msk.msra.mxu1 %vm97_vm0, %v31_v31 }
  0x34   :  { %381 = vmatpush.xpose.msk.msra.mxu0 %vm97_vm0, %v356_v32  ;;  %398 = vmatpush.xpose.msk.msra.mxu1 %vm97_vm0, %v30_v33 }
  0x38   :  { %382 = vmatpush.xpose.msk.msra.mxu0 %vm97_vm0, %v355_v34  ;;  %399 = vmatpush.xpose.msk.msra.mxu1 %vm97_vm0, %v29_v35 }
  0x3c   :  { %383 = vmatpush.xpose.msk.msra.mxu0 %vm97_vm0, %v354_v36  ;;  %400 = vmatpush.xpose.msk.msra.mxu1 %vm97_vm0, %v28_v37 }
  0x40   :  { %384 = vmatpush.xpose.msk.msra.mxu0 %vm97_vm0, %v353_v38  ;;  %401 = vmatpush.xpose.msk.msra.mxu1 %vm97_vm0, %v27_v39 }
  0x73   :  { %v276_v46 = vpop.permute.xlu2 %275 }
  0x81   :  { %413 = vset.pattern.permute.xlu0 %v442_v41 }
  0x8b   :  { %296 = vadd.xlane.f32.xlu0 %v295_v45 }
  0xa6   :  { %v81_v42 = vpop.trf.xlu0 }
  0xa7   :  { %v185_v43 = vpop.trf.xlu1  ;;  %385 = vmatmul.msk.f32.vlgmr.msra.gmra.mxu0 %vm97_vm0, %v81_v42 }
  0xa8   :  { %402 = vmatmul.msk.f32.vlgmr.msra.gmra.mxu1 %vm97_vm0, %v185_v43 }
  0xfe   :  { %v297_v57 = vpop.xlane.xlu0 %296 }
  0xff   :  { %v298_v58 = vrot.slane %v297_v57, 4 }
 0x101   :  { %v299_v59 = vadd.f32 %v298_v58, %v297_v57 }
 0x103   :  { %v300_v60 = vrot.slane %v299_v59, 2 }
 0x105   :  { %v301_v0 = vadd.f32 %v300_v60, %v299_v59 }
 0x107   :  { %v302_v3 = vrot.slane %v301_v0, 1 }
 0x109   :  { %v303_v6 = vadd.f32 %v302_v3, %v301_v0 }
 0x124   :  { %v166_v47 = vpop.f32.mrf.mxu0 }
 0x125   :  { %v269_v48 = vpop.f32.mrf.mxu1 }
 0x126   :  { %v270_v49 = vadd.f32 %v269_v48, %v166_v47 }
 0x128   :  { %v278_v51 = vadd.f32 %v276_v46, %v270_v49 }
 0x12a   :  { %v281_v52 = vsub.f32 %v278_v51, %v279_v50  ;;  %v327_v53 = vsel %vm326_vm2, %v279_v50, %v278_v51 }
 0x12b   :  { %328 = vst [vmem:[%s653_s5] sm:$0xf] %v327_v53 }
 0x12c   :  { %v282_v54 = vmul.f32 %v281_v52, %v280_v44 }
 0x12e   :  { %v283_v55 = vmul.f32 %v282_v54, %v281_v52 }
 0x130   :  { %v285_v56 = vsel %vm284_vm1, %v283_v55, 0.0 }
 0x131   :  { %286 = vadd.xlane.f32.xlu2 %v285_v56 }
 0x1a4   :  { %v287_v61 = vpop.xlane.xlu2 %286 }
 0x1a5   :  { %v288_v62 = vrot.slane %v287_v61, 4 }
 0x1a7   :  { %v289_v63 = vadd.f32 %v288_v62, %v287_v61 }
 0x1a9   :  { %v290_v1 = vrot.slane %v289_v63, 2 }
 0x1ab   :  { %v291_v2 = vadd.f32 %v290_v1, %v289_v63 }
 0x1ad   :  { %v292_v4 = vrot.slane %v291_v2, 1 }
 0x1af   :  { %v293_v5 = vadd.f32 %v292_v4, %v291_v2 }
 0x1b1   :  { %403 = vpush %v293_v5 }
 0x1b2   :  { %405 = vpush %v303_v6 }
 0x1e2   :  { %s404_s3 = spop %403 }
 0x1e3   :  { %s406_s4 = spop %405 }
 0x1e4   :  { %s305_s5 = sadd.f32 1e-08, %s406_s4 }
 0x1e6   :  { %v306_v7 = vstv %s305_s5 }
 0x1e7   :  { %414 = vrcp.f32 %v306_v7  ;;  %v318_v11 = vand.u32 2147483648, %v306_v7  ;;  %v316_v13 = vand.u32 2147483647, %v306_v7  ;;  %vm312_vm4 = vweird.f32 %v306_v7 }
 0x1e9   :  { %v319_v15 = vor.u32 1.1754944e-38, %v318_v11  ;;  %vm317_vm6 = vcmp.eq.f32.partialorder %v316_v13, 8.507059e+37 }
 0x1ed   :  { %v415_v8 = vpop.eup %414 }
 0x1ee   :  { %v308_v9 = vmul.f32 %v415_v8, %v306_v7  ;;  %vm313_vm3 = vweird.f32 %v415_v8 }
 0x1ef   :  { %vm314_vm5 = vmor %vm312_vm4, %vm313_vm3 }
 0x1f0   :  { %v309_v10 = vsub.f32 1.0, %v308_v9 }
 0x1f2   :  { %v310_v12 = vmul.f32 %v415_v8, %v309_v10 }
 0x1f4   :  { %v311_v14 = vadd.f32 %v415_v8, %v310_v12 }
 0x1f6   :  { %v315_v16 = vsel %vm314_vm5, %v415_v8, %v311_v14 }
 0x1f7   :  { %v320_v17 = vsel %vm317_vm6, %v319_v15, %v315_v16 }
 0x1f8   :  { %407 = vpush %v320_v17 }
 0x229   :  { %s408_s14 = spop %407 }
 0x22a   :  { %s322_s15 = smul.f32 %s408_s14, %s404_s3 }
 0x22c   :  { %v323_v18 = vstv %s322_s15 }
 0x22d   :  { %325 = vst.msk [vmem:[#allocation2] sm:$0x1] %vm324_vm7, %v323_v18 }
 0x22e   :  { %341 = dma.vmem_to_hbm [thread:$0]  %s337_s10, 16, %s339_s13, [#allocation3]  }
 0x22f   :  { %440 = dma.done.wait [#allocation3], 16  }
 0x230   :  { %441 = vsyncadd [#allocation3], 4294967280 }
 0x231   :  { %348 = vsyncpa [#allocation3], 1 }

// kernel: stgi_forward.5
= control target key start
LH: loop header
LB: loop body
LE: loop exit
PB: predicated region body
PF: predicated region fallthrough
CT: control target
= control target key end

     0   :  { %s2085_s15 = smov 0   ;;  %s2508_s0 = inlined_call_operand.vmem [shape: f32[1,128,32], index: 0, kind: input, shape index: {}]   ;;  %s2509_s1 = inlined_call_operand.vmem [shape: f32[2,1,32,128], index: 1, kind: input, shape index: {}]   ;;  %s2510_s2 = inlined_call_operand.vmem [shape: f32[2,32,128], index: 2, kind: input, shape index: {}]   ;;  %s2511_s3 = inlined_call_operand.vmem [shape: f32[2,1,128], index: 3, kind: input, shape index: {}]   ;;  %s2512_s4 = inlined_call_operand.vmem [shape: f32[2,128,32], index: 4, kind: output, shape index: {}]  }
   0x1   :  { %2513 = sst [smem:[#allocation3_spill]] %s2508_s0 }
   0x2   :  { %2514 = sst [smem:[#allocation4_spill]] %s2509_s1 }
   0x3   :  { %2515 = sst [smem:[#allocation5_spill]] %s2510_s2 }
   0x4 LB: > { %s2091_s16 = sadd.s32 4294967295, %s2055_s15   ;;  %p1819_p0 = scmp.ge.s32.totalorder %s2055_s15, 1  ;;  %s2055_s15 = sphi %s2085_s15, %s14_s15  }
   0x5   : > { %p180_p1 = scmp.lt.s32.totalorder %s2055_s15, 3 }
   0x7   : > { %p181_p2 = pnand %p1819_p0, %p180_p1 }
   0x8   : > { %p214_p3 = scmp.lt.s32.totalorder (!%p181_p2), %s2091_s16, 1  ;;  %s2516_s1 = sld [smem:[#allocation4_spill]] (!%p181_p2) }
   0x9   : > { %184 = sbr.rel (%p181_p2) target bundleno = 9377 (0x24a1), region = 36  ;;  %s2517_s0 = sld [smem:[#allocation3_spill]] (!%p181_p2) }
   0xa   : > { %s2518_s2 = sld [smem:[#allocation5_spill]] (!%p181_p2)  ;;  %s1842_s12 = sshll.u32 (!%p181_p2), %s2091_s16, 1 }
   0xb   : > { %s2221_s14 = ssub.s32 (!%p181_p2), 1, %s1842_s12  ;;  %s2224_s19 = smul.u32 (!%p181_p2), 15, %s2091_s16 }
   0xc   : > { %s1847_s20 = sshll.u32 (!%p181_p2), %s2221_s14, 1  ;;  %s612_s22 = smul.u32 (!%p181_p2), 3, %s2221_s14 }
   0xd   : > { %s2229_s23 = sadd.s32 (!%p181_p2), %s1847_s20, %s2224_s19  ;;  %s762_s26 = smul.u32 (!%p181_p2), 5, %s2221_s14 }
   0xe   : > { %s2097_s17 = scalar_select %p214_p3, %s2091_s16, 1  ;;  %vm256_vm0 = vcmask 261120   ;;  %v2057_v21 = vmov 0.0  }
   0xf   : > { %v232_v4 = vld [vmem:[%s2517_s0] sm:$0xff]  ;;  %v242_v5 = vld [vmem:[%s2517_s0 + $0x50] sm:$0xff]  ;;  %v245_v6 = vld [vmem:[%s2517_s0 + $0x68] sm:$0xff]  ;;  %s837_s27 = smul.u32 6, %s2221_s14  ;;  %s2241_s28 = sadd.s32 %s762_s26, %s2224_s19 }
  0x10   : > { %s1894_s18 = sshll.u32 %s2097_s17, 5  ;;  %v233_v7 = vld [vmem:[%s2517_s0 + $0x8] sm:$0xff]  ;;  %v243_v8 = vld [vmem:[%s2517_s0 + $0x58] sm:$0xff]  ;;  %v246_v9 = vld [vmem:[%s2517_s0 + $0x70] sm:$0xff]  ;;  %s912_s29 = smul.u32 7, %s2221_s14 }
  0x11   : > { %s218_s24 = scalar_lea.vmem %s2516_s1, %s1894_s18  ;;  %s2138_s13 = scalar_lea.vmem %s2518_s2, %s1894_s18  ;;  %v234_v10 = vld [vmem:[%s2517_s0 + $0x10] sm:$0xff]  ;;  %v240_v11 = vld [vmem:[%s2517_s0 + $0x40] sm:$0xff]  ;;  %v247_v13 = vld [vmem:[%s2517_s0 + $0x78] sm:$0xff] }
  0x12   : > { %v251_v0 = vld [vmem:[%s218_s24 + $0x18] sm:$0xff]  ;;  %v250_v1 = vld [vmem:[%s218_s24 + $0x10] sm:$0xff]  ;;  %v249_v2 = vld [vmem:[%s218_s24 + $0x8] sm:$0xff]  ;;  %s1854_s18 = sshll.u32 %s2221_s14, 2  ;;  %s2245_s30 = sadd.s32 %s837_s27, %s2224_s19 }
  0x13   : > { %317 = vmatpush.msra.mxu0 %v251_v0  ;;  %1898 = vmatpush.msra.mxu2 %v251_v0  ;;  %v248_v3 = vld [vmem:[%s218_s24] sm:$0xff]  ;;  %v2155_v14 = vld [vmem:[%s2138_s13 + $0x18] sm:$0xff]  ;;  %v2160_v15 = vld [vmem:[%s2138_s13 + $0x10] sm:$0xff]  ;;  %s2232_s24 = sadd.s32 %s612_s22, %s2224_s19  ;;  %s2236_s25 = sadd.s32 %s1854_s18, %s2224_s19 }
  0x14   : > { %1899 = vmatpush.msra.mxu3 %v251_v0  ;;  %1897 = vmatpush.msra.mxu1 %v251_v0  ;;  %v244_v12 = vld [vmem:[%s2517_s0 + $0x60] sm:$0xff]  ;;  %v235_v16 = vld [vmem:[%s2517_s0 + $0x18] sm:$0xff]  ;;  %v241_v17 = vld [vmem:[%s2517_s0 + $0x48] sm:$0xff]  ;;  %s1867_s5 = sshll.u32 %s2221_s14, 3  ;;  %s2249_s6 = sadd.s32 %s912_s29, %s2224_s19 }
  0x15   : > { %318 = vmatpush.msra.mxu0 %v250_v1  ;;  %1901 = vmatpush.msra.mxu2 %v250_v1  ;;  %v2177_v18 = vld [vmem:[%s2138_s13 + $0x8] sm:$0xff]  ;;  %v2180_v19 = vld [vmem:[%s2138_s13] sm:$0xff]  ;;  %v238_v23 = vld [vmem:[%s2517_s0 + $0x30] sm:$0xff]  ;;  %s2252_s7 = sadd.s32 %s1867_s5, %s2224_s19  ;;  %s1062_s8 = smul.u32 9, %s2221_s14 }
  0x16   : > { %1902 = vmatpush.msra.mxu3 %v250_v1  ;;  %1900 = vmatpush.msra.mxu1 %v250_v1  ;;  %v236_v20 = vld [vmem:[%s2517_s0 + $0x20] sm:$0xff]  ;;  %v237_v22 = vld [vmem:[%s2517_s0 + $0x28] sm:$0xff]  ;;  %v239_v24 = vld [vmem:[%s2517_s0 + $0x38] sm:$0xff]  ;;  %s1137_s9 = smul.u32 10, %s2221_s14  ;;  %s2519_s2 = scalar_lea.vmem %s2511_s3, %s2097_s17 }
  0x17   : > { %319 = vmatpush.msra.mxu0 %v249_v2  ;;  %1904 = vmatpush.msra.mxu2 %v249_v2  ;;  %s2257_s10 = sadd.s32 %s1062_s8, %s2224_s19  ;;  %s1212_s11 = smul.u32 11, %s2221_s14  ;;  %v1920_v25 = vld [vmem:[%s2519_s2] ss:$0 sm:$0xff] }
  0x18   : > { %1905 = vmatpush.msra.mxu3 %v249_v2  ;;  %1903 = vmatpush.msra.mxu1 %v249_v2  ;;  %s2261_s12 = sadd.s32 %s1137_s9, %s2224_s19  ;;  %s1287_s22 = smul.u32 12, %s2221_s14 }
  0x19   : > { %320 = vmatpush.msra.mxu0 %v248_v3  ;;  %1907 = vmatpush.msra.mxu2 %v248_v3  ;;  %s2264_s20 = sadd.s32 %s1212_s11, %s2224_s19  ;;  %s1362_s18 = smul.u32 13, %s2221_s14 }
  0x1a   : > { %1826 = vmatmul.msk.f32.vlgmr.msra.gmra.mxu0 %vm256_vm0, %v232_v4  ;;  %1908 = vmatpush.msra.mxu3 %v248_v3  ;;  %s2269_s26 = sadd.s32 %s1287_s22, %s2224_s19  ;;  %s1437_s27 = smul.u32 14, %s2221_s14 }
  0x1b   : > { %1836 = vmatmul.msk.f32.vlgmr.msra.gmra.mxu2 %vm256_vm0, %v242_v5  ;;  %1839 = vmatmul.msk.f32.vlgmr.msra.gmra.mxu3 %vm256_vm0, %v245_v6  ;;  %s2273_s21 = sadd.s32 %s1362_s18, %s2224_s19  ;;  %s1512_s5 = smul.u32 15, %s2221_s14 }
  0x1c   : > { %1906 = vmatpush.msra.mxu1 %v248_v3  ;;  %485 = vmatpush.msrb.mxu2 %v2155_v14  ;;  %s2276_s29 = sadd.s32 %s1437_s27, %s2224_s19  ;;  %s389_s1 = smul.u32 120, %s2091_s16 }
  0x1d   : > { %1834 = vmatmul.msk.f32.vlgmr.msra.gmra.mxu1 %vm256_vm0, %v240_v11  ;;  %560 = vmatpush.msrb.mxu3 %v2155_v14  ;;  %s2280_s0 = sadd.s32 %s1512_s5, %s2224_s19  ;;  %s2058_s9 = smov 64  }
  0x1e   : > { %411 = vmatpush.msrb.mxu1 %v2155_v14  ;;  %486 = vmatpush.msrb.mxu2 %v2160_v15  ;;  %s390_s2 = scalar_lea.vmem [#allocation2], %s389_s1  ;;  %s2059_s11 = smov 32  }
  0x1f   : > { %561 = vmatpush.msrb.mxu3 %v2160_v15  ;;  %s1896_s22 = sshll.u32 %s2097_s17, 7  ;;  %s463_s17 = sadd.s32 %s2221_s14, %s2224_s19 }
  0x20   : > { %412 = vmatpush.msrb.mxu1 %v2160_v15  ;;  %487 = vmatpush.msrb.mxu2 %v2177_v18  ;;  %s2298_s5 = scalar_lea.vmem %s2512_s4, %s1896_s22  ;;  %s1848_s19 = sshll.u32 %s2229_s23, 3 }
  0x21   : > { %562 = vmatpush.msrb.mxu3 %v2177_v18  ;;  %s461_s8 = scalar_lea.vmem %s2298_s5, %s389_s1  ;;  %s540_s1 = scalar_lea.vmem [#allocation2], %s1848_s19 }
  0x22   : > { %1827 = vmatmul.msk.f32.gmra.mxu0 %vm256_vm0, %v233_v7  ;;  %413 = vmatpush.msrb.mxu1 %v2177_v18  ;;  %s610_s22 = scalar_lea.vmem %s2298_s5, %s1848_s19  ;;  %s1851_s18 = sshll.u32 %s2232_s24, 3 }
  0x23   : > { %1837 = vmatmul.msk.f32.gmra.mxu2 %vm256_vm0, %v243_v8  ;;  %1840 = vmatmul.msk.f32.gmra.mxu3 %vm256_vm0, %v246_v9  ;;  %s615_s27 = scalar_lea.vmem [#allocation2], %s1851_s18  ;;  %s685_s23 = scalar_lea.vmem %s2298_s5, %s1851_s18 }
  0x24   : > { %414 = vmatpush.msrb.mxu1 %v2180_v19  ;;  %488 = vmatpush.msrb.mxu2 %v2180_v19  ;;  %s1868_s18 = sshll.u32 %s2252_s7, 3  ;;  %s1874_s7 = sshll.u32 %s2261_s12, 3 }
  0x25   : > { %1835 = vmatmul.msk.f32.gmra.mxu1 %vm256_vm0, %v241_v17  ;;  %563 = vmatpush.msrb.mxu3 %v2180_v19 }
  0x26   : > { %635 = vmatpush.msra.mxu1 %v2155_v14  ;;  %710 = vmatpush.msra.mxu2 %v2155_v14 }
  0x27   : > { %785 = vmatpush.msra.mxu3 %v2155_v14 }
  0x28   : > { %636 = vmatpush.msra.mxu1 %v2160_v15  ;;  %711 = vmatpush.msra.mxu2 %v2160_v15 }
  0x29   : > { %786 = vmatpush.msra.mxu3 %v2160_v15 }
  0x2a   : > { %1828 = vmatmul.msk.f32.gmra.mxu0 %vm256_vm0, %v234_v10  ;;  %637 = vmatpush.msra.mxu1 %v2177_v18 }
  0x2b   : > { %1838 = vmatmul.msk.f32.gmra.mxu2 %vm256_vm0, %v244_v12  ;;  %1841 = vmatmul.msk.f32.gmra.mxu3 %vm256_vm0, %v247_v13 }
  0x2c   : > { %712 = vmatpush.msra.mxu2 %v2177_v18  ;;  %787 = vmatpush.msra.mxu3 %v2177_v18 }
  0x2d   : > { %415 = vmatmul.f32.vlgmr.msrb.gmra.mxu1 %v2057_v21 }
  0x2e   : > { %638 = vmatpush.msra.mxu1 %v2180_v19  ;;  %713 = vmatpush.msra.mxu2 %v2180_v19 }
  0x2f   : > { %788 = vmatpush.msra.mxu3 %v2180_v19 }
  0x30   : > { %860 = vmatpush.msrb.mxu1 %v2155_v14 }
  0x32   : > { %1829 = vmatmul.msk.f32.gmra.mxu0 %vm256_vm0, %v235_v16  ;;  %861 = vmatpush.msrb.mxu1 %v2160_v15 }
  0x34   : > { %862 = vmatpush.msrb.mxu1 %v2177_v18 }
  0x36   : > { %863 = vmatpush.msrb.mxu1 %v2180_v19 }
  0x3a   : > { %1830 = vmatmul.msk.f32.gmra.mxu0 %vm256_vm0, %v236_v20 }
  0x42   : > { %1831 = vmatmul.msk.f32.gmra.mxu0 %vm256_vm0, %v237_v22 }
  0x4a   : > { %1832 = vmatmul.msk.f32.gmra.mxu0 %vm256_vm0, %v238_v23 }
  0x52   : > { %1833 = vmatmul.msk.f32.gmra.mxu0 %vm256_vm0, %v239_v24 }
  0x97   : > { %v322_v26 = vpop.f32.mrf.mxu0 }
  0x98   : > { %v323_v27 = vadd.f32 %v1920_v25, %v322_v26 }
  0x9a   : > { %370 = vst [vmem:[#allocation2] sm:$0xff] %v323_v27  ;;  %v346_v35 = vpop.f32.mrf.mxu1 }
  0x9b   : > { %v347_v37 = vadd.f32 %v1920_v25, %v346_v35 }
  0x9d   : > { %378 = vst [vmem:[#allocation2 + $0x40] sm:$0xff] %v347_v37 }
  0x9e   : > { %v352_v29 = vpop.f32.mrf.mxu2  ;;  %v361_v32 = vpop.f32.mrf.mxu3 }
  0x9f   : > { %v325_v28 = vpop.f32.mrf.mxu0  ;;  %v353_v31 = vadd.f32 %v1920_v25, %v352_v29  ;;  %v362_v33 = vadd.f32 %v1920_v25, %v361_v32 }
  0xa0   : > { %v326_v30 = vadd.f32 %v1920_v25, %v325_v28 }
  0xa1   : > { %380 = vst [vmem:[#allocation2 + $0x50] sm:$0xff] %v353_v31 }
  0xa2   : > { %371 = vst [vmem:[#allocation2 + $0x8] sm:$0xff] %v326_v30  ;;  %v349_v43 = vpop.f32.mrf.mxu1 }
  0xa3   : > { %383 = vst [vmem:[#allocation2 + $0x68] sm:$0xff] %v362_v33  ;;  %v350_v45 = vadd.f32 %v1920_v25, %v349_v43 }
  0xa5   : > { %379 = vst [vmem:[#allocation2 + $0x48] sm:$0xff] %v350_v45 }
  0xa6   : > { %v355_v38 = vpop.f32.mrf.mxu2  ;;  %v364_v39 = vpop.f32.mrf.mxu3 }
  0xa7   : > { %v328_v34 = vpop.f32.mrf.mxu0  ;;  %v356_v40 = vadd.f32 %v1920_v25, %v355_v38  ;;  %v365_v41 = vadd.f32 %v1920_v25, %v364_v39 }
  0xa8   : > { %v329_v36 = vadd.f32 %v1920_v25, %v328_v34 }
  0xa9   : > { %381 = vst [vmem:[#allocation2 + $0x58] sm:$0xff] %v356_v40 }
  0xaa   : > { %372 = vst [vmem:[#allocation2 + $0x10] sm:$0xff] %v329_v36  ;;  %v416_v58 = vpop.f32.mrf.mxu1 }
  0xab   : > { %384 = vst [vmem:[#allocation2 + $0x70] sm:$0xff] %v365_v41 }
  0xae   : > { %v358_v46 = vpop.f32.mrf.mxu2  ;;  %v367_v47 = vpop.f32.mrf.mxu3 }
  0xaf   : > { %v331_v42 = vpop.f32.mrf.mxu0  ;;  %v359_v48 = vadd.f32 %v1920_v25, %v358_v46  ;;  %v368_v49 = vadd.f32 %v1920_v25, %v367_v47 }
  0xb0   : > { %v332_v44 = vadd.f32 %v1920_v25, %v331_v42 }
  0xb1   : > { %382 = vst [vmem:[#allocation2 + $0x60] sm:$0xff] %v359_v48 }
  0xb2   : > { %373 = vst [vmem:[#allocation2 + $0x18] sm:$0xff] %v332_v44 }
  0xb3   : > { %385 = vst [vmem:[#allocation2 + $0x78] sm:$0xff] %v368_v49 }
  0xb7   : > { %v334_v50 = vpop.f32.mrf.mxu0 }
  0xb8   : > { %v335_v51 = vadd.f32 %v1920_v25, %v334_v50 }
  0xba   : > { %374 = vst [vmem:[#allocation2 + $0x20] sm:$0xff] %v335_v51 }
  0xbf   : > { %v337_v52 = vpop.f32.mrf.mxu0 }
  0xc0   : > { %v338_v53 = vadd.f32 %v1920_v25, %v337_v52 }
  0xc2   : > { %375 = vst [vmem:[#allocation2 + $0x28] sm:$0xff] %v338_v53 }
  0xc7   : > { %v340_v54 = vpop.f32.mrf.mxu0 }
  0xc8   : > { %v341_v55 = vadd.f32 %v1920_v25, %v340_v54 }
  0xca   : > { %376 = vst [vmem:[#allocation2 + $0x30] sm:$0xff] %v341_v55 }
  0xcf   : > { %v343_v56 = vpop.f32.mrf.mxu0 }
  0xd0   : > { %v344_v57 = vadd.f32 %v1920_v25, %v343_v56 }
  0xd2   : > { %377 = vst [vmem:[#allocation2 + $0x38] sm:$0xff] %v344_v57 }
  0xd9   : > { %v391_v59 = vld [vmem:[%s390_s2] sm:$0xff]  ;;  %s2311_s2 = sshll.u32 %s463_s17, 3 }
  0xda   : > { %v419_v60 = vadd.f32 %v416_v58, %v391_v59  ;;  %s465_s16 = scalar_lea.vmem [#allocation2], %s2311_s2  ;;  %s535_s14 = scalar_lea.vmem %s2298_s5, %s2311_s2  ;;  %v541_v50 = vld [vmem:[%s540_s1] sm:$0xff] }
  0xdb   : > { %v466_v24 = vld [vmem:[%s465_s16] sm:$0xff]  ;;  %s1858_s2 = sshll.u32 %s2241_s28, 3  ;;  %s1864_s1 = sshll.u32 %s2249_s6, 3 }
  0xdc   : > { %1921 = vtanh.f32 %v419_v60  ;;  %v1843_v62 = vmul.f32 -1.442695, %v419_v60  ;;  %s765_s16 = scalar_lea.vmem [#allocation2], %s1858_s2  ;;  %s1060_s6 = scalar_lea.vmem %s2298_s5, %s1868_s18 }
  0xde   : > { %1923 = vpow2.f32 %v1843_v62 }
  0xe2   : > { %v1922_v61 = vpop.eup %1921 }
  0xe3   : > { %442 = vrot.lane.b32.xlu0 %v1922_v61, %s2058_s9 }
  0xe4   : > { %v1924_v63 = vpop.eup %1923 }
  0xe5   : > { %v423_v0 = vadd.f32 1.0, %v1924_v63 }
  0xe7   : > { %1925 = vrcp.f32 %v423_v0  ;;  %v435_v6 = vand.u32 2147483648, %v423_v0  ;;  %vm429_vm2 = vweird.f32 %v423_v0  ;;  %v433_v7 = vand.u32 2147483647, %v423_v0 }
  0xe9   : > { %v436_v9 = vor.u32 1.1754944e-38, %v435_v6  ;;  %vm434_vm4 = vcmp.eq.f32.partialorder %v433_v7, 8.507059e+37 }
  0xed   : > { %v1926_v1 = vpop.eup %1925 }
  0xee   : > { %v425_v2 = vmul.f32 %v1926_v1, %v423_v0  ;;  %vm430_vm1 = vweird.f32 %v1926_v1 }
  0xef   : > { %vm431_vm3 = vmor %vm429_vm2, %vm430_vm1 }
  0xf0   : > { %v426_v3 = vsub.f32 1.0, %v425_v2 }
  0xf2   : > { %v427_v4 = vmul.f32 %v1926_v1, %v426_v3 }
  0xf4   : > { %v428_v5 = vadd.f32 %v1926_v1, %v427_v4 }
  0xf6   : > { %v432_v8 = vsel %vm431_vm3, %v1926_v1, %v428_v5 }
  0xf7   : > { %v437_v11 = vsel %vm434_vm4, %v436_v9, %v432_v8 }
  0xf8   : > { %v440_v13 = vmul.f32 0.0, %v437_v11 }
 0x155   : > { %v443_v10 = vpop.permute.xlu0 %442 }
 0x156   : > { %v445_v12 = vmul.f32 %v443_v10, %v437_v11 }
 0x158   : > { %447 = vrot.lane.b32.xlu0 %v445_v12, %s2059_s11  ;;  %v616_v12 = vld [vmem:[%s615_s27] sm:$0xff]  ;;  %s990_s27 = scalar_lea.vmem [#allocation2], %s1868_s18 }
 0x1ca   : > { %v448_v16 = vpop.permute.xlu0 %447 }
 0x1cb   : > { %v450_v17 = vadd.f32 %v448_v16, %v440_v13 }
 0x1cd   : > { %1927 = vtanh.f32 %v450_v17 }
 0x1d3   : > { %v1928_v20 = vpop.eup %1927 }
 0x1d4   : > { %453 = vrot.lane.b32.xlu1 %v1928_v20, %s2058_s9 }
 0x246   : > { %v454_v21 = vpop.permute.xlu1 %453 }
 0x247   : > { %v456_v22 = vmul.f32 %v454_v21, %v437_v11 }
 0x249   : > { %458 = vrot.lane.b32.xlu1 %v456_v22, %s2059_s11 }
 0x2bb   : > { %v459_v23 = vpop.permute.xlu1 %458 }
 0x2bc   : > { %462 = vst.msk [vmem:[%s461_s8] sm:$0xff] %vm256_vm0, %v459_v23  ;;  %1845 = vmatmul.msk.f32.vlgmr.msrb.gmra.mxu2 %vm256_vm0, %v459_v23  ;;  %s1855_s8 = sshll.u32 %s2236_s25, 3  ;;  %s835_s25 = scalar_lea.vmem %s2298_s5, %s1858_s2 }
 0x2bd   : > { %935 = vmatpush.msrb.mxu2 %v2155_v14  ;;  %s690_s17 = scalar_lea.vmem [#allocation2], %s1855_s8  ;;  %s760_s24 = scalar_lea.vmem %s2298_s5, %s1855_s8 }
 0x2bf   : > { %936 = vmatpush.msrb.mxu2 %v2160_v15 }
 0x2c1   : > { %937 = vmatpush.msrb.mxu2 %v2177_v18 }
 0x2c3   : > { %938 = vmatpush.msrb.mxu2 %v2180_v19 }
 0x33f   : > { %v490_v25 = vpop.f32.mrf.mxu2 }
 0x340   : > { %v493_v26 = vadd.f32 %v490_v25, %v466_v24 }
 0x342   : > { %1929 = vtanh.f32 %v493_v26  ;;  %v1846_v28 = vmul.f32 -1.442695, %v493_v26 }
 0x344   : > { %1931 = vpow2.f32 %v1846_v28 }
 0x348   : > { %v1930_v27 = vpop.eup %1929 }
 0x349   : > { %516 = vrot.lane.b32.xlu2 %v1930_v27, %s2058_s9 }
 0x34a   : > { %v1932_v29 = vpop.eup %1931 }
 0x34b   : > { %v497_v30 = vadd.f32 1.0, %v1932_v29 }
 0x34d   : > { %1933 = vrcp.f32 %v497_v30  ;;  %v509_v36 = vand.u32 2147483648, %v497_v30  ;;  %vm503_vm6 = vweird.f32 %v497_v30  ;;  %v507_v37 = vand.u32 2147483647, %v497_v30 }
 0x34f   : > { %v510_v39 = vor.u32 1.1754944e-38, %v509_v36  ;;  %vm508_vm8 = vcmp.eq.f32.partialorder %v507_v37, 8.507059e+37 }
 0x353   : > { %v1934_v31 = vpop.eup %1933 }
 0x354   : > { %v499_v32 = vmul.f32 %v1934_v31, %v497_v30  ;;  %vm504_vm5 = vweird.f32 %v1934_v31 }
 0x355   : > { %vm505_vm7 = vmor %vm503_vm6, %vm504_vm5 }
 0x356   : > { %v500_v33 = vsub.f32 1.0, %v499_v32 }
 0x358   : > { %v501_v34 = vmul.f32 %v1934_v31, %v500_v33 }
 0x35a   : > { %v502_v35 = vadd.f32 %v1934_v31, %v501_v34 }
 0x35c   : > { %v506_v38 = vsel %vm505_vm7, %v1934_v31, %v502_v35 }
 0x35d   : > { %v511_v41 = vsel %vm508_vm8, %v510_v39, %v506_v38  ;;  %v691_v38 = vld [vmem:[%s690_s17] sm:$0xff]  ;;  %s1140_s17 = scalar_lea.vmem [#allocation2], %s1874_s7 }
 0x35e   : > { %v514_v43 = vmul.f32 %v511_v41, %v450_v17 }
 0x3a3   : > { %v517_v40 = vpop.permute.xlu2 %516 }
 0x3a4   : > { %v519_v42 = vmul.f32 %v517_v40, %v511_v41 }
 0x3a6   : > { %521 = vrot.lane.b32.xlu2 %v519_v42, %s2059_s11 }
 0x400   : > { %v522_v44 = vpop.permute.xlu2 %521 }
 0x401   : > { %v524_v45 = vadd.f32 %v522_v44, %v514_v43 }
 0x403   : > { %1935 = vtanh.f32 %v524_v45 }
 0x409   : > { %v1936_v46 = vpop.eup %1935 }
 0x40a   : > { %527 = vrot.lane.b32.xlu0 %v1936_v46, %s2058_s9 }
 0x47c   : > { %v528_v47 = vpop.permute.xlu0 %527 }
 0x47d   : > { %v530_v48 = vmul.f32 %v528_v47, %v511_v41 }
 0x47f   : > { %532 = vrot.lane.b32.xlu1 %v530_v48, %s2059_s11 }
 0x4f1   : > { %v533_v49 = vpop.permute.xlu1 %532 }
 0x4f2   : > { %536 = vst.msk [vmem:[%s535_s14] sm:$0xff] %vm256_vm0, %v533_v49  ;;  %1849 = vmatmul.msk.f32.vlgmr.msrb.gmra.mxu3 %vm256_vm0, %v533_v49  ;;  %s1861_s14 = sshll.u32 %s2245_s30, 3  ;;  %s985_s30 = scalar_lea.vmem %s2298_s5, %s1864_s1 }
 0x4f3   : > { %1010 = vmatpush.msrb.mxu3 %v2155_v14  ;;  %s840_s19 = scalar_lea.vmem [#allocation2], %s1861_s14  ;;  %s910_s28 = scalar_lea.vmem %s2298_s5, %s1861_s14 }
 0x4f4   : > { %s1883_s14 = sshll.u32 %s2273_s21, 3 }
 0x4f5   : > { %1011 = vmatpush.msrb.mxu3 %v2160_v15 }
 0x4f7   : > { %1012 = vmatpush.msrb.mxu3 %v2177_v18 }
 0x4f9   : > { %1013 = vmatpush.msrb.mxu3 %v2180_v19 }
 0x575   : > { %v565_v51 = vpop.f32.mrf.mxu3 }
 0x576   : > { %v568_v52 = vadd.f32 %v565_v51, %v541_v50 }
 0x578   : > { %1937 = vtanh.f32 %v568_v52  ;;  %v1850_v54 = vmul.f32 -1.442695, %v568_v52 }
 0x57a   : > { %1939 = vpow2.f32 %v1850_v54 }
 0x57e   : > { %v1938_v53 = vpop.eup %1937 }
 0x57f   : > { %591 = vrot.lane.b32.xlu2 %v1938_v53, %s2058_s9 }
 0x580   : > { %v1940_v55 = vpop.eup %1939 }
 0x581   : > { %v572_v56 = vadd.f32 1.0, %v1940_v55 }
 0x583   : > { %1941 = vrcp.f32 %v572_v56  ;;  %v584_v62 = vand.u32 2147483648, %v572_v56  ;;  %vm578_vm10 = vweird.f32 %v572_v56  ;;  %v582_v63 = vand.u32 2147483647, %v572_v56 }
 0x585   : > { %v585_v1 = vor.u32 1.1754944e-38, %v584_v62  ;;  %vm583_vm12 = vcmp.eq.f32.partialorder %v582_v63, 8.507059e+37 }
 0x589   : > { %v1942_v57 = vpop.eup %1941 }
 0x58a   : > { %v574_v58 = vmul.f32 %v1942_v57, %v572_v56  ;;  %vm579_vm9 = vweird.f32 %v1942_v57 }
 0x58b   : > { %vm580_vm11 = vmor %vm578_vm10, %vm579_vm9 }
 0x58c   : > { %v575_v59 = vsub.f32 1.0, %v574_v58 }
 0x58e   : > { %v576_v60 = vmul.f32 %v1942_v57, %v575_v59 }
 0x590   : > { %v577_v61 = vadd.f32 %v1942_v57, %v576_v60 }
 0x592   : > { %v581_v0 = vsel %vm580_vm11, %v1942_v57, %v577_v61 }
 0x593   : > { %v586_v3 = vsel %vm583_vm12, %v585_v1, %v581_v0  ;;  %v766_v0 = vld [vmem:[%s765_s16] sm:$0xff]  ;;  %s1880_s16 = sshll.u32 %s2269_s26, 3  ;;  %s1435_s26 = scalar_lea.vmem %s2298_s5, %s1883_s14 }
 0x594   : > { %v589_v5 = vmul.f32 %v586_v3, %v524_v45 }
 0x5d9   : > { %v592_v2 = vpop.permute.xlu2 %591 }
 0x5da   : > { %v594_v4 = vmul.f32 %v592_v2, %v586_v3 }
 0x5dc   : > { %596 = vrot.lane.b32.xlu0 %v594_v4, %s2059_s11 }
 0x64e   : > { %v597_v6 = vpop.permute.xlu0 %596 }
 0x64f   : > { %v599_v7 = vadd.f32 %v597_v6, %v589_v5 }
 0x651   : > { %1943 = vtanh.f32 %v599_v7 }
 0x657   : > { %v1944_v8 = vpop.eup %1943 }
 0x658   : > { %602 = vrot.lane.b32.xlu1 %v1944_v8, %s2058_s9 }
 0x6ca   : > { %v603_v9 = vpop.permute.xlu1 %602 }
 0x6cb   : > { %v605_v10 = vmul.f32 %v603_v9, %v586_v3 }
 0x6cd   : > { %607 = vrot.lane.b32.xlu2 %v605_v10, %s2059_s11 }
 0x727   : > { %v608_v11 = vpop.permute.xlu2 %607 }
 0x728   : > { %611 = vst.msk [vmem:[%s610_s22] sm:$0xff] %vm256_vm0, %v608_v11  ;;  %1852 = vmatmul.msk.f32.vlgmr.msra.gmra.mxu1 %vm256_vm0, %v608_v11  ;;  %s915_s22 = scalar_lea.vmem [#allocation2], %s1864_s1 }
 0x729   : > { %1085 = vmatpush.msra.mxu1 %v2155_v14 }
 0x72b   : > { %1086 = vmatpush.msra.mxu1 %v2160_v15 }
 0x72d   : > { %1087 = vmatpush.msra.mxu1 %v2177_v18 }
 0x72f   : > { %1088 = vmatpush.msra.mxu1 %v2180_v19 }
 0x7a5   : > { %v640_v13 = vpop.f32.mrf.mxu1 }
 0x7a6   : > { %v643_v16 = vadd.f32 %v640_v13, %v616_v12 }
 0x7a8   : > { %1945 = vtanh.f32 %v643_v16  ;;  %v1853_v20 = vmul.f32 -1.442695, %v643_v16 }
 0x7aa   : > { %1947 = vpow2.f32 %v1853_v20 }
 0x7ae   : > { %v1946_v17 = vpop.eup %1945 }
 0x7af   : > { %666 = vrot.lane.b32.xlu0 %v1946_v17, %s2058_s9 }
 0x7b0   : > { %v1948_v21 = vpop.eup %1947 }
 0x7b1   : > { %v647_v14 = vadd.f32 1.0, %v1948_v21 }
 0x7b3   : > { %1949 = vrcp.f32 %v647_v14  ;;  %v659_v24 = vand.u32 2147483648, %v647_v14  ;;  %vm653_vm14 = vweird.f32 %v647_v14  ;;  %v657_v25 = vand.u32 2147483647, %v647_v14 }
 0x7b5   : > { %v660_v27 = vor.u32 1.1754944e-38, %v659_v24  ;;  %vm658_vm1 = vcmp.eq.f32.partialorder %v657_v25, 8.507059e+37 }
 0x7b9   : > { %v1950_v15 = vpop.eup %1949 }
 0x7ba   : > { %v649_v22 = vmul.f32 %v1950_v15, %v647_v14  ;;  %vm654_vm13 = vweird.f32 %v1950_v15 }
 0x7bb   : > { %vm655_vm15 = vmor %vm653_vm14, %vm654_vm13 }
 0x7bc   : > { %v650_v18 = vsub.f32 1.0, %v649_v22 }
 0x7be   : > { %v651_v23 = vmul.f32 %v1950_v15, %v650_v18 }
 0x7c0   : > { %v652_v19 = vadd.f32 %v1950_v15, %v651_v23 }
 0x7c2   : > { %v656_v26 = vsel %vm655_vm15, %v1950_v15, %v652_v19 }
 0x7c3   : > { %v661_v29 = vsel %vm658_vm1, %v660_v27, %v656_v26  ;;  %v841_v26 = vld [vmem:[%s840_s19] sm:$0xff]  ;;  %s1365_s19 = scalar_lea.vmem [#allocation2], %s1883_s14 }
 0x7c4   : > { %v664_v31 = vmul.f32 %v661_v29, %v599_v7 }
 0x821   : > { %v667_v28 = vpop.permute.xlu0 %666 }
 0x822   : > { %v669_v30 = vmul.f32 %v667_v28, %v661_v29 }
 0x824   : > { %671 = vrot.lane.b32.xlu1 %v669_v30, %s2059_s11 }
 0x896   : > { %v672_v32 = vpop.permute.xlu1 %671 }
 0x897   : > { %v674_v33 = vadd.f32 %v672_v32, %v664_v31 }
 0x899   : > { %1951 = vtanh.f32 %v674_v33 }
 0x89f   : > { %v1952_v34 = vpop.eup %1951 }
 0x8a0   : > { %677 = vrot.lane.b32.xlu2 %v1952_v34, %s2058_s9 }
 0x8fa   : > { %v678_v35 = vpop.permute.xlu2 %677 }
 0x8fb   : > { %v680_v36 = vmul.f32 %v678_v35, %v661_v29 }
 0x8fd   : > { %682 = vrot.lane.b32.xlu0 %v680_v36, %s2059_s11 }
 0x96f   : > { %v683_v37 = vpop.permute.xlu0 %682 }
 0x970   : > { %686 = vst.msk [vmem:[%s685_s23] sm:$0xff] %vm256_vm0, %v683_v37  ;;  %1856 = vmatmul.msk.f32.vlgmr.msra.gmra.mxu2 %vm256_vm0, %v683_v37  ;;  %s1871_s23 = sshll.u32 %s2257_s10, 3  ;;  %s1210_s10 = scalar_lea.vmem %s2298_s5, %s1874_s7 }
 0x971   : > { %s1065_s8 = scalar_lea.vmem [#allocation2], %s1871_s23 }
 0x9f3   : > { %v715_v39 = vpop.f32.mrf.mxu2 }
 0x9f4   : > { %v718_v40 = vadd.f32 %v715_v39, %v691_v38 }
 0x9f6   : > { %1953 = vtanh.f32 %v718_v40  ;;  %v1857_v42 = vmul.f32 -1.442695, %v718_v40 }
 0x9f8   : > { %1955 = vpow2.f32 %v1857_v42 }
 0x9fc   : > { %v1954_v41 = vpop.eup %1953 }
 0x9fd   : > { %741 = vrot.lane.b32.xlu1 %v1954_v41, %s2058_s9 }
 0x9fe   : > { %v1956_v43 = vpop.eup %1955 }
 0x9ff   : > { %v722_v44 = vadd.f32 1.0, %v1956_v43 }
 0xa01   : > { %1957 = vrcp.f32 %v722_v44  ;;  %v734_v50 = vand.u32 2147483648, %v722_v44  ;;  %vm728_vm3 = vweird.f32 %v722_v44  ;;  %v732_v51 = vand.u32 2147483647, %v722_v44 }
 0xa03   : > { %v735_v53 = vor.u32 1.1754944e-38, %v734_v50  ;;  %vm733_vm5 = vcmp.eq.f32.partialorder %v732_v51, 8.507059e+37 }
 0xa07   : > { %v1958_v45 = vpop.eup %1957 }
 0xa08   : > { %v724_v46 = vmul.f32 %v1958_v45, %v722_v44  ;;  %vm729_vm2 = vweird.f32 %v1958_v45 }
 0xa09   : > { %vm730_vm4 = vmor %vm728_vm3, %vm729_vm2 }
 0xa0a   : > { %v725_v47 = vsub.f32 1.0, %v724_v46 }
 0xa0c   : > { %v726_v48 = vmul.f32 %v1958_v45, %v725_v47 }
 0xa0e   : > { %v727_v49 = vadd.f32 %v1958_v45, %v726_v48 }
 0xa10   : > { %v731_v52 = vsel %vm730_vm4, %v1958_v45, %v727_v49 }
 0xa11   : > { %v736_v55 = vsel %vm733_vm5, %v735_v53, %v731_v52  ;;  %v916_v52 = vld [vmem:[%s915_s22] sm:$0xff]  ;;  %s1889_s22 = sshll.u32 %s2280_s0, 3 }
 0xa12   : > { %v739_v57 = vmul.f32 %v736_v55, %v674_v33 }
 0xa6f   : > { %v742_v54 = vpop.permute.xlu1 %741 }
 0xa70   : > { %v744_v56 = vmul.f32 %v742_v54, %v736_v55 }
 0xa72   : > { %746 = vrot.lane.b32.xlu2 %v744_v56, %s2059_s11 }
 0xacc   : > { %v747_v58 = vpop.permute.xlu2 %746 }
 0xacd   : > { %v749_v59 = vadd.f32 %v747_v58, %v739_v57 }
 0xacf   : > { %1959 = vtanh.f32 %v749_v59 }
 0xad5   : > { %v1960_v60 = vpop.eup %1959 }
 0xad6   : > { %752 = vrot.lane.b32.xlu0 %v1960_v60, %s2058_s9 }
 0xb48   : > { %v753_v61 = vpop.permute.xlu0 %752 }
 0xb49   : > { %v755_v62 = vmul.f32 %v753_v61, %v736_v55 }
 0xb4b   : > { %757 = vrot.lane.b32.xlu1 %v755_v62, %s2059_s11 }
 0xbbd   : > { %v758_v63 = vpop.permute.xlu1 %757 }
 0xbbe   : > { %761 = vst.msk [vmem:[%s760_s24] sm:$0xff] %vm256_vm0, %v758_v63  ;;  %1859 = vmatmul.msk.f32.vlgmr.msra.gmra.mxu3 %vm256_vm0, %v758_v63  ;;  %s1877_s24 = sshll.u32 %s2264_s20, 3  ;;  %s1360_s20 = scalar_lea.vmem %s2298_s5, %s1880_s16 }
 0xbbf   : > { %s1215_s2 = scalar_lea.vmem [#allocation2], %s1877_s24  ;;  %s1285_s12 = scalar_lea.vmem %s2298_s5, %s1877_s24 }
 0xc41   : > { %v790_v1 = vpop.f32.mrf.mxu3 }
 0xc42   : > { %v793_v2 = vadd.f32 %v790_v1, %v766_v0 }
 0xc44   : > { %1961 = vtanh.f32 %v793_v2  ;;  %v1860_v4 = vmul.f32 -1.442695, %v793_v2 }
 0xc46   : > { %1963 = vpow2.f32 %v1860_v4 }
 0xc4a   : > { %v1962_v3 = vpop.eup %1961 }
 0xc4b   : > { %816 = vrot.lane.b32.xlu2 %v1962_v3, %s2058_s9 }
 0xc4c   : > { %v1964_v5 = vpop.eup %1963 }
 0xc4d   : > { %v797_v6 = vadd.f32 1.0, %v1964_v5 }
 0xc4f   : > { %1965 = vrcp.f32 %v797_v6  ;;  %v809_v12 = vand.u32 2147483648, %v797_v6  ;;  %vm803_vm7 = vweird.f32 %v797_v6  ;;  %v807_v13 = vand.u32 2147483647, %v797_v6 }
 0xc51   : > { %v810_v17 = vor.u32 1.1754944e-38, %v809_v12  ;;  %vm808_vm9 = vcmp.eq.f32.partialorder %v807_v13, 8.507059e+37 }
 0xc55   : > { %v1966_v7 = vpop.eup %1965 }
 0xc56   : > { %v799_v8 = vmul.f32 %v1966_v7, %v797_v6  ;;  %vm804_vm6 = vweird.f32 %v1966_v7 }
 0xc57   : > { %vm805_vm8 = vmor %vm803_vm7, %vm804_vm6 }
 0xc58   : > { %v800_v9 = vsub.f32 1.0, %v799_v8 }
 0xc5a   : > { %v801_v10 = vmul.f32 %v1966_v7, %v800_v9 }
 0xc5c   : > { %v802_v11 = vadd.f32 %v1966_v7, %v801_v10 }
 0xc5e   : > { %v806_v16 = vsel %vm805_vm8, %v1966_v7, %v802_v11 }
 0xc5f   : > { %v811_v21 = vsel %vm808_vm9, %v810_v17, %v806_v16  ;;  %v991_v16 = vld [vmem:[%s990_s27] sm:$0xff] }
 0xc60   : > { %v814_v15 = vmul.f32 %v811_v21, %v749_v59 }
 0xca5   : > { %v817_v20 = vpop.permute.xlu2 %816 }
 0xca6   : > { %v819_v14 = vmul.f32 %v817_v20, %v811_v21 }
 0xca8   : > { %821 = vrot.lane.b32.xlu0 %v819_v14, %s2059_s11 }
 0xd1a   : > { %v822_v22 = vpop.permute.xlu0 %821 }
 0xd1b   : > { %v824_v18 = vadd.f32 %v822_v22, %v814_v15 }
 0xd1d   : > { %1967 = vtanh.f32 %v824_v18 }
 0xd23   : > { %v1968_v23 = vpop.eup %1967 }
 0xd24   : > { %827 = vrot.lane.b32.xlu1 %v1968_v23, %s2058_s9 }
 0xd96   : > { %v828_v19 = vpop.permute.xlu1 %827 }
 0xd97   : > { %v830_v24 = vmul.f32 %v828_v19, %v811_v21 }
 0xd99   : > { %832 = vrot.lane.b32.xlu2 %v830_v24, %s2059_s11 }
 0xdf3   : > { %v833_v25 = vpop.permute.xlu2 %832 }
 0xdf4   : > { %836 = vst.msk [vmem:[%s835_s25] sm:$0xff] %vm256_vm0, %v833_v25  ;;  %1862 = vmatmul.msk.f32.vlgmr.msrb.gmra.mxu1 %vm256_vm0, %v833_v25  ;;  %s1290_s25 = scalar_lea.vmem [#allocation2], %s1880_s16 }
 0xe71   : > { %v865_v27 = vpop.f32.mrf.mxu1 }
 0xe72   : > { %v868_v28 = vadd.f32 %v865_v27, %v841_v26 }
 0xe74   : > { %1969 = vtanh.f32 %v868_v28  ;;  %v1863_v30 = vmul.f32 -1.442695, %v868_v28 }
 0xe76   : > { %1971 = vpow2.f32 %v1863_v30 }
 0xe7a   : > { %v1970_v29 = vpop.eup %1969 }
 0xe7b   : > { %891 = vrot.lane.b32.xlu0 %v1970_v29, %s2058_s9 }
 0xe7c   : > { %v1972_v31 = vpop.eup %1971 }
 0xe7d   : > { %v872_v32 = vadd.f32 1.0, %v1972_v31 }
 0xe7f   : > { %1973 = vrcp.f32 %v872_v32  ;;  %v884_v38 = vand.u32 2147483648, %v872_v32  ;;  %vm878_vm11 = vweird.f32 %v872_v32  ;;  %v882_v39 = vand.u32 2147483647, %v872_v32 }
 0xe81   : > { %v885_v41 = vor.u32 1.1754944e-38, %v884_v38  ;;  %vm883_vm13 = vcmp.eq.f32.partialorder %v882_v39, 8.507059e+37 }
 0xe85   : > { %v1974_v33 = vpop.eup %1973 }
 0xe86   : > { %v874_v34 = vmul.f32 %v1974_v33, %v872_v32  ;;  %vm879_vm10 = vweird.f32 %v1974_v33 }
 0xe87   : > { %vm880_vm12 = vmor %vm878_vm11, %vm879_vm10 }
 0xe88   : > { %v875_v35 = vsub.f32 1.0, %v874_v34 }
 0xe8a   : > { %v876_v36 = vmul.f32 %v1974_v33, %v875_v35 }
 0xe8c   : > { %v877_v37 = vadd.f32 %v1974_v33, %v876_v36 }
 0xe8e   : > { %v881_v40 = vsel %vm880_vm12, %v1974_v33, %v877_v37 }
 0xe8f   : > { %v886_v43 = vsel %vm883_vm13, %v885_v41, %v881_v40  ;;  %v1066_v40 = vld [vmem:[%s1065_s8] sm:$0xff] }
 0xe90   : > { %v889_v45 = vmul.f32 %v886_v43, %v824_v18 }
 0xeed   : > { %v892_v42 = vpop.permute.xlu0 %891 }
 0xeee   : > { %v894_v44 = vmul.f32 %v892_v42, %v886_v43 }
 0xef0   : > { %896 = vrot.lane.b32.xlu1 %v894_v44, %s2059_s11 }
 0xf62   : > { %v897_v46 = vpop.permute.xlu1 %896 }
 0xf63   : > { %v899_v47 = vadd.f32 %v897_v46, %v889_v45 }
 0xf65   : > { %1975 = vtanh.f32 %v899_v47 }
 0xf6b   : > { %v1976_v48 = vpop.eup %1975 }
 0xf6c   : > { %902 = vrot.lane.b32.xlu2 %v1976_v48, %s2058_s9 }
 0xfc6   : > { %v903_v49 = vpop.permute.xlu2 %902 }
 0xfc7   : > { %v905_v50 = vmul.f32 %v903_v49, %v886_v43 }
 0xfc9   : > { %907 = vrot.lane.b32.xlu0 %v905_v50, %s2059_s11 }
0x103b   : > { %v908_v51 = vpop.permute.xlu0 %907 }
0x103c   : > { %911 = vst.msk [vmem:[%s910_s28] sm:$0xff] %vm256_vm0, %v908_v51  ;;  %1865 = vmatmul.msk.f32.vlgmr.msrb.gmra.mxu2 %vm256_vm0, %v908_v51  ;;  %s1886_s28 = sshll.u32 %s2276_s29, 3  ;;  %s1585_s29 = scalar_lea.vmem %s2298_s5, %s1889_s22 }
0x103d   : > { %s1440_s1 = scalar_lea.vmem [#allocation2], %s1886_s28  ;;  %s1510_s21 = scalar_lea.vmem %s2298_s5, %s1886_s28 }
0x10bf   : > { %v940_v53 = vpop.f32.mrf.mxu2 }
0x10c0   : > { %v943_v54 = vadd.f32 %v940_v53, %v916_v52 }
0x10c2   : > { %1977 = vtanh.f32 %v943_v54  ;;  %v1866_v56 = vmul.f32 -1.442695, %v943_v54 }
0x10c4   : > { %1979 = vpow2.f32 %v1866_v56 }
0x10c8   : > { %v1978_v55 = vpop.eup %1977 }
0x10c9   : > { %966 = vrot.lane.b32.xlu1 %v1978_v55, %s2058_s9 }
0x10ca   : > { %v1980_v57 = vpop.eup %1979 }
0x10cb   : > { %v947_v58 = vadd.f32 1.0, %v1980_v57 }
0x10cd   : > { %1981 = vrcp.f32 %v947_v58  ;;  %v959_v0 = vand.u32 2147483648, %v947_v58  ;;  %vm953_vm15 = vweird.f32 %v947_v58  ;;  %v957_v1 = vand.u32 2147483647, %v947_v58 }
0x10cf   : > { %v960_v3 = vor.u32 1.1754944e-38, %v959_v0  ;;  %vm958_vm2 = vcmp.eq.f32.partialorder %v957_v1, 8.507059e+37  ;;  %v1144_v0 = vld [vmem:[%s2138_s13 + $0x10] sm:$0xff]  ;;  %v1143_v1 = vld [vmem:[%s2138_s13 + $0x8] sm:$0xff] }
0x10d3   : > { %v1982_v59 = vpop.eup %1981 }
0x10d4   : > { %v949_v60 = vmul.f32 %v1982_v59, %v947_v58  ;;  %vm954_vm14 = vweird.f32 %v1982_v59 }
0x10d5   : > { %vm955_vm1 = vmor %vm953_vm15, %vm954_vm14 }
0x10d6   : > { %v950_v61 = vsub.f32 1.0, %v949_v60 }
0x10d8   : > { %v951_v62 = vmul.f32 %v1982_v59, %v950_v61 }
0x10da   : > { %v952_v63 = vadd.f32 %v1982_v59, %v951_v62 }
0x10dc   : > { %v956_v2 = vsel %vm955_vm1, %v1982_v59, %v952_v63  ;;  %v1145_v63 = vld [vmem:[%s2138_s13 + $0x18] sm:$0xff] }
0x10dd   : > { %v961_v5 = vsel %vm958_vm2, %v960_v3, %v956_v2  ;;  %1160 = vmatpush.msra.mxu2 %v1145_v63  ;;  %1235 = vmatpush.msra.mxu3 %v1145_v63  ;;  %v1142_v2 = vld [vmem:[%s2138_s13] sm:$0xff]  ;;  %s1135_s13 = scalar_lea.vmem %s2298_s5, %s1871_s23 }
0x10de   : > { %v964_v7 = vmul.f32 %v961_v5, %v899_v47  ;;  %1310 = vmatpush.msrb.mxu1 %v1145_v63 }
0x10df   : > { %1161 = vmatpush.msra.mxu2 %v1144_v0  ;;  %1236 = vmatpush.msra.mxu3 %v1144_v0 }
0x10e0   : > { %1311 = vmatpush.msrb.mxu1 %v1144_v0 }
0x10e1   : > { %1162 = vmatpush.msra.mxu2 %v1143_v1  ;;  %1237 = vmatpush.msra.mxu3 %v1143_v1 }
0x10e2   : > { %1312 = vmatpush.msrb.mxu1 %v1143_v1 }
0x10e3   : > { %1163 = vmatpush.msra.mxu2 %v1142_v2  ;;  %1238 = vmatpush.msra.mxu3 %v1142_v2 }
0x10e4   : > { %1313 = vmatpush.msrb.mxu1 %v1142_v2 }
0x10e5   : > { %1385 = vmatpush.msrb.mxu2 %v1145_v63 }
0x10e7   : > { %1386 = vmatpush.msrb.mxu2 %v1144_v0 }
0x10e9   : > { %1387 = vmatpush.msrb.mxu2 %v1143_v1 }
0x10eb   : > { %1388 = vmatpush.msrb.mxu2 %v1142_v2 }
0x113b   : > { %v967_v4 = vpop.permute.xlu1 %966 }
0x113c   : > { %v969_v6 = vmul.f32 %v967_v4, %v961_v5 }
0x113e   : > { %971 = vrot.lane.b32.xlu2 %v969_v6, %s2059_s11  ;;  %v1141_v6 = vld [vmem:[%s1140_s17] sm:$0xff] }
0x1198   : > { %v972_v8 = vpop.permute.xlu2 %971 }
0x1199   : > { %v974_v9 = vadd.f32 %v972_v8, %v964_v7 }
0x119b   : > { %1983 = vtanh.f32 %v974_v9 }
0x11a1   : > { %v1984_v10 = vpop.eup %1983 }
0x11a2   : > { %977 = vrot.lane.b32.xlu0 %v1984_v10, %s2058_s9 }
0x1214   : > { %v978_v11 = vpop.permute.xlu0 %977 }
0x1215   : > { %v980_v12 = vmul.f32 %v978_v11, %v961_v5 }
0x1217   : > { %982 = vrot.lane.b32.xlu1 %v980_v12, %s2059_s11 }
0x1289   : > { %v983_v13 = vpop.permute.xlu1 %982 }
0x128a   : > { %986 = vst.msk [vmem:[%s985_s30] sm:$0xff] %vm256_vm0, %v983_v13  ;;  %1869 = vmatmul.msk.f32.vlgmr.msrb.gmra.mxu3 %vm256_vm0, %v983_v13  ;;  %s1515_s30 = scalar_lea.vmem [#allocation2], %s1889_s22 }
0x128b   : > { %1460 = vmatpush.msrb.mxu3 %v1145_v63 }
0x128d   : > { %1461 = vmatpush.msrb.mxu3 %v1144_v0 }
0x128f   : > { %1462 = vmatpush.msrb.mxu3 %v1143_v1 }
0x1291   : > { %1463 = vmatpush.msrb.mxu3 %v1142_v2 }
0x130d   : > { %v1015_v17 = vpop.f32.mrf.mxu3 }
0x130e   : > { %v1018_v20 = vadd.f32 %v1015_v17, %v991_v16 }
0x1310   : > { %1985 = vtanh.f32 %v1018_v20  ;;  %v1870_v14 = vmul.f32 -1.442695, %v1018_v20 }
0x1312   : > { %1987 = vpow2.f32 %v1870_v14 }
0x1316   : > { %v1986_v21 = vpop.eup %1985 }
0x1317   : > { %1041 = vrot.lane.b32.xlu2 %v1986_v21, %s2058_s9 }
0x1318   : > { %v1988_v15 = vpop.eup %1987 }
0x1319   : > { %v1022_v22 = vadd.f32 1.0, %v1988_v15 }
0x131b   : > { %1989 = vrcp.f32 %v1022_v22  ;;  %v1034_v26 = vand.u32 2147483648, %v1022_v22  ;;  %vm1028_vm4 = vweird.f32 %v1022_v22  ;;  %v1032_v27 = vand.u32 2147483647, %v1022_v22 }
0x131d   : > { %v1035_v29 = vor.u32 1.1754944e-38, %v1034_v26  ;;  %vm1033_vm6 = vcmp.eq.f32.partialorder %v1032_v27, 8.507059e+37 }
0x1321   : > { %v1990_v18 = vpop.eup %1989 }
0x1322   : > { %v1024_v23 = vmul.f32 %v1990_v18, %v1022_v22  ;;  %vm1029_vm3 = vweird.f32 %v1990_v18 }
0x1323   : > { %vm1030_vm5 = vmor %vm1028_vm4, %vm1029_vm3 }
0x1324   : > { %v1025_v19 = vsub.f32 1.0, %v1024_v23 }
0x1326   : > { %v1026_v24 = vmul.f32 %v1990_v18, %v1025_v19 }
0x1328   : > { %v1027_v25 = vadd.f32 %v1990_v18, %v1026_v24 }
0x132a   : > { %v1031_v28 = vsel %vm1030_vm5, %v1990_v18, %v1027_v25 }
0x132b   : > { %v1036_v31 = vsel %vm1033_vm6, %v1035_v29, %v1031_v28 }
0x132c   : > { %v1039_v33 = vmul.f32 %v1036_v31, %v974_v9 }
0x1371   : > { %v1042_v30 = vpop.permute.xlu2 %1041 }
0x1372   : > { %v1044_v32 = vmul.f32 %v1042_v30, %v1036_v31 }
0x1374   : > { %1046 = vrot.lane.b32.xlu0 %v1044_v32, %s2059_s11  ;;  %v1216_v32 = vld [vmem:[%s1215_s2] sm:$0xff] }
0x13e6   : > { %v1047_v34 = vpop.permute.xlu0 %1046 }
0x13e7   : > { %v1049_v35 = vadd.f32 %v1047_v34, %v1039_v33 }
0x13e9   : > { %1991 = vtanh.f32 %v1049_v35 }
0x13ef   : > { %v1992_v36 = vpop.eup %1991 }
0x13f0   : > { %1052 = vrot.lane.b32.xlu1 %v1992_v36, %s2058_s9 }
0x1462   : > { %v1053_v37 = vpop.permute.xlu1 %1052 }
0x1463   : > { %v1055_v38 = vmul.f32 %v1053_v37, %v1036_v31 }
0x1465   : > { %1057 = vrot.lane.b32.xlu2 %v1055_v38, %s2059_s11 }
0x14bf   : > { %v1058_v39 = vpop.permute.xlu2 %1057 }
0x14c0   : > { %1061 = vst.msk [vmem:[%s1060_s6] sm:$0xff] %vm256_vm0, %v1058_v39  ;;  %1872 = vmatmul.msk.f32.vlgmr.msra.gmra.mxu1 %vm256_vm0, %v1058_v39 }
0x14c1   : > { %1535 = vmatpush.msra.mxu1 %v1145_v63 }
0x14c3   : > { %1536 = vmatpush.msra.mxu1 %v1144_v0 }
0x14c5   : > { %1537 = vmatpush.msra.mxu1 %v1143_v1 }
0x14c7   : > { %1538 = vmatpush.msra.mxu1 %v1142_v2 }
0x153d   : > { %v1090_v41 = vpop.f32.mrf.mxu1 }
0x153e   : > { %v1093_v42 = vadd.f32 %v1090_v41, %v1066_v40 }
0x1540   : > { %1993 = vtanh.f32 %v1093_v42  ;;  %v1873_v44 = vmul.f32 -1.442695, %v1093_v42 }
0x1542   : > { %1995 = vpow2.f32 %v1873_v44 }
0x1546   : > { %v1994_v43 = vpop.eup %1993 }
0x1547   : > { %1116 = vrot.lane.b32.xlu0 %v1994_v43, %s2058_s9 }
0x1548   : > { %v1996_v45 = vpop.eup %1995 }
0x1549   : > { %v1097_v46 = vadd.f32 1.0, %v1996_v45 }
0x154b   : > { %1997 = vrcp.f32 %v1097_v46  ;;  %v1109_v52 = vand.u32 2147483648, %v1097_v46  ;;  %vm1103_vm8 = vweird.f32 %v1097_v46  ;;  %v1107_v53 = vand.u32 2147483647, %v1097_v46 }
0x154d   : > { %v1110_v55 = vor.u32 1.1754944e-38, %v1109_v52  ;;  %vm1108_vm10 = vcmp.eq.f32.partialorder %v1107_v53, 8.507059e+37 }
0x1551   : > { %v1998_v47 = vpop.eup %1997 }
0x1552   : > { %v1099_v48 = vmul.f32 %v1998_v47, %v1097_v46  ;;  %vm1104_vm7 = vweird.f32 %v1998_v47 }
0x1553   : > { %vm1105_vm9 = vmor %vm1103_vm8, %vm1104_vm7 }
0x1554   : > { %v1100_v49 = vsub.f32 1.0, %v1099_v48 }
0x1556   : > { %v1101_v50 = vmul.f32 %v1998_v47, %v1100_v49 }
0x1558   : > { %v1102_v51 = vadd.f32 %v1998_v47, %v1101_v50 }
0x155a   : > { %v1106_v54 = vsel %vm1105_vm9, %v1998_v47, %v1102_v51 }
0x155b   : > { %v1111_v57 = vsel %vm1108_vm10, %v1110_v55, %v1106_v54 }
0x155c   : > { %v1114_v59 = vmul.f32 %v1111_v57, %v1049_v35 }
0x15b9   : > { %v1117_v56 = vpop.permute.xlu0 %1116 }
0x15ba   : > { %v1119_v58 = vmul.f32 %v1117_v56, %v1111_v57 }
0x15bc   : > { %1121 = vrot.lane.b32.xlu1 %v1119_v58, %s2059_s11  ;;  %v1291_v58 = vld [vmem:[%s1290_s25] sm:$0xff] }
0x162e   : > { %v1122_v60 = vpop.permute.xlu1 %1121 }
0x162f   : > { %v2419_v61 = vadd.f32 %v1122_v60, %v1114_v59 }
0x1631   : > { %1999 = vtanh.f32 %v2419_v61 }
0x1637   : > { %v2000_v62 = vpop.eup %1999 }
0x1638   : > { %1127 = vrot.lane.b32.xlu2 %v2000_v62, %s2058_s9 }
0x1692   : > { %v1128_v3 = vpop.permute.xlu2 %1127 }
0x1693   : > { %v1130_v4 = vmul.f32 %v1128_v3, %v1111_v57 }
0x1695   : > { %1132 = vrot.lane.b32.xlu0 %v1130_v4, %s2059_s11 }
0x1707   : > { %v1133_v5 = vpop.permute.xlu0 %1132 }
0x1708   : > { %1136 = vst.msk [vmem:[%s1135_s13] sm:$0xff] %vm256_vm0, %v1133_v5  ;;  %1875 = vmatmul.msk.f32.vlgmr.msra.gmra.mxu2 %vm256_vm0, %v1133_v5 }
0x178b   : > { %v1165_v7 = vpop.f32.mrf.mxu2 }
0x178c   : > { %v1168_v8 = vadd.f32 %v1165_v7, %v1141_v6 }
0x178e   : > { %2001 = vtanh.f32 %v1168_v8  ;;  %v1876_v10 = vmul.f32 -1.442695, %v1168_v8 }
0x1790   : > { %2003 = vpow2.f32 %v1876_v10 }
0x1794   : > { %v2002_v9 = vpop.eup %2001 }
0x1795   : > { %1191 = vrot.lane.b32.xlu1 %v2002_v9, %s2058_s9 }
0x1796   : > { %v2004_v11 = vpop.eup %2003 }
0x1797   : > { %v1172_v12 = vadd.f32 1.0, %v2004_v11 }
0x1799   : > { %2005 = vrcp.f32 %v1172_v12  ;;  %v1184_v14 = vand.u32 2147483648, %v1172_v12  ;;  %vm1178_vm12 = vweird.f32 %v1172_v12  ;;  %v1182_v15 = vand.u32 2147483647, %v1172_v12 }
0x179b   : > { %v1185_v18 = vor.u32 1.1754944e-38, %v1184_v14  ;;  %vm1183_vm14 = vcmp.eq.f32.partialorder %v1182_v15, 8.507059e+37 }
0x179f   : > { %v2006_v13 = vpop.eup %2005 }
0x17a0   : > { %v1174_v16 = vmul.f32 %v2006_v13, %v1172_v12  ;;  %vm1179_vm11 = vweird.f32 %v2006_v13 }
0x17a1   : > { %vm1180_vm13 = vmor %vm1178_vm12, %vm1179_vm11 }
0x17a2   : > { %v1175_v17 = vsub.f32 1.0, %v1174_v16 }
0x17a4   : > { %v1176_v20 = vmul.f32 %v2006_v13, %v1175_v17 }
0x17a6   : > { %v1177_v21 = vadd.f32 %v2006_v13, %v1176_v20 }
0x17a8   : > { %v1181_v22 = vsel %vm1180_vm13, %v2006_v13, %v1177_v21 }
0x17a9   : > { %v1186_v19 = vsel %vm1183_vm14, %v1185_v18, %v1181_v22  ;;  %v1366_v22 = vld [vmem:[%s1365_s19] sm:$0xff] }
0x17aa   : > { %v1189_v25 = vmul.f32 %v1186_v19, %v2419_v61 }
0x1807   : > { %v1192_v23 = vpop.permute.xlu1 %1191 }
0x1808   : > { %v1194_v24 = vmul.f32 %v1192_v23, %v1186_v19 }
0x180a   : > { %1196 = vrot.lane.b32.xlu2 %v1194_v24, %s2059_s11 }
0x1864   : > { %v1197_v26 = vpop.permute.xlu2 %1196 }
0x1865   : > { %v1199_v27 = vadd.f32 %v1197_v26, %v1189_v25 }
0x1867   : > { %2007 = vtanh.f32 %v1199_v27 }
0x186d   : > { %v2008_v28 = vpop.eup %2007 }
0x186e   : > { %1202 = vrot.lane.b32.xlu0 %v2008_v28, %s2058_s9 }
0x18e0   : > { %v1203_v29 = vpop.permute.xlu0 %1202 }
0x18e1   : > { %v1205_v30 = vmul.f32 %v1203_v29, %v1186_v19 }
0x18e3   : > { %1207 = vrot.lane.b32.xlu1 %v1205_v30, %s2059_s11 }
0x1955   : > { %v1208_v31 = vpop.permute.xlu1 %1207 }
0x1956   : > { %1211 = vst.msk [vmem:[%s1210_s10] sm:$0xff] %vm256_vm0, %v1208_v31  ;;  %1878 = vmatmul.msk.f32.vlgmr.msra.gmra.mxu3 %vm256_vm0, %v1208_v31 }
0x19d9   : > { %v1240_v33 = vpop.f32.mrf.mxu3 }
0x19da   : > { %v1243_v34 = vadd.f32 %v1240_v33, %v1216_v32 }
0x19dc   : > { %2009 = vtanh.f32 %v1243_v34  ;;  %v1879_v36 = vmul.f32 -1.442695, %v1243_v34 }
0x19de   : > { %2011 = vpow2.f32 %v1879_v36 }
0x19e2   : > { %v2010_v35 = vpop.eup %2009 }
0x19e3   : > { %1266 = vrot.lane.b32.xlu2 %v2010_v35, %s2058_s9 }
0x19e4   : > { %v2012_v37 = vpop.eup %2011 }
0x19e5   : > { %v1247_v38 = vadd.f32 1.0, %v2012_v37 }
0x19e7   : > { %2013 = vrcp.f32 %v1247_v38  ;;  %v1259_v44 = vand.u32 2147483648, %v1247_v38  ;;  %vm1253_vm1 = vweird.f32 %v1247_v38  ;;  %v1257_v45 = vand.u32 2147483647, %v1247_v38 }
0x19e9   : > { %v1260_v47 = vor.u32 1.1754944e-38, %v1259_v44  ;;  %vm1258_vm3 = vcmp.eq.f32.partialorder %v1257_v45, 8.507059e+37 }
0x19ed   : > { %v2014_v39 = vpop.eup %2013 }
0x19ee   : > { %v1249_v40 = vmul.f32 %v2014_v39, %v1247_v38  ;;  %vm1254_vm15 = vweird.f32 %v2014_v39 }
0x19ef   : > { %vm1255_vm2 = vmor %vm1253_vm1, %vm1254_vm15 }
0x19f0   : > { %v1250_v41 = vsub.f32 1.0, %v1249_v40 }
0x19f2   : > { %v1251_v42 = vmul.f32 %v2014_v39, %v1250_v41 }
0x19f4   : > { %v1252_v43 = vadd.f32 %v2014_v39, %v1251_v42 }
0x19f6   : > { %v1256_v46 = vsel %vm1255_vm2, %v2014_v39, %v1252_v43 }
0x19f7   : > { %v1261_v49 = vsel %vm1258_vm3, %v1260_v47, %v1256_v46  ;;  %v1441_v46 = vld [vmem:[%s1440_s1] sm:$0xff] }
0x19f8   : > { %v1264_v51 = vmul.f32 %v1261_v49, %v1199_v27 }
0x1a3d   : > { %v1267_v48 = vpop.permute.xlu2 %1266 }
0x1a3e   : > { %v1269_v50 = vmul.f32 %v1267_v48, %v1261_v49 }
0x1a40   : > { %1271 = vrot.lane.b32.xlu0 %v1269_v50, %s2059_s11 }
0x1ab2   : > { %v1272_v52 = vpop.permute.xlu0 %1271 }
0x1ab3   : > { %v1274_v53 = vadd.f32 %v1272_v52, %v1264_v51 }
0x1ab5   : > { %2015 = vtanh.f32 %v1274_v53 }
0x1abb   : > { %v2016_v54 = vpop.eup %2015 }
0x1abc   : > { %1277 = vrot.lane.b32.xlu1 %v2016_v54, %s2058_s9 }
0x1b2e   : > { %v1278_v55 = vpop.permute.xlu1 %1277 }
0x1b2f   : > { %v1280_v56 = vmul.f32 %v1278_v55, %v1261_v49 }
0x1b31   : > { %1282 = vrot.lane.b32.xlu2 %v1280_v56, %s2059_s11 }
0x1b8b   : > { %v1283_v57 = vpop.permute.xlu2 %1282 }
0x1b8c   : > { %1286 = vst.msk [vmem:[%s1285_s12] sm:$0xff] %vm256_vm0, %v1283_v57  ;;  %1881 = vmatmul.msk.f32.vlgmr.msrb.gmra.mxu1 %vm256_vm0, %v1283_v57 }
0x1c09   : > { %v1315_v59 = vpop.f32.mrf.mxu1 }
0x1c0a   : > { %v1318_v60 = vadd.f32 %v1315_v59, %v1291_v58 }
0x1c0c   : > { %2017 = vtanh.f32 %v1318_v60  ;;  %v1882_v62 = vmul.f32 -1.442695, %v1318_v60 }
0x1c0e   : > { %2019 = vpow2.f32 %v1882_v62 }
0x1c12   : > { %v2018_v61 = vpop.eup %2017 }
0x1c13   : > { %1341 = vrot.lane.b32.xlu0 %v2018_v61, %s2058_s9 }
0x1c14   : > { %v2020_v63 = vpop.eup %2019 }
0x1c15   : > { %v1322_v0 = vadd.f32 1.0, %v2020_v63 }
0x1c17   : > { %2021 = vrcp.f32 %v1322_v0  ;;  %v1334_v6 = vand.u32 2147483648, %v1322_v0  ;;  %vm1328_vm5 = vweird.f32 %v1322_v0  ;;  %v1332_v7 = vand.u32 2147483647, %v1322_v0 }
0x1c19   : > { %v1335_v9 = vor.u32 1.1754944e-38, %v1334_v6  ;;  %vm1333_vm7 = vcmp.eq.f32.partialorder %v1332_v7, 8.507059e+37 }
0x1c1d   : > { %v2022_v1 = vpop.eup %2021 }
0x1c1e   : > { %v1324_v2 = vmul.f32 %v2022_v1, %v1322_v0  ;;  %vm1329_vm4 = vweird.f32 %v2022_v1 }
0x1c1f   : > { %vm1330_vm6 = vmor %vm1328_vm5, %vm1329_vm4 }
0x1c20   : > { %v1325_v3 = vsub.f32 1.0, %v1324_v2 }
0x1c22   : > { %v1326_v4 = vmul.f32 %v2022_v1, %v1325_v3 }
0x1c24   : > { %v1327_v5 = vadd.f32 %v2022_v1, %v1326_v4 }
0x1c26   : > { %v1331_v8 = vsel %vm1330_vm6, %v2022_v1, %v1327_v5 }
0x1c27   : > { %v1336_v11 = vsel %vm1333_vm7, %v1335_v9, %v1331_v8  ;;  %v1516_v8 = vld [vmem:[%s1515_s30] sm:$0xff] }
0x1c28   : > { %v1339_v13 = vmul.f32 %v1336_v11, %v1274_v53 }
0x1c85   : > { %v1342_v10 = vpop.permute.xlu0 %1341 }
0x1c86   : > { %v1344_v12 = vmul.f32 %v1342_v10, %v1336_v11 }
0x1c88   : > { %1346 = vrot.lane.b32.xlu1 %v1344_v12, %s2059_s11 }
0x1cfa   : > { %v1347_v16 = vpop.permute.xlu1 %1346 }
0x1cfb   : > { %v1349_v17 = vadd.f32 %v1347_v16, %v1339_v13 }
0x1cfd   : > { %2023 = vtanh.f32 %v1349_v17 }
0x1d03   : > { %v2024_v20 = vpop.eup %2023 }
0x1d04   : > { %1352 = vrot.lane.b32.xlu2 %v2024_v20, %s2058_s9 }
0x1d5e   : > { %v1353_v21 = vpop.permute.xlu2 %1352 }
0x1d5f   : > { %v1355_v14 = vmul.f32 %v1353_v21, %v1336_v11 }
0x1d61   : > { %1357 = vrot.lane.b32.xlu0 %v1355_v14, %s2059_s11 }
0x1dd3   : > { %v1358_v15 = vpop.permute.xlu0 %1357 }
0x1dd4   : > { %1361 = vst.msk [vmem:[%s1360_s20] sm:$0xff] %vm256_vm0, %v1358_v15  ;;  %1884 = vmatmul.msk.f32.vlgmr.msrb.gmra.mxu2 %vm256_vm0, %v1358_v15 }
0x1e57   : > { %v1390_v18 = vpop.f32.mrf.mxu2 }
0x1e58   : > { %v1393_v23 = vadd.f32 %v1390_v18, %v1366_v22 }
0x1e5a   : > { %2025 = vtanh.f32 %v1393_v23  ;;  %v1885_v24 = vmul.f32 -1.442695, %v1393_v23 }
0x1e5c   : > { %2027 = vpow2.f32 %v1885_v24 }
0x1e60   : > { %v2026_v19 = vpop.eup %2025 }
0x1e61   : > { %1416 = vrot.lane.b32.xlu1 %v2026_v19, %s2058_s9 }
0x1e62   : > { %v2028_v25 = vpop.eup %2027 }
0x1e63   : > { %v1397_v26 = vadd.f32 1.0, %v2028_v25 }
0x1e65   : > { %2029 = vrcp.f32 %v1397_v26  ;;  %v1409_v32 = vand.u32 2147483648, %v1397_v26  ;;  %vm1403_vm9 = vweird.f32 %v1397_v26  ;;  %v1407_v33 = vand.u32 2147483647, %v1397_v26 }
0x1e67   : > { %v1410_v35 = vor.u32 1.1754944e-38, %v1409_v32  ;;  %vm1408_vm11 = vcmp.eq.f32.partialorder %v1407_v33, 8.507059e+37 }
0x1e6b   : > { %v2030_v27 = vpop.eup %2029 }
0x1e6c   : > { %v1399_v28 = vmul.f32 %v2030_v27, %v1397_v26  ;;  %vm1404_vm8 = vweird.f32 %v2030_v27 }
0x1e6d   : > { %vm1405_vm10 = vmor %vm1403_vm9, %vm1404_vm8 }
0x1e6e   : > { %v1400_v29 = vsub.f32 1.0, %v1399_v28 }
0x1e70   : > { %v1401_v30 = vmul.f32 %v2030_v27, %v1400_v29 }
0x1e72   : > { %v1402_v31 = vadd.f32 %v2030_v27, %v1401_v30 }
0x1e74   : > { %v1406_v34 = vsel %vm1405_vm10, %v2030_v27, %v1402_v31 }
0x1e75   : > { %v1411_v37 = vsel %vm1408_vm11, %v1410_v35, %v1406_v34 }
0x1e76   : > { %v1414_v39 = vmul.f32 %v1411_v37, %v1349_v17 }
0x1ed3   : > { %v1417_v36 = vpop.permute.xlu1 %1416 }
0x1ed4   : > { %v1419_v38 = vmul.f32 %v1417_v36, %v1411_v37 }
0x1ed6   : > { %1421 = vrot.lane.b32.xlu2 %v1419_v38, %s2059_s11 }
0x1f30   : > { %v1422_v40 = vpop.permute.xlu2 %1421 }
0x1f31   : > { %v1424_v41 = vadd.f32 %v1422_v40, %v1414_v39 }
0x1f33   : > { %2031 = vtanh.f32 %v1424_v41 }
0x1f39   : > { %v2032_v42 = vpop.eup %2031 }
0x1f3a   : > { %1427 = vrot.lane.b32.xlu0 %v2032_v42, %s2058_s9 }
0x1fac   : > { %v1428_v43 = vpop.permute.xlu0 %1427 }
0x1fad   : > { %v1430_v44 = vmul.f32 %v1428_v43, %v1411_v37 }
0x1faf   : > { %1432 = vrot.lane.b32.xlu1 %v1430_v44, %s2059_s11 }
0x2021   : > { %v1433_v45 = vpop.permute.xlu1 %1432 }
0x2022   : > { %1436 = vst.msk [vmem:[%s1435_s26] sm:$0xff] %vm256_vm0, %v1433_v45  ;;  %1887 = vmatmul.msk.f32.vlgmr.msrb.gmra.mxu3 %vm256_vm0, %v1433_v45 }
0x20a5   : > { %v1465_v47 = vpop.f32.mrf.mxu3 }
0x20a6   : > { %v1468_v48 = vadd.f32 %v1465_v47, %v1441_v46 }
0x20a8   : > { %2033 = vtanh.f32 %v1468_v48  ;;  %v1888_v50 = vmul.f32 -1.442695, %v1468_v48 }
0x20aa   : > { %2035 = vpow2.f32 %v1888_v50 }
0x20ae   : > { %v2034_v49 = vpop.eup %2033 }
0x20af   : > { %1491 = vrot.lane.b32.xlu2 %v2034_v49, %s2058_s9 }
0x20b0   : > { %v2036_v51 = vpop.eup %2035 }
0x20b1   : > { %v1472_v52 = vadd.f32 1.0, %v2036_v51 }
0x20b3   : > { %2037 = vrcp.f32 %v1472_v52  ;;  %v1484_v58 = vand.u32 2147483648, %v1472_v52  ;;  %vm1478_vm13 = vweird.f32 %v1472_v52  ;;  %v1482_v59 = vand.u32 2147483647, %v1472_v52 }
0x20b5   : > { %v1485_v61 = vor.u32 1.1754944e-38, %v1484_v58  ;;  %vm1483_vm15 = vcmp.eq.f32.partialorder %v1482_v59, 8.507059e+37 }
0x20b9   : > { %v2038_v53 = vpop.eup %2037 }
0x20ba   : > { %v1474_v54 = vmul.f32 %v2038_v53, %v1472_v52  ;;  %vm1479_vm12 = vweird.f32 %v2038_v53 }
0x20bb   : > { %vm1480_vm14 = vmor %vm1478_vm13, %vm1479_vm12 }
0x20bc   : > { %v1475_v55 = vsub.f32 1.0, %v1474_v54 }
0x20be   : > { %v1476_v56 = vmul.f32 %v2038_v53, %v1475_v55 }
0x20c0   : > { %v1477_v57 = vadd.f32 %v2038_v53, %v1476_v56 }
0x20c2   : > { %v1481_v60 = vsel %vm1480_vm14, %v2038_v53, %v1477_v57 }
0x20c3   : > { %v1486_v63 = vsel %vm1483_vm15, %v1485_v61, %v1481_v60 }
0x20c4   : > { %v1489_v1 = vmul.f32 %v1486_v63, %v1424_v41 }
0x2109   : > { %v1492_v62 = vpop.permute.xlu2 %1491 }
0x210a   : > { %v1494_v0 = vmul.f32 %v1492_v62, %v1486_v63 }
0x210c   : > { %1496 = vrot.lane.b32.xlu0 %v1494_v0, %s2059_s11 }
0x217e   : > { %v1497_v2 = vpop.permute.xlu0 %1496 }
0x217f   : > { %v1499_v3 = vadd.f32 %v1497_v2, %v1489_v1 }
0x2181   : > { %2039 = vtanh.f32 %v1499_v3 }
0x2187   : > { %v2040_v4 = vpop.eup %2039 }
0x2188   : > { %1502 = vrot.lane.b32.xlu1 %v2040_v4, %s2058_s9 }
0x21fa   : > { %v1503_v5 = vpop.permute.xlu1 %1502 }
0x21fb   : > { %v1505_v6 = vmul.f32 %v1503_v5, %v1486_v63 }
0x21fd   : > { %1507 = vrot.lane.b32.xlu2 %v1505_v6, %s2059_s11 }
0x2257   : > { %v1508_v7 = vpop.permute.xlu2 %1507 }
0x2258   : > { %1511 = vst.msk [vmem:[%s1510_s21] sm:$0xff] %vm256_vm0, %v1508_v7  ;;  %1890 = vmatmul.msk.f32.vlgmr.msra.gmra.mxu1 %vm256_vm0, %v1508_v7 }
0x22d5   : > { %v1540_v9 = vpop.f32.mrf.mxu1 }
0x22d6   : > { %v1543_v10 = vadd.f32 %v1540_v9, %v1516_v8 }
0x22d8   : > { %2041 = vtanh.f32 %v1543_v10  ;;  %v1891_v12 = vmul.f32 -1.442695, %v1543_v10 }
0x22da   : > { %2043 = vpow2.f32 %v1891_v12 }
0x22de   : > { %v2042_v11 = vpop.eup %2041 }
0x22df   : > { %1566 = vrot.lane.b32.xlu0 %v2042_v11, %s2058_s9 }
0x22e0   : > { %v2044_v13 = vpop.eup %2043 }
0x22e1   : > { %v1547_v16 = vadd.f32 1.0, %v2044_v13 }
0x22e3   : > { %2045 = vrcp.f32 %v1547_v16  ;;  %v1559_v22 = vand.u32 2147483648, %v1547_v16  ;;  %vm1553_vm2 = vweird.f32 %v1547_v16  ;;  %v1557_v18 = vand.u32 2147483647, %v1547_v16 }
0x22e5   : > { %v1560_v19 = vor.u32 1.1754944e-38, %v1559_v22  ;;  %vm1558_vm4 = vcmp.eq.f32.partialorder %v1557_v18, 8.507059e+37 }
0x22e9   : > { %v2046_v17 = vpop.eup %2045 }
0x22ea   : > { %v1549_v20 = vmul.f32 %v2046_v17, %v1547_v16  ;;  %vm1554_vm1 = vweird.f32 %v2046_v17 }
0x22eb   : > { %vm1555_vm3 = vmor %vm1553_vm2, %vm1554_vm1 }
0x22ec   : > { %v1550_v21 = vsub.f32 1.0, %v1549_v20 }
0x22ee   : > { %v1551_v14 = vmul.f32 %v2046_v17, %v1550_v21 }
0x22f0   : > { %v1552_v15 = vadd.f32 %v2046_v17, %v1551_v14 }
0x22f2   : > { %v1556_v23 = vsel %vm1555_vm3, %v2046_v17, %v1552_v15 }
0x22f3   : > { %v1561_v25 = vsel %vm1558_vm4, %v1560_v19, %v1556_v23 }
0x22f4   : > { %v1564_v27 = vmul.f32 %v1561_v25, %v1499_v3 }
0x2351   : > { %v1567_v24 = vpop.permute.xlu0 %1566 }
0x2352   : > { %v1569_v26 = vmul.f32 %v1567_v24, %v1561_v25 }
0x2354   : > { %1571 = vrot.lane.b32.xlu1 %v1569_v26, %s2059_s11 }
0x23c6   : > { %v1572_v28 = vpop.permute.xlu1 %1571 }
0x23c7   : > { %v1574_v29 = vadd.f32 %v1572_v28, %v1564_v27 }
0x23c9   : > { %2047 = vtanh.f32 %v1574_v29 }
0x23cf   : > { %v2048_v30 = vpop.eup %2047 }
0x23d0   : > { %1577 = vrot.lane.b32.xlu2 %v2048_v30, %s2058_s9 }
0x242a   : > { %v1578_v31 = vpop.permute.xlu2 %1577 }
0x242b   : > { %v1580_v32 = vmul.f32 %v1578_v31, %v1561_v25 }
0x242d   : > { %1582 = vrot.lane.b32.xlu0 %v1580_v32, %s2059_s11 }
0x249f   : > { %v1583_v33 = vpop.permute.xlu0 %1582 }
0x24a0   : > { %1586 = vst.msk [vmem:[%s1585_s29] sm:$0xff] %vm256_vm0, %v1583_v33 }
0x24a1 PF: > { %s14_s15 = sadd.s32 1, %s2055_s15  }
0x24a2   : > { %p11_p4 = scmp.ge.s32.totalorder %s14_s15, 4  }
0x24a4   :  { %13 = sbr.rel (!%p11_p4) target bundleno = 4 (0x4), region = 104 }

// kernel: stgi_forward.6
= control target key start
LH: loop header
LB: loop body
LE: loop exit
PB: predicated region body
PF: predicated region fallthrough
CT: control target
= control target key end

     0   :  { %s3000_s0 = inlined_call_operand.vmem [shape: f32[2,128,32], index: 0, kind: input, shape index: {}]   ;;  %s3001_s1 = inlined_call_operand.vmem [shape: f32[2,2,32,128], index: 1, kind: input, shape index: {}]   ;;  %s3002_s2 = inlined_call_operand.hbm [shape: f32[2,32,128], index: 2, kind: input, shape index: {}]   ;;  %s3003_s3 = inlined_call_operand.vmem [shape: f32[2,1,128], index: 3, kind: input, shape index: {}]   ;;  %s3004_s4 = inlined_call_operand.vmem [shape: f32[2,128,32], index: 4, kind: output, shape index: {}]  }
   0x1   :  { %3007 = sst [smem:[#allocation9_spill]] %s3000_s0 }
   0x2   :  { %3008 = sst [smem:[#allocation10_spill]] %s3001_s1 }
   0x3   :  { %3009 = sst [smem:[#allocation11_spill]] %s3002_s2 }
   0x4   :  { %9 = vsyncpa [#allocation4], 0 }
   0x5   :  { %11 = vsyncpa [#allocation4 + $0x1], 0  ;;  %s2396_s15 = smov 0   ;;  %s2398_s16 = smov 0  }
   0x6   :  { %s2400_s17 = smov 0   ;;  %s2402_s18 = smov 0  }
   0x7 LB: > { %3010 = sst [smem:[#allocation6_spill]] %s2356_s16  ;;  %s2415_s19 = sadd.s32 4294967295, %s2364_s18   ;;  %s2364_s18 = sphi %s2402_s18, %s3023_s18   ;;  %s2360_s17 = sphi %s2400_s17, %s3022_s17   ;;  %s2356_s16 = sphi %s2398_s16, %s3021_s16   ;;  %s2352_s15 = sphi %s2396_s15, %s3020_s15  }
   0x8   : > { %3011 = sst [smem:[#allocation7_spill]] %s2360_s17  ;;  %s2418_s20 = sadd.s32 1, %s2364_s18  }
   0x9   : > { %s68_s21 = ssub.s32 %s2364_s18, %s2418_s20  ;;  %s71_s22 = sadd.s32 1, %s2360_s17 }
   0xa   : > { %p69_p0 = scmp.eq.s32.totalorder %s68_s21, 0  ;;  %p78_p1 = scmp.ne.s32.totalorder %s2360_s17, %s2356_s16 }
   0xb   : > { %p79_p2 = scmp.eq.s32.totalorder %s2364_s18, 0  ;;  %p84_p3 = scmp.ne.s32.totalorder %s2356_s16, %s2352_s15 }
   0xc   : > { %s2428_s23 = scalar_select %p69_p0, %s2360_s17, %s71_s22  }
   0xd   : > { %p2430_p4 = por %p79_p2, %p78_p1  ;;  %p85_p5 = scmp.eq.s32.totalorder %s2415_s19, 0 }
   0xe   : > { %3012 = sst [smem:[#allocation8_spill]] %s2428_s23  ;;  %p2133_p6 = scmp.lt.s32.totalorder %s2364_s18, 2 }
   0xf   : > { %p2436_p7 = por %p85_p5, %p84_p3  ;;  %s171_s26 = sand.u32 1, %s2360_s17  }
  0x10   : > { %s2003_s27 = sshll.u32 %s171_s26, 5  ;;  %s2116_s28 = sshll.u32 %s2364_s18, 5 }
  0x11   : > { %s3015_s2 = sld [smem:[#allocation11_spill]]  ;;  %s175_s6 = scalar_lea.vmem [#allocation3], %s2003_s27 }
  0x12   : > { %s183_s7 = sshll.u32 %s175_s6, 4  ;;  %p2447_p8 = pnand %p2133_p6, %p2430_p4  ;;  %s184_s7 = int_to_ptr.vmem [resolvable:$true] %s183_s7 }
  0x13   : > { %p2006_p9 = scmp.ge.s32.totalorder %s2364_s18, 1  ;;  %s172_s10 = scalar_lea.sflag [#allocation4], %s171_s26 }
  0x14   : > { %p2304_p11 = pneg %p2447_p8 }
  0x17   : > { %s180_s5 = scalar_lea.hbm %s3015_s2, %s2116_s28  ;;  %s2307_s15 = scalar_lea.hbm %s3015_s2, 64 }
  0x18   : > { %s181_s8 = sshll.u32 %s180_s5, 4  ;;  %s182_s8 = int_to_ptr.hbm [resolvable:$true] %s181_s8 }
  0x19   : > { %s2300_s11 = sshra.s32 %s182_s8, 4  ;;  %s2301_s11 = int_to_ptr.hbm [resolvable:$true] %s2300_s11 }
  0x1a   : > { %s2302_s12 = scalar_lea.hbm %s2301_s11, 32  ;;  %p2308_p0 = scmp.lt.s32.totalorder %s2301_s11, %s3015_s2 }
  0x1b   : > { %p2303_p10 = scmp.ne.s32.totalorder %s2301_s11, %s2302_s12  ;;  %p2309_p1 = scmp.lt.s32.totalorder %s2307_s15, %s2302_s12 }
  0x1d   : > { %p2305_p12 = pnand %p2304_p11, %p2303_p10  ;;  %p2310_p2 = por %p2309_p1, %p2308_p0 }
  0x1f   : > { %p2306_p13 = pneg %p2305_p12 }
  0x21   : > { %p2311_p3 = pnand %p2310_p2, %p2306_p13 }
  0x23   : > { %2314 = shalt.err (!%p2311_p3)
}
  0x24   : > { %s2366_s24 = smov 128   ;;  %s2367_s26 = smov 8  }
  0x25   : > { %2132 = dma.hbm_to_vmem [thread:$0]  (!%p2447_p8), %s182_s8, 512, %s184_s7, %s172_s10, %s2366_s24, %s2366_s24, %s2367_s26  }
  0x26   : > { %p197_p4 = scmp.lt.s32.totalorder %s2364_s18, 3 }
  0x28   : > { %p198_p5 = pnand %p2006_p9, %p197_p4 }
  0x29   : > { %s203_s27 = sand.u32 (!%p198_p5), 1, %s2356_s16  }
  0x2a   : > { %201 = sbr.rel (%p198_p5) target bundleno = 9479 (0x2507), region = 36  ;;  %s2007_s28 = sshll.u32 (!%p198_p5), %s203_s27, 5 }
  0x2b   : > { %s204_s29 = scalar_lea.sflag (!%p198_p5), [#allocation4], %s203_s27  ;;  %s2466_s30 = scalar_lea.vmem (!%p198_p5), [#allocation3], %s2007_s28 }
  0x2f   : > { %2347 = dma.done.wait (%p2436_p7), %s204_s29, 512  }
  0x30   : > { %2349 = vsyncadd (%p2436_p7), %s204_s29, 4294966784  ;;  %p241_p6 = scmp.lt.s32.totalorder %s2415_s19, 1  ;;  %s3017_s1 = sld [smem:[#allocation10_spill]]  ;;  %vm296_vm0 = vcmask 261120   ;;  %v2523_v18 = vld [vmem:[%s2466_s30 + $0x18] sm:$0xff]  ;;  %v2544_v23 = vld [vmem:[%s2466_s30 + $0x10] sm:$0xff] }
  0x31   : > { %s3018_s0 = sld [smem:[#allocation9_spill]]  ;;  %v2565_v28 = vld [vmem:[%s2466_s30 + $0x8] sm:$0xff]  ;;  %v2586_v33 = vld [vmem:[%s2466_s30] sm:$0xff]  ;;  %v2368_v36 = vmov 0.0   ;;  %s2064_s28 = sshll.u32 %s2415_s19, 1 }
  0x32   : > { %s2474_s5 = scalar_select %p241_p6, %s2415_s19, 1 }
  0x33   : > { %s2645_s29 = ssub.s32 1, %s2064_s28  ;;  %s2369_s17 = smov 64  }
  0x34   : > { %s2117_s18 = sshll.u32 %s2474_s5, 6  ;;  %s2069_s6 = sshll.u32 %s2645_s29, 1 }
  0x35   : > { %s785_s7 = smul.u32 3, %s2645_s29  ;;  %s2076_s10 = sshll.u32 %s2645_s29, 2 }
  0x36   : > { %s245_s8 = scalar_lea.vmem %s3017_s1, %s2117_s18  ;;  %s2648_s18 = smul.u32 15, %s2415_s19 }
  0x37   : > { %v2031_v0 = vld [vmem:[%s245_s8 + $0x38] sm:$0xff]  ;;  %v2030_v2 = vld [vmem:[%s245_s8 + $0x30] sm:$0xff]  ;;  %v2029_v4 = vld [vmem:[%s245_s8 + $0x28] sm:$0xff]  ;;  %s935_s12 = smul.u32 5, %s2645_s29  ;;  %s2089_s22 = sshll.u32 %s2645_s29, 3 }
  0x38   : > { %357 = vmatpush.msra.mxu0 %v2031_v0  ;;  %v273_v1 = vld [vmem:[%s245_s8 + $0x18] sm:$0xff]  ;;  %v272_v3 = vld [vmem:[%s245_s8 + $0x10] sm:$0xff]  ;;  %2119 = vmatpush.msra.mxu2 %v2031_v0  ;;  %v271_v5 = vld [vmem:[%s245_s8 + $0x8] sm:$0xff]  ;;  %s2656_s9 = sadd.s32 %s785_s7, %s2648_s18  ;;  %s2660_s25 = sadd.s32 %s2076_s10, %s2648_s18 }
  0x39   : > { %470 = vmatpush.msra.mxu1 %v273_v1  ;;  %2123 = vmatpush.msra.mxu3 %v273_v1  ;;  %v2028_v6 = vld [vmem:[%s245_s8 + $0x20] sm:$0xff]  ;;  %v2013_v10 = vld [vmem:[%s3018_s0 + $0x88] sm:$0xff]  ;;  %v2014_v12 = vld [vmem:[%s3018_s0 + $0x90] sm:$0xff]  ;;  %s1010_s13 = smul.u32 6, %s2645_s29  ;;  %s2665_s14 = sadd.s32 %s935_s12, %s2648_s18 }
  0x3a   : > { %358 = vmatpush.msra.mxu0 %v2030_v2  ;;  %2120 = vmatpush.msra.mxu2 %v2030_v2  ;;  %v270_v7 = vld [vmem:[%s245_s8] sm:$0xff]  ;;  %v255_v11 = vld [vmem:[%s3018_s0 + $0x8] sm:$0xff]  ;;  %v256_v13 = vld [vmem:[%s3018_s0 + $0x10] sm:$0xff]  ;;  %s2653_s8 = sadd.s32 %s2069_s6, %s2648_s18  ;;  %s1085_s15 = smul.u32 7, %s2645_s29 }
  0x3b   : > { %471 = vmatpush.msra.mxu1 %v272_v3  ;;  %2124 = vmatpush.msra.mxu3 %v272_v3  ;;  %v2012_v8 = vld [vmem:[%s3018_s0 + $0x80] sm:$0xff]  ;;  %v2015_v14 = vld [vmem:[%s3018_s0 + $0x98] sm:$0xff]  ;;  %v2025_v21 = vld [vmem:[%s3018_s0 + $0xe8] sm:$0xff]  ;;  %s2669_s21 = sadd.s32 %s1010_s13, %s2648_s18  ;;  %s2676_s26 = sadd.s32 %s2089_s22, %s2648_s18 }
  0x3c   : > { %359 = vmatpush.msra.mxu0 %v2029_v4  ;;  %2121 = vmatpush.msra.mxu2 %v2029_v4  ;;  %v254_v9 = vld [vmem:[%s3018_s0] sm:$0xff]  ;;  %v257_v15 = vld [vmem:[%s3018_s0 + $0x18] sm:$0xff]  ;;  %v267_v22 = vld [vmem:[%s3018_s0 + $0x68] sm:$0xff]  ;;  %s2673_s24 = sadd.s32 %s1085_s15, %s2648_s18  ;;  %s1235_s27 = smul.u32 9, %s2645_s29 }
  0x3d   : > { %472 = vmatpush.msra.mxu1 %v271_v5  ;;  %2125 = vmatpush.msra.mxu3 %v271_v5  ;;  %v2024_v16 = vld [vmem:[%s3018_s0 + $0xe0] sm:$0xff]  ;;  %v2017_v24 = vld [vmem:[%s3018_s0 + $0xa8] sm:$0xff]  ;;  %v2026_v26 = vld [vmem:[%s3018_s0 + $0xf0] sm:$0xff]  ;;  %s1310_s28 = smul.u32 10, %s2645_s29  ;;  %s3019_s16 = scalar_lea.vmem %s3003_s3, %s2474_s5 }
  0x3e   : > { %360 = vmatpush.msra.mxu0 %v2028_v6  ;;  %2122 = vmatpush.msra.mxu2 %v2028_v6  ;;  %v266_v17 = vld [vmem:[%s3018_s0 + $0x60] sm:$0xff]  ;;  %v259_v25 = vld [vmem:[%s3018_s0 + $0x28] sm:$0xff]  ;;  %v268_v27 = vld [vmem:[%s3018_s0 + $0x70] sm:$0xff]  ;;  %s2681_s6 = sadd.s32 %s1235_s27, %s2648_s18  ;;  %s1385_s7 = smul.u32 11, %s2645_s29 }
  0x3f   : > { %473 = vmatpush.msra.mxu1 %v270_v7  ;;  %2032 = vmatmul.msk.f32.vlgmr.msra.gmra.mxu0 %vm296_vm0, %v2012_v8  ;;  %v2016_v19 = vld [vmem:[%s3018_s0 + $0xa0] sm:$0xff]  ;;  %v2018_v29 = vld [vmem:[%s3018_s0 + $0xb0] sm:$0xff]  ;;  %v2027_v31 = vld [vmem:[%s3018_s0 + $0xf8] sm:$0xff]  ;;  %s2685_s10 = sadd.s32 %s1310_s28, %s2648_s18  ;;  %s1460_s11 = smul.u32 12, %s2645_s29 }
  0x40   : > { %2048 = vmatmul.msk.f32.vlgmr.msra.gmra.mxu1 %vm296_vm0, %v254_v9  ;;  %2126 = vmatpush.msra.mxu3 %v270_v7  ;;  %v258_v20 = vld [vmem:[%s3018_s0 + $0x20] sm:$0xff]  ;;  %v260_v30 = vld [vmem:[%s3018_s0 + $0x30] sm:$0xff]  ;;  %v269_v32 = vld [vmem:[%s3018_s0 + $0x78] sm:$0xff]  ;;  %s2688_s12 = sadd.s32 %s1385_s7, %s2648_s18  ;;  %s1535_s13 = smul.u32 13, %s2645_s29 }
  0x41   : > { %2044 = vmatmul.msk.f32.vlgmr.msra.gmra.mxu2 %vm296_vm0, %v2024_v16  ;;  %2060 = vmatmul.msk.f32.vlgmr.msra.gmra.mxu3 %vm296_vm0, %v266_v17  ;;  %v2019_v34 = vld [vmem:[%s3018_s0 + $0xb8] sm:$0xff]  ;;  %v2020_v37 = vld [vmem:[%s3018_s0 + $0xc0] sm:$0xff]  ;;  %v2021_v39 = vld [vmem:[%s3018_s0 + $0xc8] sm:$0xff]  ;;  %s1610_s1 = smul.u32 14, %s2645_s29  ;;  %s2118_s28 = sshll.u32 %s2474_s5, 7 }
  0x42   : > { %584 = vmatpush.msrb.mxu2 %v2523_v18  ;;  %658 = vmatpush.msrb.mxu3 %v2523_v18  ;;  %v261_v35 = vld [vmem:[%s3018_s0 + $0x38] sm:$0xff]  ;;  %v262_v38 = vld [vmem:[%s3018_s0 + $0x40] sm:$0xff]  ;;  %v263_v40 = vld [vmem:[%s3018_s0 + $0x48] sm:$0xff]  ;;  %s2697_s2 = sadd.s32 %s1535_s13, %s2648_s18  ;;  %s1685_s22 = smul.u32 15, %s2645_s29 }
  0x43   : > { %v2022_v41 = vld [vmem:[%s3018_s0 + $0xd0] sm:$0xff]  ;;  %v2023_v43 = vld [vmem:[%s3018_s0 + $0xd8] sm:$0xff]  ;;  %s2700_s15 = sadd.s32 %s1610_s1, %s2648_s18  ;;  %v2711_v45 = vld [vmem:[%s3019_s16] ss:$0 sm:$0xff]  ;;  %s562_s1 = smul.u32 120, %s2415_s19 }
  0x44   : > { %585 = vmatpush.msrb.mxu2 %v2544_v23  ;;  %659 = vmatpush.msrb.mxu3 %v2544_v23  ;;  %v264_v42 = vld [vmem:[%s3018_s0 + $0x50] sm:$0xff]  ;;  %v265_v44 = vld [vmem:[%s3018_s0 + $0x58] sm:$0xff]  ;;  %s2693_s0 = sadd.s32 %s1460_s11, %s2648_s18  ;;  %s2704_s23 = sadd.s32 %s1685_s22, %s2648_s18 }
  0x45   : > { %s563_s16 = scalar_lea.vmem [#allocation2], %s562_s1  ;;  %s2370_s11 = smov 32  }
  0x46   : > { %586 = vmatpush.msrb.mxu2 %v2565_v28  ;;  %660 = vmatpush.msrb.mxu3 %v2565_v28  ;;  %s2740_s22 = scalar_lea.vmem %s3004_s4, %s2118_s28  ;;  %s636_s5 = sadd.s32 %s2645_s29, %s2648_s18 }
  0x47   : > { %2033 = vmatmul.msk.f32.gmra.mxu0 %vm296_vm0, %v2013_v10  ;;  %s634_s27 = scalar_lea.vmem %s2740_s22, %s562_s1  ;;  %s2070_s18 = sshll.u32 %s2653_s8, 3 }
  0x48   : > { %2049 = vmatmul.msk.f32.gmra.mxu1 %vm296_vm0, %v255_v11  ;;  %587 = vmatpush.msrb.mxu2 %v2586_v33  ;;  %s713_s1 = scalar_lea.vmem [#allocation2], %s2070_s18  ;;  %s783_s28 = scalar_lea.vmem %s2740_s22, %s2070_s18 }
  0x49   : > { %2045 = vmatmul.msk.f32.gmra.mxu2 %vm296_vm0, %v2025_v21  ;;  %2061 = vmatmul.msk.f32.gmra.mxu3 %vm296_vm0, %v267_v22  ;;  %s2073_s7 = sshll.u32 %s2656_s9, 3 }
  0x4a   : > { %661 = vmatpush.msrb.mxu3 %v2586_v33  ;;  %733 = vmatpush.msra.mxu2 %v2523_v18  ;;  %s788_s13 = scalar_lea.vmem [#allocation2], %s2073_s7  ;;  %s858_s8 = scalar_lea.vmem %s2740_s22, %s2073_s7 }
  0x4b   : > { %s2090_s7 = sshll.u32 %s2676_s26, 3 }
  0x4c   : > { %808 = vmatpush.msra.mxu3 %v2523_v18  ;;  %734 = vmatpush.msra.mxu2 %v2544_v23 }
  0x4e   : > { %809 = vmatpush.msra.mxu3 %v2544_v23  ;;  %735 = vmatpush.msra.mxu2 %v2565_v28 }
  0x4f   : > { %2034 = vmatmul.msk.f32.gmra.mxu0 %vm296_vm0, %v2014_v12 }
  0x50   : > { %2050 = vmatmul.msk.f32.gmra.mxu1 %vm296_vm0, %v256_v13  ;;  %810 = vmatpush.msra.mxu3 %v2565_v28 }
  0x51   : > { %2046 = vmatmul.msk.f32.gmra.mxu2 %vm296_vm0, %v2026_v26  ;;  %2062 = vmatmul.msk.f32.gmra.mxu3 %vm296_vm0, %v268_v27 }
  0x52   : > { %736 = vmatpush.msra.mxu2 %v2586_v33  ;;  %811 = vmatpush.msra.mxu3 %v2586_v33 }
  0x57   : > { %2035 = vmatmul.msk.f32.gmra.mxu0 %vm296_vm0, %v2015_v14 }
  0x58   : > { %2051 = vmatmul.msk.f32.gmra.mxu1 %vm296_vm0, %v257_v15 }
  0x59   : > { %2047 = vmatmul.msk.f32.gmra.mxu2 %vm296_vm0, %v2027_v31  ;;  %2063 = vmatmul.msk.f32.gmra.mxu3 %vm296_vm0, %v269_v32 }
  0x5f   : > { %2036 = vmatmul.msk.f32.gmra.mxu0 %vm296_vm0, %v2016_v19 }
  0x60   : > { %2052 = vmatmul.msk.f32.gmra.mxu1 %vm296_vm0, %v258_v20 }
  0x61   : > { %588 = vmatmul.f32.vlgmr.msrb.gmra.mxu2 %v2368_v36 }
  0x62   : > { %883 = vmatpush.msrb.mxu2 %v2523_v18 }
  0x64   : > { %884 = vmatpush.msrb.mxu2 %v2544_v23 }
  0x66   : > { %885 = vmatpush.msrb.mxu2 %v2565_v28 }
  0x67   : > { %2037 = vmatmul.msk.f32.gmra.mxu0 %vm296_vm0, %v2017_v24 }
  0x68   : > { %2053 = vmatmul.msk.f32.gmra.mxu1 %vm296_vm0, %v259_v25  ;;  %886 = vmatpush.msrb.mxu2 %v2586_v33 }
  0x6f   : > { %2038 = vmatmul.msk.f32.gmra.mxu0 %vm296_vm0, %v2018_v29 }
  0x70   : > { %2054 = vmatmul.msk.f32.gmra.mxu1 %vm296_vm0, %v260_v30 }
  0x77   : > { %2039 = vmatmul.msk.f32.gmra.mxu0 %vm296_vm0, %v2019_v34 }
  0x78   : > { %2055 = vmatmul.msk.f32.gmra.mxu1 %vm296_vm0, %v261_v35 }
  0x7f   : > { %2040 = vmatmul.msk.f32.gmra.mxu0 %vm296_vm0, %v2020_v37 }
  0x80   : > { %2056 = vmatmul.msk.f32.gmra.mxu1 %vm296_vm0, %v262_v38 }
  0x87   : > { %2041 = vmatmul.msk.f32.gmra.mxu0 %vm296_vm0, %v2021_v39 }
  0x88   : > { %2057 = vmatmul.msk.f32.gmra.mxu1 %vm296_vm0, %v263_v40 }
  0x8f   : > { %2042 = vmatmul.msk.f32.gmra.mxu0 %vm296_vm0, %v2022_v41 }
  0x90   : > { %2058 = vmatmul.msk.f32.gmra.mxu1 %vm296_vm0, %v264_v42 }
  0x97   : > { %2043 = vmatmul.msk.f32.gmra.mxu0 %vm296_vm0, %v2023_v43 }
  0x98   : > { %2059 = vmatmul.msk.f32.gmra.mxu1 %vm296_vm0, %v265_v44 }
  0xbc   : > { %v362_v46 = vpop.f32.mrf.mxu0 }
  0xbd   : > { %v475_v47 = vpop.f32.mrf.mxu1 }
  0xbe   : > { %v476_v48 = vadd.f32 %v475_v47, %v362_v46 }
  0xc0   : > { %v527_v49 = vadd.f32 %v2711_v45, %v476_v48 }
  0xc2   : > { %543 = vst [vmem:[#allocation2] sm:$0xff] %v527_v49 }
  0xc4   : > { %v365_v50 = vpop.f32.mrf.mxu0  ;;  %v398_v63 = vpop.f32.mrf.mxu2 }
  0xc5   : > { %v478_v51 = vpop.f32.mrf.mxu1  ;;  %v511_v1 = vpop.f32.mrf.mxu3 }
  0xc6   : > { %v479_v52 = vadd.f32 %v478_v51, %v365_v50  ;;  %v512_v3 = vadd.f32 %v511_v1, %v398_v63 }
  0xc8   : > { %v528_v53 = vadd.f32 %v2711_v45, %v479_v52  ;;  %v539_v5 = vadd.f32 %v2711_v45, %v512_v3 }
  0xca   : > { %544 = vst [vmem:[#allocation2 + $0x8] sm:$0xff] %v528_v53 }
  0xcb   : > { %555 = vst [vmem:[#allocation2 + $0x60] sm:$0xff] %v539_v5 }
  0xcc   : > { %v368_v54 = vpop.f32.mrf.mxu0  ;;  %v401_v7 = vpop.f32.mrf.mxu2 }
  0xcd   : > { %v481_v55 = vpop.f32.mrf.mxu1  ;;  %v514_v9 = vpop.f32.mrf.mxu3 }
  0xce   : > { %v482_v56 = vadd.f32 %v481_v55, %v368_v54  ;;  %v515_v11 = vadd.f32 %v514_v9, %v401_v7 }
  0xd0   : > { %v529_v57 = vadd.f32 %v2711_v45, %v482_v56  ;;  %v540_v13 = vadd.f32 %v2711_v45, %v515_v11 }
  0xd2   : > { %545 = vst [vmem:[#allocation2 + $0x10] sm:$0xff] %v529_v57 }
  0xd3   : > { %556 = vst [vmem:[#allocation2 + $0x68] sm:$0xff] %v540_v13 }
  0xd4   : > { %v371_v58 = vpop.f32.mrf.mxu0  ;;  %v404_v15 = vpop.f32.mrf.mxu2 }
  0xd5   : > { %v484_v59 = vpop.f32.mrf.mxu1  ;;  %v517_v17 = vpop.f32.mrf.mxu3 }
  0xd6   : > { %v485_v60 = vadd.f32 %v484_v59, %v371_v58  ;;  %v518_v20 = vadd.f32 %v517_v17, %v404_v15 }
  0xd8   : > { %v530_v61 = vadd.f32 %v2711_v45, %v485_v60  ;;  %v541_v22 = vadd.f32 %v2711_v45, %v518_v20 }
  0xda   : > { %546 = vst [vmem:[#allocation2 + $0x18] sm:$0xff] %v530_v61 }
  0xdb   : > { %557 = vst [vmem:[#allocation2 + $0x70] sm:$0xff] %v541_v22 }
  0xdc   : > { %v374_v62 = vpop.f32.mrf.mxu0  ;;  %v407_v25 = vpop.f32.mrf.mxu2 }
  0xdd   : > { %v487_v0 = vpop.f32.mrf.mxu1  ;;  %v520_v27 = vpop.f32.mrf.mxu3 }
  0xde   : > { %v488_v2 = vadd.f32 %v487_v0, %v374_v62  ;;  %v521_v30 = vadd.f32 %v520_v27, %v407_v25 }
  0xe0   : > { %v531_v4 = vadd.f32 %v2711_v45, %v488_v2  ;;  %v542_v32 = vadd.f32 %v2711_v45, %v521_v30 }
  0xe2   : > { %547 = vst [vmem:[#allocation2 + $0x20] sm:$0xff] %v531_v4 }
  0xe3   : > { %558 = vst [vmem:[#allocation2 + $0x78] sm:$0xff] %v542_v32 }
  0xe4   : > { %v377_v6 = vpop.f32.mrf.mxu0  ;;  %v589_v51 = vpop.f32.mrf.mxu2 }
  0xe5   : > { %v490_v8 = vpop.f32.mrf.mxu1 }
  0xe6   : > { %v491_v10 = vadd.f32 %v490_v8, %v377_v6 }
  0xe8   : > { %v532_v12 = vadd.f32 %v2711_v45, %v491_v10 }
  0xea   : > { %548 = vst [vmem:[#allocation2 + $0x28] sm:$0xff] %v532_v12 }
  0xec   : > { %v380_v14 = vpop.f32.mrf.mxu0 }
  0xed   : > { %v493_v16 = vpop.f32.mrf.mxu1 }
  0xee   : > { %v494_v19 = vadd.f32 %v493_v16, %v380_v14 }
  0xf0   : > { %v533_v21 = vadd.f32 %v2711_v45, %v494_v19 }
  0xf2   : > { %549 = vst [vmem:[#allocation2 + $0x30] sm:$0xff] %v533_v21 }
  0xf4   : > { %v383_v24 = vpop.f32.mrf.mxu0 }
  0xf5   : > { %v496_v26 = vpop.f32.mrf.mxu1 }
  0xf6   : > { %v497_v29 = vadd.f32 %v496_v26, %v383_v24 }
  0xf8   : > { %v534_v31 = vadd.f32 %v2711_v45, %v497_v29 }
  0xfa   : > { %550 = vst [vmem:[#allocation2 + $0x38] sm:$0xff] %v534_v31 }
  0xfc   : > { %v386_v34 = vpop.f32.mrf.mxu0 }
  0xfd   : > { %v499_v35 = vpop.f32.mrf.mxu1 }
  0xfe   : > { %v500_v36 = vadd.f32 %v499_v35, %v386_v34 }
 0x100   : > { %v535_v37 = vadd.f32 %v2711_v45, %v500_v36 }
 0x102   : > { %551 = vst [vmem:[#allocation2 + $0x40] sm:$0xff] %v535_v37 }
 0x104   : > { %v389_v38 = vpop.f32.mrf.mxu0 }
 0x105   : > { %v502_v39 = vpop.f32.mrf.mxu1 }
 0x106   : > { %v503_v40 = vadd.f32 %v502_v39, %v389_v38 }
 0x108   : > { %v536_v41 = vadd.f32 %v2711_v45, %v503_v40 }
 0x10a   : > { %552 = vst [vmem:[#allocation2 + $0x48] sm:$0xff] %v536_v41 }
 0x10c   : > { %v392_v42 = vpop.f32.mrf.mxu0 }
 0x10d   : > { %v505_v43 = vpop.f32.mrf.mxu1 }
 0x10e   : > { %v506_v44 = vadd.f32 %v505_v43, %v392_v42 }
 0x110   : > { %v537_v46 = vadd.f32 %v2711_v45, %v506_v44 }
 0x112   : > { %553 = vst [vmem:[#allocation2 + $0x50] sm:$0xff] %v537_v46 }
 0x114   : > { %v395_v47 = vpop.f32.mrf.mxu0 }
 0x115   : > { %v508_v48 = vpop.f32.mrf.mxu1 }
 0x116   : > { %v509_v49 = vadd.f32 %v508_v48, %v395_v47 }
 0x118   : > { %v538_v50 = vadd.f32 %v2711_v45, %v509_v49 }
 0x11a   : > { %554 = vst [vmem:[#allocation2 + $0x58] sm:$0xff] %v538_v50 }
 0x121   : > { %v564_v52 = vld [vmem:[%s563_s16] sm:$0xff]  ;;  %s2753_s16 = sshll.u32 %s636_s5, 3 }
 0x122   : > { %v592_v53 = vadd.f32 %v589_v51, %v564_v52  ;;  %s638_s19 = scalar_lea.vmem [#allocation2], %s2753_s16  ;;  %s708_s29 = scalar_lea.vmem %s2740_s22, %s2753_s16  ;;  %v714_v42 = vld [vmem:[%s713_s1] sm:$0xff] }
 0x123   : > { %v639_v12 = vld [vmem:[%s638_s19] sm:$0xff]  ;;  %s2080_s16 = sshll.u32 %s2665_s14, 3  ;;  %s2086_s1 = sshll.u32 %s2673_s24, 3 }
 0x124   : > { %2172 = vtanh.f32 %v592_v53  ;;  %v2065_v55 = vmul.f32 -1.442695, %v592_v53  ;;  %s938_s19 = scalar_lea.vmem [#allocation2], %s2080_s16  ;;  %s2093_s24 = sshll.u32 %s2681_s6, 3 }
 0x125   : > { %s1308_s26 = scalar_lea.vmem %s2740_s22, %s2093_s24 }
 0x126   : > { %2174 = vpow2.f32 %v2065_v55 }
 0x12a   : > { %v2173_v54 = vpop.eup %2172 }
 0x12b   : > { %615 = vrot.lane.b32.xlu0 %v2173_v54, %s2369_s17 }
 0x12c   : > { %v2175_v56 = vpop.eup %2174 }
 0x12d   : > { %v596_v57 = vadd.f32 1.0, %v2175_v56 }
 0x12f   : > { %2176 = vrcp.f32 %v596_v57  ;;  %v608_v62 = vand.u32 2147483648, %v596_v57  ;;  %vm602_vm2 = vweird.f32 %v596_v57  ;;  %v606_v63 = vand.u32 2147483647, %v596_v57 }
 0x131   : > { %v609_v1 = vor.u32 1.1754944e-38, %v608_v62  ;;  %vm607_vm4 = vcmp.eq.f32.partialorder %v606_v63, 8.507059e+37 }
 0x135   : > { %v2177_v58 = vpop.eup %2176 }
 0x136   : > { %v598_v59 = vmul.f32 %v2177_v58, %v596_v57  ;;  %vm603_vm1 = vweird.f32 %v2177_v58 }
 0x137   : > { %vm604_vm3 = vmor %vm602_vm2, %vm603_vm1 }
 0x138   : > { %v599_v45 = vsub.f32 1.0, %v598_v59 }
 0x13a   : > { %v600_v60 = vmul.f32 %v2177_v58, %v599_v45 }
 0x13c   : > { %v601_v61 = vadd.f32 %v2177_v58, %v600_v60 }
 0x13e   : > { %v605_v0 = vsel %vm604_vm3, %v2177_v58, %v601_v61 }
 0x13f   : > { %v610_v3 = vsel %vm607_vm4, %v609_v1, %v605_v0 }
 0x140   : > { %v613_v5 = vmul.f32 0.0, %v610_v3 }
 0x19d   : > { %v616_v2 = vpop.permute.xlu0 %615 }
 0x19e   : > { %v618_v4 = vmul.f32 %v616_v2, %v610_v3 }
 0x1a0   : > { %620 = vrot.lane.b32.xlu0 %v618_v4, %s2370_s11  ;;  %v789_v4 = vld [vmem:[%s788_s13] sm:$0xff]  ;;  %s1163_s13 = scalar_lea.vmem [#allocation2], %s2090_s7 }
 0x212   : > { %v621_v6 = vpop.permute.xlu0 %620 }
 0x213   : > { %v623_v7 = vadd.f32 %v621_v6, %v613_v5 }
 0x215   : > { %2178 = vtanh.f32 %v623_v7 }
 0x21b   : > { %v2179_v8 = vpop.eup %2178 }
 0x21c   : > { %626 = vrot.lane.b32.xlu1 %v2179_v8, %s2369_s17 }
 0x28e   : > { %v627_v9 = vpop.permute.xlu1 %626 }
 0x28f   : > { %v629_v10 = vmul.f32 %v627_v9, %v610_v3 }
 0x291   : > { %631 = vrot.lane.b32.xlu1 %v629_v10, %s2370_s11 }
 0x303   : > { %v632_v11 = vpop.permute.xlu1 %631 }
 0x304   : > { %635 = vst.msk [vmem:[%s634_s27] sm:$0xff] %vm296_vm0, %v632_v11  ;;  %2067 = vmatmul.msk.f32.vlgmr.msrb.gmra.mxu3 %vm296_vm0, %v632_v11  ;;  %s2077_s27 = sshll.u32 %s2660_s25, 3  ;;  %s1008_s25 = scalar_lea.vmem %s2740_s22, %s2080_s16 }
 0x305   : > { %958 = vmatpush.msrb.mxu3 %v2523_v18  ;;  %s863_s5 = scalar_lea.vmem [#allocation2], %s2077_s27  ;;  %s933_s9 = scalar_lea.vmem %s2740_s22, %s2077_s27 }
 0x306   : > { %s2096_s27 = sshll.u32 %s2685_s10, 3 }
 0x307   : > { %959 = vmatpush.msrb.mxu3 %v2544_v23  ;;  %s1383_s6 = scalar_lea.vmem %s2740_s22, %s2096_s27 }
 0x309   : > { %960 = vmatpush.msrb.mxu3 %v2565_v28 }
 0x30b   : > { %961 = vmatpush.msrb.mxu3 %v2586_v33 }
 0x387   : > { %v663_v13 = vpop.f32.mrf.mxu3 }
 0x388   : > { %v666_v14 = vadd.f32 %v663_v13, %v639_v12 }
 0x38a   : > { %2180 = vtanh.f32 %v666_v14  ;;  %v2068_v16 = vmul.f32 -1.442695, %v666_v14 }
 0x38c   : > { %2182 = vpow2.f32 %v2068_v16 }
 0x390   : > { %v2181_v15 = vpop.eup %2180 }
 0x391   : > { %689 = vrot.lane.b32.xlu2 %v2181_v15, %s2369_s17 }
 0x392   : > { %v2183_v17 = vpop.eup %2182 }
 0x393   : > { %v670_v19 = vadd.f32 1.0, %v2183_v17 }
 0x395   : > { %2184 = vrcp.f32 %v670_v19  ;;  %v682_v26 = vand.u32 2147483648, %v670_v19  ;;  %vm676_vm6 = vweird.f32 %v670_v19  ;;  %v680_v27 = vand.u32 2147483647, %v670_v19 }
 0x397   : > { %v683_v30 = vor.u32 1.1754944e-38, %v682_v26  ;;  %vm681_vm8 = vcmp.eq.f32.partialorder %v680_v27, 8.507059e+37 }
 0x39b   : > { %v2185_v20 = vpop.eup %2184 }
 0x39c   : > { %v672_v21 = vmul.f32 %v2185_v20, %v670_v19  ;;  %vm677_vm5 = vweird.f32 %v2185_v20 }
 0x39d   : > { %vm678_vm7 = vmor %vm676_vm6, %vm677_vm5 }
 0x39e   : > { %v673_v22 = vsub.f32 1.0, %v672_v21 }
 0x3a0   : > { %v674_v24 = vmul.f32 %v2185_v20, %v673_v22 }
 0x3a2   : > { %v675_v25 = vadd.f32 %v2185_v20, %v674_v24 }
 0x3a4   : > { %v679_v29 = vsel %vm678_vm7, %v2185_v20, %v675_v25 }
 0x3a5   : > { %v684_v32 = vsel %vm681_vm8, %v683_v30, %v679_v29 }
 0x3a6   : > { %v687_v35 = vmul.f32 %v684_v32, %v623_v7 }
 0x3eb   : > { %v690_v31 = vpop.permute.xlu2 %689 }
 0x3ec   : > { %v692_v34 = vmul.f32 %v690_v31, %v684_v32 }
 0x3ee   : > { %694 = vrot.lane.b32.xlu2 %v692_v34, %s2370_s11  ;;  %v864_v34 = vld [vmem:[%s863_s5] sm:$0xff]  ;;  %s1313_s5 = scalar_lea.vmem [#allocation2], %s2096_s27 }
 0x448   : > { %v695_v36 = vpop.permute.xlu2 %694 }
 0x449   : > { %v697_v37 = vadd.f32 %v695_v36, %v687_v35 }
 0x44b   : > { %2186 = vtanh.f32 %v697_v37 }
 0x451   : > { %v2187_v38 = vpop.eup %2186 }
 0x452   : > { %700 = vrot.lane.b32.xlu0 %v2187_v38, %s2369_s17 }
 0x4c4   : > { %v701_v39 = vpop.permute.xlu0 %700 }
 0x4c5   : > { %v703_v40 = vmul.f32 %v701_v39, %v684_v32 }
 0x4c7   : > { %705 = vrot.lane.b32.xlu1 %v703_v40, %s2370_s11 }
 0x539   : > { %v706_v41 = vpop.permute.xlu1 %705 }
 0x53a   : > { %709 = vst.msk [vmem:[%s708_s29] sm:$0xff] %vm296_vm0, %v706_v41  ;;  %2071 = vmatmul.msk.f32.vlgmr.msra.gmra.mxu2 %vm296_vm0, %v706_v41  ;;  %s2083_s29 = sshll.u32 %s2669_s21, 3  ;;  %s1158_s21 = scalar_lea.vmem %s2740_s22, %s2086_s1 }
 0x53b   : > { %1033 = vmatpush.msra.mxu2 %v2523_v18  ;;  %s1013_s18 = scalar_lea.vmem [#allocation2], %s2083_s29  ;;  %s1083_s14 = scalar_lea.vmem %s2740_s22, %s2083_s29 }
 0x53c   : > { %s2105_s29 = sshll.u32 %s2697_s2, 3 }
 0x53d   : > { %1034 = vmatpush.msra.mxu2 %v2544_v23 }
 0x53f   : > { %1035 = vmatpush.msra.mxu2 %v2565_v28 }
 0x541   : > { %1036 = vmatpush.msra.mxu2 %v2586_v33 }
 0x5bd   : > { %v738_v43 = vpop.f32.mrf.mxu2 }
 0x5be   : > { %v741_v44 = vadd.f32 %v738_v43, %v714_v42 }
 0x5c0   : > { %2188 = vtanh.f32 %v741_v44  ;;  %v2072_v47 = vmul.f32 -1.442695, %v741_v44 }
 0x5c2   : > { %2190 = vpow2.f32 %v2072_v47 }
 0x5c6   : > { %v2189_v46 = vpop.eup %2188 }
 0x5c7   : > { %764 = vrot.lane.b32.xlu2 %v2189_v46, %s2369_s17 }
 0x5c8   : > { %v2191_v48 = vpop.eup %2190 }
 0x5c9   : > { %v745_v49 = vadd.f32 1.0, %v2191_v48 }
 0x5cb   : > { %2192 = vrcp.f32 %v745_v49  ;;  %v757_v55 = vand.u32 2147483648, %v745_v49  ;;  %vm751_vm10 = vweird.f32 %v745_v49  ;;  %v755_v56 = vand.u32 2147483647, %v745_v49 }
 0x5cd   : > { %v758_v58 = vor.u32 1.1754944e-38, %v757_v55  ;;  %vm756_vm12 = vcmp.eq.f32.partialorder %v755_v56, 8.507059e+37 }
 0x5d1   : > { %v2193_v50 = vpop.eup %2192 }
 0x5d2   : > { %v747_v51 = vmul.f32 %v2193_v50, %v745_v49  ;;  %vm752_vm9 = vweird.f32 %v2193_v50 }
 0x5d3   : > { %vm753_vm11 = vmor %vm751_vm10, %vm752_vm9 }
 0x5d4   : > { %v748_v52 = vsub.f32 1.0, %v747_v51 }
 0x5d6   : > { %v749_v53 = vmul.f32 %v2193_v50, %v748_v52 }
 0x5d8   : > { %v750_v54 = vadd.f32 %v2193_v50, %v749_v53 }
 0x5da   : > { %v754_v57 = vsel %vm753_vm11, %v2193_v50, %v750_v54 }
 0x5db   : > { %v759_v45 = vsel %vm756_vm12, %v758_v58, %v754_v57  ;;  %v939_v57 = vld [vmem:[%s938_s19] sm:$0xff]  ;;  %s2102_s19 = sshll.u32 %s2693_s0, 3  ;;  %s1608_s0 = scalar_lea.vmem %s2740_s22, %s2105_s29 }
 0x5dc   : > { %v762_v61 = vmul.f32 %v759_v45, %v697_v37 }
 0x621   : > { %v765_v59 = vpop.permute.xlu2 %764 }
 0x622   : > { %v767_v60 = vmul.f32 %v765_v59, %v759_v45 }
 0x624   : > { %769 = vrot.lane.b32.xlu0 %v767_v60, %s2370_s11 }
 0x696   : > { %v770_v62 = vpop.permute.xlu0 %769 }
 0x697   : > { %v772_v63 = vadd.f32 %v770_v62, %v762_v61 }
 0x699   : > { %2194 = vtanh.f32 %v772_v63 }
 0x69f   : > { %v2195_v0 = vpop.eup %2194 }
 0x6a0   : > { %775 = vrot.lane.b32.xlu1 %v2195_v0, %s2369_s17 }
 0x712   : > { %v776_v1 = vpop.permute.xlu1 %775 }
 0x713   : > { %v778_v2 = vmul.f32 %v776_v1, %v759_v45 }
 0x715   : > { %780 = vrot.lane.b32.xlu2 %v778_v2, %s2370_s11 }
 0x76f   : > { %v781_v3 = vpop.permute.xlu2 %780 }
 0x770   : > { %784 = vst.msk [vmem:[%s783_s28] sm:$0xff] %vm296_vm0, %v781_v3  ;;  %2074 = vmatmul.msk.f32.vlgmr.msra.gmra.mxu3 %vm296_vm0, %v781_v3  ;;  %s1088_s28 = scalar_lea.vmem [#allocation2], %s2086_s1 }
 0x771   : > { %1108 = vmatpush.msra.mxu3 %v2523_v18 }
 0x773   : > { %1109 = vmatpush.msra.mxu3 %v2544_v23 }
 0x775   : > { %1110 = vmatpush.msra.mxu3 %v2565_v28 }
 0x777   : > { %1111 = vmatpush.msra.mxu3 %v2586_v33 }
 0x7f3   : > { %v813_v5 = vpop.f32.mrf.mxu3 }
 0x7f4   : > { %v816_v6 = vadd.f32 %v813_v5, %v789_v4 }
 0x7f6   : > { %2196 = vtanh.f32 %v816_v6  ;;  %v2075_v8 = vmul.f32 -1.442695, %v816_v6 }
 0x7f8   : > { %2198 = vpow2.f32 %v2075_v8 }
 0x7fc   : > { %v2197_v7 = vpop.eup %2196 }
 0x7fd   : > { %839 = vrot.lane.b32.xlu0 %v2197_v7, %s2369_s17 }
 0x7fe   : > { %v2199_v9 = vpop.eup %2198 }
 0x7ff   : > { %v820_v10 = vadd.f32 1.0, %v2199_v9 }
 0x801   : > { %2200 = vrcp.f32 %v820_v10  ;;  %v832_v16 = vand.u32 2147483648, %v820_v10  ;;  %vm826_vm14 = vweird.f32 %v820_v10  ;;  %v830_v17 = vand.u32 2147483647, %v820_v10 }
 0x803   : > { %v833_v20 = vor.u32 1.1754944e-38, %v832_v16  ;;  %vm831_vm1 = vcmp.eq.f32.partialorder %v830_v17, 8.507059e+37 }
 0x807   : > { %v2201_v11 = vpop.eup %2200 }
 0x808   : > { %v822_v12 = vmul.f32 %v2201_v11, %v820_v10  ;;  %vm827_vm13 = vweird.f32 %v2201_v11 }
 0x809   : > { %vm828_vm15 = vmor %vm826_vm14, %vm827_vm13 }
 0x80a   : > { %v823_v13 = vsub.f32 1.0, %v822_v12 }
 0x80c   : > { %v824_v14 = vmul.f32 %v2201_v11, %v823_v13 }
 0x80e   : > { %v825_v15 = vadd.f32 %v2201_v11, %v824_v14 }
 0x810   : > { %v829_v19 = vsel %vm828_vm15, %v2201_v11, %v825_v15 }
 0x811   : > { %v834_v22 = vsel %vm831_vm1, %v833_v20, %v829_v19  ;;  %v1014_v19 = vld [vmem:[%s1013_s18] sm:$0xff]  ;;  %s1538_s18 = scalar_lea.vmem [#allocation2], %s2105_s29 }
 0x812   : > { %v837_v25 = vmul.f32 %v834_v22, %v772_v63 }
 0x86f   : > { %v840_v21 = vpop.permute.xlu0 %839 }
 0x870   : > { %v842_v24 = vmul.f32 %v840_v21, %v834_v22 }
 0x872   : > { %844 = vrot.lane.b32.xlu1 %v842_v24, %s2370_s11 }
 0x8e4   : > { %v845_v26 = vpop.permute.xlu1 %844 }
 0x8e5   : > { %v847_v27 = vadd.f32 %v845_v26, %v837_v25 }
 0x8e7   : > { %2202 = vtanh.f32 %v847_v27 }
 0x8ed   : > { %v2203_v29 = vpop.eup %2202 }
 0x8ee   : > { %850 = vrot.lane.b32.xlu2 %v2203_v29, %s2369_s17 }
 0x948   : > { %v851_v30 = vpop.permute.xlu2 %850 }
 0x949   : > { %v853_v31 = vmul.f32 %v851_v30, %v834_v22 }
 0x94b   : > { %855 = vrot.lane.b32.xlu0 %v853_v31, %s2370_s11 }
 0x9bd   : > { %v856_v32 = vpop.permute.xlu0 %855 }
 0x9be   : > { %859 = vst.msk [vmem:[%s858_s8] sm:$0xff] %vm296_vm0, %v856_v32  ;;  %2078 = vmatmul.msk.f32.vlgmr.msrb.gmra.mxu2 %vm296_vm0, %v856_v32  ;;  %s1238_s8 = scalar_lea.vmem [#allocation2], %s2093_s24 }
 0x9bf   : > { %1183 = vmatpush.msrb.mxu2 %v2523_v18 }
 0x9c1   : > { %1184 = vmatpush.msrb.mxu2 %v2544_v23 }
 0x9c3   : > { %1185 = vmatpush.msrb.mxu2 %v2565_v28 }
 0x9c5   : > { %1186 = vmatpush.msrb.mxu2 %v2586_v33 }
 0xa41   : > { %v888_v35 = vpop.f32.mrf.mxu2 }
 0xa42   : > { %v891_v36 = vadd.f32 %v888_v35, %v864_v34 }
 0xa44   : > { %2204 = vtanh.f32 %v891_v36  ;;  %v2079_v38 = vmul.f32 -1.442695, %v891_v36 }
 0xa46   : > { %2206 = vpow2.f32 %v2079_v38 }
 0xa4a   : > { %v2205_v37 = vpop.eup %2204 }
 0xa4b   : > { %914 = vrot.lane.b32.xlu1 %v2205_v37, %s2369_s17 }
 0xa4c   : > { %v2207_v39 = vpop.eup %2206 }
 0xa4d   : > { %v895_v18 = vadd.f32 1.0, %v2207_v39 }
 0xa4f   : > { %2208 = vrcp.f32 %v895_v18  ;;  %v907_v42 = vand.u32 2147483648, %v895_v18  ;;  %vm901_vm3 = vweird.f32 %v895_v18  ;;  %v905_v43 = vand.u32 2147483647, %v895_v18 }
 0xa51   : > { %v908_v46 = vor.u32 1.1754944e-38, %v907_v42  ;;  %vm906_vm5 = vcmp.eq.f32.partialorder %v905_v43, 8.507059e+37 }
 0xa55   : > { %v2209_v23 = vpop.eup %2208 }
 0xa56   : > { %v897_v40 = vmul.f32 %v2209_v23, %v895_v18  ;;  %vm902_vm2 = vweird.f32 %v2209_v23 }
 0xa57   : > { %vm903_vm4 = vmor %vm901_vm3, %vm902_vm2 }
 0xa58   : > { %v898_v28 = vsub.f32 1.0, %v897_v40 }
 0xa5a   : > { %v899_v41 = vmul.f32 %v2209_v23, %v898_v28 }
 0xa5c   : > { %v900_v33 = vadd.f32 %v2209_v23, %v899_v41 }
 0xa5e   : > { %v904_v44 = vsel %vm903_vm4, %v2209_v23, %v900_v33 }
 0xa5f   : > { %v909_v48 = vsel %vm906_vm5, %v908_v46, %v904_v44  ;;  %v1089_v44 = vld [vmem:[%s1088_s28] sm:$0xff]  ;;  %s2111_s28 = sshll.u32 %s2704_s23, 3 }
 0xa60   : > { %v912_v50 = vmul.f32 %v909_v48, %v847_v27 }
 0xabd   : > { %v915_v47 = vpop.permute.xlu1 %914 }
 0xabe   : > { %v917_v49 = vmul.f32 %v915_v47, %v909_v48 }
 0xac0   : > { %919 = vrot.lane.b32.xlu2 %v917_v49, %s2370_s11 }
 0xb1a   : > { %v920_v51 = vpop.permute.xlu2 %919 }
 0xb1b   : > { %v922_v52 = vadd.f32 %v920_v51, %v912_v50 }
 0xb1d   : > { %2210 = vtanh.f32 %v922_v52 }
 0xb23   : > { %v2211_v53 = vpop.eup %2210 }
 0xb24   : > { %925 = vrot.lane.b32.xlu0 %v2211_v53, %s2369_s17 }
 0xb96   : > { %v926_v54 = vpop.permute.xlu0 %925 }
 0xb97   : > { %v928_v55 = vmul.f32 %v926_v54, %v909_v48 }
 0xb99   : > { %930 = vrot.lane.b32.xlu1 %v928_v55, %s2370_s11 }
 0xc0b   : > { %v931_v56 = vpop.permute.xlu1 %930 }
 0xc0c   : > { %934 = vst.msk [vmem:[%s933_s9] sm:$0xff] %vm296_vm0, %v931_v56  ;;  %2081 = vmatmul.msk.f32.vlgmr.msrb.gmra.mxu3 %vm296_vm0, %v931_v56  ;;  %s2099_s9 = sshll.u32 %s2688_s12, 3  ;;  %s1533_s12 = scalar_lea.vmem %s2740_s22, %s2102_s19 }
 0xc0d   : > { %s1388_s16 = scalar_lea.vmem [#allocation2], %s2099_s9  ;;  %s1458_s10 = scalar_lea.vmem %s2740_s22, %s2099_s9 }
 0xc8f   : > { %v963_v58 = vpop.f32.mrf.mxu3 }
 0xc90   : > { %v966_v59 = vadd.f32 %v963_v58, %v939_v57 }
 0xc92   : > { %2212 = vtanh.f32 %v966_v59  ;;  %v2082_v60 = vmul.f32 -1.442695, %v966_v59 }
 0xc94   : > { %2214 = vpow2.f32 %v2082_v60 }
 0xc98   : > { %v2213_v45 = vpop.eup %2212 }
 0xc99   : > { %989 = vrot.lane.b32.xlu2 %v2213_v45, %s2369_s17 }
 0xc9a   : > { %v2215_v61 = vpop.eup %2214 }
 0xc9b   : > { %v970_v62 = vadd.f32 1.0, %v2215_v61 }
 0xc9d   : > { %2216 = vrcp.f32 %v970_v62  ;;  %v982_v4 = vand.u32 2147483648, %v970_v62  ;;  %vm976_vm7 = vweird.f32 %v970_v62  ;;  %v980_v5 = vand.u32 2147483647, %v970_v62 }
 0xc9f   : > { %v983_v7 = vor.u32 1.1754944e-38, %v982_v4  ;;  %vm981_vm9 = vcmp.eq.f32.partialorder %v980_v5, 8.507059e+37 }
 0xca3   : > { %v2217_v63 = vpop.eup %2216 }
 0xca4   : > { %v972_v0 = vmul.f32 %v2217_v63, %v970_v62  ;;  %vm977_vm6 = vweird.f32 %v2217_v63 }
 0xca5   : > { %vm978_vm8 = vmor %vm976_vm7, %vm977_vm6 }
 0xca6   : > { %v973_v1 = vsub.f32 1.0, %v972_v0 }
 0xca8   : > { %v974_v2 = vmul.f32 %v2217_v63, %v973_v1 }
 0xcaa   : > { %v975_v3 = vadd.f32 %v2217_v63, %v974_v2 }
 0xcac   : > { %v979_v6 = vsel %vm978_vm8, %v2217_v63, %v975_v3 }
 0xcad   : > { %v984_v9 = vsel %vm981_vm9, %v983_v7, %v979_v6  ;;  %v1164_v6 = vld [vmem:[%s1163_s13] sm:$0xff] }
 0xcae   : > { %v987_v11 = vmul.f32 %v984_v9, %v922_v52 }
 0xcf3   : > { %v990_v8 = vpop.permute.xlu2 %989 }
 0xcf4   : > { %v992_v10 = vmul.f32 %v990_v8, %v984_v9 }
 0xcf6   : > { %994 = vrot.lane.b32.xlu0 %v992_v10, %s2370_s11 }
 0xd68   : > { %v995_v12 = vpop.permute.xlu0 %994 }
 0xd69   : > { %v997_v13 = vadd.f32 %v995_v12, %v987_v11 }
 0xd6b   : > { %2218 = vtanh.f32 %v997_v13 }
 0xd71   : > { %v2219_v14 = vpop.eup %2218 }
 0xd72   : > { %1000 = vrot.lane.b32.xlu1 %v2219_v14, %s2369_s17 }
 0xde4   : > { %v1001_v15 = vpop.permute.xlu1 %1000 }
 0xde5   : > { %v1003_v16 = vmul.f32 %v1001_v15, %v984_v9 }
 0xde7   : > { %1005 = vrot.lane.b32.xlu2 %v1003_v16, %s2370_s11 }
 0xe41   : > { %v1006_v17 = vpop.permute.xlu2 %1005 }
 0xe42   : > { %1009 = vst.msk [vmem:[%s1008_s25] sm:$0xff] %vm296_vm0, %v1006_v17  ;;  %2084 = vmatmul.msk.f32.vlgmr.msra.gmra.mxu2 %vm296_vm0, %v1006_v17  ;;  %s1463_s25 = scalar_lea.vmem [#allocation2], %s2102_s19 }
 0xec5   : > { %v1038_v20 = vpop.f32.mrf.mxu2 }
 0xec6   : > { %v1041_v21 = vadd.f32 %v1038_v20, %v1014_v19 }
 0xec8   : > { %2220 = vtanh.f32 %v1041_v21  ;;  %v2085_v24 = vmul.f32 -1.442695, %v1041_v21 }
 0xeca   : > { %2222 = vpow2.f32 %v2085_v24 }
 0xece   : > { %v2221_v22 = vpop.eup %2220 }
 0xecf   : > { %1064 = vrot.lane.b32.xlu0 %v2221_v22, %s2369_s17 }
 0xed0   : > { %v2223_v25 = vpop.eup %2222 }
 0xed1   : > { %v1045_v26 = vadd.f32 1.0, %v2223_v25 }
 0xed3   : > { %2224 = vrcp.f32 %v1045_v26  ;;  %v1057_v34 = vand.u32 2147483648, %v1045_v26  ;;  %vm1051_vm11 = vweird.f32 %v1045_v26  ;;  %v1055_v35 = vand.u32 2147483647, %v1045_v26 }
 0xed5   : > { %v1058_v37 = vor.u32 1.1754944e-38, %v1057_v34  ;;  %vm1056_vm13 = vcmp.eq.f32.partialorder %v1055_v35, 8.507059e+37  ;;  %v2861_v34 = vld [vmem:[%s2466_s30 + $0x10] sm:$0xff]  ;;  %v2866_v35 = vld [vmem:[%s2466_s30 + $0x8] sm:$0xff] }
 0xed9   : > { %v2225_v27 = vpop.eup %2224 }
 0xeda   : > { %v1047_v29 = vmul.f32 %v2225_v27, %v1045_v26  ;;  %vm1052_vm10 = vweird.f32 %v2225_v27 }
 0xedb   : > { %vm1053_vm12 = vmor %vm1051_vm11, %vm1052_vm10 }
 0xedc   : > { %v1048_v30 = vsub.f32 1.0, %v1047_v29 }
 0xede   : > { %v1049_v31 = vmul.f32 %v2225_v27, %v1048_v30 }
 0xee0   : > { %v1050_v32 = vadd.f32 %v2225_v27, %v1049_v31 }
 0xee2   : > { %v1054_v36 = vsel %vm1053_vm12, %v2225_v27, %v1050_v32  ;;  %v2858_v32 = vld [vmem:[%s2466_s30 + $0x18] sm:$0xff] }
 0xee3   : > { %v1059_v39 = vsel %vm1056_vm13, %v1058_v37, %v1054_v36  ;;  %1258 = vmatpush.msrb.mxu3 %v2858_v32  ;;  %1333 = vmatpush.msra.mxu2 %v2858_v32  ;;  %v2871_v36 = vld [vmem:[%s2466_s30] sm:$0xff]  ;;  %s1233_s30 = scalar_lea.vmem %s2740_s22, %s2090_s7 }
 0xee4   : > { %v1062_v23 = vmul.f32 %v1059_v39, %v997_v13 }
 0xee5   : > { %1259 = vmatpush.msrb.mxu3 %v2861_v34  ;;  %1334 = vmatpush.msra.mxu2 %v2861_v34 }
 0xee7   : > { %1260 = vmatpush.msrb.mxu3 %v2866_v35  ;;  %1335 = vmatpush.msra.mxu2 %v2866_v35 }
 0xee9   : > { %1261 = vmatpush.msrb.mxu3 %v2871_v36  ;;  %1336 = vmatpush.msra.mxu2 %v2871_v36 }
 0xf41   : > { %v1065_v38 = vpop.permute.xlu0 %1064 }
 0xf42   : > { %v1067_v18 = vmul.f32 %v1065_v38, %v1059_v39 }
 0xf44   : > { %1069 = vrot.lane.b32.xlu1 %v1067_v18, %s2370_s11  ;;  %v1239_v18 = vld [vmem:[%s1238_s8] sm:$0xff] }
 0xfb6   : > { %v1070_v40 = vpop.permute.xlu1 %1069 }
 0xfb7   : > { %v1072_v28 = vadd.f32 %v1070_v40, %v1062_v23 }
 0xfb9   : > { %2226 = vtanh.f32 %v1072_v28 }
 0xfbf   : > { %v2227_v41 = vpop.eup %2226 }
 0xfc0   : > { %1075 = vrot.lane.b32.xlu2 %v2227_v41, %s2369_s17 }
0x101a   : > { %v1076_v33 = vpop.permute.xlu2 %1075 }
0x101b   : > { %v1078_v42 = vmul.f32 %v1076_v33, %v1059_v39 }
0x101d   : > { %1080 = vrot.lane.b32.xlu0 %v1078_v42, %s2370_s11 }
0x108f   : > { %v1081_v43 = vpop.permute.xlu0 %1080 }
0x1090   : > { %1084 = vst.msk [vmem:[%s1083_s14] sm:$0xff] %vm296_vm0, %v1081_v43  ;;  %2087 = vmatmul.msk.f32.vlgmr.msra.gmra.mxu3 %vm296_vm0, %v1081_v43  ;;  %s2108_s14 = sshll.u32 %s2700_s15, 3  ;;  %s1758_s15 = scalar_lea.vmem %s2740_s22, %s2111_s28 }
0x1091   : > { %1408 = vmatpush.msra.mxu3 %v2858_v32  ;;  %s1613_s1 = scalar_lea.vmem [#allocation2], %s2108_s14  ;;  %s1683_s2 = scalar_lea.vmem %s2740_s22, %s2108_s14 }
0x1093   : > { %1409 = vmatpush.msra.mxu3 %v2861_v34 }
0x1095   : > { %1410 = vmatpush.msra.mxu3 %v2866_v35 }
0x1097   : > { %1411 = vmatpush.msra.mxu3 %v2871_v36 }
0x1113   : > { %v1113_v46 = vpop.f32.mrf.mxu3 }
0x1114   : > { %v1116_v47 = vadd.f32 %v1113_v46, %v1089_v44 }
0x1116   : > { %2228 = vtanh.f32 %v1116_v47  ;;  %v2088_v49 = vmul.f32 -1.442695, %v1116_v47 }
0x1118   : > { %2230 = vpow2.f32 %v2088_v49 }
0x111c   : > { %v2229_v48 = vpop.eup %2228 }
0x111d   : > { %1139 = vrot.lane.b32.xlu1 %v2229_v48, %s2369_s17 }
0x111e   : > { %v2231_v50 = vpop.eup %2230 }
0x111f   : > { %v1120_v51 = vadd.f32 1.0, %v2231_v50 }
0x1121   : > { %2232 = vrcp.f32 %v1120_v51  ;;  %v1132_v57 = vand.u32 2147483648, %v1120_v51  ;;  %vm1126_vm15 = vweird.f32 %v1120_v51  ;;  %v1130_v58 = vand.u32 2147483647, %v1120_v51 }
0x1123   : > { %v1133_v45 = vor.u32 1.1754944e-38, %v1132_v57  ;;  %vm1131_vm2 = vcmp.eq.f32.partialorder %v1130_v58, 8.507059e+37 }
0x1127   : > { %v2233_v52 = vpop.eup %2232 }
0x1128   : > { %v1122_v53 = vmul.f32 %v2233_v52, %v1120_v51  ;;  %vm1127_vm14 = vweird.f32 %v2233_v52 }
0x1129   : > { %vm1128_vm1 = vmor %vm1126_vm15, %vm1127_vm14 }
0x112a   : > { %v1123_v54 = vsub.f32 1.0, %v1122_v53 }
0x112c   : > { %v1124_v55 = vmul.f32 %v2233_v52, %v1123_v54 }
0x112e   : > { %v1125_v56 = vadd.f32 %v2233_v52, %v1124_v55 }
0x1130   : > { %v1129_v59 = vsel %vm1128_vm1, %v2233_v52, %v1125_v56 }
0x1131   : > { %v1134_v61 = vsel %vm1131_vm2, %v1133_v45, %v1129_v59 }
0x1132   : > { %v1137_v63 = vmul.f32 %v1134_v61, %v1072_v28 }
0x118f   : > { %v1140_v60 = vpop.permute.xlu1 %1139 }
0x1190   : > { %v1142_v62 = vmul.f32 %v1140_v60, %v1134_v61 }
0x1192   : > { %1144 = vrot.lane.b32.xlu2 %v1142_v62, %s2370_s11  ;;  %v1314_v62 = vld [vmem:[%s1313_s5] sm:$0xff] }
0x11ec   : > { %v1145_v0 = vpop.permute.xlu2 %1144 }
0x11ed   : > { %v1147_v1 = vadd.f32 %v1145_v0, %v1137_v63 }
0x11ef   : > { %2234 = vtanh.f32 %v1147_v1 }
0x11f5   : > { %v2235_v2 = vpop.eup %2234 }
0x11f6   : > { %1150 = vrot.lane.b32.xlu0 %v2235_v2, %s2369_s17 }
0x1268   : > { %v1151_v3 = vpop.permute.xlu0 %1150 }
0x1269   : > { %v1153_v4 = vmul.f32 %v1151_v3, %v1134_v61 }
0x126b   : > { %1155 = vrot.lane.b32.xlu1 %v1153_v4, %s2370_s11 }
0x12dd   : > { %v1156_v5 = vpop.permute.xlu1 %1155 }
0x12de   : > { %1159 = vst.msk [vmem:[%s1158_s21] sm:$0xff] %vm296_vm0, %v1156_v5  ;;  %2091 = vmatmul.msk.f32.vlgmr.msrb.gmra.mxu2 %vm296_vm0, %v1156_v5  ;;  %s1688_s21 = scalar_lea.vmem [#allocation2], %s2111_s28 }
0x12df   : > { %1483 = vmatpush.msrb.mxu2 %v2858_v32 }
0x12e1   : > { %1484 = vmatpush.msrb.mxu2 %v2861_v34 }
0x12e3   : > { %1485 = vmatpush.msrb.mxu2 %v2866_v35 }
0x12e5   : > { %1486 = vmatpush.msrb.mxu2 %v2871_v36 }
0x1361   : > { %v1188_v7 = vpop.f32.mrf.mxu2 }
0x1362   : > { %v1191_v8 = vadd.f32 %v1188_v7, %v1164_v6 }
0x1364   : > { %2236 = vtanh.f32 %v1191_v8  ;;  %v2092_v10 = vmul.f32 -1.442695, %v1191_v8 }
0x1366   : > { %2238 = vpow2.f32 %v2092_v10 }
0x136a   : > { %v2237_v9 = vpop.eup %2236 }
0x136b   : > { %1214 = vrot.lane.b32.xlu2 %v2237_v9, %s2369_s17 }
0x136c   : > { %v2239_v11 = vpop.eup %2238 }
0x136d   : > { %v1195_v12 = vadd.f32 1.0, %v2239_v11 }
0x136f   : > { %2240 = vrcp.f32 %v1195_v12  ;;  %v1207_v19 = vand.u32 2147483648, %v1195_v12  ;;  %vm1201_vm4 = vweird.f32 %v1195_v12  ;;  %v1205_v20 = vand.u32 2147483647, %v1195_v12 }
0x1371   : > { %v1208_v22 = vor.u32 1.1754944e-38, %v1207_v19  ;;  %vm1206_vm6 = vcmp.eq.f32.partialorder %v1205_v20, 8.507059e+37 }
0x1375   : > { %v2241_v13 = vpop.eup %2240 }
0x1376   : > { %v1197_v14 = vmul.f32 %v2241_v13, %v1195_v12  ;;  %vm1202_vm3 = vweird.f32 %v2241_v13 }
0x1377   : > { %vm1203_vm5 = vmor %vm1201_vm4, %vm1202_vm3 }
0x1378   : > { %v1198_v15 = vsub.f32 1.0, %v1197_v14 }
0x137a   : > { %v1199_v16 = vmul.f32 %v2241_v13, %v1198_v15 }
0x137c   : > { %v1200_v17 = vadd.f32 %v2241_v13, %v1199_v16 }
0x137e   : > { %v1204_v21 = vsel %vm1203_vm5, %v2241_v13, %v1200_v17 }
0x137f   : > { %v1209_v25 = vsel %vm1206_vm6, %v1208_v22, %v1204_v21 }
0x1380   : > { %v1212_v27 = vmul.f32 %v1209_v25, %v1147_v1 }
0x13c5   : > { %v1215_v24 = vpop.permute.xlu2 %1214 }
0x13c6   : > { %v1217_v26 = vmul.f32 %v1215_v24, %v1209_v25 }
0x13c8   : > { %1219 = vrot.lane.b32.xlu0 %v1217_v26, %s2370_s11  ;;  %v1389_v26 = vld [vmem:[%s1388_s16] sm:$0xff] }
0x143a   : > { %v1220_v29 = vpop.permute.xlu0 %1219 }
0x143b   : > { %v2853_v30 = vadd.f32 %v1220_v29, %v1212_v27 }
0x143d   : > { %2242 = vtanh.f32 %v2853_v30 }
0x1443   : > { %v2243_v31 = vpop.eup %2242 }
0x1444   : > { %1225 = vrot.lane.b32.xlu1 %v2243_v31, %s2369_s17 }
0x14b6   : > { %v1226_v37 = vpop.permute.xlu1 %1225 }
0x14b7   : > { %v1228_v38 = vmul.f32 %v1226_v37, %v1209_v25 }
0x14b9   : > { %1230 = vrot.lane.b32.xlu2 %v1228_v38, %s2370_s11 }
0x1513   : > { %v1231_v39 = vpop.permute.xlu2 %1230 }
0x1514   : > { %1234 = vst.msk [vmem:[%s1233_s30] sm:$0xff] %vm296_vm0, %v1231_v39  ;;  %2094 = vmatmul.msk.f32.vlgmr.msrb.gmra.mxu3 %vm296_vm0, %v1231_v39 }
0x1515   : > { %1558 = vmatpush.msrb.mxu3 %v2858_v32 }
0x1517   : > { %1559 = vmatpush.msrb.mxu3 %v2861_v34 }
0x1519   : > { %1560 = vmatpush.msrb.mxu3 %v2866_v35 }
0x151b   : > { %1561 = vmatpush.msrb.mxu3 %v2871_v36 }
0x1597   : > { %v1263_v23 = vpop.f32.mrf.mxu3 }
0x1598   : > { %v1266_v40 = vadd.f32 %v1263_v23, %v1239_v18 }
0x159a   : > { %2244 = vtanh.f32 %v1266_v40  ;;  %v2095_v41 = vmul.f32 -1.442695, %v1266_v40 }
0x159c   : > { %2246 = vpow2.f32 %v2095_v41 }
0x15a0   : > { %v2245_v28 = vpop.eup %2244 }
0x15a1   : > { %1289 = vrot.lane.b32.xlu0 %v2245_v28, %s2369_s17 }
0x15a2   : > { %v2247_v33 = vpop.eup %2246 }
0x15a3   : > { %v1270_v42 = vadd.f32 1.0, %v2247_v33 }
0x15a5   : > { %2248 = vrcp.f32 %v1270_v42  ;;  %v1282_v49 = vand.u32 2147483648, %v1270_v42  ;;  %vm1276_vm8 = vweird.f32 %v1270_v42  ;;  %v1280_v50 = vand.u32 2147483647, %v1270_v42 }
0x15a7   : > { %v1283_v52 = vor.u32 1.1754944e-38, %v1282_v49  ;;  %vm1281_vm10 = vcmp.eq.f32.partialorder %v1280_v50, 8.507059e+37 }
0x15ab   : > { %v2249_v43 = vpop.eup %2248 }
0x15ac   : > { %v1272_v44 = vmul.f32 %v2249_v43, %v1270_v42  ;;  %vm1277_vm7 = vweird.f32 %v2249_v43 }
0x15ad   : > { %vm1278_vm9 = vmor %vm1276_vm8, %vm1277_vm7 }
0x15ae   : > { %v1273_v46 = vsub.f32 1.0, %v1272_v44 }
0x15b0   : > { %v1274_v47 = vmul.f32 %v2249_v43, %v1273_v46 }
0x15b2   : > { %v1275_v48 = vadd.f32 %v2249_v43, %v1274_v47 }
0x15b4   : > { %v1279_v51 = vsel %vm1278_vm9, %v2249_v43, %v1275_v48 }
0x15b5   : > { %v1284_v54 = vsel %vm1281_vm10, %v1283_v52, %v1279_v51  ;;  %v1464_v51 = vld [vmem:[%s1463_s25] sm:$0xff] }
0x15b6   : > { %v1287_v56 = vmul.f32 %v1284_v54, %v2853_v30 }
0x1613   : > { %v1290_v53 = vpop.permute.xlu0 %1289 }
0x1614   : > { %v1292_v55 = vmul.f32 %v1290_v53, %v1284_v54 }
0x1616   : > { %1294 = vrot.lane.b32.xlu1 %v1292_v55, %s2370_s11 }
0x1688   : > { %v1295_v57 = vpop.permute.xlu1 %1294 }
0x1689   : > { %v1297_v58 = vadd.f32 %v1295_v57, %v1287_v56 }
0x168b   : > { %2250 = vtanh.f32 %v1297_v58 }
0x1691   : > { %v2251_v59 = vpop.eup %2250 }
0x1692   : > { %1300 = vrot.lane.b32.xlu2 %v2251_v59, %s2369_s17 }
0x16ec   : > { %v1301_v45 = vpop.permute.xlu2 %1300 }
0x16ed   : > { %v1303_v60 = vmul.f32 %v1301_v45, %v1284_v54 }
0x16ef   : > { %1305 = vrot.lane.b32.xlu0 %v1303_v60, %s2370_s11 }
0x1761   : > { %v1306_v61 = vpop.permute.xlu0 %1305 }
0x1762   : > { %1309 = vst.msk [vmem:[%s1308_s26] sm:$0xff] %vm296_vm0, %v1306_v61  ;;  %2097 = vmatmul.msk.f32.vlgmr.msra.gmra.mxu2 %vm296_vm0, %v1306_v61 }
0x1763   : > { %1633 = vmatpush.msra.mxu2 %v2858_v32 }
0x1765   : > { %1634 = vmatpush.msra.mxu2 %v2861_v34 }
0x1767   : > { %1635 = vmatpush.msra.mxu2 %v2866_v35 }
0x1769   : > { %1636 = vmatpush.msra.mxu2 %v2871_v36 }
0x17e5   : > { %v1338_v63 = vpop.f32.mrf.mxu2 }
0x17e6   : > { %v1341_v0 = vadd.f32 %v1338_v63, %v1314_v62 }
0x17e8   : > { %2252 = vtanh.f32 %v1341_v0  ;;  %v2098_v2 = vmul.f32 -1.442695, %v1341_v0 }
0x17ea   : > { %2254 = vpow2.f32 %v2098_v2 }
0x17ee   : > { %v2253_v1 = vpop.eup %2252 }
0x17ef   : > { %1364 = vrot.lane.b32.xlu1 %v2253_v1, %s2369_s17 }
0x17f0   : > { %v2255_v3 = vpop.eup %2254 }
0x17f1   : > { %v1345_v4 = vadd.f32 1.0, %v2255_v3 }
0x17f3   : > { %2256 = vrcp.f32 %v1345_v4  ;;  %v1357_v10 = vand.u32 2147483648, %v1345_v4  ;;  %vm1351_vm12 = vweird.f32 %v1345_v4  ;;  %v1355_v11 = vand.u32 2147483647, %v1345_v4 }
0x17f5   : > { %v1358_v13 = vor.u32 1.1754944e-38, %v1357_v10  ;;  %vm1356_vm14 = vcmp.eq.f32.partialorder %v1355_v11, 8.507059e+37 }
0x17f9   : > { %v2257_v5 = vpop.eup %2256 }
0x17fa   : > { %v1347_v6 = vmul.f32 %v2257_v5, %v1345_v4  ;;  %vm1352_vm11 = vweird.f32 %v2257_v5 }
0x17fb   : > { %vm1353_vm13 = vmor %vm1351_vm12, %vm1352_vm11 }
0x17fc   : > { %v1348_v7 = vsub.f32 1.0, %v1347_v6 }
0x17fe   : > { %v1349_v8 = vmul.f32 %v2257_v5, %v1348_v7 }
0x1800   : > { %v1350_v9 = vadd.f32 %v2257_v5, %v1349_v8 }
0x1802   : > { %v1354_v12 = vsel %vm1353_vm13, %v2257_v5, %v1350_v9 }
0x1803   : > { %v1359_v15 = vsel %vm1356_vm14, %v1358_v13, %v1354_v12  ;;  %v1539_v12 = vld [vmem:[%s1538_s18] sm:$0xff] }
0x1804   : > { %v1362_v17 = vmul.f32 %v1359_v15, %v1297_v58 }
0x1861   : > { %v1365_v14 = vpop.permute.xlu1 %1364 }
0x1862   : > { %v1367_v16 = vmul.f32 %v1365_v14, %v1359_v15 }
0x1864   : > { %1369 = vrot.lane.b32.xlu2 %v1367_v16, %s2370_s11 }
0x18be   : > { %v1370_v19 = vpop.permute.xlu2 %1369 }
0x18bf   : > { %v1372_v20 = vadd.f32 %v1370_v19, %v1362_v17 }
0x18c1   : > { %2258 = vtanh.f32 %v1372_v20 }
0x18c7   : > { %v2259_v21 = vpop.eup %2258 }
0x18c8   : > { %1375 = vrot.lane.b32.xlu0 %v2259_v21, %s2369_s17 }
0x193a   : > { %v1376_v22 = vpop.permute.xlu0 %1375 }
0x193b   : > { %v1378_v24 = vmul.f32 %v1376_v22, %v1359_v15 }
0x193d   : > { %1380 = vrot.lane.b32.xlu1 %v1378_v24, %s2370_s11 }
0x19af   : > { %v1381_v25 = vpop.permute.xlu1 %1380 }
0x19b0   : > { %1384 = vst.msk [vmem:[%s1383_s6] sm:$0xff] %vm296_vm0, %v1381_v25  ;;  %2100 = vmatmul.msk.f32.vlgmr.msra.gmra.mxu3 %vm296_vm0, %v1381_v25 }
0x19b1   : > { %1708 = vmatpush.msra.mxu3 %v2858_v32 }
0x19b3   : > { %1709 = vmatpush.msra.mxu3 %v2861_v34 }
0x19b5   : > { %1710 = vmatpush.msra.mxu3 %v2866_v35 }
0x19b7   : > { %1711 = vmatpush.msra.mxu3 %v2871_v36 }
0x1a33   : > { %v1413_v27 = vpop.f32.mrf.mxu3 }
0x1a34   : > { %v1416_v29 = vadd.f32 %v1413_v27, %v1389_v26 }
0x1a36   : > { %2260 = vtanh.f32 %v1416_v29  ;;  %v2101_v31 = vmul.f32 -1.442695, %v1416_v29 }
0x1a38   : > { %2262 = vpow2.f32 %v2101_v31 }
0x1a3c   : > { %v2261_v30 = vpop.eup %2260 }
0x1a3d   : > { %1439 = vrot.lane.b32.xlu2 %v2261_v30, %s2369_s17 }
0x1a3e   : > { %v2263_v37 = vpop.eup %2262 }
0x1a3f   : > { %v1420_v32 = vadd.f32 1.0, %v2263_v37 }
0x1a41   : > { %2264 = vrcp.f32 %v1420_v32  ;;  %v1432_v18 = vand.u32 2147483648, %v1420_v32  ;;  %vm1426_vm1 = vweird.f32 %v1420_v32  ;;  %v1430_v23 = vand.u32 2147483647, %v1420_v32 }
0x1a43   : > { %v1433_v28 = vor.u32 1.1754944e-38, %v1432_v18  ;;  %vm1431_vm3 = vcmp.eq.f32.partialorder %v1430_v23, 8.507059e+37 }
0x1a47   : > { %v2265_v34 = vpop.eup %2264 }
0x1a48   : > { %v1422_v38 = vmul.f32 %v2265_v34, %v1420_v32  ;;  %vm1427_vm15 = vweird.f32 %v2265_v34 }
0x1a49   : > { %vm1428_vm2 = vmor %vm1426_vm1, %vm1427_vm15 }
0x1a4a   : > { %v1423_v35 = vsub.f32 1.0, %v1422_v38 }
0x1a4c   : > { %v1424_v39 = vmul.f32 %v2265_v34, %v1423_v35 }
0x1a4e   : > { %v1425_v36 = vadd.f32 %v2265_v34, %v1424_v39 }
0x1a50   : > { %v1429_v40 = vsel %vm1428_vm2, %v2265_v34, %v1425_v36 }
0x1a51   : > { %v1434_v33 = vsel %vm1431_vm3, %v1433_v28, %v1429_v40  ;;  %v1614_v40 = vld [vmem:[%s1613_s1] sm:$0xff] }
0x1a52   : > { %v1437_v43 = vmul.f32 %v1434_v33, %v1372_v20 }
0x1a97   : > { %v1440_v41 = vpop.permute.xlu2 %1439 }
0x1a98   : > { %v1442_v42 = vmul.f32 %v1440_v41, %v1434_v33 }
0x1a9a   : > { %1444 = vrot.lane.b32.xlu0 %v1442_v42, %s2370_s11 }
0x1b0c   : > { %v1445_v44 = vpop.permute.xlu0 %1444 }
0x1b0d   : > { %v1447_v46 = vadd.f32 %v1445_v44, %v1437_v43 }
0x1b0f   : > { %2266 = vtanh.f32 %v1447_v46 }
0x1b15   : > { %v2267_v47 = vpop.eup %2266 }
0x1b16   : > { %1450 = vrot.lane.b32.xlu1 %v2267_v47, %s2369_s17 }
0x1b88   : > { %v1451_v48 = vpop.permute.xlu1 %1450 }
0x1b89   : > { %v1453_v49 = vmul.f32 %v1451_v48, %v1434_v33 }
0x1b8b   : > { %1455 = vrot.lane.b32.xlu2 %v1453_v49, %s2370_s11 }
0x1be5   : > { %v1456_v50 = vpop.permute.xlu2 %1455 }
0x1be6   : > { %1459 = vst.msk [vmem:[%s1458_s10] sm:$0xff] %vm296_vm0, %v1456_v50  ;;  %2103 = vmatmul.msk.f32.vlgmr.msrb.gmra.mxu2 %vm296_vm0, %v1456_v50 }
0x1c69   : > { %v1488_v52 = vpop.f32.mrf.mxu2 }
0x1c6a   : > { %v1491_v53 = vadd.f32 %v1488_v52, %v1464_v51 }
0x1c6c   : > { %2268 = vtanh.f32 %v1491_v53  ;;  %v2104_v55 = vmul.f32 -1.442695, %v1491_v53 }
0x1c6e   : > { %2270 = vpow2.f32 %v2104_v55 }
0x1c72   : > { %v2269_v54 = vpop.eup %2268 }
0x1c73   : > { %1514 = vrot.lane.b32.xlu0 %v2269_v54, %s2369_s17 }
0x1c74   : > { %v2271_v56 = vpop.eup %2270 }
0x1c75   : > { %v1495_v57 = vadd.f32 1.0, %v2271_v56 }
0x1c77   : > { %2272 = vrcp.f32 %v1495_v57  ;;  %v1507_v62 = vand.u32 2147483648, %v1495_v57  ;;  %vm1501_vm5 = vweird.f32 %v1495_v57  ;;  %v1505_v63 = vand.u32 2147483647, %v1495_v57 }
0x1c79   : > { %v1508_v1 = vor.u32 1.1754944e-38, %v1507_v62  ;;  %vm1506_vm7 = vcmp.eq.f32.partialorder %v1505_v63, 8.507059e+37 }
0x1c7d   : > { %v2273_v58 = vpop.eup %2272 }
0x1c7e   : > { %v1497_v59 = vmul.f32 %v2273_v58, %v1495_v57  ;;  %vm1502_vm4 = vweird.f32 %v2273_v58 }
0x1c7f   : > { %vm1503_vm6 = vmor %vm1501_vm5, %vm1502_vm4 }
0x1c80   : > { %v1498_v45 = vsub.f32 1.0, %v1497_v59 }
0x1c82   : > { %v1499_v60 = vmul.f32 %v2273_v58, %v1498_v45 }
0x1c84   : > { %v1500_v61 = vadd.f32 %v2273_v58, %v1499_v60 }
0x1c86   : > { %v1504_v0 = vsel %vm1503_vm6, %v2273_v58, %v1500_v61 }
0x1c87   : > { %v1509_v3 = vsel %vm1506_vm7, %v1508_v1, %v1504_v0  ;;  %v1689_v0 = vld [vmem:[%s1688_s21] sm:$0xff] }
0x1c88   : > { %v1512_v5 = vmul.f32 %v1509_v3, %v1447_v46 }
0x1ce5   : > { %v1515_v2 = vpop.permute.xlu0 %1514 }
0x1ce6   : > { %v1517_v4 = vmul.f32 %v1515_v2, %v1509_v3 }
0x1ce8   : > { %1519 = vrot.lane.b32.xlu1 %v1517_v4, %s2370_s11 }
0x1d5a   : > { %v1520_v6 = vpop.permute.xlu1 %1519 }
0x1d5b   : > { %v1522_v7 = vadd.f32 %v1520_v6, %v1512_v5 }
0x1d5d   : > { %2274 = vtanh.f32 %v1522_v7 }
0x1d63   : > { %v2275_v8 = vpop.eup %2274 }
0x1d64   : > { %1525 = vrot.lane.b32.xlu2 %v2275_v8, %s2369_s17 }
0x1dbe   : > { %v1526_v9 = vpop.permute.xlu2 %1525 }
0x1dbf   : > { %v1528_v10 = vmul.f32 %v1526_v9, %v1509_v3 }
0x1dc1   : > { %1530 = vrot.lane.b32.xlu0 %v1528_v10, %s2370_s11 }
0x1e33   : > { %v1531_v11 = vpop.permute.xlu0 %1530 }
0x1e34   : > { %1534 = vst.msk [vmem:[%s1533_s12] sm:$0xff] %vm296_vm0, %v1531_v11  ;;  %2106 = vmatmul.msk.f32.vlgmr.msrb.gmra.mxu3 %vm296_vm0, %v1531_v11 }
0x1eb7   : > { %v1563_v13 = vpop.f32.mrf.mxu3 }
0x1eb8   : > { %v1566_v14 = vadd.f32 %v1563_v13, %v1539_v12 }
0x1eba   : > { %2276 = vtanh.f32 %v1566_v14  ;;  %v2107_v16 = vmul.f32 -1.442695, %v1566_v14 }
0x1ebc   : > { %2278 = vpow2.f32 %v2107_v16 }
0x1ec0   : > { %v2277_v15 = vpop.eup %2276 }
0x1ec1   : > { %1589 = vrot.lane.b32.xlu1 %v2277_v15, %s2369_s17 }
0x1ec2   : > { %v2279_v17 = vpop.eup %2278 }
0x1ec3   : > { %v1570_v19 = vadd.f32 1.0, %v2279_v17 }
0x1ec5   : > { %2280 = vrcp.f32 %v1570_v19  ;;  %v1582_v26 = vand.u32 2147483648, %v1570_v19  ;;  %vm1576_vm9 = vweird.f32 %v1570_v19  ;;  %v1580_v27 = vand.u32 2147483647, %v1570_v19 }
0x1ec7   : > { %v1583_v30 = vor.u32 1.1754944e-38, %v1582_v26  ;;  %vm1581_vm11 = vcmp.eq.f32.partialorder %v1580_v27, 8.507059e+37 }
0x1ecb   : > { %v2281_v20 = vpop.eup %2280 }
0x1ecc   : > { %v1572_v21 = vmul.f32 %v2281_v20, %v1570_v19  ;;  %vm1577_vm8 = vweird.f32 %v2281_v20 }
0x1ecd   : > { %vm1578_vm10 = vmor %vm1576_vm9, %vm1577_vm8 }
0x1ece   : > { %v1573_v22 = vsub.f32 1.0, %v1572_v21 }
0x1ed0   : > { %v1574_v24 = vmul.f32 %v2281_v20, %v1573_v22 }
0x1ed2   : > { %v1575_v25 = vadd.f32 %v2281_v20, %v1574_v24 }
0x1ed4   : > { %v1579_v29 = vsel %vm1578_vm10, %v2281_v20, %v1575_v25 }
0x1ed5   : > { %v1584_v37 = vsel %vm1581_vm11, %v1583_v30, %v1579_v29 }
0x1ed6   : > { %v1587_v34 = vmul.f32 %v1584_v37, %v1522_v7 }
0x1f33   : > { %v1590_v31 = vpop.permute.xlu1 %1589 }
0x1f34   : > { %v1592_v32 = vmul.f32 %v1590_v31, %v1584_v37 }
0x1f36   : > { %1594 = vrot.lane.b32.xlu2 %v1592_v32, %s2370_s11 }
0x1f90   : > { %v1595_v38 = vpop.permute.xlu2 %1594 }
0x1f91   : > { %v1597_v35 = vadd.f32 %v1595_v38, %v1587_v34 }
0x1f93   : > { %2282 = vtanh.f32 %v1597_v35 }
0x1f99   : > { %v2283_v39 = vpop.eup %2282 }
0x1f9a   : > { %1600 = vrot.lane.b32.xlu0 %v2283_v39, %s2369_s17 }
0x200c   : > { %v1601_v36 = vpop.permute.xlu0 %1600 }
0x200d   : > { %v1603_v18 = vmul.f32 %v1601_v36, %v1584_v37 }
0x200f   : > { %1605 = vrot.lane.b32.xlu1 %v1603_v18, %s2370_s11 }
0x2081   : > { %v1606_v23 = vpop.permute.xlu1 %1605 }
0x2082   : > { %1609 = vst.msk [vmem:[%s1608_s0] sm:$0xff] %vm296_vm0, %v1606_v23  ;;  %2109 = vmatmul.msk.f32.vlgmr.msra.gmra.mxu2 %vm296_vm0, %v1606_v23 }
0x2105   : > { %v1638_v28 = vpop.f32.mrf.mxu2 }
0x2106   : > { %v1641_v41 = vadd.f32 %v1638_v28, %v1614_v40 }
0x2108   : > { %2284 = vtanh.f32 %v1641_v41  ;;  %v2110_v42 = vmul.f32 -1.442695, %v1641_v41 }
0x210a   : > { %2286 = vpow2.f32 %v2110_v42 }
0x210e   : > { %v2285_v33 = vpop.eup %2284 }
0x210f   : > { %1664 = vrot.lane.b32.xlu2 %v2285_v33, %s2369_s17 }
0x2110   : > { %v2287_v43 = vpop.eup %2286 }
0x2111   : > { %v1645_v44 = vadd.f32 1.0, %v2287_v43 }
0x2113   : > { %2288 = vrcp.f32 %v1645_v44  ;;  %v1657_v51 = vand.u32 2147483648, %v1645_v44  ;;  %vm1651_vm13 = vweird.f32 %v1645_v44  ;;  %v1655_v52 = vand.u32 2147483647, %v1645_v44 }
0x2115   : > { %v1658_v54 = vor.u32 1.1754944e-38, %v1657_v51  ;;  %vm1656_vm15 = vcmp.eq.f32.partialorder %v1655_v52, 8.507059e+37 }
0x2119   : > { %v2289_v46 = vpop.eup %2288 }
0x211a   : > { %v1647_v47 = vmul.f32 %v2289_v46, %v1645_v44  ;;  %vm1652_vm12 = vweird.f32 %v2289_v46 }
0x211b   : > { %vm1653_vm14 = vmor %vm1651_vm13, %vm1652_vm12 }
0x211c   : > { %v1648_v48 = vsub.f32 1.0, %v1647_v47 }
0x211e   : > { %v1649_v49 = vmul.f32 %v2289_v46, %v1648_v48 }
0x2120   : > { %v1650_v50 = vadd.f32 %v2289_v46, %v1649_v49 }
0x2122   : > { %v1654_v53 = vsel %vm1653_vm14, %v2289_v46, %v1650_v50 }
0x2123   : > { %v1659_v56 = vsel %vm1656_vm15, %v1658_v54, %v1654_v53 }
0x2124   : > { %v1662_v58 = vmul.f32 %v1659_v56, %v1597_v35 }
0x2169   : > { %v1665_v55 = vpop.permute.xlu2 %1664 }
0x216a   : > { %v1667_v57 = vmul.f32 %v1665_v55, %v1659_v56 }
0x216c   : > { %1669 = vrot.lane.b32.xlu0 %v1667_v57, %s2370_s11 }
0x21de   : > { %v1670_v59 = vpop.permute.xlu0 %1669 }
0x21df   : > { %v1672_v45 = vadd.f32 %v1670_v59, %v1662_v58 }
0x21e1   : > { %2290 = vtanh.f32 %v1672_v45 }
0x21e7   : > { %v2291_v60 = vpop.eup %2290 }
0x21e8   : > { %1675 = vrot.lane.b32.xlu1 %v2291_v60, %s2369_s17 }
0x225a   : > { %v1676_v61 = vpop.permute.xlu1 %1675 }
0x225b   : > { %v1678_v62 = vmul.f32 %v1676_v61, %v1659_v56 }
0x225d   : > { %1680 = vrot.lane.b32.xlu2 %v1678_v62, %s2370_s11 }
0x22b7   : > { %v1681_v63 = vpop.permute.xlu2 %1680 }
0x22b8   : > { %1684 = vst.msk [vmem:[%s1683_s2] sm:$0xff] %vm296_vm0, %v1681_v63  ;;  %2112 = vmatmul.msk.f32.vlgmr.msra.gmra.mxu3 %vm296_vm0, %v1681_v63 }
0x233b   : > { %v1713_v1 = vpop.f32.mrf.mxu3 }
0x233c   : > { %v1716_v2 = vadd.f32 %v1713_v1, %v1689_v0 }
0x233e   : > { %2292 = vtanh.f32 %v1716_v2  ;;  %v2113_v4 = vmul.f32 -1.442695, %v1716_v2 }
0x2340   : > { %2294 = vpow2.f32 %v2113_v4 }
0x2344   : > { %v2293_v3 = vpop.eup %2292 }
0x2345   : > { %1739 = vrot.lane.b32.xlu0 %v2293_v3, %s2369_s17 }
0x2346   : > { %v2295_v5 = vpop.eup %2294 }
0x2347   : > { %v1720_v6 = vadd.f32 1.0, %v2295_v5 }
0x2349   : > { %2296 = vrcp.f32 %v1720_v6  ;;  %v1732_v12 = vand.u32 2147483648, %v1720_v6  ;;  %vm1726_vm2 = vweird.f32 %v1720_v6  ;;  %v1730_v13 = vand.u32 2147483647, %v1720_v6 }
0x234b   : > { %v1733_v15 = vor.u32 1.1754944e-38, %v1732_v12  ;;  %vm1731_vm4 = vcmp.eq.f32.partialorder %v1730_v13, 8.507059e+37 }
0x234f   : > { %v2297_v7 = vpop.eup %2296 }
0x2350   : > { %v1722_v8 = vmul.f32 %v2297_v7, %v1720_v6  ;;  %vm1727_vm1 = vweird.f32 %v2297_v7 }
0x2351   : > { %vm1728_vm3 = vmor %vm1726_vm2, %vm1727_vm1 }
0x2352   : > { %v1723_v9 = vsub.f32 1.0, %v1722_v8 }
0x2354   : > { %v1724_v10 = vmul.f32 %v2297_v7, %v1723_v9 }
0x2356   : > { %v1725_v11 = vadd.f32 %v2297_v7, %v1724_v10 }
0x2358   : > { %v1729_v14 = vsel %vm1728_vm3, %v2297_v7, %v1725_v11 }
0x2359   : > { %v1734_v17 = vsel %vm1731_vm4, %v1733_v15, %v1729_v14 }
0x235a   : > { %v1737_v20 = vmul.f32 %v1734_v17, %v1672_v45 }
0x23b7   : > { %v1740_v16 = vpop.permute.xlu0 %1739 }
0x23b8   : > { %v1742_v19 = vmul.f32 %v1740_v16, %v1734_v17 }
0x23ba   : > { %1744 = vrot.lane.b32.xlu1 %v1742_v19, %s2370_s11 }
0x242c   : > { %v1745_v21 = vpop.permute.xlu1 %1744 }
0x242d   : > { %v1747_v22 = vadd.f32 %v1745_v21, %v1737_v20 }
0x242f   : > { %2298 = vtanh.f32 %v1747_v22 }
0x2435   : > { %v2299_v24 = vpop.eup %2298 }
0x2436   : > { %1750 = vrot.lane.b32.xlu2 %v2299_v24, %s2369_s17 }
0x2490   : > { %v1751_v25 = vpop.permute.xlu2 %1750 }
0x2491   : > { %v1753_v26 = vmul.f32 %v1751_v25, %v1734_v17 }
0x2493   : > { %1755 = vrot.lane.b32.xlu0 %v1753_v26, %s2370_s11 }
0x2505   : > { %v1756_v27 = vpop.permute.xlu0 %1755 }
0x2506   : > { %1759 = vst.msk [vmem:[%s1758_s15] sm:$0xff] %vm296_vm0, %v1756_v27 }
0x2507 PF: > { %s3020_s15 = sld [smem:[#allocation6_spill]]  ;;  %p14_p7 = scmp.ge.s32.totalorder %s2418_s20, 4  }
0x2508   : > { %s3021_s16 = sld [smem:[#allocation7_spill]]  ;;  %s3023_s18 = smov %s2418_s20 }
0x2509   : > { %s3022_s17 = sld [smem:[#allocation8_spill]]  ;;  %16 = sbr.rel (!%p14_p7) target bundleno = 7 (0x7), region = 116 }
0x250e   :  { %1781 = vsyncpa [#allocation4], 1 }
0x250f   :  { %1783 = vsyncpa [#allocation4 + $0x1], 1 }

</bundles_post_ra>
